<compile_context>
chip_gen: v6e
topology: v6e:2x2x1
jax: 0.10.0
libtpu: 0.0.40
codegen_flags: <defaults>
</compile_context>

<pallas_src>
import functools

import numpy as np

import jax
import jax.numpy as jnp
from jax.experimental import pallas as pl
from jax.experimental.pallas import tpu as pltpu

EPS = 1e-5  # BatchNorm / LayerNorm eps (PyTorch default)


# ----------------------------------------------------------------------------
# Host-side constants (depend only on B, H, W)
# ----------------------------------------------------------------------------
def _shift_matrices(B, H, W):
    """9 (M, M) 0/1 matrices: S_t[src, dst] = 1 iff the 3x3 tap t at output `dst`
    reads input `src` (in-bounds); batch/row boundaries are baked in."""
    HW = H * W
    M = B * HW
    m = np.arange(M)
    b, rem = np.divmod(m, HW)
    h, w = np.divmod(rem, W)
    mats = np.zeros((9, M, M), np.float32)
    t = 0
    for dh in (-1, 0, 1):
        for dw in (-1, 0, 1):
            hh, ww = h + dh, w + dw
            valid = (hh >= 0) & (hh < H) & (ww >= 0) & (ww < W)
            src = b * HW + np.clip(hh, 0, H - 1) * W + np.clip(ww, 0, W - 1)
            mats[t, src[valid], m[valid]] = 1.0
            t += 1
    return mats


def _selectors(B, HW):
    """(3B, 4M) pack of two 0/1 indicator matrices:
       cols [0, 3M): seg6  — (act, sample)-segment membership over the 3M-wide lanes
       cols [3M,4M): seg3  — sample membership of each (act, sample) column over M."""
    M = B * HW
    seg = np.zeros((B, M), np.float32)
    for b in range(B):
        seg[b, b * HW:(b + 1) * HW] = 1.0
    seg6 = np.zeros((3 * B, 3 * M), np.float32)
    for i in range(3):
        seg6[i * B:(i + 1) * B, i * M:(i + 1) * M] = seg
    seg3 = np.tile(seg, (3, 1))
    return np.concatenate([seg6, seg3], axis=1)


# ----------------------------------------------------------------------------
# Fused Pallas kernel (single grid step; everything stays in VMEM)
# ----------------------------------------------------------------------------
def _msablock1_kernel(x_ref, smat_ref, sel_ref,
                      c1w_ref, lcw_ref, lcdw_ref,
                      td1_ref, td2_ref,
                      gmw_ref, gw1_ref, gw2_ref,
                      c3w_ref, dsw_ref,
                      midp_ref, plnp_ref, coutp_ref,
                      o_ref, *, M, scale):
    f32 = jnp.float32
    inv_m = 1.0 / M

    def col(ref, j):
        return ref[:, j:j + 1]                                    # (C, 1) slice of a pack

    def bn(y, g, b):
        """Single-pass train-mode BatchNorm2d; y is (C, M), stats over M."""
        mu = jnp.sum(y, axis=1, keepdims=True) * inv_m
        var = jnp.sum(y * y, axis=1, keepdims=True) * inv_m - mu * mu
        sc = g * jax.lax.rsqrt(var + EPS)
        return y * sc + (b - mu * sc)

    x_t = x_ref[...]                                              # (Cin, M)

    # ---- conv1: 1x1 + BN + ReLU --------------------------------------------
    x1 = jnp.maximum(
        bn(jnp.dot(c1w_ref[...], x_t, preferred_element_type=f32),
           col(midp_ref, 0), col(midp_ref, 1)), 0.0)              # (mid, M)

    # ---- LightConv3x3 x3: 1x1 + depthwise 3x3 (shift-matrix MXU) + BN + ReLU
    def lightconv(a, i):
        y = jnp.dot(lcw_ref[i], a, preferred_element_type=f32)    # (mid, M)
        # out = sum_t (k[:,t] * y) @ S_t  — boundary handling is inside S_t.
        acc = jnp.dot(y * lcdw_ref[i, 0], smat_ref[0], preferred_element_type=f32)
        for t in range(1, 9):
            acc = acc + jnp.dot(y * lcdw_ref[i, t], smat_ref[t],
                                preferred_element_type=f32)
        return jnp.maximum(
            bn(acc, col(midp_ref, 2 + 2 * i), col(midp_ref, 3 + 2 * i)), 0.0)

    x2a = lightconv(x1, 0)
    x2b = lightconv(x2a, 1)
    x2c = lightconv(x2b, 2)

    # ---- top-down 1x1 aggregation (concat-K matmuls) ------------------------
    x2b_td = jnp.dot(td1_ref[...], jnp.concatenate([x2c, x2b], axis=0),
                     preferred_element_type=f32)                  # (mid, M)
    x2a_td = jnp.dot(td2_ref[...], jnp.concatenate([x2b_td, x2a], axis=0),
                     preferred_element_type=f32)                  # (mid, M)

    # ---- ContextBlock gate (LAPE), 3 activations x B samples, fully batched --
    seg6 = sel_ref[:, :3 * M]                                     # (3B, 3M)
    seg3 = sel_ref[:, 3 * M:]                                     # (3B, M)
    a_wide = jnp.concatenate([x2a_td, x2b_td, x2c], axis=1)       # (mid, 3M)
    # conv_mask (1x1 -> 1 channel); its bias cancels in the softmax and is omitted.
    logits = jnp.dot(gmw_ref[...], a_wide, preferred_element_type=f32)   # (1, 3M)
    e = jnp.exp(logits - jnp.max(logits, axis=1, keepdims=True))
    den = jax.lax.dot_general(e, seg6, (((1,), (1,)), ((), ())),
                              preferred_element_type=f32)         # (1, 3B)
    den_l = jnp.dot(den, seg6, preferred_element_type=f32)        # (1, 3M)
    p = e * pl.reciprocal(den_l, approx=True)                     # per-segment softmax
    ctx = jax.lax.dot_general(a_wide, seg6 * p, (((1,), (1,)), ((), ())),
                              preferred_element_type=f32)         # (mid, 3B)
    ctx = ctx * (1.0 / scale) + col(midp_ref, 8)                  # LAPE pos. embedding

    # channel_add_conv: 1x1 + LayerNorm([planes,1,1]) + ReLU + 1x1 (6 tiny columns)
    h = jnp.dot(gw1_ref[...], ctx, preferred_element_type=f32) + col(plnp_ref, 0)
    mu = jnp.mean(h, axis=0, keepdims=True)
    var = jnp.mean(h * h, axis=0, keepdims=True) - mu * mu
    h = jnp.maximum((h - mu) * jax.lax.rsqrt(var + EPS) * col(plnp_ref, 1)
                    + col(plnp_ref, 2), 0.0)
    terms = jnp.dot(gw2_ref[...], h, preferred_element_type=f32) + col(midp_ref, 9)

    # gate(x2a_td) + gate(x2b_td) + gate(x2c): activations + per-sample term sums,
    # broadcast back over H*W lanes via one indicator matmul.
    x2 = (x2a_td + x2b_td + x2c
          + jnp.dot(terms, seg3, preferred_element_type=f32))     # (mid, M)

    # ---- conv3 (1x1+BN), downsample (1x1+BN), residual add, final ReLU -------
    x3 = bn(jnp.dot(c3w_ref[...], x2, preferred_element_type=f32),
            col(coutp_ref, 0), col(coutp_ref, 1))                 # (Cout, M)
    ident = bn(jnp.dot(dsw_ref[...], x_t, preferred_element_type=f32),
               col(coutp_ref, 2), col(coutp_ref, 3))              # (Cout, M)
    o_ref[...] = jnp.maximum(x3 + ident, 0.0)


# ----------------------------------------------------------------------------
# Wrapper (layout glue at the boundary only)
# ----------------------------------------------------------------------------
def msablock1_forward(x_nchw, params, *, scale=3.0):
    B, Cin, H, W = x_nchw.shape
    HW = H * W
    M = B * HW
    Cout = params["conv3_w"].shape[0]

    # channels-major, lane-dense layout: (Cin, B*H*W), flat index b*H*W + h*W + w
    x_t = jnp.transpose(x_nchw, (1, 0, 2, 3)).reshape(Cin, M)

    # shape-only constants, built host-side at trace time (become jit constants)
    smat = jnp.asarray(_shift_matrices(B, H, W))                  # (9, M, M)
    sel = jnp.asarray(_selectors(B, HW))                          # (3B, 4M)

    inputs = [
        x_t, smat, sel,
        params["conv1_w"], params["lc_w1"], params["lc_dw"],
        params["td1_w"], params["td2_w"],
        params["gate_mask_w"], params["gate_w1"], params["gate_w2"],
        params["conv3_w"], params["ds_w"],
        params["mid_pack"], params["planes_pack"], params["cout_pack"],
    ]

    def full_spec(shape):
        nd = len(shape)
        return pl.BlockSpec(shape, lambda i, _n=nd: (0,) * _n)

    kernel = functools.partial(_msablock1_kernel, M=M, scale=scale)

    out_t = pl.pallas_call(
        kernel,
        out_shape=jax.ShapeDtypeStruct((Cout, M), jnp.float32),
        grid=(1,),
        in_specs=[full_spec(a.shape) for a in inputs],
        out_specs=full_spec((Cout, M)),
        compiler_params=pltpu.CompilerParams(
            dimension_semantics=("arbitrary",),
            vmem_limit_bytes=32 * 1024 * 1024,   # ~3 MiB actually used
        ),
    )(*inputs)

    # back to PyTorch NCHW
    return out_t.reshape(Cout, B, H, W).transpose(1, 0, 2, 3)


# ----------------------------------------------------------------------------
# Deterministic synthetic parameters (packed, matmul-ready layouts)
# ----------------------------------------------------------------------------
def init_params(key, Cin, Cout, mid, planes):
    keys = iter(jax.random.split(key, 64))

    def nrm(shape, std=0.1):
        return (std * jax.random.normal(next(keys), shape)).astype(jnp.float32)

    p = {}
    # conv1: Conv1x1 (1x1 conv, no bias)
    p["conv1_w"] = nrm((mid, Cin))
    # conv2a/b/c: LightConv3x3 (1x1 no-bias + depthwise 3x3 no-bias), stacked
    p["lc_w1"] = nrm((3, mid, mid))
    p["lc_dw"] = nrm((3, 9, mid, 1))        # tap-major depthwise taps, t=(dh+1)*3+(dw+1)
    # conv1x1_1..4 (no bias), concatenated along K for the dual matmuls
    p["td1_w"] = nrm((mid, 2 * mid))        # [W1 | W2]
    p["td2_w"] = nrm((mid, 2 * mid))        # [W3 | W4]
    # ContextBlock gate (LAPE); conv_mask bias omitted (cancels in softmax)
    p["gate_mask_w"] = nrm((1, mid))
    p["gate_w1"] = nrm((planes, mid))
    p["gate_w2"] = nrm((mid, planes))
    # conv3 / downsample 1x1 weights
    p["conv3_w"] = nrm((Cout, mid))
    p["ds_w"] = nrm((Cout, Cin))
    # packed per-channel vectors ------------------------------------------------
    # mid_pack cols: conv1 γ,β | lc0 γ,β | lc1 γ,β | lc2 γ,β | LAPE pos-emb | gate 2nd-conv bias
    mid_cols = [1.0 + nrm((mid, 1)), nrm((mid, 1))]
    for _ in range(3):
        mid_cols += [1.0 + nrm((mid, 1)), nrm((mid, 1))]
    mid_cols += [nrm((mid, 1), std=0.01), nrm((mid, 1))]
    p["mid_pack"] = jnp.concatenate(mid_cols, axis=1)             # (mid, 10)
    # planes_pack cols: gate 1st-conv bias | LN γ | LN β
    p["planes_pack"] = jnp.concatenate(
        [nrm((planes, 1)), 1.0 + nrm((planes, 1)), nrm((planes, 1))], axis=1)
    # cout_pack cols: conv3 γ,β | downsample γ,β
    p["cout_pack"] = jnp.concatenate(
        [1.0 + nrm((Cout, 1)), nrm((Cout, 1)),
         1.0 + nrm((Cout, 1)), nrm((Cout, 1))], axis=1)
    return p


if __name__ == "__main__":
    # MSABlock_1(in_channels=16, out_channels=128, bottleneck_reduction=4, pos_type='LAPE')
    B, Cin, H, W = 2, 16, 8, 8
    Cout = 128
    mid = Cout // 4                      # mid_channels = 32
    planes = int(mid * (1.0 / 16.0))     # ContextBlock planes = 2

    key = jax.random.PRNGKey(0)
    kx, kp = jax.random.split(key)
    x = jax.random.normal(kx, (B, Cin, H, W), dtype=jnp.float32)
    params = init_params(kp, Cin, Cout, mid, planes)

    fwd = jax.jit(msablock1_forward)
    out = jax.block_until_ready(fwd(x, params))
    assert out.shape == (B, Cout, H, W)
    assert bool(jnp.all(jnp.isfinite(out)))
    print("KERNEL_OK")
</pallas_src>

<mosaic_0001>
module attributes {stable_mosaic.version = 11 : i64} {
  func.func @_msablock1_kernel(%arg0: i32, %arg1: memref<16x128xf32, #tpu.memory_space<vmem>>, %arg2: memref<9x128x128xf32, #tpu.memory_space<vmem>>, %arg3: memref<6x512xf32, #tpu.memory_space<vmem>>, %arg4: memref<32x16xf32, #tpu.memory_space<vmem>>, %arg5: memref<3x32x32xf32, #tpu.memory_space<vmem>>, %arg6: memref<3x9x32x1xf32, #tpu.memory_space<vmem>>, %arg7: memref<32x64xf32, #tpu.memory_space<vmem>>, %arg8: memref<32x64xf32, #tpu.memory_space<vmem>>, %arg9: memref<1x32xf32, #tpu.memory_space<vmem>>, %arg10: memref<2x32xf32, #tpu.memory_space<vmem>>, %arg11: memref<32x2xf32, #tpu.memory_space<vmem>>, %arg12: memref<128x32xf32, #tpu.memory_space<vmem>>, %arg13: memref<128x16xf32, #tpu.memory_space<vmem>>, %arg14: memref<32x10xf32, #tpu.memory_space<vmem>>, %arg15: memref<2x3xf32, #tpu.memory_space<vmem>>, %arg16: memref<128x4xf32, #tpu.memory_space<vmem>>, %arg17: memref<128x128xf32, #tpu.memory_space<vmem>>) attributes {dimension_semantics = [#tpu.dimension_semantics<arbitrary>], iteration_bounds = array<i64: 1>, scalar_prefetch = 0 : i64, scratch_operands = 0 : i64, tpu.core_type = #tpu.core_type<tc>, window_params = [{pipeline_mode = #tpu.pipeline_mode<synchronous>, transform_indices = @transform_0, window_bounds = array<i64: 16, 128>}, {pipeline_mode = #tpu.pipeline_mode<synchronous>, transform_indices = @transform_1, window_bounds = array<i64: 9, 128, 128>}, {pipeline_mode = #tpu.pipeline_mode<synchronous>, transform_indices = @transform_2, window_bounds = array<i64: 6, 512>}, {pipeline_mode = #tpu.pipeline_mode<synchronous>, transform_indices = @transform_3, window_bounds = array<i64: 32, 16>}, {pipeline_mode = #tpu.pipeline_mode<synchronous>, transform_indices = @transform_4, window_bounds = array<i64: 3, 32, 32>}, {pipeline_mode = #tpu.pipeline_mode<synchronous>, transform_indices = @transform_5, window_bounds = array<i64: 3, 9, 32, 1>}, {pipeline_mode = #tpu.pipeline_mode<synchronous>, transform_indices = @transform_6, window_bounds = array<i64: 32, 64>}, {pipeline_mode = #tpu.pipeline_mode<synchronous>, transform_indices = @transform_7, window_bounds = array<i64: 32, 64>}, {pipeline_mode = #tpu.pipeline_mode<synchronous>, transform_indices = @transform_8, window_bounds = array<i64: 1, 32>}, {pipeline_mode = #tpu.pipeline_mode<synchronous>, transform_indices = @transform_9, window_bounds = array<i64: 2, 32>}, {pipeline_mode = #tpu.pipeline_mode<synchronous>, transform_indices = @transform_10, window_bounds = array<i64: 32, 2>}, {pipeline_mode = #tpu.pipeline_mode<synchronous>, transform_indices = @transform_11, window_bounds = array<i64: 128, 32>}, {pipeline_mode = #tpu.pipeline_mode<synchronous>, transform_indices = @transform_12, window_bounds = array<i64: 128, 16>}, {pipeline_mode = #tpu.pipeline_mode<synchronous>, transform_indices = @transform_13, window_bounds = array<i64: 32, 10>}, {pipeline_mode = #tpu.pipeline_mode<synchronous>, transform_indices = @transform_14, window_bounds = array<i64: 2, 3>}, {pipeline_mode = #tpu.pipeline_mode<synchronous>, transform_indices = @transform_15, window_bounds = array<i64: 128, 4>}, {pipeline_mode = #tpu.pipeline_mode<synchronous>, transform_indices = @transform_16, window_bounds = array<i64: 128, 128>}]} {
    %c0 = arith.constant 0 : index
    %c0_0 = arith.constant 0 : index
    %0 = vector.load %arg1[%c0, %c0_0] : memref<16x128xf32, #tpu.memory_space<vmem>>, vector<16x128xf32>
    %c0_1 = arith.constant 0 : index
    %c0_2 = arith.constant 0 : index
    %1 = vector.load %arg4[%c0_1, %c0_2] : memref<32x16xf32, #tpu.memory_space<vmem>>, vector<32x16xf32>
    %cst = arith.constant dense<0.000000e+00> : vector<32x128xf32>
    %2 = tpu.matmul %1, %0, %cst {dimension_numbers = #tpu.dot_dimension_numbers<[1], [0], [0], [1], [0, 0, 1, 1], [], []>} : vector<32x16xf32>, vector<16x128xf32>, vector<32x128xf32> -> vector<32x128xf32>
    %c0_3 = arith.constant 0 : index
    %c0_4 = arith.constant 0 : index
    %3 = vector.load %arg14[%c0_3, %c0_4] : memref<32x10xf32, #tpu.memory_space<vmem>>, vector<32x1xf32>
    %c0_5 = arith.constant 0 : index
    %c1 = arith.constant 1 : index
    %4 = vector.load %arg14[%c0_5, %c1] : memref<32x10xf32, #tpu.memory_space<vmem>>, vector<32x1xf32>
    %cst_6 = arith.constant dense<0.000000e+00> : vector<32xf32>
    %5 = vector.multi_reduction <add>, %2, %cst_6 [1] : vector<32x128xf32> to vector<32xf32>
    %6 = vector.shape_cast %5 : vector<32xf32> to vector<32x1xf32>
    %cst_7 = arith.constant 7.812500e-03 : f32
    %7 = vector.broadcast %cst_7 : f32 to vector<32x1xf32>
    %8 = arith.mulf %6, %7 : vector<32x1xf32>
    %9 = arith.mulf %2, %2 : vector<32x128xf32>
    %cst_8 = arith.constant dense<0.000000e+00> : vector<32xf32>
    %10 = vector.multi_reduction <add>, %9, %cst_8 [1] : vector<32x128xf32> to vector<32xf32>
    %11 = vector.shape_cast %10 : vector<32xf32> to vector<32x1xf32>
    %cst_9 = arith.constant 7.812500e-03 : f32
    %12 = vector.broadcast %cst_9 : f32 to vector<32x1xf32>
    %13 = arith.mulf %11, %12 : vector<32x1xf32>
    %14 = arith.mulf %8, %8 : vector<32x1xf32>
    %15 = arith.subf %13, %14 : vector<32x1xf32>
    %cst_10 = arith.constant 9.99999974E-6 : f32
    %16 = vector.broadcast %cst_10 : f32 to vector<32x1xf32>
    %17 = arith.addf %15, %16 : vector<32x1xf32>
    %18 = math.rsqrt %17 : vector<32x1xf32>
    %19 = arith.mulf %3, %18 : vector<32x1xf32>
    %20 = vector.broadcast %19 : vector<32x1xf32> to vector<32x128xf32>
    %21 = arith.mulf %2, %20 : vector<32x128xf32>
    %22 = arith.mulf %8, %19 : vector<32x1xf32>
    %23 = arith.subf %4, %22 : vector<32x1xf32>
    %24 = vector.broadcast %23 : vector<32x1xf32> to vector<32x128xf32>
    %25 = arith.addf %21, %24 : vector<32x128xf32>
    %cst_11 = arith.constant 0.000000e+00 : f32
    %26 = vector.broadcast %cst_11 : f32 to vector<32x128xf32>
    %27 = arith.maximumf %25, %26 : vector<32x128xf32>
    %c0_12 = arith.constant 0 : index
    %c0_13 = arith.constant 0 : index
    %c0_14 = arith.constant 0 : index
    %28 = vector.load %arg5[%c0_12, %c0_13, %c0_14] : memref<3x32x32xf32, #tpu.memory_space<vmem>>, vector<1x32x32xf32>
    %29 = vector.shape_cast %28 : vector<1x32x32xf32> to vector<32x32xf32>
    %cst_15 = arith.constant dense<0.000000e+00> : vector<32x128xf32>
    %30 = tpu.matmul %29, %27, %cst_15 {dimension_numbers = #tpu.dot_dimension_numbers<[1], [0], [0], [1], [0, 0, 1, 1], [], []>} : vector<32x32xf32>, vector<32x128xf32>, vector<32x128xf32> -> vector<32x128xf32>
    %c0_16 = arith.constant 0 : index
    %c0_17 = arith.constant 0 : index
    %c0_18 = arith.constant 0 : index
    %c0_19 = arith.constant 0 : index
    %31 = vector.load %arg6[%c0_16, %c0_17, %c0_18, %c0_19] : memref<3x9x32x1xf32, #tpu.memory_space<vmem>>, vector<1x1x32x1xf32>
    %32 = vector.shape_cast %31 : vector<1x1x32x1xf32> to vector<32x1xf32>
    %33 = vector.broadcast %32 : vector<32x1xf32> to vector<32x128xf32>
    %34 = arith.mulf %30, %33 : vector<32x128xf32>
    %c0_20 = arith.constant 0 : index
    %c0_21 = arith.constant 0 : index
    %c0_22 = arith.constant 0 : index
    %35 = vector.load %arg2[%c0_20, %c0_21, %c0_22] : memref<9x128x128xf32, #tpu.memory_space<vmem>>, vector<1x128x128xf32>
    %36 = vector.shape_cast %35 : vector<1x128x128xf32> to vector<128x128xf32>
    %cst_23 = arith.constant dense<0.000000e+00> : vector<32x128xf32>
    %37 = tpu.matmul %34, %36, %cst_23 {dimension_numbers = #tpu.dot_dimension_numbers<[1], [0], [0], [1], [0, 0, 1, 1], [], []>} : vector<32x128xf32>, vector<128x128xf32>, vector<32x128xf32> -> vector<32x128xf32>
    %c0_24 = arith.constant 0 : index
    %c1_25 = arith.constant 1 : index
    %c0_26 = arith.constant 0 : index
    %c0_27 = arith.constant 0 : index
    %38 = vector.load %arg6[%c0_24, %c1_25, %c0_26, %c0_27] : memref<3x9x32x1xf32, #tpu.memory_space<vmem>>, vector<1x1x32x1xf32>
    %39 = vector.shape_cast %38 : vector<1x1x32x1xf32> to vector<32x1xf32>
    %40 = vector.broadcast %39 : vector<32x1xf32> to vector<32x128xf32>
    %41 = arith.mulf %30, %40 : vector<32x128xf32>
    %c1_28 = arith.constant 1 : index
    %c0_29 = arith.constant 0 : index
    %c0_30 = arith.constant 0 : index
    %42 = vector.load %arg2[%c1_28, %c0_29, %c0_30] : memref<9x128x128xf32, #tpu.memory_space<vmem>>, vector<1x128x128xf32>
    %43 = vector.shape_cast %42 : vector<1x128x128xf32> to vector<128x128xf32>
    %cst_31 = arith.constant dense<0.000000e+00> : vector<32x128xf32>
    %44 = tpu.matmul %41, %43, %cst_31 {dimension_numbers = #tpu.dot_dimension_numbers<[1], [0], [0], [1], [0, 0, 1, 1], [], []>} : vector<32x128xf32>, vector<128x128xf32>, vector<32x128xf32> -> vector<32x128xf32>
    %45 = arith.addf %37, %44 : vector<32x128xf32>
    %c0_32 = arith.constant 0 : index
    %c2 = arith.constant 2 : index
    %c0_33 = arith.constant 0 : index
    %c0_34 = arith.constant 0 : index
    %46 = vector.load %arg6[%c0_32, %c2, %c0_33, %c0_34] : memref<3x9x32x1xf32, #tpu.memory_space<vmem>>, vector<1x1x32x1xf32>
    %47 = vector.shape_cast %46 : vector<1x1x32x1xf32> to vector<32x1xf32>
    %48 = vector.broadcast %47 : vector<32x1xf32> to vector<32x128xf32>
    %49 = arith.mulf %30, %48 : vector<32x128xf32>
    %c2_35 = arith.constant 2 : index
    %c0_36 = arith.constant 0 : index
    %c0_37 = arith.constant 0 : index
    %50 = vector.load %arg2[%c2_35, %c0_36, %c0_37] : memref<9x128x128xf32, #tpu.memory_space<vmem>>, vector<1x128x128xf32>
    %51 = vector.shape_cast %50 : vector<1x128x128xf32> to vector<128x128xf32>
    %cst_38 = arith.constant dense<0.000000e+00> : vector<32x128xf32>
    %52 = tpu.matmul %49, %51, %cst_38 {dimension_numbers = #tpu.dot_dimension_numbers<[1], [0], [0], [1], [0, 0, 1, 1], [], []>} : vector<32x128xf32>, vector<128x128xf32>, vector<32x128xf32> -> vector<32x128xf32>
    %53 = arith.addf %45, %52 : vector<32x128xf32>
    %c0_39 = arith.constant 0 : index
    %c3 = arith.constant 3 : index
    %c0_40 = arith.constant 0 : index
    %c0_41 = arith.constant 0 : index
    %54 = vector.load %arg6[%c0_39, %c3, %c0_40, %c0_41] : memref<3x9x32x1xf32, #tpu.memory_space<vmem>>, vector<1x1x32x1xf32>
    %55 = vector.shape_cast %54 : vector<1x1x32x1xf32> to vector<32x1xf32>
    %56 = vector.broadcast %55 : vector<32x1xf32> to vector<32x128xf32>
    %57 = arith.mulf %30, %56 : vector<32x128xf32>
    %c3_42 = arith.constant 3 : index
    %c0_43 = arith.constant 0 : index
    %c0_44 = arith.constant 0 : index
    %58 = vector.load %arg2[%c3_42, %c0_43, %c0_44] : memref<9x128x128xf32, #tpu.memory_space<vmem>>, vector<1x128x128xf32>
    %59 = vector.shape_cast %58 : vector<1x128x128xf32> to vector<128x128xf32>
    %cst_45 = arith.constant dense<0.000000e+00> : vector<32x128xf32>
    %60 = tpu.matmul %57, %59, %cst_45 {dimension_numbers = #tpu.dot_dimension_numbers<[1], [0], [0], [1], [0, 0, 1, 1], [], []>} : vector<32x128xf32>, vector<128x128xf32>, vector<32x128xf32> -> vector<32x128xf32>
    %61 = arith.addf %53, %60 : vector<32x128xf32>
    %c0_46 = arith.constant 0 : index
    %c4 = arith.constant 4 : index
    %c0_47 = arith.constant 0 : index
    %c0_48 = arith.constant 0 : index
    %62 = vector.load %arg6[%c0_46, %c4, %c0_47, %c0_48] : memref<3x9x32x1xf32, #tpu.memory_space<vmem>>, vector<1x1x32x1xf32>
    %63 = vector.shape_cast %62 : vector<1x1x32x1xf32> to vector<32x1xf32>
    %64 = vector.broadcast %63 : vector<32x1xf32> to vector<32x128xf32>
    %65 = arith.mulf %30, %64 : vector<32x128xf32>
    %c4_49 = arith.constant 4 : index
    %c0_50 = arith.constant 0 : index
    %c0_51 = arith.constant 0 : index
    %66 = vector.load %arg2[%c4_49, %c0_50, %c0_51] : memref<9x128x128xf32, #tpu.memory_space<vmem>>, vector<1x128x128xf32>
    %67 = vector.shape_cast %66 : vector<1x128x128xf32> to vector<128x128xf32>
    %cst_52 = arith.constant dense<0.000000e+00> : vector<32x128xf32>
    %68 = tpu.matmul %65, %67, %cst_52 {dimension_numbers = #tpu.dot_dimension_numbers<[1], [0], [0], [1], [0, 0, 1, 1], [], []>} : vector<32x128xf32>, vector<128x128xf32>, vector<32x128xf32> -> vector<32x128xf32>
    %69 = arith.addf %61, %68 : vector<32x128xf32>
    %c0_53 = arith.constant 0 : index
    %c5 = arith.constant 5 : index
    %c0_54 = arith.constant 0 : index
    %c0_55 = arith.constant 0 : index
    %70 = vector.load %arg6[%c0_53, %c5, %c0_54, %c0_55] : memref<3x9x32x1xf32, #tpu.memory_space<vmem>>, vector<1x1x32x1xf32>
    %71 = vector.shape_cast %70 : vector<1x1x32x1xf32> to vector<32x1xf32>
    %72 = vector.broadcast %71 : vector<32x1xf32> to vector<32x128xf32>
    %73 = arith.mulf %30, %72 : vector<32x128xf32>
    %c5_56 = arith.constant 5 : index
    %c0_57 = arith.constant 0 : index
    %c0_58 = arith.constant 0 : index
    %74 = vector.load %arg2[%c5_56, %c0_57, %c0_58] : memref<9x128x128xf32, #tpu.memory_space<vmem>>, vector<1x128x128xf32>
    %75 = vector.shape_cast %74 : vector<1x128x128xf32> to vector<128x128xf32>
    %cst_59 = arith.constant dense<0.000000e+00> : vector<32x128xf32>
    %76 = tpu.matmul %73, %75, %cst_59 {dimension_numbers = #tpu.dot_dimension_numbers<[1], [0], [0], [1], [0, 0, 1, 1], [], []>} : vector<32x128xf32>, vector<128x128xf32>, vector<32x128xf32> -> vector<32x128xf32>
    %77 = arith.addf %69, %76 : vector<32x128xf32>
    %c0_60 = arith.constant 0 : index
    %c6 = arith.constant 6 : index
    %c0_61 = arith.constant 0 : index
    %c0_62 = arith.constant 0 : index
    %78 = vector.load %arg6[%c0_60, %c6, %c0_61, %c0_62] : memref<3x9x32x1xf32, #tpu.memory_space<vmem>>, vector<1x1x32x1xf32>
    %79 = vector.shape_cast %78 : vector<1x1x32x1xf32> to vector<32x1xf32>
    %80 = vector.broadcast %79 : vector<32x1xf32> to vector<32x128xf32>
    %81 = arith.mulf %30, %80 : vector<32x128xf32>
    %c6_63 = arith.constant 6 : index
    %c0_64 = arith.constant 0 : index
    %c0_65 = arith.constant 0 : index
    %82 = vector.load %arg2[%c6_63, %c0_64, %c0_65] : memref<9x128x128xf32, #tpu.memory_space<vmem>>, vector<1x128x128xf32>
    %83 = vector.shape_cast %82 : vector<1x128x128xf32> to vector<128x128xf32>
    %cst_66 = arith.constant dense<0.000000e+00> : vector<32x128xf32>
    %84 = tpu.matmul %81, %83, %cst_66 {dimension_numbers = #tpu.dot_dimension_numbers<[1], [0], [0], [1], [0, 0, 1, 1], [], []>} : vector<32x128xf32>, vector<128x128xf32>, vector<32x128xf32> -> vector<32x128xf32>
    %85 = arith.addf %77, %84 : vector<32x128xf32>
    %c0_67 = arith.constant 0 : index
    %c7 = arith.constant 7 : index
    %c0_68 = arith.constant 0 : index
    %c0_69 = arith.constant 0 : index
    %86 = vector.load %arg6[%c0_67, %c7, %c0_68, %c0_69] : memref<3x9x32x1xf32, #tpu.memory_space<vmem>>, vector<1x1x32x1xf32>
    %87 = vector.shape_cast %86 : vector<1x1x32x1xf32> to vector<32x1xf32>
    %88 = vector.broadcast %87 : vector<32x1xf32> to vector<32x128xf32>
    %89 = arith.mulf %30, %88 : vector<32x128xf32>
    %c7_70 = arith.constant 7 : index
    %c0_71 = arith.constant 0 : index
    %c0_72 = arith.constant 0 : index
    %90 = vector.load %arg2[%c7_70, %c0_71, %c0_72] : memref<9x128x128xf32, #tpu.memory_space<vmem>>, vector<1x128x128xf32>
    %91 = vector.shape_cast %90 : vector<1x128x128xf32> to vector<128x128xf32>
    %cst_73 = arith.constant dense<0.000000e+00> : vector<32x128xf32>
    %92 = tpu.matmul %89, %91, %cst_73 {dimension_numbers = #tpu.dot_dimension_numbers<[1], [0], [0], [1], [0, 0, 1, 1], [], []>} : vector<32x128xf32>, vector<128x128xf32>, vector<32x128xf32> -> vector<32x128xf32>
    %93 = arith.addf %85, %92 : vector<32x128xf32>
    %c0_74 = arith.constant 0 : index
    %c8 = arith.constant 8 : index
    %c0_75 = arith.constant 0 : index
    %c0_76 = arith.constant 0 : index
    %94 = vector.load %arg6[%c0_74, %c8, %c0_75, %c0_76] : memref<3x9x32x1xf32, #tpu.memory_space<vmem>>, vector<1x1x32x1xf32>
    %95 = vector.shape_cast %94 : vector<1x1x32x1xf32> to vector<32x1xf32>
    %96 = vector.broadcast %95 : vector<32x1xf32> to vector<32x128xf32>
    %97 = arith.mulf %30, %96 : vector<32x128xf32>
    %c8_77 = arith.constant 8 : index
    %c0_78 = arith.constant 0 : index
    %c0_79 = arith.constant 0 : index
    %98 = vector.load %arg2[%c8_77, %c0_78, %c0_79] : memref<9x128x128xf32, #tpu.memory_space<vmem>>, vector<1x128x128xf32>
    %99 = vector.shape_cast %98 : vector<1x128x128xf32> to vector<128x128xf32>
    %cst_80 = arith.constant dense<0.000000e+00> : vector<32x128xf32>
    %100 = tpu.matmul %97, %99, %cst_80 {dimension_numbers = #tpu.dot_dimension_numbers<[1], [0], [0], [1], [0, 0, 1, 1], [], []>} : vector<32x128xf32>, vector<128x128xf32>, vector<32x128xf32> -> vector<32x128xf32>
    %101 = arith.addf %93, %100 : vector<32x128xf32>
    %c0_81 = arith.constant 0 : index
    %c2_82 = arith.constant 2 : index
    %102 = vector.load %arg14[%c0_81, %c2_82] : memref<32x10xf32, #tpu.memory_space<vmem>>, vector<32x1xf32>
    %c0_83 = arith.constant 0 : index
    %c3_84 = arith.constant 3 : index
    %103 = vector.load %arg14[%c0_83, %c3_84] : memref<32x10xf32, #tpu.memory_space<vmem>>, vector<32x1xf32>
    %cst_85 = arith.constant dense<0.000000e+00> : vector<32xf32>
    %104 = vector.multi_reduction <add>, %101, %cst_85 [1] : vector<32x128xf32> to vector<32xf32>
    %105 = vector.shape_cast %104 : vector<32xf32> to vector<32x1xf32>
    %cst_86 = arith.constant 7.812500e-03 : f32
    %106 = vector.broadcast %cst_86 : f32 to vector<32x1xf32>
    %107 = arith.mulf %105, %106 : vector<32x1xf32>
    %108 = arith.mulf %101, %101 : vector<32x128xf32>
    %cst_87 = arith.constant dense<0.000000e+00> : vector<32xf32>
    %109 = vector.multi_reduction <add>, %108, %cst_87 [1] : vector<32x128xf32> to vector<32xf32>
    %110 = vector.shape_cast %109 : vector<32xf32> to vector<32x1xf32>
    %cst_88 = arith.constant 7.812500e-03 : f32
    %111 = vector.broadcast %cst_88 : f32 to vector<32x1xf32>
    %112 = arith.mulf %110, %111 : vector<32x1xf32>
    %113 = arith.mulf %107, %107 : vector<32x1xf32>
    %114 = arith.subf %112, %113 : vector<32x1xf32>
    %cst_89 = arith.constant 9.99999974E-6 : f32
    %115 = vector.broadcast %cst_89 : f32 to vector<32x1xf32>
    %116 = arith.addf %114, %115 : vector<32x1xf32>
    %117 = math.rsqrt %116 : vector<32x1xf32>
    %118 = arith.mulf %102, %117 : vector<32x1xf32>
    %119 = vector.broadcast %118 : vector<32x1xf32> to vector<32x128xf32>
    %120 = arith.mulf %101, %119 : vector<32x128xf32>
    %121 = arith.mulf %107, %118 : vector<32x1xf32>
    %122 = arith.subf %103, %121 : vector<32x1xf32>
    %123 = vector.broadcast %122 : vector<32x1xf32> to vector<32x128xf32>
    %124 = arith.addf %120, %123 : vector<32x128xf32>
    %cst_90 = arith.constant 0.000000e+00 : f32
    %125 = vector.broadcast %cst_90 : f32 to vector<32x128xf32>
    %126 = arith.maximumf %124, %125 : vector<32x128xf32>
    %c1_91 = arith.constant 1 : index
    %c0_92 = arith.constant 0 : index
    %c0_93 = arith.constant 0 : index
    %127 = vector.load %arg5[%c1_91, %c0_92, %c0_93] : memref<3x32x32xf32, #tpu.memory_space<vmem>>, vector<1x32x32xf32>
    %128 = vector.shape_cast %127 : vector<1x32x32xf32> to vector<32x32xf32>
    %cst_94 = arith.constant dense<0.000000e+00> : vector<32x128xf32>
    %129 = tpu.matmul %128, %126, %cst_94 {dimension_numbers = #tpu.dot_dimension_numbers<[1], [0], [0], [1], [0, 0, 1, 1], [], []>} : vector<32x32xf32>, vector<32x128xf32>, vector<32x128xf32> -> vector<32x128xf32>
    %c1_95 = arith.constant 1 : index
    %c0_96 = arith.constant 0 : index
    %c0_97 = arith.constant 0 : index
    %c0_98 = arith.constant 0 : index
    %130 = vector.load %arg6[%c1_95, %c0_96, %c0_97, %c0_98] : memref<3x9x32x1xf32, #tpu.memory_space<vmem>>, vector<1x1x32x1xf32>
    %131 = vector.shape_cast %130 : vector<1x1x32x1xf32> to vector<32x1xf32>
    %132 = vector.broadcast %131 : vector<32x1xf32> to vector<32x128xf32>
    %133 = arith.mulf %129, %132 : vector<32x128xf32>
    %c0_99 = arith.constant 0 : index
    %c0_100 = arith.constant 0 : index
    %c0_101 = arith.constant 0 : index
    %134 = vector.load %arg2[%c0_99, %c0_100, %c0_101] : memref<9x128x128xf32, #tpu.memory_space<vmem>>, vector<1x128x128xf32>
    %135 = vector.shape_cast %134 : vector<1x128x128xf32> to vector<128x128xf32>
    %cst_102 = arith.constant dense<0.000000e+00> : vector<32x128xf32>
    %136 = tpu.matmul %133, %135, %cst_102 {dimension_numbers = #tpu.dot_dimension_numbers<[1], [0], [0], [1], [0, 0, 1, 1], [], []>} : vector<32x128xf32>, vector<128x128xf32>, vector<32x128xf32> -> vector<32x128xf32>
    %c1_103 = arith.constant 1 : index
    %c1_104 = arith.constant 1 : index
    %c0_105 = arith.constant 0 : index
    %c0_106 = arith.constant 0 : index
    %137 = vector.load %arg6[%c1_103, %c1_104, %c0_105, %c0_106] : memref<3x9x32x1xf32, #tpu.memory_space<vmem>>, vector<1x1x32x1xf32>
    %138 = vector.shape_cast %137 : vector<1x1x32x1xf32> to vector<32x1xf32>
    %139 = vector.broadcast %138 : vector<32x1xf32> to vector<32x128xf32>
    %140 = arith.mulf %129, %139 : vector<32x128xf32>
    %c1_107 = arith.constant 1 : index
    %c0_108 = arith.constant 0 : index
    %c0_109 = arith.constant 0 : index
    %141 = vector.load %arg2[%c1_107, %c0_108, %c0_109] : memref<9x128x128xf32, #tpu.memory_space<vmem>>, vector<1x128x128xf32>
    %142 = vector.shape_cast %141 : vector<1x128x128xf32> to vector<128x128xf32>
    %cst_110 = arith.constant dense<0.000000e+00> : vector<32x128xf32>
    %143 = tpu.matmul %140, %142, %cst_110 {dimension_numbers = #tpu.dot_dimension_numbers<[1], [0], [0], [1], [0, 0, 1, 1], [], []>} : vector<32x128xf32>, vector<128x128xf32>, vector<32x128xf32> -> vector<32x128xf32>
    %144 = arith.addf %136, %143 : vector<32x128xf32>
    %c1_111 = arith.constant 1 : index
    %c2_112 = arith.constant 2 : index
    %c0_113 = arith.constant 0 : index
    %c0_114 = arith.constant 0 : index
    %145 = vector.load %arg6[%c1_111, %c2_112, %c0_113, %c0_114] : memref<3x9x32x1xf32, #tpu.memory_space<vmem>>, vector<1x1x32x1xf32>
    %146 = vector.shape_cast %145 : vector<1x1x32x1xf32> to vector<32x1xf32>
    %147 = vector.broadcast %146 : vector<32x1xf32> to vector<32x128xf32>
    %148 = arith.mulf %129, %147 : vector<32x128xf32>
    %c2_115 = arith.constant 2 : index
    %c0_116 = arith.constant 0 : index
    %c0_117 = arith.constant 0 : index
    %149 = vector.load %arg2[%c2_115, %c0_116, %c0_117] : memref<9x128x128xf32, #tpu.memory_space<vmem>>, vector<1x128x128xf32>
    %150 = vector.shape_cast %149 : vector<1x128x128xf32> to vector<128x128xf32>
    %cst_118 = arith.constant dense<0.000000e+00> : vector<32x128xf32>
    %151 = tpu.matmul %148, %150, %cst_118 {dimension_numbers = #tpu.dot_dimension_numbers<[1], [0], [0], [1], [0, 0, 1, 1], [], []>} : vector<32x128xf32>, vector<128x128xf32>, vector<32x128xf32> -> vector<32x128xf32>
    %152 = arith.addf %144, %151 : vector<32x128xf32>
    %c1_119 = arith.constant 1 : index
    %c3_120 = arith.constant 3 : index
    %c0_121 = arith.constant 0 : index
    %c0_122 = arith.constant 0 : index
    %153 = vector.load %arg6[%c1_119, %c3_120, %c0_121, %c0_122] : memref<3x9x32x1xf32, #tpu.memory_space<vmem>>, vector<1x1x32x1xf32>
    %154 = vector.shape_cast %153 : vector<1x1x32x1xf32> to vector<32x1xf32>
    %155 = vector.broadcast %154 : vector<32x1xf32> to vector<32x128xf32>
    %156 = arith.mulf %129, %155 : vector<32x128xf32>
    %c3_123 = arith.constant 3 : index
    %c0_124 = arith.constant 0 : index
    %c0_125 = arith.constant 0 : index
    %157 = vector.load %arg2[%c3_123, %c0_124, %c0_125] : memref<9x128x128xf32, #tpu.memory_space<vmem>>, vector<1x128x128xf32>
    %158 = vector.shape_cast %157 : vector<1x128x128xf32> to vector<128x128xf32>
    %cst_126 = arith.constant dense<0.000000e+00> : vector<32x128xf32>
    %159 = tpu.matmul %156, %158, %cst_126 {dimension_numbers = #tpu.dot_dimension_numbers<[1], [0], [0], [1], [0, 0, 1, 1], [], []>} : vector<32x128xf32>, vector<128x128xf32>, vector<32x128xf32> -> vector<32x128xf32>
    %160 = arith.addf %152, %159 : vector<32x128xf32>
    %c1_127 = arith.constant 1 : index
    %c4_128 = arith.constant 4 : index
    %c0_129 = arith.constant 0 : index
    %c0_130 = arith.constant 0 : index
    %161 = vector.load %arg6[%c1_127, %c4_128, %c0_129, %c0_130] : memref<3x9x32x1xf32, #tpu.memory_space<vmem>>, vector<1x1x32x1xf32>
    %162 = vector.shape_cast %161 : vector<1x1x32x1xf32> to vector<32x1xf32>
    %163 = vector.broadcast %162 : vector<32x1xf32> to vector<32x128xf32>
    %164 = arith.mulf %129, %163 : vector<32x128xf32>
    %c4_131 = arith.constant 4 : index
    %c0_132 = arith.constant 0 : index
    %c0_133 = arith.constant 0 : index
    %165 = vector.load %arg2[%c4_131, %c0_132, %c0_133] : memref<9x128x128xf32, #tpu.memory_space<vmem>>, vector<1x128x128xf32>
    %166 = vector.shape_cast %165 : vector<1x128x128xf32> to vector<128x128xf32>
    %cst_134 = arith.constant dense<0.000000e+00> : vector<32x128xf32>
    %167 = tpu.matmul %164, %166, %cst_134 {dimension_numbers = #tpu.dot_dimension_numbers<[1], [0], [0], [1], [0, 0, 1, 1], [], []>} : vector<32x128xf32>, vector<128x128xf32>, vector<32x128xf32> -> vector<32x128xf32>
    %168 = arith.addf %160, %167 : vector<32x128xf32>
    %c1_135 = arith.constant 1 : index
    %c5_136 = arith.constant 5 : index
    %c0_137 = arith.constant 0 : index
    %c0_138 = arith.constant 0 : index
    %169 = vector.load %arg6[%c1_135, %c5_136, %c0_137, %c0_138] : memref<3x9x32x1xf32, #tpu.memory_space<vmem>>, vector<1x1x32x1xf32>
    %170 = vector.shape_cast %169 : vector<1x1x32x1xf32> to vector<32x1xf32>
    %171 = vector.broadcast %170 : vector<32x1xf32> to vector<32x128xf32>
    %172 = arith.mulf %129, %171 : vector<32x128xf32>
    %c5_139 = arith.constant 5 : index
    %c0_140 = arith.constant 0 : index
    %c0_141 = arith.constant 0 : index
    %173 = vector.load %arg2[%c5_139, %c0_140, %c0_141] : memref<9x128x128xf32, #tpu.memory_space<vmem>>, vector<1x128x128xf32>
    %174 = vector.shape_cast %173 : vector<1x128x128xf32> to vector<128x128xf32>
    %cst_142 = arith.constant dense<0.000000e+00> : vector<32x128xf32>
    %175 = tpu.matmul %172, %174, %cst_142 {dimension_numbers = #tpu.dot_dimension_numbers<[1], [0], [0], [1], [0, 0, 1, 1], [], []>} : vector<32x128xf32>, vector<128x128xf32>, vector<32x128xf32> -> vector<32x128xf32>
    %176 = arith.addf %168, %175 : vector<32x128xf32>
    %c1_143 = arith.constant 1 : index
    %c6_144 = arith.constant 6 : index
    %c0_145 = arith.constant 0 : index
    %c0_146 = arith.constant 0 : index
    %177 = vector.load %arg6[%c1_143, %c6_144, %c0_145, %c0_146] : memref<3x9x32x1xf32, #tpu.memory_space<vmem>>, vector<1x1x32x1xf32>
    %178 = vector.shape_cast %177 : vector<1x1x32x1xf32> to vector<32x1xf32>
    %179 = vector.broadcast %178 : vector<32x1xf32> to vector<32x128xf32>
    %180 = arith.mulf %129, %179 : vector<32x128xf32>
    %c6_147 = arith.constant 6 : index
    %c0_148 = arith.constant 0 : index
    %c0_149 = arith.constant 0 : index
    %181 = vector.load %arg2[%c6_147, %c0_148, %c0_149] : memref<9x128x128xf32, #tpu.memory_space<vmem>>, vector<1x128x128xf32>
    %182 = vector.shape_cast %181 : vector<1x128x128xf32> to vector<128x128xf32>
    %cst_150 = arith.constant dense<0.000000e+00> : vector<32x128xf32>
    %183 = tpu.matmul %180, %182, %cst_150 {dimension_numbers = #tpu.dot_dimension_numbers<[1], [0], [0], [1], [0, 0, 1, 1], [], []>} : vector<32x128xf32>, vector<128x128xf32>, vector<32x128xf32> -> vector<32x128xf32>
    %184 = arith.addf %176, %183 : vector<32x128xf32>
    %c1_151 = arith.constant 1 : index
    %c7_152 = arith.constant 7 : index
    %c0_153 = arith.constant 0 : index
    %c0_154 = arith.constant 0 : index
    %185 = vector.load %arg6[%c1_151, %c7_152, %c0_153, %c0_154] : memref<3x9x32x1xf32, #tpu.memory_space<vmem>>, vector<1x1x32x1xf32>
    %186 = vector.shape_cast %185 : vector<1x1x32x1xf32> to vector<32x1xf32>
    %187 = vector.broadcast %186 : vector<32x1xf32> to vector<32x128xf32>
    %188 = arith.mulf %129, %187 : vector<32x128xf32>
    %c7_155 = arith.constant 7 : index
    %c0_156 = arith.constant 0 : index
    %c0_157 = arith.constant 0 : index
    %189 = vector.load %arg2[%c7_155, %c0_156, %c0_157] : memref<9x128x128xf32, #tpu.memory_space<vmem>>, vector<1x128x128xf32>
    %190 = vector.shape_cast %189 : vector<1x128x128xf32> to vector<128x128xf32>
    %cst_158 = arith.constant dense<0.000000e+00> : vector<32x128xf32>
    %191 = tpu.matmul %188, %190, %cst_158 {dimension_numbers = #tpu.dot_dimension_numbers<[1], [0], [0], [1], [0, 0, 1, 1], [], []>} : vector<32x128xf32>, vector<128x128xf32>, vector<32x128xf32> -> vector<32x128xf32>
    %192 = arith.addf %184, %191 : vector<32x128xf32>
    %c1_159 = arith.constant 1 : index
    %c8_160 = arith.constant 8 : index
    %c0_161 = arith.constant 0 : index
    %c0_162 = arith.constant 0 : index
    %193 = vector.load %arg6[%c1_159, %c8_160, %c0_161, %c0_162] : memref<3x9x32x1xf32, #tpu.memory_space<vmem>>, vector<1x1x32x1xf32>
    %194 = vector.shape_cast %193 : vector<1x1x32x1xf32> to vector<32x1xf32>
    %195 = vector.broadcast %194 : vector<32x1xf32> to vector<32x128xf32>
    %196 = arith.mulf %129, %195 : vector<32x128xf32>
    %c8_163 = arith.constant 8 : index
    %c0_164 = arith.constant 0 : index
    %c0_165 = arith.constant 0 : index
    %197 = vector.load %arg2[%c8_163, %c0_164, %c0_165] : memref<9x128x128xf32, #tpu.memory_space<vmem>>, vector<1x128x128xf32>
    %198 = vector.shape_cast %197 : vector<1x128x128xf32> to vector<128x128xf32>
    %cst_166 = arith.constant dense<0.000000e+00> : vector<32x128xf32>
    %199 = tpu.matmul %196, %198, %cst_166 {dimension_numbers = #tpu.dot_dimension_numbers<[1], [0], [0], [1], [0, 0, 1, 1], [], []>} : vector<32x128xf32>, vector<128x128xf32>, vector<32x128xf32> -> vector<32x128xf32>
    %200 = arith.addf %192, %199 : vector<32x128xf32>
    %c0_167 = arith.constant 0 : index
    %c4_168 = arith.constant 4 : index
    %201 = vector.load %arg14[%c0_167, %c4_168] : memref<32x10xf32, #tpu.memory_space<vmem>>, vector<32x1xf32>
    %c0_169 = arith.constant 0 : index
    %c5_170 = arith.constant 5 : index
    %202 = vector.load %arg14[%c0_169, %c5_170] : memref<32x10xf32, #tpu.memory_space<vmem>>, vector<32x1xf32>
    %cst_171 = arith.constant dense<0.000000e+00> : vector<32xf32>
    %203 = vector.multi_reduction <add>, %200, %cst_171 [1] : vector<32x128xf32> to vector<32xf32>
    %204 = vector.shape_cast %203 : vector<32xf32> to vector<32x1xf32>
    %cst_172 = arith.constant 7.812500e-03 : f32
    %205 = vector.broadcast %cst_172 : f32 to vector<32x1xf32>
    %206 = arith.mulf %204, %205 : vector<32x1xf32>
    %207 = arith.mulf %200, %200 : vector<32x128xf32>
    %cst_173 = arith.constant dense<0.000000e+00> : vector<32xf32>
    %208 = vector.multi_reduction <add>, %207, %cst_173 [1] : vector<32x128xf32> to vector<32xf32>
    %209 = vector.shape_cast %208 : vector<32xf32> to vector<32x1xf32>
    %cst_174 = arith.constant 7.812500e-03 : f32
    %210 = vector.broadcast %cst_174 : f32 to vector<32x1xf32>
    %211 = arith.mulf %209, %210 : vector<32x1xf32>
    %212 = arith.mulf %206, %206 : vector<32x1xf32>
    %213 = arith.subf %211, %212 : vector<32x1xf32>
    %cst_175 = arith.constant 9.99999974E-6 : f32
    %214 = vector.broadcast %cst_175 : f32 to vector<32x1xf32>
    %215 = arith.addf %213, %214 : vector<32x1xf32>
    %216 = math.rsqrt %215 : vector<32x1xf32>
    %217 = arith.mulf %201, %216 : vector<32x1xf32>
    %218 = vector.broadcast %217 : vector<32x1xf32> to vector<32x128xf32>
    %219 = arith.mulf %200, %218 : vector<32x128xf32>
    %220 = arith.mulf %206, %217 : vector<32x1xf32>
    %221 = arith.subf %202, %220 : vector<32x1xf32>
    %222 = vector.broadcast %221 : vector<32x1xf32> to vector<32x128xf32>
    %223 = arith.addf %219, %222 : vector<32x128xf32>
    %cst_176 = arith.constant 0.000000e+00 : f32
    %224 = vector.broadcast %cst_176 : f32 to vector<32x128xf32>
    %225 = arith.maximumf %223, %224 : vector<32x128xf32>
    %c2_177 = arith.constant 2 : index
    %c0_178 = arith.constant 0 : index
    %c0_179 = arith.constant 0 : index
    %226 = vector.load %arg5[%c2_177, %c0_178, %c0_179] : memref<3x32x32xf32, #tpu.memory_space<vmem>>, vector<1x32x32xf32>
    %227 = vector.shape_cast %226 : vector<1x32x32xf32> to vector<32x32xf32>
    %cst_180 = arith.constant dense<0.000000e+00> : vector<32x128xf32>
    %228 = tpu.matmul %227, %225, %cst_180 {dimension_numbers = #tpu.dot_dimension_numbers<[1], [0], [0], [1], [0, 0, 1, 1], [], []>} : vector<32x32xf32>, vector<32x128xf32>, vector<32x128xf32> -> vector<32x128xf32>
    %c2_181 = arith.constant 2 : index
    %c0_182 = arith.constant 0 : index
    %c0_183 = arith.constant 0 : index
    %c0_184 = arith.constant 0 : index
    %229 = vector.load %arg6[%c2_181, %c0_182, %c0_183, %c0_184] : memref<3x9x32x1xf32, #tpu.memory_space<vmem>>, vector<1x1x32x1xf32>
    %230 = vector.shape_cast %229 : vector<1x1x32x1xf32> to vector<32x1xf32>
    %231 = vector.broadcast %230 : vector<32x1xf32> to vector<32x128xf32>
    %232 = arith.mulf %228, %231 : vector<32x128xf32>
    %c0_185 = arith.constant 0 : index
    %c0_186 = arith.constant 0 : index
    %c0_187 = arith.constant 0 : index
    %233 = vector.load %arg2[%c0_185, %c0_186, %c0_187] : memref<9x128x128xf32, #tpu.memory_space<vmem>>, vector<1x128x128xf32>
    %234 = vector.shape_cast %233 : vector<1x128x128xf32> to vector<128x128xf32>
    %cst_188 = arith.constant dense<0.000000e+00> : vector<32x128xf32>
    %235 = tpu.matmul %232, %234, %cst_188 {dimension_numbers = #tpu.dot_dimension_numbers<[1], [0], [0], [1], [0, 0, 1, 1], [], []>} : vector<32x128xf32>, vector<128x128xf32>, vector<32x128xf32> -> vector<32x128xf32>
    %c2_189 = arith.constant 2 : index
    %c1_190 = arith.constant 1 : index
    %c0_191 = arith.constant 0 : index
    %c0_192 = arith.constant 0 : index
    %236 = vector.load %arg6[%c2_189, %c1_190, %c0_191, %c0_192] : memref<3x9x32x1xf32, #tpu.memory_space<vmem>>, vector<1x1x32x1xf32>
    %237 = vector.shape_cast %236 : vector<1x1x32x1xf32> to vector<32x1xf32>
    %238 = vector.broadcast %237 : vector<32x1xf32> to vector<32x128xf32>
    %239 = arith.mulf %228, %238 : vector<32x128xf32>
    %c1_193 = arith.constant 1 : index
    %c0_194 = arith.constant 0 : index
    %c0_195 = arith.constant 0 : index
    %240 = vector.load %arg2[%c1_193, %c0_194, %c0_195] : memref<9x128x128xf32, #tpu.memory_space<vmem>>, vector<1x128x128xf32>
    %241 = vector.shape_cast %240 : vector<1x128x128xf32> to vector<128x128xf32>
    %cst_196 = arith.constant dense<0.000000e+00> : vector<32x128xf32>
    %242 = tpu.matmul %239, %241, %cst_196 {dimension_numbers = #tpu.dot_dimension_numbers<[1], [0], [0], [1], [0, 0, 1, 1], [], []>} : vector<32x128xf32>, vector<128x128xf32>, vector<32x128xf32> -> vector<32x128xf32>
    %243 = arith.addf %235, %242 : vector<32x128xf32>
    %c2_197 = arith.constant 2 : index
    %c2_198 = arith.constant 2 : index
    %c0_199 = arith.constant 0 : index
    %c0_200 = arith.constant 0 : index
    %244 = vector.load %arg6[%c2_197, %c2_198, %c0_199, %c0_200] : memref<3x9x32x1xf32, #tpu.memory_space<vmem>>, vector<1x1x32x1xf32>
    %245 = vector.shape_cast %244 : vector<1x1x32x1xf32> to vector<32x1xf32>
    %246 = vector.broadcast %245 : vector<32x1xf32> to vector<32x128xf32>
    %247 = arith.mulf %228, %246 : vector<32x128xf32>
    %c2_201 = arith.constant 2 : index
    %c0_202 = arith.constant 0 : index
    %c0_203 = arith.constant 0 : index
    %248 = vector.load %arg2[%c2_201, %c0_202, %c0_203] : memref<9x128x128xf32, #tpu.memory_space<vmem>>, vector<1x128x128xf32>
    %249 = vector.shape_cast %248 : vector<1x128x128xf32> to vector<128x128xf32>
    %cst_204 = arith.constant dense<0.000000e+00> : vector<32x128xf32>
    %250 = tpu.matmul %247, %249, %cst_204 {dimension_numbers = #tpu.dot_dimension_numbers<[1], [0], [0], [1], [0, 0, 1, 1], [], []>} : vector<32x128xf32>, vector<128x128xf32>, vector<32x128xf32> -> vector<32x128xf32>
    %251 = arith.addf %243, %250 : vector<32x128xf32>
    %c2_205 = arith.constant 2 : index
    %c3_206 = arith.constant 3 : index
    %c0_207 = arith.constant 0 : index
    %c0_208 = arith.constant 0 : index
    %252 = vector.load %arg6[%c2_205, %c3_206, %c0_207, %c0_208] : memref<3x9x32x1xf32, #tpu.memory_space<vmem>>, vector<1x1x32x1xf32>
    %253 = vector.shape_cast %252 : vector<1x1x32x1xf32> to vector<32x1xf32>
    %254 = vector.broadcast %253 : vector<32x1xf32> to vector<32x128xf32>
    %255 = arith.mulf %228, %254 : vector<32x128xf32>
    %c3_209 = arith.constant 3 : index
    %c0_210 = arith.constant 0 : index
    %c0_211 = arith.constant 0 : index
    %256 = vector.load %arg2[%c3_209, %c0_210, %c0_211] : memref<9x128x128xf32, #tpu.memory_space<vmem>>, vector<1x128x128xf32>
    %257 = vector.shape_cast %256 : vector<1x128x128xf32> to vector<128x128xf32>
    %cst_212 = arith.constant dense<0.000000e+00> : vector<32x128xf32>
    %258 = tpu.matmul %255, %257, %cst_212 {dimension_numbers = #tpu.dot_dimension_numbers<[1], [0], [0], [1], [0, 0, 1, 1], [], []>} : vector<32x128xf32>, vector<128x128xf32>, vector<32x128xf32> -> vector<32x128xf32>
    %259 = arith.addf %251, %258 : vector<32x128xf32>
    %c2_213 = arith.constant 2 : index
    %c4_214 = arith.constant 4 : index
    %c0_215 = arith.constant 0 : index
    %c0_216 = arith.constant 0 : index
    %260 = vector.load %arg6[%c2_213, %c4_214, %c0_215, %c0_216] : memref<3x9x32x1xf32, #tpu.memory_space<vmem>>, vector<1x1x32x1xf32>
    %261 = vector.shape_cast %260 : vector<1x1x32x1xf32> to vector<32x1xf32>
    %262 = vector.broadcast %261 : vector<32x1xf32> to vector<32x128xf32>
    %263 = arith.mulf %228, %262 : vector<32x128xf32>
    %c4_217 = arith.constant 4 : index
    %c0_218 = arith.constant 0 : index
    %c0_219 = arith.constant 0 : index
    %264 = vector.load %arg2[%c4_217, %c0_218, %c0_219] : memref<9x128x128xf32, #tpu.memory_space<vmem>>, vector<1x128x128xf32>
    %265 = vector.shape_cast %264 : vector<1x128x128xf32> to vector<128x128xf32>
    %cst_220 = arith.constant dense<0.000000e+00> : vector<32x128xf32>
    %266 = tpu.matmul %263, %265, %cst_220 {dimension_numbers = #tpu.dot_dimension_numbers<[1], [0], [0], [1], [0, 0, 1, 1], [], []>} : vector<32x128xf32>, vector<128x128xf32>, vector<32x128xf32> -> vector<32x128xf32>
    %267 = arith.addf %259, %266 : vector<32x128xf32>
    %c2_221 = arith.constant 2 : index
    %c5_222 = arith.constant 5 : index
    %c0_223 = arith.constant 0 : index
    %c0_224 = arith.constant 0 : index
    %268 = vector.load %arg6[%c2_221, %c5_222, %c0_223, %c0_224] : memref<3x9x32x1xf32, #tpu.memory_space<vmem>>, vector<1x1x32x1xf32>
    %269 = vector.shape_cast %268 : vector<1x1x32x1xf32> to vector<32x1xf32>
    %270 = vector.broadcast %269 : vector<32x1xf32> to vector<32x128xf32>
    %271 = arith.mulf %228, %270 : vector<32x128xf32>
    %c5_225 = arith.constant 5 : index
    %c0_226 = arith.constant 0 : index
    %c0_227 = arith.constant 0 : index
    %272 = vector.load %arg2[%c5_225, %c0_226, %c0_227] : memref<9x128x128xf32, #tpu.memory_space<vmem>>, vector<1x128x128xf32>
    %273 = vector.shape_cast %272 : vector<1x128x128xf32> to vector<128x128xf32>
    %cst_228 = arith.constant dense<0.000000e+00> : vector<32x128xf32>
    %274 = tpu.matmul %271, %273, %cst_228 {dimension_numbers = #tpu.dot_dimension_numbers<[1], [0], [0], [1], [0, 0, 1, 1], [], []>} : vector<32x128xf32>, vector<128x128xf32>, vector<32x128xf32> -> vector<32x128xf32>
    %275 = arith.addf %267, %274 : vector<32x128xf32>
    %c2_229 = arith.constant 2 : index
    %c6_230 = arith.constant 6 : index
    %c0_231 = arith.constant 0 : index
    %c0_232 = arith.constant 0 : index
    %276 = vector.load %arg6[%c2_229, %c6_230, %c0_231, %c0_232] : memref<3x9x32x1xf32, #tpu.memory_space<vmem>>, vector<1x1x32x1xf32>
    %277 = vector.shape_cast %276 : vector<1x1x32x1xf32> to vector<32x1xf32>
    %278 = vector.broadcast %277 : vector<32x1xf32> to vector<32x128xf32>
    %279 = arith.mulf %228, %278 : vector<32x128xf32>
    %c6_233 = arith.constant 6 : index
    %c0_234 = arith.constant 0 : index
    %c0_235 = arith.constant 0 : index
    %280 = vector.load %arg2[%c6_233, %c0_234, %c0_235] : memref<9x128x128xf32, #tpu.memory_space<vmem>>, vector<1x128x128xf32>
    %281 = vector.shape_cast %280 : vector<1x128x128xf32> to vector<128x128xf32>
    %cst_236 = arith.constant dense<0.000000e+00> : vector<32x128xf32>
    %282 = tpu.matmul %279, %281, %cst_236 {dimension_numbers = #tpu.dot_dimension_numbers<[1], [0], [0], [1], [0, 0, 1, 1], [], []>} : vector<32x128xf32>, vector<128x128xf32>, vector<32x128xf32> -> vector<32x128xf32>
    %283 = arith.addf %275, %282 : vector<32x128xf32>
    %c2_237 = arith.constant 2 : index
    %c7_238 = arith.constant 7 : index
    %c0_239 = arith.constant 0 : index
    %c0_240 = arith.constant 0 : index
    %284 = vector.load %arg6[%c2_237, %c7_238, %c0_239, %c0_240] : memref<3x9x32x1xf32, #tpu.memory_space<vmem>>, vector<1x1x32x1xf32>
    %285 = vector.shape_cast %284 : vector<1x1x32x1xf32> to vector<32x1xf32>
    %286 = vector.broadcast %285 : vector<32x1xf32> to vector<32x128xf32>
    %287 = arith.mulf %228, %286 : vector<32x128xf32>
    %c7_241 = arith.constant 7 : index
    %c0_242 = arith.constant 0 : index
    %c0_243 = arith.constant 0 : index
    %288 = vector.load %arg2[%c7_241, %c0_242, %c0_243] : memref<9x128x128xf32, #tpu.memory_space<vmem>>, vector<1x128x128xf32>
    %289 = vector.shape_cast %288 : vector<1x128x128xf32> to vector<128x128xf32>
    %cst_244 = arith.constant dense<0.000000e+00> : vector<32x128xf32>
    %290 = tpu.matmul %287, %289, %cst_244 {dimension_numbers = #tpu.dot_dimension_numbers<[1], [0], [0], [1], [0, 0, 1, 1], [], []>} : vector<32x128xf32>, vector<128x128xf32>, vector<32x128xf32> -> vector<32x128xf32>
    %291 = arith.addf %283, %290 : vector<32x128xf32>
    %c2_245 = arith.constant 2 : index
    %c8_246 = arith.constant 8 : index
    %c0_247 = arith.constant 0 : index
    %c0_248 = arith.constant 0 : index
    %292 = vector.load %arg6[%c2_245, %c8_246, %c0_247, %c0_248] : memref<3x9x32x1xf32, #tpu.memory_space<vmem>>, vector<1x1x32x1xf32>
    %293 = vector.shape_cast %292 : vector<1x1x32x1xf32> to vector<32x1xf32>
    %294 = vector.broadcast %293 : vector<32x1xf32> to vector<32x128xf32>
    %295 = arith.mulf %228, %294 : vector<32x128xf32>
    %c8_249 = arith.constant 8 : index
    %c0_250 = arith.constant 0 : index
    %c0_251 = arith.constant 0 : index
    %296 = vector.load %arg2[%c8_249, %c0_250, %c0_251] : memref<9x128x128xf32, #tpu.memory_space<vmem>>, vector<1x128x128xf32>
    %297 = vector.shape_cast %296 : vector<1x128x128xf32> to vector<128x128xf32>
    %cst_252 = arith.constant dense<0.000000e+00> : vector<32x128xf32>
    %298 = tpu.matmul %295, %297, %cst_252 {dimension_numbers = #tpu.dot_dimension_numbers<[1], [0], [0], [1], [0, 0, 1, 1], [], []>} : vector<32x128xf32>, vector<128x128xf32>, vector<32x128xf32> -> vector<32x128xf32>
    %299 = arith.addf %291, %298 : vector<32x128xf32>
    %c0_253 = arith.constant 0 : index
    %c6_254 = arith.constant 6 : index
    %300 = vector.load %arg14[%c0_253, %c6_254] : memref<32x10xf32, #tpu.memory_space<vmem>>, vector<32x1xf32>
    %c0_255 = arith.constant 0 : index
    %c7_256 = arith.constant 7 : index
    %301 = vector.load %arg14[%c0_255, %c7_256] : memref<32x10xf32, #tpu.memory_space<vmem>>, vector<32x1xf32>
    %cst_257 = arith.constant dense<0.000000e+00> : vector<32xf32>
    %302 = vector.multi_reduction <add>, %299, %cst_257 [1] : vector<32x128xf32> to vector<32xf32>
    %303 = vector.shape_cast %302 : vector<32xf32> to vector<32x1xf32>
    %cst_258 = arith.constant 7.812500e-03 : f32
    %304 = vector.broadcast %cst_258 : f32 to vector<32x1xf32>
    %305 = arith.mulf %303, %304 : vector<32x1xf32>
    %306 = arith.mulf %299, %299 : vector<32x128xf32>
    %cst_259 = arith.constant dense<0.000000e+00> : vector<32xf32>
    %307 = vector.multi_reduction <add>, %306, %cst_259 [1] : vector<32x128xf32> to vector<32xf32>
    %308 = vector.shape_cast %307 : vector<32xf32> to vector<32x1xf32>
    %cst_260 = arith.constant 7.812500e-03 : f32
    %309 = vector.broadcast %cst_260 : f32 to vector<32x1xf32>
    %310 = arith.mulf %308, %309 : vector<32x1xf32>
    %311 = arith.mulf %305, %305 : vector<32x1xf32>
    %312 = arith.subf %310, %311 : vector<32x1xf32>
    %cst_261 = arith.constant 9.99999974E-6 : f32
    %313 = vector.broadcast %cst_261 : f32 to vector<32x1xf32>
    %314 = arith.addf %312, %313 : vector<32x1xf32>
    %315 = math.rsqrt %314 : vector<32x1xf32>
    %316 = arith.mulf %300, %315 : vector<32x1xf32>
    %317 = vector.broadcast %316 : vector<32x1xf32> to vector<32x128xf32>
    %318 = arith.mulf %299, %317 : vector<32x128xf32>
    %319 = arith.mulf %305, %316 : vector<32x1xf32>
    %320 = arith.subf %301, %319 : vector<32x1xf32>
    %321 = vector.broadcast %320 : vector<32x1xf32> to vector<32x128xf32>
    %322 = arith.addf %318, %321 : vector<32x128xf32>
    %cst_262 = arith.constant 0.000000e+00 : f32
    %323 = vector.broadcast %cst_262 : f32 to vector<32x128xf32>
    %324 = arith.maximumf %322, %323 : vector<32x128xf32>
    %c0_263 = arith.constant 0 : index
    %c0_264 = arith.constant 0 : index
    %325 = vector.load %arg7[%c0_263, %c0_264] : memref<32x64xf32, #tpu.memory_space<vmem>>, vector<32x64xf32>
    %326 = tpu.concatenate %324, %225 in 0 : vector<32x128xf32>, vector<32x128xf32> -> vector<64x128xf32>
    %cst_265 = arith.constant dense<0.000000e+00> : vector<32x128xf32>
    %327 = tpu.matmul %325, %326, %cst_265 {dimension_numbers = #tpu.dot_dimension_numbers<[1], [0], [0], [1], [0, 0, 1, 1], [], []>} : vector<32x64xf32>, vector<64x128xf32>, vector<32x128xf32> -> vector<32x128xf32>
    %c0_266 = arith.constant 0 : index
    %c0_267 = arith.constant 0 : index
    %328 = vector.load %arg8[%c0_266, %c0_267] : memref<32x64xf32, #tpu.memory_space<vmem>>, vector<32x64xf32>
    %329 = tpu.concatenate %327, %126 in 0 : vector<32x128xf32>, vector<32x128xf32> -> vector<64x128xf32>
    %cst_268 = arith.constant dense<0.000000e+00> : vector<32x128xf32>
    %330 = tpu.matmul %328, %329, %cst_268 {dimension_numbers = #tpu.dot_dimension_numbers<[1], [0], [0], [1], [0, 0, 1, 1], [], []>} : vector<32x64xf32>, vector<64x128xf32>, vector<32x128xf32> -> vector<32x128xf32>
    %c0_269 = arith.constant 0 : index
    %c0_270 = arith.constant 0 : index
    %331 = vector.load %arg3[%c0_269, %c0_270] : memref<6x512xf32, #tpu.memory_space<vmem>>, vector<6x384xf32>
    %c0_271 = arith.constant 0 : index
    %c384 = arith.constant 384 : index
    %332 = vector.load %arg3[%c0_271, %c384] : memref<6x512xf32, #tpu.memory_space<vmem>>, vector<6x128xf32>
    %333 = tpu.concatenate %330, %327, %324 in 1 : vector<32x128xf32>, vector<32x128xf32>, vector<32x128xf32> -> vector<32x384xf32>
    %c0_272 = arith.constant 0 : index
    %c0_273 = arith.constant 0 : index
    %334 = vector.load %arg9[%c0_272, %c0_273] : memref<1x32xf32, #tpu.memory_space<vmem>>, vector<1x32xf32>
    %cst_274 = arith.constant dense<0.000000e+00> : vector<1x384xf32>
    %335 = tpu.matmul %334, %333, %cst_274 {dimension_numbers = #tpu.dot_dimension_numbers<[1], [0], [0], [1], [0, 0, 1, 1], [], []>} : vector<1x32xf32>, vector<32x384xf32>, vector<1x384xf32> -> vector<1x384xf32>
    %cst_275 = arith.constant dense<0xFF800000> : vector<1xf32>
    %336 = vector.multi_reduction <maximumf>, %335, %cst_275 [1] : vector<1x384xf32> to vector<1xf32>
    %337 = vector.shape_cast %336 : vector<1xf32> to vector<1x1xf32>
    %338 = vector.broadcast %337 : vector<1x1xf32> to vector<1x384xf32>
    %339 = arith.subf %335, %338 : vector<1x384xf32>
    %340 = math.exp %339 : vector<1x384xf32>
    %cst_276 = arith.constant dense<0.000000e+00> : vector<1x6xf32>
    %341 = tpu.matmul %340, %331, %cst_276 {dimension_numbers = #tpu.dot_dimension_numbers<[1], [1], [0], [0], [0, 0, 1, 0], [], []>} : vector<1x384xf32>, vector<6x384xf32>, vector<1x6xf32> -> vector<1x6xf32>
    %cst_277 = arith.constant dense<0.000000e+00> : vector<1x384xf32>
    %342 = tpu.matmul %341, %331, %cst_277 {dimension_numbers = #tpu.dot_dimension_numbers<[1], [0], [0], [1], [0, 0, 1, 1], [], []>} : vector<1x6xf32>, vector<6x384xf32>, vector<1x384xf32> -> vector<1x384xf32>
    %343 = tpu.reciprocal %342 {approx = true} : vector<1x384xf32> -> vector<1x384xf32>
    %344 = arith.mulf %340, %343 : vector<1x384xf32>
    %345 = vector.broadcast %344 : vector<1x384xf32> to vector<6x384xf32>
    %346 = arith.mulf %331, %345 : vector<6x384xf32>
    %cst_278 = arith.constant dense<0.000000e+00> : vector<32x6xf32>
    %347 = tpu.matmul %333, %346, %cst_278 {dimension_numbers = #tpu.dot_dimension_numbers<[1], [1], [0], [0], [0, 0, 1, 0], [], []>} : vector<32x384xf32>, vector<6x384xf32>, vector<32x6xf32> -> vector<32x6xf32>
    %cst_279 = arith.constant 0.333333343 : f32
    %348 = vector.broadcast %cst_279 : f32 to vector<32x6xf32>
    %349 = arith.mulf %347, %348 : vector<32x6xf32>
    %c0_280 = arith.constant 0 : index
    %c8_281 = arith.constant 8 : index
    %350 = vector.load %arg14[%c0_280, %c8_281] : memref<32x10xf32, #tpu.memory_space<vmem>>, vector<32x1xf32>
    %351 = vector.broadcast %350 : vector<32x1xf32> to vector<32x6xf32>
    %352 = arith.addf %349, %351 : vector<32x6xf32>
    %c0_282 = arith.constant 0 : index
    %c0_283 = arith.constant 0 : index
    %353 = vector.load %arg10[%c0_282, %c0_283] : memref<2x32xf32, #tpu.memory_space<vmem>>, vector<2x32xf32>
    %cst_284 = arith.constant dense<0.000000e+00> : vector<2x6xf32>
    %354 = tpu.matmul %353, %352, %cst_284 {dimension_numbers = #tpu.dot_dimension_numbers<[1], [0], [0], [1], [0, 0, 1, 1], [], []>} : vector<2x32xf32>, vector<32x6xf32>, vector<2x6xf32> -> vector<2x6xf32>
    %c0_285 = arith.constant 0 : index
    %c0_286 = arith.constant 0 : index
    %355 = vector.load %arg15[%c0_285, %c0_286] : memref<2x3xf32, #tpu.memory_space<vmem>>, vector<2x1xf32>
    %356 = vector.broadcast %355 : vector<2x1xf32> to vector<2x6xf32>
    %357 = arith.addf %354, %356 : vector<2x6xf32>
    %cst_287 = arith.constant dense<0.000000e+00> : vector<6xf32>
    %358 = vector.multi_reduction <add>, %357, %cst_287 [0] : vector<2x6xf32> to vector<6xf32>
    %359 = vector.shape_cast %358 : vector<6xf32> to vector<1x6xf32>
    %cst_288 = arith.constant 2.000000e+00 : f32
    %360 = vector.broadcast %cst_288 : f32 to vector<1x6xf32>
    %361 = arith.divf %359, %360 : vector<1x6xf32>
    %362 = arith.mulf %357, %357 : vector<2x6xf32>
    %cst_289 = arith.constant dense<0.000000e+00> : vector<6xf32>
    %363 = vector.multi_reduction <add>, %362, %cst_289 [0] : vector<2x6xf32> to vector<6xf32>
    %364 = vector.shape_cast %363 : vector<6xf32> to vector<1x6xf32>
    %cst_290 = arith.constant 2.000000e+00 : f32
    %365 = vector.broadcast %cst_290 : f32 to vector<1x6xf32>
    %366 = arith.divf %364, %365 : vector<1x6xf32>
    %367 = arith.mulf %361, %361 : vector<1x6xf32>
    %368 = arith.subf %366, %367 : vector<1x6xf32>
    %369 = vector.broadcast %361 : vector<1x6xf32> to vector<2x6xf32>
    %370 = arith.subf %357, %369 : vector<2x6xf32>
    %cst_291 = arith.constant 9.99999974E-6 : f32
    %371 = vector.broadcast %cst_291 : f32 to vector<1x6xf32>
    %372 = arith.addf %368, %371 : vector<1x6xf32>
    %373 = math.rsqrt %372 : vector<1x6xf32>
    %374 = vector.broadcast %373 : vector<1x6xf32> to vector<2x6xf32>
    %375 = arith.mulf %370, %374 : vector<2x6xf32>
    %c0_292 = arith.constant 0 : index
    %c1_293 = arith.constant 1 : index
    %376 = vector.load %arg15[%c0_292, %c1_293] : memref<2x3xf32, #tpu.memory_space<vmem>>, vector<2x1xf32>
    %377 = vector.broadcast %376 : vector<2x1xf32> to vector<2x6xf32>
    %378 = arith.mulf %375, %377 : vector<2x6xf32>
    %c0_294 = arith.constant 0 : index
    %c2_295 = arith.constant 2 : index
    %379 = vector.load %arg15[%c0_294, %c2_295] : memref<2x3xf32, #tpu.memory_space<vmem>>, vector<2x1xf32>
    %380 = vector.broadcast %379 : vector<2x1xf32> to vector<2x6xf32>
    %381 = arith.addf %378, %380 : vector<2x6xf32>
    %cst_296 = arith.constant 0.000000e+00 : f32
    %382 = vector.broadcast %cst_296 : f32 to vector<2x6xf32>
    %383 = arith.maximumf %381, %382 : vector<2x6xf32>
    %c0_297 = arith.constant 0 : index
    %c0_298 = arith.constant 0 : index
    %384 = vector.load %arg11[%c0_297, %c0_298] : memref<32x2xf32, #tpu.memory_space<vmem>>, vector<32x2xf32>
    %cst_299 = arith.constant dense<0.000000e+00> : vector<32x6xf32>
    %385 = tpu.matmul %384, %383, %cst_299 {dimension_numbers = #tpu.dot_dimension_numbers<[1], [0], [0], [1], [0, 0, 1, 1], [], []>} : vector<32x2xf32>, vector<2x6xf32>, vector<32x6xf32> -> vector<32x6xf32>
    %c0_300 = arith.constant 0 : index
    %c9 = arith.constant 9 : index
    %386 = vector.load %arg14[%c0_300, %c9] : memref<32x10xf32, #tpu.memory_space<vmem>>, vector<32x1xf32>
    %387 = vector.broadcast %386 : vector<32x1xf32> to vector<32x6xf32>
    %388 = arith.addf %385, %387 : vector<32x6xf32>
    %389 = arith.addf %330, %327 : vector<32x128xf32>
    %390 = arith.addf %389, %324 : vector<32x128xf32>
    %cst_301 = arith.constant dense<0.000000e+00> : vector<32x128xf32>
    %391 = tpu.matmul %388, %332, %cst_301 {dimension_numbers = #tpu.dot_dimension_numbers<[1], [0], [0], [1], [0, 0, 1, 1], [], []>} : vector<32x6xf32>, vector<6x128xf32>, vector<32x128xf32> -> vector<32x128xf32>
    %392 = arith.addf %390, %391 : vector<32x128xf32>
    %c0_302 = arith.constant 0 : index
    %c0_303 = arith.constant 0 : index
    %393 = vector.load %arg12[%c0_302, %c0_303] : memref<128x32xf32, #tpu.memory_space<vmem>>, vector<128x32xf32>
    %cst_304 = arith.constant dense<0.000000e+00> : vector<128x128xf32>
    %394 = tpu.matmul %393, %392, %cst_304 {dimension_numbers = #tpu.dot_dimension_numbers<[1], [0], [0], [1], [0, 0, 1, 1], [], []>} : vector<128x32xf32>, vector<32x128xf32>, vector<128x128xf32> -> vector<128x128xf32>
    %c0_305 = arith.constant 0 : index
    %c0_306 = arith.constant 0 : index
    %395 = vector.load %arg16[%c0_305, %c0_306] : memref<128x4xf32, #tpu.memory_space<vmem>>, vector<128x1xf32>
    %c0_307 = arith.constant 0 : index
    %c1_308 = arith.constant 1 : index
    %396 = vector.load %arg16[%c0_307, %c1_308] : memref<128x4xf32, #tpu.memory_space<vmem>>, vector<128x1xf32>
    %cst_309 = arith.constant dense<0.000000e+00> : vector<128xf32>
    %397 = vector.multi_reduction <add>, %394, %cst_309 [1] : vector<128x128xf32> to vector<128xf32>
    %398 = vector.shape_cast %397 : vector<128xf32> to vector<128x1xf32>
    %cst_310 = arith.constant 7.812500e-03 : f32
    %399 = vector.broadcast %cst_310 : f32 to vector<128x1xf32>
    %400 = arith.mulf %398, %399 : vector<128x1xf32>
    %401 = arith.mulf %394, %394 : vector<128x128xf32>
    %cst_311 = arith.constant dense<0.000000e+00> : vector<128xf32>
    %402 = vector.multi_reduction <add>, %401, %cst_311 [1] : vector<128x128xf32> to vector<128xf32>
    %403 = vector.shape_cast %402 : vector<128xf32> to vector<128x1xf32>
    %cst_312 = arith.constant 7.812500e-03 : f32
    %404 = vector.broadcast %cst_312 : f32 to vector<128x1xf32>
    %405 = arith.mulf %403, %404 : vector<128x1xf32>
    %406 = arith.mulf %400, %400 : vector<128x1xf32>
    %407 = arith.subf %405, %406 : vector<128x1xf32>
    %cst_313 = arith.constant 9.99999974E-6 : f32
    %408 = vector.broadcast %cst_313 : f32 to vector<128x1xf32>
    %409 = arith.addf %407, %408 : vector<128x1xf32>
    %410 = math.rsqrt %409 : vector<128x1xf32>
    %411 = arith.mulf %395, %410 : vector<128x1xf32>
    %412 = vector.broadcast %411 : vector<128x1xf32> to vector<128x128xf32>
    %413 = arith.mulf %394, %412 : vector<128x128xf32>
    %414 = arith.mulf %400, %411 : vector<128x1xf32>
    %415 = arith.subf %396, %414 : vector<128x1xf32>
    %416 = vector.broadcast %415 : vector<128x1xf32> to vector<128x128xf32>
    %417 = arith.addf %413, %416 : vector<128x128xf32>
    %c0_314 = arith.constant 0 : index
    %c0_315 = arith.constant 0 : index
    %418 = vector.load %arg13[%c0_314, %c0_315] : memref<128x16xf32, #tpu.memory_space<vmem>>, vector<128x16xf32>
    %cst_316 = arith.constant dense<0.000000e+00> : vector<128x128xf32>
    %419 = tpu.matmul %418, %0, %cst_316 {dimension_numbers = #tpu.dot_dimension_numbers<[1], [0], [0], [1], [0, 0, 1, 1], [], []>} : vector<128x16xf32>, vector<16x128xf32>, vector<128x128xf32> -> vector<128x128xf32>
    %c0_317 = arith.constant 0 : index
    %c2_318 = arith.constant 2 : index
    %420 = vector.load %arg16[%c0_317, %c2_318] : memref<128x4xf32, #tpu.memory_space<vmem>>, vector<128x1xf32>
    %c0_319 = arith.constant 0 : index
    %c3_320 = arith.constant 3 : index
    %421 = vector.load %arg16[%c0_319, %c3_320] : memref<128x4xf32, #tpu.memory_space<vmem>>, vector<128x1xf32>
    %cst_321 = arith.constant dense<0.000000e+00> : vector<128xf32>
    %422 = vector.multi_reduction <add>, %419, %cst_321 [1] : vector<128x128xf32> to vector<128xf32>
    %423 = vector.shape_cast %422 : vector<128xf32> to vector<128x1xf32>
    %cst_322 = arith.constant 7.812500e-03 : f32
    %424 = vector.broadcast %cst_322 : f32 to vector<128x1xf32>
    %425 = arith.mulf %423, %424 : vector<128x1xf32>
    %426 = arith.mulf %419, %419 : vector<128x128xf32>
    %cst_323 = arith.constant dense<0.000000e+00> : vector<128xf32>
    %427 = vector.multi_reduction <add>, %426, %cst_323 [1] : vector<128x128xf32> to vector<128xf32>
    %428 = vector.shape_cast %427 : vector<128xf32> to vector<128x1xf32>
    %cst_324 = arith.constant 7.812500e-03 : f32
    %429 = vector.broadcast %cst_324 : f32 to vector<128x1xf32>
    %430 = arith.mulf %428, %429 : vector<128x1xf32>
    %431 = arith.mulf %425, %425 : vector<128x1xf32>
    %432 = arith.subf %430, %431 : vector<128x1xf32>
    %cst_325 = arith.constant 9.99999974E-6 : f32
    %433 = vector.broadcast %cst_325 : f32 to vector<128x1xf32>
    %434 = arith.addf %432, %433 : vector<128x1xf32>
    %435 = math.rsqrt %434 : vector<128x1xf32>
    %436 = arith.mulf %420, %435 : vector<128x1xf32>
    %437 = vector.broadcast %436 : vector<128x1xf32> to vector<128x128xf32>
    %438 = arith.mulf %419, %437 : vector<128x128xf32>
    %439 = arith.mulf %425, %436 : vector<128x1xf32>
    %440 = arith.subf %421, %439 : vector<128x1xf32>
    %441 = vector.broadcast %440 : vector<128x1xf32> to vector<128x128xf32>
    %442 = arith.addf %438, %441 : vector<128x128xf32>
    %443 = arith.addf %417, %442 : vector<128x128xf32>
    %cst_326 = arith.constant 0.000000e+00 : f32
    %444 = vector.broadcast %cst_326 : f32 to vector<128x128xf32>
    %445 = arith.maximumf %443, %444 : vector<128x128xf32>
    %c0_327 = arith.constant 0 : index
    %c0_328 = arith.constant 0 : index
    %446 = vector.load %arg17[%c0_327, %c0_328] : memref<128x128xf32, #tpu.memory_space<vmem>>, vector<128x128xf32>
    tpu.vector_store %arg17[%c0_327, %c0_328], %445 {strides = array<i32>} : memref<128x128xf32, #tpu.memory_space<vmem>>, vector<128x128xf32>,
    return
  }
  func.func @transform_0(%arg0: i32) -> (i32, i32) {
    %c0_i32 = arith.constant 0 : i32
    %c0_i32_0 = arith.constant 0 : i32
    %c0_i32_1 = arith.constant 0 : i32
    return %c0_i32, %c0_i32_0 : i32, i32
  }
  func.func @transform_1(%arg0: i32) -> (i32, i32, i32) {
    %c0_i32 = arith.constant 0 : i32
    %c0_i32_0 = arith.constant 0 : i32
    %c0_i32_1 = arith.constant 0 : i32
    %c0_i32_2 = arith.constant 0 : i32
    return %c0_i32, %c0_i32_0, %c0_i32_1 : i32, i32, i32
  }
  func.func @transform_2(%arg0: i32) -> (i32, i32) {
    %c0_i32 = arith.constant 0 : i32
    %c0_i32_0 = arith.constant 0 : i32
    %c0_i32_1 = arith.constant 0 : i32
    return %c0_i32, %c0_i32_0 : i32, i32
  }
  func.func @transform_3(%arg0: i32) -> (i32, i32) {
    %c0_i32 = arith.constant 0 : i32
    %c0_i32_0 = arith.constant 0 : i32
    %c0_i32_1 = arith.constant 0 : i32
    return %c0_i32, %c0_i32_0 : i32, i32
  }
  func.func @transform_4(%arg0: i32) -> (i32, i32, i32) {
    %c0_i32 = arith.constant 0 : i32
    %c0_i32_0 = arith.constant 0 : i32
    %c0_i32_1 = arith.constant 0 : i32
    %c0_i32_2 = arith.constant 0 : i32
    return %c0_i32, %c0_i32_0, %c0_i32_1 : i32, i32, i32
  }
  func.func @transform_5(%arg0: i32) -> (i32, i32, i32, i32) {
    %c0_i32 = arith.constant 0 : i32
    %c0_i32_0 = arith.constant 0 : i32
    %c0_i32_1 = arith.constant 0 : i32
    %c0_i32_2 = arith.constant 0 : i32
    %c0_i32_3 = arith.constant 0 : i32
    return %c0_i32, %c0_i32_0, %c0_i32_1, %c0_i32_2 : i32, i32, i32, i32
  }
  func.func @transform_6(%arg0: i32) -> (i32, i32) {
    %c0_i32 = arith.constant 0 : i32
    %c0_i32_0 = arith.constant 0 : i32
    %c0_i32_1 = arith.constant 0 : i32
    return %c0_i32, %c0_i32_0 : i32, i32
  }
  func.func @transform_7(%arg0: i32) -> (i32, i32) {
    %c0_i32 = arith.constant 0 : i32
    %c0_i32_0 = arith.constant 0 : i32
    %c0_i32_1 = arith.constant 0 : i32
    return %c0_i32, %c0_i32_0 : i32, i32
  }
  func.func @transform_8(%arg0: i32) -> (i32, i32) {
    %c0_i32 = arith.constant 0 : i32
    %c0_i32_0 = arith.constant 0 : i32
    %c0_i32_1 = arith.constant 0 : i32
    return %c0_i32, %c0_i32_0 : i32, i32
  }
  func.func @transform_9(%arg0: i32) -> (i32, i32) {
    %c0_i32 = arith.constant 0 : i32
    %c0_i32_0 = arith.constant 0 : i32
    %c0_i32_1 = arith.constant 0 : i32
    return %c0_i32, %c0_i32_0 : i32, i32
  }
  func.func @transform_10(%arg0: i32) -> (i32, i32) {
    %c0_i32 = arith.constant 0 : i32
    %c0_i32_0 = arith.constant 0 : i32
    %c0_i32_1 = arith.constant 0 : i32
    return %c0_i32, %c0_i32_0 : i32, i32
  }
  func.func @transform_11(%arg0: i32) -> (i32, i32) {
    %c0_i32 = arith.constant 0 : i32
    %c0_i32_0 = arith.constant 0 : i32
    %c0_i32_1 = arith.constant 0 : i32
    return %c0_i32, %c0_i32_0 : i32, i32
  }
  func.func @transform_12(%arg0: i32) -> (i32, i32) {
    %c0_i32 = arith.constant 0 : i32
    %c0_i32_0 = arith.constant 0 : i32
    %c0_i32_1 = arith.constant 0 : i32
    return %c0_i32, %c0_i32_0 : i32, i32
  }
  func.func @transform_13(%arg0: i32) -> (i32, i32) {
    %c0_i32 = arith.constant 0 : i32
    %c0_i32_0 = arith.constant 0 : i32
    %c0_i32_1 = arith.constant 0 : i32
    return %c0_i32, %c0_i32_0 : i32, i32
  }
  func.func @transform_14(%arg0: i32) -> (i32, i32) {
    %c0_i32 = arith.constant 0 : i32
    %c0_i32_0 = arith.constant 0 : i32
    %c0_i32_1 = arith.constant 0 : i32
    return %c0_i32, %c0_i32_0 : i32, i32
  }
  func.func @transform_15(%arg0: i32) -> (i32, i32) {
    %c0_i32 = arith.constant 0 : i32
    %c0_i32_0 = arith.constant 0 : i32
    %c0_i32_1 = arith.constant 0 : i32
    return %c0_i32, %c0_i32_0 : i32, i32
  }
  func.func @transform_16(%arg0: i32) -> (i32, i32) {
    %c0_i32 = arith.constant 0 : i32
    %c0_i32_0 = arith.constant 0 : i32
    %c0_i32_1 = arith.constant 0 : i32
    return %c0_i32, %c0_i32_0 : i32, i32
  }
}

</mosaic_0001>

<bundles_post_ra>
// kernel: msablock1_forward.1
= control target key start
LH: loop header
LB: loop body
LE: loop exit
PB: predicated region body
PF: predicated region fallthrough
CT: control target
= control target key end

     0   :  { %vm59_vm0 = vcmask 130048   ;;  %v13024_v14 = vmov 0   ;;  %s9619_s20 = smov 1   ;;  %v13017_v59 = vmov 1   ;;  %vm289_vm1 = vcmask 261120   ;;  %s12999_s0 = inlined_call_operand.vmem [shape: f32[16,128], index: 0, kind: input, shape index: {}]   ;;  %s13000_s3 = inlined_call_operand.vmem [shape: f32[32,16], index: 3, kind: input, shape index: {}]   ;;  %s13001_s13 = inlined_call_operand.vmem [shape: f32[32,10], index: 13, kind: input, shape index: {}]   ;;  %s13002_s5 = inlined_call_operand.vmem [shape: f32[3,9,32,1], index: 5, kind: input, shape index: {}]   ;;  %s13003_s4 = inlined_call_operand.vmem [shape: f32[3,32,32], index: 4, kind: input, shape index: {}]   ;;  %s13004_s1 = inlined_call_operand.vmem [shape: f32[9,128,128], index: 1, kind: input, shape index: {}]   ;;  %s13005_s6 = inlined_call_operand.vmem [shape: f32[32,64], index: 6, kind: input, shape index: {}]   ;;  %s13006_s7 = inlined_call_operand.vmem [shape: f32[32,64], index: 7, kind: input, shape index: {}]   ;;  %s13007_s8 = inlined_call_operand.vmem [shape: f32[1,32], index: 8, kind: input, shape index: {}]   ;;  %s13008_s2 = inlined_call_operand.vmem [shape: f32[6,512], index: 2, kind: input, shape index: {}]   ;;  %s13009_s14 = inlined_call_operand.vmem [shape: f32[2,3], index: 14, kind: input, shape index: {}]   ;;  %s13010_s9 = inlined_call_operand.vmem [shape: f32[2,32], index: 9, kind: input, shape index: {}]   ;;  %s13011_s10 = inlined_call_operand.vmem [shape: f32[32,2], index: 10, kind: input, shape index: {}]   ;;  %s13012_s12 = inlined_call_operand.vmem [shape: f32[128,16], index: 12, kind: input, shape index: {}]   ;;  %s13013_s11 = inlined_call_operand.vmem [shape: f32[128,32], index: 11, kind: input, shape index: {}]   ;;  %s13014_s15 = inlined_call_operand.vmem [shape: f32[128,4], index: 15, kind: input, shape index: {}]   ;;  %s13015_s16 = inlined_call_operand.vmem [shape: f32[128,128], index: 16, kind: output, shape index: {}]  }
   0x1   :  { %13047 = sst [smem:[#allocation39_spill]] %s12999_s0  ;;  %v55_v2 = vld [vmem:[%s13000_s3] sm:$0xff]  ;;  %v56_v3 = vld [vmem:[%s13000_s3 + $0x8] sm:$0xff]  ;;  %v57_v4 = vld [vmem:[%s13000_s3 + $0x10] sm:$0xff]  ;;  %9181 = vset.pattern.permute.xlu0 %v13024_v14  ;;  %9182 = vset.pattern.permute.xlu1 %v13024_v14  ;;  %vm4280_vm2 = vcmask 523264   ;;  %vm9628_vm3 = vmmov 0  }
   0x2   :  { %s13048_s23 = sld [smem:[#allocation39_spill]]  ;;  %7934 = vmatprep.mubr.msk.f32.mxu0 %vm59_vm0, %v55_v2  ;;  %v58_v5 = vld [vmem:[%s13000_s3 + $0x18] sm:$0xff]  ;;  %v158_v47 = vld [vmem:[%s13001_s13 + $0x8] sm:$0xff]  ;;  %v159_v50 = vld [vmem:[%s13001_s13 + $0x10] sm:$0xff]  ;;  %vm4628_vm4 = vcmask 1040384   ;;  %vm4789_vm5 = vcmask 1045504  }
   0x3   :  { %v160_v43 = vld [vmem:[%s13001_s13 + $0x18] sm:$0xff]  ;;  %v157_v53 = vld [vmem:[%s13001_s13] sm:$0xff]  ;;  %vm4785_vm6 = vcmask 48128   ;;  %vm5295_vm7 = vcmask 15360   ;;  %vm5239_vm8 = vcmask 41984   ;;  %vm5308_vm9 = vcmask 1041408  }
   0x8   :  { %v54_v0 = vld [vmem:[%s13048_s23 + $0x8] sm:$0xff]  ;;  %v53_v1 = vld [vmem:[%s13048_s23] sm:$0xff] }
   0x9   :  { %7930 = vmatprep.subr.mxu0 %v54_v0 }
   0xa   :  { %7931 = vmatpush3.msra.mxu0 %v54_v0 }
   0xb   :  { %7932 = vmatprep.subr.mxu0 %v53_v1 }
   0xc   :  { %7933 = vmatpush3.msra.mxu0 %v53_v1 }
   0xd   :  { %7935 = vmatmul.mubr.msk.f32.vlgmr.msra.gmra.mxu0 %vm59_vm0, %v56_v3 }
   0xe   :  { %7937 = vmatprep.mubr.msk.f32.mxu0 %vm59_vm0, %v57_v4  ;;  %v6963_v4 = vld [vmem:[%s13002_s5 + $0x20] sm:$0xff] }
  0x11   :  { %7938 = vmatmul.mubr.msk.f32.gmra.mxu0 %vm59_vm0, %v58_v5  ;;  %v285_v5 = vld [vmem:[%s13003_s4] sm:$0xff] }
  0x12   :  { %7948 = vmatprep.mubr.msk.f32.mxu1 %vm289_vm1, %v285_v5 }
  0xcd   :  { %v9738_v6 = vpop.f32.mrf.mxu0 }
  0xce   :  { %163 = vadd.xlane.f32.xlu1 %v9738_v6  ;;  %v174_v13 = vmul.f32 %v9738_v6, %v9738_v6 }
  0xcf   :  { %v9741_v7 = vpop.f32.mrf.mxu0 }
  0xd0   :  { %v173_v12 = vmul.f32 %v9741_v7, %v9741_v7 }
  0xd1   :  { %v9743_v8 = vpop.f32.mrf.mxu0 }
  0xd2   :  { %167 = vadd.xlane.f32.xlu0 %v9743_v8  ;;  %v176_v9 = vmul.f32 %v9743_v8, %v9743_v8 }
  0xd3   :  { %v9748_v10 = vpop.f32.mrf.mxu0 }
  0xd4   :  { %183 = vadd.xlane.f32.xlu1 %v176_v9  ;;  %v175_v11 = vmul.f32 %v9748_v10, %v9748_v10  ;;  %v6964_v9 = vld [vmem:[%s13002_s5 + $0x28] sm:$0xff] }
  0xd6   :  { %165 = vadd.xlane.f32.xlu0 %v9748_v10 }
  0xd8   :  { %161 = vadd.xlane.f32.xlu1 %v9741_v7 }
  0xda   :  { %181 = vadd.xlane.f32.xlu0 %v175_v11  ;;  %v6965_v11 = vld [vmem:[%s13002_s5 + $0x30] sm:$0xff] }
  0xdc   :  { %177 = vadd.xlane.f32.xlu1 %v173_v12  ;;  %v6966_v12 = vld [vmem:[%s13002_s5 + $0x38] sm:$0xff] }
  0xde   :  { %179 = vadd.xlane.f32.xlu0 %v174_v13  ;;  %v388_v13 = vld [vmem:[%s13002_s5 + $0x8] sm:$0xff] }
 0x157   :  { %v164_v15 = vpop.xlane.xlu1 %163 }
 0x158   :  { %v170_v28 = vmul.f32 0.0078125, %v164_v15  ;;  %v387_v15 = vld [vmem:[%s13002_s5] sm:$0xff] }
 0x15a   :  { %v190_v36 = vmul.f32 %v170_v28, %v170_v28 }
 0x15b   :  { %v168_v16 = vpop.xlane.xlu0 %167 }
 0x15c   :  { %v172_v17 = vmul.f32 0.0078125, %v168_v16  ;;  %v6984_v16 = vld [vmem:[%s13002_s5 + $0x48] sm:$0xff] }
 0x15d   :  { %v184_v18 = vpop.xlane.xlu1 %183 }
 0x15e   :  { %v192_v19 = vmul.f32 %v172_v17, %v172_v17  ;;  %v188_v20 = vmul.f32 0.0078125, %v184_v18  ;;  %v390_v18 = vld [vmem:[%s13002_s5 + $0x18] sm:$0xff] }
 0x15f   :  { %v166_v21 = vpop.xlane.xlu0 %165 }
 0x160   :  { %v196_v22 = vsub.f32 %v188_v20, %v192_v19  ;;  %v171_v23 = vmul.f32 0.0078125, %v166_v21  ;;  %v389_v19 = vld [vmem:[%s13002_s5 + $0x10] sm:$0xff]  ;;  %v6986_v20 = vld [vmem:[%s13002_s5 + $0x58] sm:$0xff] }
 0x161   :  { %v162_v24 = vpop.xlane.xlu1 %161  ;;  %v6985_v21 = vld [vmem:[%s13002_s5 + $0x50] sm:$0xff] }
 0x162   :  { %v200_v25 = vadd.f32 1e-05, %v196_v22  ;;  %v169_v26 = vmul.f32 0.0078125, %v162_v24  ;;  %v191_v29 = vmul.f32 %v171_v23, %v171_v23  ;;  %v7004_v22 = vld [vmem:[%s13002_s5 + $0x68] sm:$0xff] }
 0x163   :  { %v182_v27 = vpop.xlane.xlu0 %181  ;;  %v7024_v24 = vld [vmem:[%s13002_s5 + $0x88] sm:$0xff] }
 0x164   :  { %9219 = vrsqrt.f32 %v200_v25  ;;  %v187_v30 = vmul.f32 0.0078125, %v182_v27  ;;  %v189_v32 = vmul.f32 %v169_v26, %v169_v26  ;;  %v7023_v25 = vld [vmem:[%s13002_s5 + $0x80] sm:$0xff]  ;;  %v7005_v27 = vld [vmem:[%s13002_s5 + $0x70] sm:$0xff] }
 0x165   :  { %v178_v31 = vpop.xlane.xlu1 %177 }
 0x166   :  { %v195_v33 = vsub.f32 %v187_v30, %v191_v29  ;;  %v185_v34 = vmul.f32 0.0078125, %v178_v31  ;;  %v7025_v29 = vld [vmem:[%s13002_s5 + $0x90] sm:$0xff]  ;;  %v7044_v30 = vld [vmem:[%s13002_s5 + $0xa8] sm:$0xff]  ;;  %v6982_v31 = vld [vmem:[%s13004_s1 + $0xf8] sm:$0xff] }
 0x167   :  { %v180_v35 = vpop.xlane.xlu0 %179  ;;  %7954 = vmatprep.subr.mxu0 %v6982_v31 }
 0x168   :  { %v193_v37 = vsub.f32 %v185_v34, %v189_v32  ;;  %v186_v38 = vmul.f32 0.0078125, %v180_v35  ;;  %v199_v39 = vadd.f32 1e-05, %v195_v33  ;;  %v6981_v32 = vld [vmem:[%s13004_s1 + $0xf0] sm:$0xff]  ;;  %v7043_v33 = vld [vmem:[%s13002_s5 + $0xa0] sm:$0xff]  ;;  %v7064_v34 = vld [vmem:[%s13002_s5 + $0xc8] sm:$0xff]  ;;  %7955 = vmatpush3.msra.mxu0 %v6982_v31 }
 0x169   :  { %7956 = vmatprep.subr.mxu0 %v6981_v32  ;;  %v6980_v35 = vld [vmem:[%s13004_s1 + $0xe8] sm:$0xff] }
 0x16a   :  { %v194_v40 = vsub.f32 %v186_v38, %v190_v36  ;;  %v197_v41 = vadd.f32 1e-05, %v193_v37  ;;  %9221 = vrsqrt.f32 %v199_v39  ;;  %v7063_v36 = vld [vmem:[%s13002_s5 + $0xc0] sm:$0xff]  ;;  %v7046_v37 = vld [vmem:[%s13002_s5 + $0xb8] sm:$0xff]  ;;  %7957 = vmatpush3.msra.mxu0 %v6981_v32  ;;  %v10021_v31 = vld [vmem:[%s13004_s1 + $0x28] sm:$0xff] }
 0x16b   :  { %7958 = vmatprep.subr.mxu0 %v6980_v35  ;;  %v6979_v38 = vld [vmem:[%s13004_s1 + $0xe0] sm:$0xff]  ;;  %v6978_v39 = vld [vmem:[%s13004_s1 + $0xd8] sm:$0xff] }
 0x16c   :  { %v198_v42 = vadd.f32 1e-05, %v194_v40  ;;  %7959 = vmatpush3.msra.mxu0 %v6980_v35  ;;  %v7045_v40 = vld [vmem:[%s13002_s5 + $0xb0] sm:$0xff]  ;;  %v10028_v32 = vld [vmem:[%s13004_s1 + $0x20] sm:$0xff]  ;;  %v6968_v35 = vld [vmem:[%s13004_s1 + $0x88] sm:$0xff] }
 0x16d   :  { %7960 = vmatprep.subr.mxu0 %v6979_v38 }
 0x16e   :  { %9223 = vrsqrt.f32 %v198_v42  ;;  %7961 = vmatpush3.msra.mxu0 %v6979_v38  ;;  %v6977_v42 = vld [vmem:[%s13004_s1 + $0xd0] sm:$0xff]  ;;  %v10064_v38 = vld [vmem:[%s13004_s1] sm:$0xff] }
 0x16f   :  { %9225 = vrsqrt.f32 %v197_v41  ;;  %v7066_v41 = vld [vmem:[%s13002_s5 + $0xd8] sm:$0xff]  ;;  %7962 = vmatprep.subr.mxu0 %v6978_v39 }
 0x170   :  { %7963 = vmatpush3.msra.mxu0 %v6978_v39  ;;  %v7002_v39 = vld [vmem:[%s13004_s1 + $0x178] sm:$0xff] }
 0x171   :  { %v9220_v44 = vpop.eup %9219  ;;  %7964 = vmatprep.subr.mxu0 %v6977_v42 }
 0x172   :  { %v208_v45 = vmul.f32 %v9220_v44, %v160_v43  ;;  %v7084_v44 = vld [vmem:[%s13002_s5 + $0xe8] sm:$0xff]  ;;  %7965 = vmatpush3.msra.mxu0 %v6977_v42 }
 0x174   :  { %v236_v46 = vmul.f32 %v208_v45, %v172_v17  ;;  %v6983_v17 = vld [vmem:[%s13002_s5 + $0x40] sm:$0xff] }
 0x176   :  { %247 = vrot.lane.b32.xlu0 %v236_v46, %s9619_s20  ;;  %v6975_v46 = vld [vmem:[%s13004_s1 + $0xc0] sm:$0xff] }
 0x177   :  { %v9222_v48 = vpop.eup %9221 }
 0x178   :  { %v207_v55 = vmul.f32 %v9222_v48, %v159_v50  ;;  %v7104_v48 = vld [vmem:[%s13002_s5 + $0x108] sm:$0xff] }
 0x17a   :  { %226 = vperm.xlu0 %9181, %v208_v45   ;;  %v235_v57 = vmul.f32 %v207_v55, %v171_v23  ;;  %v7003_v23 = vld [vmem:[%s13002_s5 + $0x60] sm:$0xff]  ;;  %v6976_v45 = vld [vmem:[%s13004_s1 + $0xc8] sm:$0xff] }
 0x17b   :  { %v9224_v49 = vpop.eup %9223  ;;  %7966 = vmatprep.subr.mxu0 %v6976_v45 }
 0x17c   :  { %v206_v51 = vmul.f32 %v9224_v49, %v158_v47  ;;  %v9226_v52 = vpop.eup %9225  ;;  %7967 = vmatpush3.msra.mxu0 %v6976_v45  ;;  %v6974_v49 = vld [vmem:[%s13004_s1 + $0xb8] sm:$0xff] }
 0x17d   :  { %v205_v56 = vmul.f32 %v9226_v52, %v157_v53  ;;  %7968 = vmatprep.subr.mxu0 %v6975_v46  ;;  %v6973_v52 = vld [vmem:[%s13004_s1 + $0xb0] sm:$0xff] }
 0x17e   :  { %216 = vperm.xlu0 %9181, %v206_v51   ;;  %v234_v54 = vmul.f32 %v206_v51, %v170_v28  ;;  %v7026_v28 = vld [vmem:[%s13002_s5 + $0x98] sm:$0xff]  ;;  %7969 = vmatpush3.msra.mxu0 %v6975_v46 }
 0x17f   :  { %v233_v58 = vmul.f32 %v205_v56, %v169_v26  ;;  %v7006_v26 = vld [vmem:[%s13002_s5 + $0x78] sm:$0xff]  ;;  %7970 = vmatprep.subr.mxu0 %v6974_v49 }
 0x180   :  { %243 = vrot.lane.b32.xlu1 %v234_v54, %s9619_s20  ;;  %v7086_v51 = vld [vmem:[%s13002_s5 + $0xf8] sm:$0xff]  ;;  %7971 = vmatpush3.msra.mxu0 %v6974_v49  ;;  %v7085_v54 = vld [vmem:[%s13002_s5 + $0xf0] sm:$0xff] }
 0x181   :  { %7972 = vmatprep.subr.mxu0 %v6973_v52 }
 0x182   :  { %211 = vperm.xlu0 %9181, %v205_v56   ;;  %7973 = vmatpush3.msra.mxu0 %v6973_v52  ;;  %v6971_v56 = vld [vmem:[%s13004_s1 + $0xa0] sm:$0xff] }
 0x184   :  { %245 = vrot.lane.b32.xlu1 %v235_v57, %s9619_s20  ;;  %v7105_v57 = vld [vmem:[%s13002_s5 + $0x110] sm:$0xff] }
 0x186   :  { %9184 = vset.pattern.permute.xlu0 %v13017_v59 }
 0x188   :  { %241 = vrot.lane.b32.xlu1 %v233_v58, %s9619_s20  ;;  %v6970_v58 = vld [vmem:[%s13004_s1 + $0x98] sm:$0xff] }
 0x18c   :  { %221 = vperm.xlu1 %9182, %v207_v55   ;;  %v7106_v55 = vld [vmem:[%s13002_s5 + $0x118] sm:$0xff] }
 0x190   :  { %9183 = vset.pattern.permute.xlu1 %v13017_v59 }
 0x1e8   :  { %v248_v60 = vpop.permute.xlu0 %247 }
 0x1e9   :  { %v256_v61 = vsub.f32 %v160_v43, %v248_v60  ;;  %v7065_v43 = vld [vmem:[%s13002_s5 + $0xd0] sm:$0xff] }
 0x1ea   :  { %v6969_v60 = vld [vmem:[%s13004_s1 + $0x90] sm:$0xff] }
 0x1eb   :  { %274 = vperm.xlu1 %9183, %v256_v61  }
 0x1f2   :  { %v244_v62 = vpop.permute.xlu1 %243 }
 0x1f3   :  { %v254_v2 = vsub.f32 %v158_v47, %v244_v62  ;;  %v7083_v47 = vld [vmem:[%s13002_s5 + $0xe0] sm:$0xff] }
 0x1f5   :  { %v227_v61 = vpop.permute.xlu0 %226 }
 0x1f6   :  { %v246_v63 = vpop.permute.xlu1 %245 }
 0x1f7   :  { %v255_v0 = vsub.f32 %v159_v50, %v246_v63  ;;  %v7103_v50 = vld [vmem:[%s13002_s5 + $0x100] sm:$0xff]  ;;  %v232_v63 = vmul.f32 %v9743_v8, %v227_v61 }
 0x1f9   :  { %269 = vperm.xlu1 %9183, %v255_v0  }
 0x1fa   :  { %v242_v1 = vpop.permute.xlu1 %241 }
 0x1fb   :  { %v253_v3 = vsub.f32 %v157_v53, %v242_v1  ;;  %v6972_v53 = vld [vmem:[%s13004_s1 + $0xa8] sm:$0xff] }
 0x1fc   :  { %7974 = vmatprep.subr.mxu0 %v6972_v53 }
 0x1fd   :  { %259 = vperm.xlu0 %9184, %v253_v3   ;;  %264 = vperm.xlu1 %9183, %v254_v2   ;;  %v217_v3 = vpop.permute.xlu0 %216 }
 0x1fe   :  { %7975 = vmatpush3.msra.mxu0 %v6972_v53 }
 0x1ff   :  { %7976 = vmatprep.subr.mxu0 %v6971_v56 }
 0x200   :  { %7977 = vmatpush3.msra.mxu0 %v6971_v56 }
 0x201   :  { %9185 = vset.pattern.permute.xlu1 %v13024_v14  ;;  %9186 = vset.pattern.permute.xlu0 %v13024_v14  ;;  %v212_v5 = vpop.permute.xlu0 %211 }
 0x202   :  { %438 = vperm.xlu1 %9185, %v6963_v4   ;;  %448 = vperm.xlu0 %9186, %v6965_v11  }
 0x203   :  { %7978 = vmatprep.subr.mxu0 %v6970_v58 }
 0x204   :  { %7979 = vmatpush3.msra.mxu0 %v6970_v58  ;;  %v7021_v58 = vld [vmem:[%s13004_s1 + $0x1f0] sm:$0xff] }
 0x205   :  { %7980 = vmatprep.subr.mxu0 %v6969_v60 }
 0x206   :  { %443 = vperm.xlu1 %9185, %v6964_v9   ;;  %398 = vperm.xlu0 %9186, %v388_v13   ;;  %v229_v13 = vmul.f32 %v212_v5, %v9741_v7  ;;  %v287_v7 = vld [vmem:[%s13003_s4 + $0x10] sm:$0xff]  ;;  %v6999_v5 = vld [vmem:[%s13004_s1 + $0x160] sm:$0xff] }
 0x207   :  { %7981 = vmatpush3.msra.mxu0 %v6969_v60  ;;  %v222_v62 = vpop.permute.xlu1 %221 }
 0x208   :  { %v231_v4 = vmul.f32 %v222_v62, %v9748_v10  ;;  %v286_v10 = vld [vmem:[%s13003_s4 + $0x8] sm:$0xff]  ;;  %7982 = vmatprep.subr.mxu0 %v6968_v35 }
 0x209   :  { %7983 = vmatpush3.msra.mxu0 %v6968_v35  ;;  %v6993_v35 = vld [vmem:[%s13004_s1 + $0x130] sm:$0xff] }
 0x20a   :  { %453 = vperm.xlu1 %9185, %v6966_v12   ;;  %659 = vperm.xlu0 %9186, %v6984_v16   ;;  %v230_v12 = vmul.f32 %v9738_v6, %v217_v3  ;;  %v9944_v6 = vld [vmem:[%s13004_s1 + $0x78] sm:$0xff] }
 0x20e   :  { %393 = vperm.xlu1 %9185, %v387_v15   ;;  %408 = vperm.xlu0 %9186, %v390_v18  }
 0x212   :  { %654 = vperm.xlu1 %9185, %v6983_v17   ;;  %669 = vperm.xlu0 %9186, %v6986_v20  }
 0x216   :  { %403 = vperm.xlu1 %9185, %v389_v19   ;;  %794 = vperm.xlu0 %9186, %v7004_v22   ;;  %v288_v22 = vld [vmem:[%s13003_s4 + $0x18] sm:$0xff] }
 0x21a   :  { %664 = vperm.xlu1 %9185, %v6985_v21   ;;  %929 = vperm.xlu0 %9186, %v7024_v24   ;;  %v9952_v21 = vld [vmem:[%s13004_s1 + $0x70] sm:$0xff]  ;;  %v9971_v24 = vld [vmem:[%s13004_s1 + $0x60] sm:$0xff] }
 0x21e   :  { %789 = vperm.xlu1 %9185, %v7003_v23   ;;  %804 = vperm.xlu0 %9186, %v7006_v26   ;;  %v9964_v23 = vld [vmem:[%s13004_s1 + $0x68] sm:$0xff]  ;;  %v9986_v26 = vld [vmem:[%s13004_s1 + $0x50] sm:$0xff] }
 0x222   :  { %924 = vperm.xlu1 %9185, %v7023_v25   ;;  %939 = vperm.xlu0 %9186, %v7026_v28   ;;  %v9979_v25 = vld [vmem:[%s13004_s1 + $0x58] sm:$0xff]  ;;  %v10000_v28 = vld [vmem:[%s13004_s1 + $0x40] sm:$0xff] }
 0x226   :  { %799 = vperm.xlu1 %9185, %v7005_v27   ;;  %1064 = vperm.xlu0 %9186, %v7044_v30   ;;  %v9993_v27 = vld [vmem:[%s13004_s1 + $0x48] sm:$0xff]  ;;  %v10014_v30 = vld [vmem:[%s13004_s1 + $0x30] sm:$0xff] }
 0x22a   :  { %934 = vperm.xlu1 %9185, %v7025_v29   ;;  %1199 = vperm.xlu0 %9186, %v7064_v34   ;;  %v10007_v29 = vld [vmem:[%s13004_s1 + $0x38] sm:$0xff]  ;;  %v10042_v34 = vld [vmem:[%s13004_s1 + $0x10] sm:$0xff] }
 0x22e   :  { %1059 = vperm.xlu1 %9185, %v7043_v33   ;;  %1074 = vperm.xlu0 %9186, %v7046_v37   ;;  %v10035_v33 = vld [vmem:[%s13004_s1 + $0x18] sm:$0xff]  ;;  %v6967_v37 = vld [vmem:[%s13004_s1 + $0x80] sm:$0xff] }
 0x22f   :  { %7984 = vmatprep.subr.mxu0 %v6967_v37 }
 0x230   :  { %7985 = vmatpush3.msra.mxu0 %v6967_v37  ;;  %v7013_v37 = vld [vmem:[%s13004_s1 + $0x1b0] sm:$0xff] }
 0x231   :  { %8030 = vmatprep.subr.mxu0 %v7002_v39 }
 0x232   :  { %1194 = vperm.xlu1 %9185, %v7063_v36   ;;  %1209 = vperm.xlu0 %9186, %v7066_v41   ;;  %v10054_v36 = vld [vmem:[%s13004_s1 + $0x8] sm:$0xff] }
 0x236   :  { %1069 = vperm.xlu1 %9185, %v7045_v40   ;;  %1334 = vperm.xlu0 %9186, %v7084_v44   ;;  %v10074_v40 = vld [vmem:[%s13004_s1 + $0x1f8] sm:$0xff] }
 0x23a   :  { %1204 = vperm.xlu1 %9185, %v7065_v43   ;;  %1469 = vperm.xlu0 %9186, %v7104_v48  }
 0x23e   :  { %1329 = vperm.xlu1 %9185, %v7083_v47   ;;  %1344 = vperm.xlu0 %9186, %v7086_v51  }
 0x242   :  { %1464 = vperm.xlu1 %9185, %v7103_v50   ;;  %1479 = vperm.xlu0 %9186, %v7106_v55  }
 0x246   :  { %1339 = vperm.xlu1 %9185, %v7085_v54  }
 0x24a   :  { %1474 = vperm.xlu1 %9185, %v7105_v57   ;;  %v7001_v57 = vld [vmem:[%s13004_s1 + $0x170] sm:$0xff] }
 0x266   :  { %v275_v0 = vpop.permute.xlu1 %274 }
 0x267   :  { %v280_v1 = vadd.f32 %v275_v0, %v232_v63 }
 0x269   :  { %v284_v2 = vmax.f32 %v280_v1, 0.0  ;;  %v7000_v1 = vld [vmem:[%s13004_s1 + $0x168] sm:$0xff] }
 0x26b   :  { %7940 = vmatprep.subr.mxu1 %v284_v2 }
 0x26c   :  { %7941 = vmatpush3.msra.mxu1 %v284_v2  ;;  %v7020_v2 = vld [vmem:[%s13004_s1 + $0x1e8] sm:$0xff] }
 0x274   :  { %v270_v9 = vpop.permute.xlu1 %269 }
 0x275   :  { %v279_v11 = vadd.f32 %v270_v9, %v231_v4 }
 0x277   :  { %v283_v15 = vmax.f32 %v279_v11, 0.0 }
 0x278   :  { %v265_v16 = vpop.permute.xlu1 %264  ;;  %v260_v17 = vpop.permute.xlu0 %259 }
 0x279   :  { %v278_v18 = vadd.f32 %v265_v16, %v230_v12  ;;  %v277_v8 = vadd.f32 %v260_v17, %v229_v13  ;;  %7942 = vmatprep.subr.mxu1 %v283_v15  ;;  %v7019_v12 = vld [vmem:[%s13004_s1 + $0x1e0] sm:$0xff]  ;;  %v7018_v16 = vld [vmem:[%s13004_s1 + $0x1d8] sm:$0xff]  ;;  %v6997_v17 = vld [vmem:[%s13004_s1 + $0x150] sm:$0xff] }
 0x27a   :  { %7943 = vmatpush3.msra.mxu1 %v283_v15  ;;  %v6998_v15 = vld [vmem:[%s13004_s1 + $0x158] sm:$0xff] }
 0x27b   :  { %v282_v19 = vmax.f32 %v278_v18, 0.0  ;;  %v281_v20 = vmax.f32 %v277_v8, 0.0  ;;  %v7017_v18 = vld [vmem:[%s13004_s1 + $0x1d0] sm:$0xff]  ;;  %v6996_v8 = vld [vmem:[%s13004_s1 + $0x148] sm:$0xff] }
 0x27d   :  { %7944 = vmatprep.subr.mxu1 %v282_v19  ;;  %v439_v41 = vpop.permute.xlu1 %438  ;;  %v449_v45 = vpop.permute.xlu0 %448 }
 0x27e   :  { %7945 = vmatpush3.msra.mxu1 %v282_v19  ;;  %v7016_v19 = vld [vmem:[%s13004_s1 + $0x1c8] sm:$0xff] }
 0x27f   :  { %7946 = vmatprep.subr.mxu1 %v281_v20 }
 0x280   :  { %7947 = vmatpush3.msra.mxu1 %v281_v20  ;;  %v6995_v20 = vld [vmem:[%s13004_s1 + $0x140] sm:$0xff] }
 0x281   :  { %7949 = vmatmul.mubr.msk.f32.vlgmr.msra.gmra.mxu1 %vm289_vm1, %v286_v10  ;;  %7992 = vmatprep.subr.mxu1 %v9944_v6  ;;  %v444_v42 = vpop.permute.xlu1 %443  ;;  %v399_v47 = vpop.permute.xlu0 %398  ;;  %v7015_v10 = vld [vmem:[%s13004_s1 + $0x1c0] sm:$0xff] }
 0x282   :  { %7951 = vmatprep.mubr.msk.f32.mxu1 %vm289_vm1, %v287_v7  ;;  %7993 = vmatpush3.msra.mxu1 %v9944_v6  ;;  %v6994_v7 = vld [vmem:[%s13004_s1 + $0x138] sm:$0xff] }
 0x283   :  { %7994 = vmatprep.subr.mxu1 %v9952_v21 }
 0x284   :  { %7995 = vmatpush3.msra.mxu1 %v9952_v21 }
 0x285   :  { %7952 = vmatmul.mubr.msk.f32.gmra.mxu1 %vm289_vm1, %v288_v22  ;;  %7996 = vmatprep.subr.mxu1 %v9964_v23  ;;  %v454_v43 = vpop.permute.xlu1 %453  ;;  %v10079_v50 = vpop.permute.xlu0 %659  ;;  %v7014_v22 = vld [vmem:[%s13004_s1 + $0x1b8] sm:$0xff] }
 0x286   :  { %7997 = vmatpush3.msra.mxu1 %v9964_v23 }
 0x287   :  { %7998 = vmatprep.subr.mxu1 %v9971_v24 }
 0x288   :  { %7999 = vmatpush3.msra.mxu1 %v9971_v24 }
 0x289   :  { %8000 = vmatprep.subr.mxu1 %v9979_v25  ;;  %v394_v44 = vpop.permute.xlu1 %393  ;;  %v409_v62 = vpop.permute.xlu0 %408 }
 0x28a   :  { %8001 = vmatpush3.msra.mxu1 %v9979_v25 }
 0x28b   :  { %8002 = vmatprep.subr.mxu1 %v9986_v26 }
 0x28c   :  { %8003 = vmatpush3.msra.mxu1 %v9986_v26 }
 0x28d   :  { %8004 = vmatprep.subr.mxu1 %v9993_v27  ;;  %v655_v46 = vpop.permute.xlu1 %654 }
 0x28e   :  { %8005 = vmatpush3.msra.mxu1 %v9993_v27 }
 0x28f   :  { %8006 = vmatprep.subr.mxu1 %v10000_v28 }
 0x290   :  { %8007 = vmatpush3.msra.mxu1 %v10000_v28 }
 0x291   :  { %8008 = vmatprep.subr.mxu1 %v10007_v29  ;;  %v404_v48 = vpop.permute.xlu1 %403 }
 0x292   :  { %8009 = vmatpush3.msra.mxu1 %v10007_v29 }
 0x293   :  { %8010 = vmatprep.subr.mxu1 %v10014_v30 }
 0x294   :  { %8011 = vmatpush3.msra.mxu1 %v10014_v30 }
 0x295   :  { %8012 = vmatprep.subr.mxu1 %v10021_v31  ;;  %v10095_v60 = vpop.permute.xlu1 %664 }
 0x296   :  { %8013 = vmatpush3.msra.mxu1 %v10021_v31 }
 0x297   :  { %8014 = vmatprep.subr.mxu1 %v10028_v32 }
 0x298   :  { %8015 = vmatpush3.msra.mxu1 %v10028_v32 }
 0x299   :  { %8016 = vmatprep.subr.mxu1 %v10035_v33  ;;  %v790_v9 = vpop.permute.xlu1 %789 }
 0x29a   :  { %8017 = vmatpush3.msra.mxu1 %v10035_v33 }
 0x29b   :  { %8018 = vmatprep.subr.mxu1 %v10042_v34 }
 0x29c   :  { %8019 = vmatpush3.msra.mxu1 %v10042_v34 }
 0x29d   :  { %8020 = vmatprep.subr.mxu1 %v10054_v36 }
 0x29e   :  { %8021 = vmatpush3.msra.mxu1 %v10054_v36 }
 0x29f   :  { %8022 = vmatprep.subr.mxu1 %v10064_v38 }
 0x2a0   :  { %8023 = vmatpush3.msra.mxu1 %v10064_v38 }
 0x2a1   :  { %8068 = vmatprep.subr.mxu1 %v10074_v40 }
 0x341   :  { %v10077_v49 = vpop.f32.mrf.mxu1 }
 0x342   :  { %v457_v55 = vmul.f32 %v10077_v49, %v444_v42  ;;  %v412_v56 = vmul.f32 %v10077_v49, %v399_v47  ;;  %v7012_v42 = vld [vmem:[%s13004_s1 + $0x1a8] sm:$0xff]  ;;  %v7010_v47 = vld [vmem:[%s13004_s1 + $0x198] sm:$0xff] }
 0x343   :  { %v10081_v51 = vpop.f32.mrf.mxu1 }
 0x344   :  { %v456_v52 = vmul.f32 %v439_v41, %v10081_v51  ;;  %v411_v53 = vmul.f32 %v394_v44, %v10081_v51  ;;  %v672_v11 = vmul.f32 %v655_v46, %v10081_v51  ;;  %v807_v13 = vmul.f32 %v790_v9, %v10081_v51  ;;  %v6992_v41 = vld [vmem:[%s13004_s1 + $0x128] sm:$0xff]  ;;  %v7011_v44 = vld [vmem:[%s13004_s1 + $0x1a0] sm:$0xff]  ;;  %v6990_v46 = vld [vmem:[%s13004_s1 + $0x118] sm:$0xff] }
 0x345   :  { %v10085_v54 = vpop.f32.mrf.mxu1  ;;  %v7041_v9 = vld [vmem:[%s13004_s1 + $0x270] sm:$0xff] }
 0x346   :  { %7986 = vmatprep.mubr.f32.mxu0 %v456_v52  ;;  %8024 = vmatprep.mubr.f32.mxu1 %v411_v53  ;;  %v414_v3 = vmul.f32 %v10085_v54, %v409_v62  ;;  %v459_v4 = vmul.f32 %v10085_v54, %v454_v43  ;;  %v6991_v43 = vld [vmem:[%s13004_s1 + $0x120] sm:$0xff]  ;;  %v6989_v52 = vld [vmem:[%s13004_s1 + $0x110] sm:$0xff] }
 0x347   :  { %v10097_v61 = vpop.f32.mrf.mxu1  ;;  %7987 = vmatmul.mubr.f32.vlgmr.msra.gmra.mxu0 %v457_v55  ;;  %8025 = vmatmul.mubr.f32.vlgmr.msra.gmra.mxu1 %v412_v56  ;;  %v7009_v53 = vld [vmem:[%s13004_s1 + $0x190] sm:$0xff]  ;;  %v6988_v55 = vld [vmem:[%s13004_s1 + $0x108] sm:$0xff]  ;;  %v7007_v62 = vld [vmem:[%s13004_s1 + $0x180] sm:$0xff] }
 0x348   :  { %8031 = vmatpush3.msra.mxu0 %v7002_v39  ;;  %8069 = vmatpush3.msra.mxu1 %v10074_v40  ;;  %v458_v63 = vmul.f32 %v449_v45, %v10097_v61  ;;  %v413_v0 = vmul.f32 %v404_v48, %v10097_v61  ;;  %v10154_v39 = vpop.permute.xlu0 %669  ;;  %v10168_v45 = vpop.permute.xlu1 %924  ;;  %v7008_v56 = vld [vmem:[%s13004_s1 + $0x188] sm:$0xff] }
 0x349   :  { %8032 = vmatprep.subr.mxu0 %v7001_v57  ;;  %8070 = vmatprep.subr.mxu1 %v7021_v58 }
 0x34a   :  { %8033 = vmatpush3.msra.mxu0 %v7001_v57  ;;  %8071 = vmatpush3.msra.mxu1 %v7021_v58  ;;  %v6987_v58 = vld [vmem:[%s13004_s1 + $0x100] sm:$0xff] }
 0x34b   :  { %7989 = vmatprep.mubr.f32.mxu0 %v458_v63  ;;  %8027 = vmatprep.mubr.f32.mxu1 %v413_v0  ;;  %v673_v0 = vmul.f32 %v10077_v49, %v10079_v50 }
 0x34c   :  { %8034 = vmatprep.subr.mxu0 %v7000_v1  ;;  %8072 = vmatprep.subr.mxu1 %v7020_v2  ;;  %v795_v48 = vpop.permute.xlu0 %794  ;;  %v800_v57 = vpop.permute.xlu1 %799 }
 0x34d   :  { %7990 = vmatmul.mubr.f32.gmra.mxu0 %v459_v4  ;;  %8028 = vmatmul.mubr.f32.gmra.mxu1 %v414_v3  ;;  %v7062_v3 = vld [vmem:[%s13004_s1 + $0x2f8] sm:$0xff]  ;;  %v809_v50 = vmul.f32 %v800_v57, %v10097_v61 }
 0x34e   :  { %8035 = vmatpush3.msra.mxu0 %v7000_v1  ;;  %8073 = vmatpush3.msra.mxu1 %v7020_v2  ;;  %v808_v1 = vmul.f32 %v10077_v49, %v795_v48  ;;  %v7042_v2 = vld [vmem:[%s13004_s1 + $0x278] sm:$0xff]  ;;  %v7032_v48 = vld [vmem:[%s13004_s1 + $0x228] sm:$0xff] }
 0x34f   :  { %8036 = vmatprep.subr.mxu0 %v6999_v5  ;;  %8062 = vmatprep.mubr.f32.mxu0 %v672_v11  ;;  %v7061_v11 = vld [vmem:[%s13004_s1 + $0x2f0] sm:$0xff]  ;;  %v7030_v57 = vld [vmem:[%s13004_s1 + $0x218] sm:$0xff] }
 0x350   :  { %8074 = vmatprep.subr.mxu1 %v7019_v12  ;;  %8100 = vmatprep.mubr.f32.mxu1 %v807_v13  ;;  %v10194_v63 = vpop.permute.xlu0 %929  ;;  %v10205_v4 = vpop.permute.xlu1 %934 }
 0x351   :  { %8037 = vmatpush3.msra.mxu0 %v6999_v5  ;;  %8075 = vmatpush3.msra.mxu1 %v7019_v12  ;;  %v674_v5 = vmul.f32 %v10095_v60, %v10097_v61  ;;  %v675_v60 = vmul.f32 %v10085_v54, %v10154_v39  ;;  %v7056_v39 = vld [vmem:[%s13004_s1 + $0x2c8] sm:$0xff] }
 0x352   :  { %8038 = vmatprep.subr.mxu0 %v6998_v15  ;;  %8076 = vmatprep.subr.mxu1 %v7018_v16 }
 0x353   :  { %8039 = vmatpush3.msra.mxu0 %v6998_v15  ;;  %8077 = vmatpush3.msra.mxu1 %v7018_v16  ;;  %v7040_v15 = vld [vmem:[%s13004_s1 + $0x268] sm:$0xff] }
 0x354   :  { %8040 = vmatprep.subr.mxu0 %v6997_v17  ;;  %8078 = vmatprep.subr.mxu1 %v7017_v18  ;;  %v805_v12 = vpop.permute.xlu0 %804  ;;  %v7060_v16 = vld [vmem:[%s13004_s1 + $0x2e8] sm:$0xff] }
 0x355   :  { %8041 = vmatpush3.msra.mxu0 %v6997_v17  ;;  %8079 = vmatpush3.msra.mxu1 %v7017_v18  ;;  %v810_v13 = vmul.f32 %v10085_v54, %v805_v12  ;;  %v1060_v17 = vpop.permute.xlu1 %1059  ;;  %v942_v18 = vmul.f32 %v10168_v45, %v10081_v51  ;;  %v7033_v45 = vld [vmem:[%s13004_s1 + $0x230] sm:$0xff]  ;;  %v943_v12 = vmul.f32 %v10077_v49, %v10194_v63 }
 0x356   :  { %8042 = vmatprep.subr.mxu0 %v6996_v8  ;;  %8080 = vmatprep.subr.mxu1 %v7016_v19 }
 0x357   :  { %8043 = vmatpush3.msra.mxu0 %v6996_v8  ;;  %8081 = vmatpush3.msra.mxu1 %v7016_v19  ;;  %v1077_v8 = vmul.f32 %v1060_v17, %v10081_v51  ;;  %v7039_v19 = vld [vmem:[%s13004_s1 + $0x260] sm:$0xff]  ;;  %v944_v17 = vmul.f32 %v10205_v4, %v10097_v61 }
 0x358   :  { %8044 = vmatprep.subr.mxu0 %v6995_v20  ;;  %8082 = vmatprep.subr.mxu1 %v7015_v10 }
 0x359   :  { %8045 = vmatpush3.msra.mxu0 %v6995_v20  ;;  %8083 = vmatpush3.msra.mxu1 %v7015_v10  ;;  %v7059_v20 = vld [vmem:[%s13004_s1 + $0x2e0] sm:$0xff]  ;;  %v7038_v10 = vld [vmem:[%s13004_s1 + $0x258] sm:$0xff] }
 0x35a   :  { %8046 = vmatprep.subr.mxu0 %v6994_v7  ;;  %8084 = vmatprep.subr.mxu1 %v7014_v22 }
 0x35b   :  { %8047 = vmatpush3.msra.mxu0 %v6994_v7  ;;  %8085 = vmatpush3.msra.mxu1 %v7014_v22  ;;  %v7058_v7 = vld [vmem:[%s13004_s1 + $0x2d8] sm:$0xff]  ;;  %v7037_v22 = vld [vmem:[%s13004_s1 + $0x250] sm:$0xff] }
 0x35c   :  { %8048 = vmatprep.subr.mxu0 %v6993_v35  ;;  %8086 = vmatprep.subr.mxu1 %v7013_v37 }
 0x35d   :  { %8049 = vmatpush3.msra.mxu0 %v6993_v35  ;;  %8087 = vmatpush3.msra.mxu1 %v7013_v37  ;;  %v7057_v35 = vld [vmem:[%s13004_s1 + $0x2d0] sm:$0xff]  ;;  %v7036_v37 = vld [vmem:[%s13004_s1 + $0x248] sm:$0xff] }
 0x35e   :  { %8050 = vmatprep.subr.mxu0 %v6992_v41  ;;  %8088 = vmatprep.subr.mxu1 %v7012_v42 }
 0x35f   :  { %8051 = vmatpush3.msra.mxu0 %v6992_v41  ;;  %8089 = vmatpush3.msra.mxu1 %v7012_v42  ;;  %v7035_v41 = vld [vmem:[%s13004_s1 + $0x240] sm:$0xff] }
 0x360   :  { %8052 = vmatprep.subr.mxu0 %v6991_v43  ;;  %8090 = vmatprep.subr.mxu1 %v7011_v44  ;;  %v7055_v42 = vld [vmem:[%s13004_s1 + $0x2c0] sm:$0xff] }
 0x361   :  { %8053 = vmatpush3.msra.mxu0 %v6991_v43  ;;  %8091 = vmatpush3.msra.mxu1 %v7011_v44  ;;  %v7034_v43 = vld [vmem:[%s13004_s1 + $0x238] sm:$0xff] }
 0x362   :  { %8054 = vmatprep.subr.mxu0 %v6990_v46  ;;  %8092 = vmatprep.subr.mxu1 %v7010_v47  ;;  %v7054_v44 = vld [vmem:[%s13004_s1 + $0x2b8] sm:$0xff] }
 0x363   :  { %8055 = vmatpush3.msra.mxu0 %v6990_v46  ;;  %8093 = vmatpush3.msra.mxu1 %v7010_v47  ;;  %v7053_v46 = vld [vmem:[%s13004_s1 + $0x2b0] sm:$0xff]  ;;  %v10270_v47 = vpop.permute.xlu0 %939 }
 0x364   :  { %8056 = vmatprep.subr.mxu0 %v6989_v52  ;;  %8094 = vmatprep.subr.mxu1 %v7009_v53  ;;  %v945_v4 = vmul.f32 %v10085_v54, %v10270_v47  ;;  %v7096_v47 = vld [vmem:[%s13004_s1 + $0x3c8] sm:$0xff] }
 0x365   :  { %8057 = vmatpush3.msra.mxu0 %v6989_v52  ;;  %8095 = vmatpush3.msra.mxu1 %v7009_v53  ;;  %v7052_v52 = vld [vmem:[%s13004_s1 + $0x2a8] sm:$0xff]  ;;  %v7031_v53 = vld [vmem:[%s13004_s1 + $0x220] sm:$0xff] }
 0x366   :  { %8058 = vmatprep.subr.mxu0 %v6988_v55  ;;  %8096 = vmatprep.subr.mxu1 %v7008_v56 }
 0x367   :  { %8059 = vmatpush3.msra.mxu0 %v6988_v55  ;;  %8097 = vmatpush3.msra.mxu1 %v7008_v56  ;;  %v7051_v55 = vld [vmem:[%s13004_s1 + $0x2a0] sm:$0xff]  ;;  %v10284_v56 = vpop.permute.xlu1 %1194 }
 0x368   :  { %8060 = vmatprep.subr.mxu0 %v6987_v58  ;;  %8098 = vmatprep.subr.mxu1 %v7007_v62 }
 0x369   :  { %8061 = vmatpush3.msra.mxu0 %v6987_v58  ;;  %8099 = vmatpush3.msra.mxu1 %v7007_v62  ;;  %v7050_v58 = vld [vmem:[%s13004_s1 + $0x298] sm:$0xff]  ;;  %v1065_v62 = vpop.permute.xlu0 %1064 }
 0x36a   :  { %8063 = vmatmul.mubr.f32.vlgmr.msra.gmra.mxu0 %v673_v0  ;;  %8101 = vmatmul.mubr.f32.vlgmr.msra.gmra.mxu1 %v808_v1  ;;  %v7029_v0 = vld [vmem:[%s13004_s1 + $0x210] sm:$0xff] }
 0x36b   :  { %8106 = vmatprep.subr.mxu0 %v7042_v2  ;;  %8144 = vmatprep.subr.mxu1 %v7062_v3  ;;  %v7049_v1 = vld [vmem:[%s13004_s1 + $0x290] sm:$0xff] }
 0x36c   :  { %8065 = vmatprep.mubr.f32.mxu0 %v674_v5  ;;  %8103 = vmatprep.mubr.f32.mxu1 %v809_v50  ;;  %v1070_v5 = vpop.permute.xlu1 %1069  ;;  %v7027_v50 = vld [vmem:[%s13004_s1 + $0x200] sm:$0xff] }
 0x36d   :  { %8107 = vmatpush3.msra.mxu0 %v7042_v2  ;;  %8145 = vmatpush3.msra.mxu1 %v7062_v3  ;;  %v7028_v2 = vld [vmem:[%s13004_s1 + $0x208] sm:$0xff]  ;;  %v1079_v63 = vmul.f32 %v1070_v5, %v10097_v61  ;;  %v7090_v5 = vld [vmem:[%s13004_s1 + $0x398] sm:$0xff] }
 0x36e   :  { %8108 = vmatprep.subr.mxu0 %v7041_v9  ;;  %8146 = vmatprep.subr.mxu1 %v7061_v11  ;;  %v7048_v3 = vld [vmem:[%s13004_s1 + $0x288] sm:$0xff] }
 0x36f   :  { %8109 = vmatpush3.msra.mxu0 %v7041_v9  ;;  %8147 = vmatpush3.msra.mxu1 %v7061_v11  ;;  %v7047_v9 = vld [vmem:[%s13004_s1 + $0x280] sm:$0xff]  ;;  %v10310_v11 = vpop.permute.xlu0 %1199 }
 0x370   :  { %8066 = vmatmul.mubr.f32.gmra.mxu0 %v675_v60  ;;  %8104 = vmatmul.mubr.f32.gmra.mxu1 %v810_v13  ;;  %v1078_v60 = vmul.f32 %v10077_v49, %v1065_v62  ;;  %v7082_v13 = vld [vmem:[%s13004_s1 + $0x378] sm:$0xff]  ;;  %v7072_v62 = vld [vmem:[%s13004_s1 + $0x328] sm:$0xff] }
 0x371   :  { %8110 = vmatprep.subr.mxu0 %v7040_v15  ;;  %8148 = vmatprep.subr.mxu1 %v7060_v16 }
 0x372   :  { %8111 = vmatpush3.msra.mxu0 %v7040_v15  ;;  %8138 = vmatprep.mubr.f32.mxu0 %v942_v18  ;;  %v7102_v15 = vld [vmem:[%s13004_s1 + $0x3f8] sm:$0xff]  ;;  %v7081_v18 = vld [vmem:[%s13004_s1 + $0x370] sm:$0xff] }
 0x373   :  { %8149 = vmatpush3.msra.mxu1 %v7060_v16  ;;  %8176 = vmatprep.mubr.f32.mxu1 %v1077_v8  ;;  %v10321_v16 = vpop.permute.xlu1 %1204  ;;  %v7101_v8 = vld [vmem:[%s13004_s1 + $0x3f0] sm:$0xff] }
 0x374   :  { %8112 = vmatprep.subr.mxu0 %v7039_v19  ;;  %8150 = vmatprep.subr.mxu1 %v7059_v20 }
 0x375   :  { %8113 = vmatpush3.msra.mxu0 %v7039_v19  ;;  %8151 = vmatpush3.msra.mxu1 %v7059_v20  ;;  %v1075_v19 = vpop.permute.xlu0 %1074 }
 0x376   :  { %8114 = vmatprep.subr.mxu0 %v7038_v10  ;;  %8152 = vmatprep.subr.mxu1 %v7058_v7  ;;  %v1080_v20 = vmul.f32 %v10085_v54, %v1075_v19 }
 0x377   :  { %8115 = vmatpush3.msra.mxu0 %v7038_v10  ;;  %8153 = vmatpush3.msra.mxu1 %v7058_v7  ;;  %v7080_v10 = vld [vmem:[%s13004_s1 + $0x368] sm:$0xff] }
 0x378   :  { %8116 = vmatprep.subr.mxu0 %v7037_v22  ;;  %8154 = vmatprep.subr.mxu1 %v7057_v35  ;;  %v7100_v7 = vld [vmem:[%s13004_s1 + $0x3e8] sm:$0xff] }
 0x379   :  { %8117 = vmatpush3.msra.mxu0 %v7037_v22  ;;  %8155 = vmatpush3.msra.mxu1 %v7057_v35  ;;  %v1330_v22 = vpop.permute.xlu1 %1329  ;;  %v1212_v35 = vmul.f32 %v10284_v56, %v10081_v51  ;;  %v7073_v56 = vld [vmem:[%s13004_s1 + $0x330] sm:$0xff] }
 0x37a   :  { %8118 = vmatprep.subr.mxu0 %v7036_v37  ;;  %8156 = vmatprep.subr.mxu1 %v7056_v39 }
 0x37b   :  { %8119 = vmatpush3.msra.mxu0 %v7036_v37  ;;  %8157 = vmatpush3.msra.mxu1 %v7056_v39  ;;  %v1347_v37 = vmul.f32 %v1330_v22, %v10081_v51  ;;  %v7079_v39 = vld [vmem:[%s13004_s1 + $0x360] sm:$0xff] }
 0x37c   :  { %8120 = vmatprep.subr.mxu0 %v7035_v41  ;;  %8158 = vmatprep.subr.mxu1 %v7055_v42 }
 0x37d   :  { %8121 = vmatpush3.msra.mxu0 %v7035_v41  ;;  %8159 = vmatpush3.msra.mxu1 %v7055_v42  ;;  %v7099_v41 = vld [vmem:[%s13004_s1 + $0x3e0] sm:$0xff]  ;;  %v7078_v42 = vld [vmem:[%s13004_s1 + $0x358] sm:$0xff] }
 0x37e   :  { %8122 = vmatprep.subr.mxu0 %v7034_v43  ;;  %8160 = vmatprep.subr.mxu1 %v7054_v44 }
 0x37f   :  { %8123 = vmatpush3.msra.mxu0 %v7034_v43  ;;  %8161 = vmatpush3.msra.mxu1 %v7054_v44  ;;  %v7098_v43 = vld [vmem:[%s13004_s1 + $0x3d8] sm:$0xff]  ;;  %v7077_v44 = vld [vmem:[%s13004_s1 + $0x350] sm:$0xff] }
 0x380   :  { %8124 = vmatprep.subr.mxu0 %v7033_v45  ;;  %8162 = vmatprep.subr.mxu1 %v7053_v46 }
 0x381   :  { %8125 = vmatpush3.msra.mxu0 %v7033_v45  ;;  %8163 = vmatpush3.msra.mxu1 %v7053_v46  ;;  %v7097_v45 = vld [vmem:[%s13004_s1 + $0x3d0] sm:$0xff]  ;;  %v7076_v46 = vld [vmem:[%s13004_s1 + $0x348] sm:$0xff] }
 0x382   :  { %8126 = vmatprep.subr.mxu0 %v7032_v48  ;;  %8164 = vmatprep.subr.mxu1 %v7052_v52 }
 0x383   :  { %8127 = vmatpush3.msra.mxu0 %v7032_v48  ;;  %8165 = vmatpush3.msra.mxu1 %v7052_v52  ;;  %v7075_v48 = vld [vmem:[%s13004_s1 + $0x340] sm:$0xff] }
 0x384   :  { %8128 = vmatprep.subr.mxu0 %v7031_v53  ;;  %8166 = vmatprep.subr.mxu1 %v7051_v55  ;;  %v7095_v52 = vld [vmem:[%s13004_s1 + $0x3c0] sm:$0xff] }
 0x385   :  { %8129 = vmatpush3.msra.mxu0 %v7031_v53  ;;  %8167 = vmatpush3.msra.mxu1 %v7051_v55  ;;  %v7074_v53 = vld [vmem:[%s13004_s1 + $0x338] sm:$0xff] }
 0x386   :  { %8130 = vmatprep.subr.mxu0 %v7030_v57  ;;  %8168 = vmatprep.subr.mxu1 %v7050_v58  ;;  %v7094_v55 = vld [vmem:[%s13004_s1 + $0x3b8] sm:$0xff] }
 0x387   :  { %8131 = vmatpush3.msra.mxu0 %v7030_v57  ;;  %8169 = vmatpush3.msra.mxu1 %v7050_v58  ;;  %v7093_v57 = vld [vmem:[%s13004_s1 + $0x3b0] sm:$0xff]  ;;  %v10386_v58 = vpop.permute.xlu0 %1209 }
 0x388   :  { %8132 = vmatprep.subr.mxu0 %v7029_v0  ;;  %8170 = vmatprep.subr.mxu1 %v7049_v1 }
 0x389   :  { %8133 = vmatpush3.msra.mxu0 %v7029_v0  ;;  %8171 = vmatpush3.msra.mxu1 %v7049_v1  ;;  %v7092_v0 = vld [vmem:[%s13004_s1 + $0x3a8] sm:$0xff]  ;;  %v7071_v1 = vld [vmem:[%s13004_s1 + $0x320] sm:$0xff] }
 0x38a   :  { %8134 = vmatprep.subr.mxu0 %v7028_v2  ;;  %8172 = vmatprep.subr.mxu1 %v7048_v3 }
 0x38b   :  { %8135 = vmatpush3.msra.mxu0 %v7028_v2  ;;  %8173 = vmatpush3.msra.mxu1 %v7048_v3  ;;  %v7091_v2 = vld [vmem:[%s13004_s1 + $0x3a0] sm:$0xff]  ;;  %v7070_v3 = vld [vmem:[%s13004_s1 + $0x318] sm:$0xff] }
 0x38c   :  { %8136 = vmatprep.subr.mxu0 %v7027_v50  ;;  %8174 = vmatprep.subr.mxu1 %v7047_v9 }
 0x38d   :  { %8137 = vmatpush3.msra.mxu0 %v7027_v50  ;;  %8175 = vmatpush3.msra.mxu1 %v7047_v9  ;;  %v1335_v50 = vpop.permute.xlu0 %1334  ;;  %v7069_v9 = vld [vmem:[%s13004_s1 + $0x310] sm:$0xff] }
 0x38e   :  { %8139 = vmatmul.mubr.f32.vlgmr.msra.gmra.mxu0 %v943_v12  ;;  %8177 = vmatmul.mubr.f32.vlgmr.msra.gmra.mxu1 %v1078_v60  ;;  %v7089_v12 = vld [vmem:[%s13004_s1 + $0x390] sm:$0xff]  ;;  %v1465_v60 = vpop.permute.xlu1 %1464  ;;  %v1348_v19 = vmul.f32 %v10077_v49, %v1335_v50 }
 0x38f   :  { %8182 = vmatprep.subr.mxu0 %v7082_v13  ;;  %8220 = vmatprep.subr.mxu1 %v7102_v15 }
 0x390   :  { %8141 = vmatprep.mubr.f32.mxu0 %v944_v17  ;;  %8179 = vmatprep.mubr.f32.mxu1 %v1079_v63  ;;  %v7067_v17 = vld [vmem:[%s13004_s1 + $0x300] sm:$0xff] }
 0x391   :  { %8183 = vmatpush3.msra.mxu0 %v7082_v13  ;;  %8221 = vmatpush3.msra.mxu1 %v7102_v15  ;;  %v7068_v13 = vld [vmem:[%s13004_s1 + $0x308] sm:$0xff]  ;;  %v7087_v63 = vld [vmem:[%s13004_s1 + $0x380] sm:$0xff] }
 0x392   :  { %8184 = vmatprep.subr.mxu0 %v7081_v18  ;;  %8222 = vmatprep.subr.mxu1 %v7101_v8  ;;  %v7088_v15 = vld [vmem:[%s13004_s1 + $0x388] sm:$0xff] }
 0x393   :  { %8185 = vmatpush3.msra.mxu0 %v7081_v18  ;;  %8223 = vmatpush3.msra.mxu1 %v7101_v8  ;;  %v10424_v18 = vpop.permute.xlu0 %1469  ;;  %v1213_v8 = vmul.f32 %v10077_v49, %v10310_v11  ;;  %v7121_v11 = vld [vmem:[%s13004_s1 + $0x470] sm:$0xff] }
 0x394   :  { %8142 = vmatmul.mubr.f32.gmra.mxu0 %v945_v4  ;;  %8180 = vmatmul.mubr.f32.gmra.mxu1 %v1080_v20  ;;  %v7122_v4 = vld [vmem:[%s13004_s1 + $0x478] sm:$0xff]  ;;  %v1340_v20 = vpop.permute.xlu1 %1339 }
 0x395   :  { %8186 = vmatprep.subr.mxu0 %v7080_v10  ;;  %8224 = vmatprep.subr.mxu1 %v7100_v7 }
 0x396   :  { %8187 = vmatpush3.msra.mxu0 %v7080_v10  ;;  %8214 = vmatprep.mubr.f32.mxu0 %v1212_v35  ;;  %v1214_v10 = vmul.f32 %v10321_v16, %v10097_v61  ;;  %v1215_v16 = vmul.f32 %v10085_v54, %v10386_v58  ;;  %v1483_v58 = vmul.f32 %v10077_v49, %v10424_v18 }
 0x397   :  { %8225 = vmatpush3.msra.mxu1 %v7100_v7  ;;  %8252 = vmatprep.mubr.f32.mxu1 %v1347_v37  ;;  %v1349_v7 = vmul.f32 %v1340_v20, %v10097_v61  ;;  %v1345_v22 = vpop.permute.xlu0 %1344  ;;  %v7120_v37 = vld [vmem:[%s13004_s1 + $0x468] sm:$0xff] }
 0x398   :  { %8188 = vmatprep.subr.mxu0 %v7079_v39  ;;  %8226 = vmatprep.subr.mxu1 %v7099_v41  ;;  %v1350_v35 = vmul.f32 %v10085_v54, %v1345_v22 }
 0x399   :  { %8189 = vmatpush3.msra.mxu0 %v7079_v39  ;;  %8227 = vmatpush3.msra.mxu1 %v7099_v41  ;;  %v1482_v39 = vmul.f32 %v1465_v60, %v10081_v51  ;;  %v7119_v41 = vld [vmem:[%s13004_s1 + $0x460] sm:$0xff]  ;;  %v7116_v51 = vld [vmem:[%s13004_s1 + $0x448] sm:$0xff] }
 0x39a   :  { %8190 = vmatprep.subr.mxu0 %v7078_v42  ;;  %8228 = vmatprep.subr.mxu1 %v7098_v43 }
 0x39b   :  { %8191 = vmatpush3.msra.mxu0 %v7078_v42  ;;  %8229 = vmatpush3.msra.mxu1 %v7098_v43  ;;  %v7118_v42 = vld [vmem:[%s13004_s1 + $0x458] sm:$0xff]  ;;  %v7117_v43 = vld [vmem:[%s13004_s1 + $0x450] sm:$0xff] }
 0x39c   :  { %8192 = vmatprep.subr.mxu0 %v7077_v44  ;;  %8230 = vmatprep.subr.mxu1 %v7097_v45 }
 0x39d   :  { %8193 = vmatpush3.msra.mxu0 %v7077_v44  ;;  %8231 = vmatpush3.msra.mxu1 %v7097_v45  ;;  %v7115_v44 = vld [vmem:[%s13004_s1 + $0x440] sm:$0xff]  ;;  %v7114_v45 = vld [vmem:[%s13004_s1 + $0x438] sm:$0xff] }
 0x39e   :  { %8194 = vmatprep.subr.mxu0 %v7076_v46  ;;  %8232 = vmatprep.subr.mxu1 %v7096_v47 }
 0x39f   :  { %8195 = vmatpush3.msra.mxu0 %v7076_v46  ;;  %8233 = vmatpush3.msra.mxu1 %v7096_v47  ;;  %v7113_v46 = vld [vmem:[%s13004_s1 + $0x430] sm:$0xff]  ;;  %v7112_v47 = vld [vmem:[%s13004_s1 + $0x428] sm:$0xff] }
 0x3a0   :  { %8196 = vmatprep.subr.mxu0 %v7075_v48  ;;  %8234 = vmatprep.subr.mxu1 %v7095_v52 }
 0x3a1   :  { %8197 = vmatpush3.msra.mxu0 %v7075_v48  ;;  %8235 = vmatpush3.msra.mxu1 %v7095_v52  ;;  %v7111_v48 = vld [vmem:[%s13004_s1 + $0x420] sm:$0xff]  ;;  %v7110_v52 = vld [vmem:[%s13004_s1 + $0x418] sm:$0xff] }
 0x3a2   :  { %8198 = vmatprep.subr.mxu0 %v7074_v53  ;;  %8236 = vmatprep.subr.mxu1 %v7094_v55 }
 0x3a3   :  { %8199 = vmatpush3.msra.mxu0 %v7074_v53  ;;  %8237 = vmatpush3.msra.mxu1 %v7094_v55  ;;  %v7109_v53 = vld [vmem:[%s13004_s1 + $0x410] sm:$0xff]  ;;  %v7108_v55 = vld [vmem:[%s13004_s1 + $0x408] sm:$0xff] }
 0x3a4   :  { %8200 = vmatprep.subr.mxu0 %v7073_v56  ;;  %8238 = vmatprep.subr.mxu1 %v7093_v57 }
 0x3a5   :  { %8201 = vmatpush3.msra.mxu0 %v7073_v56  ;;  %8239 = vmatpush3.msra.mxu1 %v7093_v57  ;;  %v7107_v56 = vld [vmem:[%s13004_s1 + $0x400] sm:$0xff]  ;;  %v1475_v57 = vpop.permute.xlu1 %1474 }
 0x3a6   :  { %8202 = vmatprep.subr.mxu0 %v7072_v62  ;;  %8240 = vmatprep.subr.mxu1 %v7092_v0 }
 0x3a7   :  { %8203 = vmatpush3.msra.mxu0 %v7072_v62  ;;  %8241 = vmatpush3.msra.mxu1 %v7092_v0  ;;  %v1480_v62 = vpop.permute.xlu0 %1479  ;;  %v1484_v0 = vmul.f32 %v1475_v57, %v10097_v61 }
 0x3a8   :  { %8204 = vmatprep.subr.mxu0 %v7071_v1  ;;  %8242 = vmatprep.subr.mxu1 %v7091_v2 }
 0x3a9   :  { %8205 = vmatpush3.msra.mxu0 %v7071_v1  ;;  %8243 = vmatpush3.msra.mxu1 %v7091_v2  ;;  %v1485_v1 = vmul.f32 %v10085_v54, %v1480_v62 }
 0x3aa   :  { %8206 = vmatprep.subr.mxu0 %v7070_v3  ;;  %8244 = vmatprep.subr.mxu1 %v7090_v5 }
 0x3ab   :  { %8207 = vmatpush3.msra.mxu0 %v7070_v3  ;;  %8245 = vmatpush3.msra.mxu1 %v7090_v5 }
 0x3ac   :  { %8208 = vmatprep.subr.mxu0 %v7069_v9  ;;  %8246 = vmatprep.subr.mxu1 %v7089_v12 }
 0x3ad   :  { %8209 = vmatpush3.msra.mxu0 %v7069_v9  ;;  %8247 = vmatpush3.msra.mxu1 %v7089_v12 }
 0x3ae   :  { %8210 = vmatprep.subr.mxu0 %v7068_v13  ;;  %8248 = vmatprep.subr.mxu1 %v7088_v15 }
 0x3af   :  { %8211 = vmatpush3.msra.mxu0 %v7068_v13  ;;  %8249 = vmatpush3.msra.mxu1 %v7088_v15 }
 0x3b0   :  { %8212 = vmatprep.subr.mxu0 %v7067_v17  ;;  %8250 = vmatprep.subr.mxu1 %v7087_v63 }
 0x3b1   :  { %8213 = vmatpush3.msra.mxu0 %v7067_v17  ;;  %8251 = vmatpush3.msra.mxu1 %v7087_v63 }
 0x3b2   :  { %8215 = vmatmul.mubr.f32.vlgmr.msra.gmra.mxu0 %v1213_v8  ;;  %8253 = vmatmul.mubr.f32.vlgmr.msra.gmra.mxu1 %v1348_v19 }
 0x3b3   :  { %8258 = vmatprep.subr.mxu0 %v7122_v4  ;;  %8217 = vmatprep.mubr.f32.mxu0 %v1214_v10 }
 0x3b4   :  { %8255 = vmatprep.mubr.f32.mxu1 %v1349_v7  ;;  %8259 = vmatpush3.msra.mxu0 %v7122_v4 }
 0x3b5   :  { %8260 = vmatprep.subr.mxu0 %v7121_v11 }
 0x3b6   :  { %8261 = vmatpush3.msra.mxu0 %v7121_v11  ;;  %8256 = vmatmul.mubr.f32.gmra.mxu1 %v1350_v35 }
 0x3b7   :  { %8218 = vmatmul.mubr.f32.gmra.mxu0 %v1215_v16  ;;  %8262 = vmatprep.subr.mxu0 %v7120_v37 }
 0x3b8   :  { %8263 = vmatpush3.msra.mxu0 %v7120_v37  ;;  %8290 = vmatprep.mubr.f32.mxu0 %v1482_v39 }
 0x3b9   :  { %8264 = vmatprep.subr.mxu0 %v7119_v41 }
 0x3ba   :  { %8265 = vmatpush3.msra.mxu0 %v7119_v41 }
 0x3bb   :  { %8266 = vmatprep.subr.mxu0 %v7118_v42 }
 0x3bc   :  { %8267 = vmatpush3.msra.mxu0 %v7118_v42 }
 0x3bd   :  { %8268 = vmatprep.subr.mxu0 %v7117_v43 }
 0x3be   :  { %8269 = vmatpush3.msra.mxu0 %v7117_v43 }
 0x3bf   :  { %8270 = vmatprep.subr.mxu0 %v7116_v51 }
 0x3c0   :  { %8271 = vmatpush3.msra.mxu0 %v7116_v51 }
 0x3c1   :  { %8272 = vmatprep.subr.mxu0 %v7115_v44 }
 0x3c2   :  { %8273 = vmatpush3.msra.mxu0 %v7115_v44 }
 0x3c3   :  { %8274 = vmatprep.subr.mxu0 %v7114_v45 }
 0x3c4   :  { %8275 = vmatpush3.msra.mxu0 %v7114_v45 }
 0x3c5   :  { %8276 = vmatprep.subr.mxu0 %v7113_v46 }
 0x3c6   :  { %8277 = vmatpush3.msra.mxu0 %v7113_v46 }
 0x3c7   :  { %8278 = vmatprep.subr.mxu0 %v7112_v47 }
 0x3c8   :  { %8279 = vmatpush3.msra.mxu0 %v7112_v47 }
 0x3c9   :  { %8280 = vmatprep.subr.mxu0 %v7111_v48 }
 0x3ca   :  { %8281 = vmatpush3.msra.mxu0 %v7111_v48 }
 0x3cb   :  { %8282 = vmatprep.subr.mxu0 %v7110_v52 }
 0x3cc   :  { %8283 = vmatpush3.msra.mxu0 %v7110_v52 }
 0x3cd   :  { %8284 = vmatprep.subr.mxu0 %v7109_v53 }
 0x3ce   :  { %8285 = vmatpush3.msra.mxu0 %v7109_v53 }
 0x3cf   :  { %8286 = vmatprep.subr.mxu0 %v7108_v55 }
 0x3d0   :  { %8287 = vmatpush3.msra.mxu0 %v7108_v55 }
 0x3d1   :  { %8288 = vmatprep.subr.mxu0 %v7107_v56 }
 0x3d2   :  { %8289 = vmatpush3.msra.mxu0 %v7107_v56 }
 0x3d3   :  { %8291 = vmatmul.mubr.f32.vlgmr.msra.gmra.mxu0 %v1483_v58  ;;  %8348 = vmatprep.subr.mxu0 %v9944_v6 }
 0x3d4   :  { %8293 = vmatprep.mubr.f32.mxu0 %v1484_v0  ;;  %8349 = vmatpush3.msra.mxu0 %v9944_v6 }
 0x3d5   :  { %8350 = vmatprep.subr.mxu0 %v9952_v21 }
 0x3d6   :  { %8351 = vmatpush3.msra.mxu0 %v9952_v21 }
 0x3d7   :  { %8294 = vmatmul.mubr.f32.gmra.mxu0 %v1485_v1  ;;  %8352 = vmatprep.subr.mxu0 %v9964_v23 }
 0x3d8   :  { %8353 = vmatpush3.msra.mxu0 %v9964_v23 }
 0x3d9   :  { %8354 = vmatprep.subr.mxu0 %v9971_v24 }
 0x3da   :  { %8355 = vmatpush3.msra.mxu0 %v9971_v24 }
 0x3db   :  { %8356 = vmatprep.subr.mxu0 %v9979_v25 }
 0x3dc   :  { %8357 = vmatpush3.msra.mxu0 %v9979_v25 }
 0x3dd   :  { %8358 = vmatprep.subr.mxu0 %v9986_v26 }
 0x3de   :  { %8359 = vmatpush3.msra.mxu0 %v9986_v26 }
 0x3df   :  { %8360 = vmatprep.subr.mxu0 %v9993_v27 }
 0x3e0   :  { %8361 = vmatpush3.msra.mxu0 %v9993_v27 }
 0x3e1   :  { %8362 = vmatprep.subr.mxu0 %v10000_v28 }
 0x3e2   :  { %8363 = vmatpush3.msra.mxu0 %v10000_v28 }
 0x3e3   :  { %8364 = vmatprep.subr.mxu0 %v10007_v29 }
 0x3e4   :  { %8365 = vmatpush3.msra.mxu0 %v10007_v29 }
 0x3e5   :  { %8366 = vmatprep.subr.mxu0 %v10014_v30 }
 0x3e6   :  { %8367 = vmatpush3.msra.mxu0 %v10014_v30 }
 0x3e7   :  { %8368 = vmatprep.subr.mxu0 %v10021_v31 }
 0x3e8   :  { %8369 = vmatpush3.msra.mxu0 %v10021_v31 }
 0x3e9   :  { %8370 = vmatprep.subr.mxu0 %v10028_v32 }
 0x3ea   :  { %8371 = vmatpush3.msra.mxu0 %v10028_v32 }
 0x3eb   :  { %8372 = vmatprep.subr.mxu0 %v10035_v33 }
 0x3ec   :  { %8373 = vmatpush3.msra.mxu0 %v10035_v33 }
 0x3ed   :  { %8374 = vmatprep.subr.mxu0 %v10042_v34 }
 0x3ee   :  { %8375 = vmatpush3.msra.mxu0 %v10042_v34 }
 0x3ef   :  { %8376 = vmatprep.subr.mxu0 %v10054_v36 }
 0x3f0   :  { %8377 = vmatpush3.msra.mxu0 %v10054_v36 }
 0x3f1   :  { %8378 = vmatprep.subr.mxu0 %v10064_v38 }
 0x3f2   :  { %8379 = vmatpush3.msra.mxu0 %v10064_v38 }
 0x3f3   :  { %8424 = vmatprep.subr.mxu0 %v10074_v40 }
 0x407   :  { %v7988_v6 = vpop.f32.mrf.mxu0  ;;  %v8026_v23 = vpop.f32.mrf.mxu1 }
 0x408   :  { %v634_v2 = vadd.f32 %v8026_v23, %v7988_v6 }
 0x409   :  { %v543_v21 = vpop.f32.mrf.mxu0  ;;  %v628_v25 = vpop.f32.mrf.mxu1 }
 0x40a   :  { %v629_v35 = vadd.f32 %v628_v25, %v543_v21 }
 0x40d   :  { %v7991_v24 = vpop.f32.mrf.mxu0  ;;  %v8029_v27 = vpop.f32.mrf.mxu1 }
 0x40e   :  { %v644_v9 = vadd.f32 %v8029_v27, %v7991_v24 }
 0x40f   :  { %v553_v26 = vpop.f32.mrf.mxu0  ;;  %v638_v29 = vpop.f32.mrf.mxu1 }
 0x410   :  { %v639_v13 = vadd.f32 %v638_v29, %v553_v26 }
 0x42a   :  { %v8064_v28 = vpop.f32.mrf.mxu0  ;;  %v8102_v31 = vpop.f32.mrf.mxu1 }
 0x42b   :  { %v779_v5 = vadd.f32 %v8064_v28, %v634_v2 }
 0x42c   :  { %v759_v30 = vpop.f32.mrf.mxu0  ;;  %v894_v33 = vpop.f32.mrf.mxu1 }
 0x42d   :  { %v914_v15 = vadd.f32 %v8102_v31, %v779_v5  ;;  %v778_v41 = vadd.f32 %v759_v30, %v629_v35  ;;  %v9621_v31 = vmov 2   ;;  %v9329_v35 = vld [vmem:[%s13001_s13 + $0x10] sm:$0xff] }
 0x42e   :  { %9188 = vset.pattern.permute.xlu0 %v9621_v31  ;;  %9187 = vset.pattern.permute.xlu1 %v9621_v31 }
 0x42f   :  { %v913_v48 = vadd.f32 %v894_v33, %v778_v41  ;;  %v9330_v41 = vld [vmem:[%s13001_s13 + $0x18] sm:$0xff] }
 0x430   :  { %v8067_v32 = vpop.f32.mrf.mxu0  ;;  %v8105_v36 = vpop.f32.mrf.mxu1 }
 0x431   :  { %v781_v17 = vadd.f32 %v8067_v32, %v644_v9 }
 0x432   :  { %v769_v34 = vpop.f32.mrf.mxu0  ;;  %v904_v54 = vpop.f32.mrf.mxu1 }
 0x433   :  { %v780_v63 = vadd.f32 %v769_v34, %v639_v13  ;;  %v916_v4 = vadd.f32 %v8105_v36, %v781_v17 }
 0x435   :  { %v915_v10 = vadd.f32 %v904_v54, %v780_v63 }
 0x44e   :  { %v8140_v49 = vpop.f32.mrf.mxu0  ;;  %v8178_v61 = vpop.f32.mrf.mxu1 }
 0x44f   :  { %v1049_v18 = vadd.f32 %v8140_v49, %v914_v15 }
 0x450   :  { %v1029_v38 = vpop.f32.mrf.mxu0  ;;  %v1164_v3 = vpop.f32.mrf.mxu1 }
 0x451   :  { %v1184_v7 = vadd.f32 %v8178_v61, %v1049_v18  ;;  %v1048_v56 = vadd.f32 %v1029_v38, %v913_v48  ;;  %v9332_v48 = vld [vmem:[%s13001_s13] sm:$0xff] }
 0x453   :  { %v1183_v21 = vadd.f32 %v1164_v3, %v1048_v56  ;;  %v13019_v56 = vmov 3  }
 0x454   :  { %v8143_v40 = vpop.f32.mrf.mxu0  ;;  %v8181_v12 = vpop.f32.mrf.mxu1 }
 0x455   :  { %v1051_v11 = vadd.f32 %v8143_v40, %v916_v4 }
 0x456   :  { %v1039_v50 = vpop.f32.mrf.mxu0  ;;  %v1174_v8 = vpop.f32.mrf.mxu1 }
 0x457   :  { %v1050_v37 = vadd.f32 %v1039_v50, %v915_v10  ;;  %v1186_v42 = vadd.f32 %v8181_v12, %v1051_v11 }
 0x459   :  { %v1185_v51 = vadd.f32 %v1174_v8, %v1050_v37 }
 0x472   :  { %v8216_v60 = vpop.f32.mrf.mxu0  ;;  %v8254_v20 = vpop.f32.mrf.mxu1 }
 0x473   :  { %v1319_v16 = vadd.f32 %v8216_v60, %v1184_v7 }
 0x474   :  { %v1299_v19 = vpop.f32.mrf.mxu0  ;;  %v1434_v39 = vpop.f32.mrf.mxu1 }
 0x475   :  { %v1454_v44 = vadd.f32 %v8254_v20, %v1319_v16  ;;  %v1318_v24 = vadd.f32 %v1299_v19, %v1183_v21 }
 0x476   :  { %v8257_v46 = vpop.f32.mrf.mxu1 }
 0x477   :  { %v8219_v22 = vpop.f32.mrf.mxu0  ;;  %v1453_v27 = vadd.f32 %v1434_v39, %v1318_v24 }
 0x478   :  { %v1321_v45 = vadd.f32 %v8219_v22, %v1186_v42  ;;  %v1444_v58 = vpop.f32.mrf.mxu1 }
 0x479   :  { %v1309_v43 = vpop.f32.mrf.mxu0 }
 0x47a   :  { %v1320_v52 = vadd.f32 %v1309_v43, %v1185_v51  ;;  %v1456_v57 = vadd.f32 %v8257_v46, %v1321_v45 }
 0x47c   :  { %v1455_v0 = vadd.f32 %v1444_v58, %v1320_v52 }
 0x493   :  { %v8292_v47 = vpop.f32.mrf.mxu0 }
 0x494   :  { %v10521_v53 = vadd.f32 %v8292_v47, %v1454_v44  ;;  %v9331_v44 = vld [vmem:[%s13001_s13 + $0x8] sm:$0xff] }
 0x495   :  { %v1569_v55 = vpop.f32.mrf.mxu0 }
 0x496   :  { %1594 = vadd.xlane.f32.xlu0 %v10521_v53  ;;  %v1605_v28 = vmul.f32 %v10521_v53, %v10521_v53  ;;  %v10536_v29 = vadd.f32 %v1569_v55, %v1453_v27  ;;  %v7135_v27 = vld [vmem:[%s13002_s5 + $0x140] sm:$0xff] }
 0x497   :  { %v8295_v62 = vpop.f32.mrf.mxu0 }
 0x498   :  { %v10524_v1 = vadd.f32 %v8295_v62, %v1456_v57  ;;  %v1604_v30 = vmul.f32 %v10536_v29, %v10536_v29 }
 0x499   :  { %v1579_v6 = vpop.f32.mrf.mxu0 }
 0x49a   :  { %v10526_v23 = vadd.f32 %v1579_v6, %v1455_v0  ;;  %1598 = vadd.xlane.f32.xlu1 %v10524_v1  ;;  %v1607_v26 = vmul.f32 %v10524_v1, %v10524_v1 }
 0x49c   :  { %1596 = vadd.xlane.f32.xlu0 %v10526_v23  ;;  %v1606_v25 = vmul.f32 %v10526_v23, %v10526_v23 }
 0x49e   :  { %1612 = vadd.xlane.f32.xlu1 %v1606_v25 }
 0x4a0   :  { %1614 = vadd.xlane.f32.xlu0 %v1607_v26  ;;  %v7123_v26 = vld [vmem:[%s13003_s4 + $0x20] sm:$0xff] }
 0x4a1   :  { %8304 = vmatprep.mubr.msk.f32.mxu1 %vm289_vm1, %v7123_v26  ;;  %v7126_v26 = vld [vmem:[%s13003_s4 + $0x38] sm:$0xff] }
 0x4a2   :  { %1610 = vadd.xlane.f32.xlu1 %v1605_v28  ;;  %v7137_v28 = vld [vmem:[%s13002_s5 + $0x150] sm:$0xff] }
 0x4a4   :  { %1592 = vadd.xlane.f32.xlu0 %v10536_v29 }
 0x4a8   :  { %1608 = vadd.xlane.f32.xlu0 %v1604_v30  ;;  %v7138_v30 = vld [vmem:[%s13002_s5 + $0x158] sm:$0xff] }
 0x51f   :  { %v1595_v32 = vpop.xlane.xlu0 %1594 }
 0x520   :  { %v1601_v38 = vmul.f32 0.0078125, %v1595_v32  ;;  %v7136_v32 = vld [vmem:[%s13002_s5 + $0x148] sm:$0xff] }
 0x522   :  { %v1621_v12 = vmul.f32 %v1601_v38, %v1601_v38 }
 0x523   :  { %v1599_v33 = vpop.xlane.xlu1 %1598 }
 0x524   :  { %v1603_v36 = vmul.f32 0.0078125, %v1599_v33  ;;  %v7131_v33 = vld [vmem:[%s13002_s5 + $0x120] sm:$0xff] }
 0x525   :  { %v1597_v34 = vpop.xlane.xlu0 %1596 }
 0x526   :  { %v1602_v49 = vmul.f32 0.0078125, %v1597_v34  ;;  %v1623_v3 = vmul.f32 %v1603_v36, %v1603_v36  ;;  %v7132_v34 = vld [vmem:[%s13002_s5 + $0x128] sm:$0xff] }
 0x527   :  { %v1613_v54 = vpop.xlane.xlu1 %1612 }
 0x528   :  { %v1622_v61 = vmul.f32 %v1602_v49, %v1602_v49  ;;  %v1618_v40 = vmul.f32 0.0078125, %v1613_v54  ;;  %v7133_v54 = vld [vmem:[%s13002_s5 + $0x130] sm:$0xff] }
 0x529   :  { %v1615_v2 = vpop.xlane.xlu0 %1614 }
 0x52a   :  { %v1626_v5 = vsub.f32 %v1618_v40, %v1622_v61  ;;  %v1619_v50 = vmul.f32 0.0078125, %v1615_v2  ;;  %v7141_v61 = vld [vmem:[%s13002_s5 + $0x170] sm:$0xff]  ;;  %v7142_v40 = vld [vmem:[%s13002_s5 + $0x178] sm:$0xff]  ;;  %v7143_v2 = vld [vmem:[%s13002_s5 + $0x180] sm:$0xff] }
 0x52b   :  { %v1611_v9 = vpop.xlane.xlu1 %1610 }
 0x52c   :  { %v1630_v60 = vadd.f32 1e-05, %v1626_v5  ;;  %v1627_v13 = vsub.f32 %v1619_v50, %v1623_v3  ;;  %v1617_v15 = vmul.f32 0.0078125, %v1611_v9  ;;  %v7144_v3 = vld [vmem:[%s13002_s5 + $0x188] sm:$0xff]  ;;  %v7147_v5 = vld [vmem:[%s13002_s5 + $0x1a0] sm:$0xff]  ;;  %v7145_v9 = vld [vmem:[%s13002_s5 + $0x190] sm:$0xff] }
 0x52d   :  { %v1593_v17 = vpop.xlane.xlu0 %1592  ;;  %v7148_v50 = vld [vmem:[%s13002_s5 + $0x1a8] sm:$0xff] }
 0x52e   :  { %9227 = vrsqrt.f32 %v1630_v60  ;;  %v1631_v63 = vadd.f32 1e-05, %v1627_v13  ;;  %v1625_v18 = vsub.f32 %v1617_v15, %v1621_v12  ;;  %v1600_v8 = vmul.f32 0.0078125, %v1593_v17  ;;  %v7146_v12 = vld [vmem:[%s13002_s5 + $0x198] sm:$0xff]  ;;  %v7149_v60 = vld [vmem:[%s13002_s5 + $0x1b0] sm:$0xff]  ;;  %v7151_v15 = vld [vmem:[%s13002_s5 + $0x1c0] sm:$0xff] }
 0x52f   :  { %v7150_v13 = vld [vmem:[%s13002_s5 + $0x1b8] sm:$0xff]  ;;  %v7152_v17 = vld [vmem:[%s13002_s5 + $0x1c8] sm:$0xff] }
 0x530   :  { %9229 = vrsqrt.f32 %v1631_v63  ;;  %v1629_v19 = vadd.f32 1e-05, %v1625_v18  ;;  %v1620_v20 = vmul.f32 %v1600_v8, %v1600_v8  ;;  %v7155_v63 = vld [vmem:[%s13002_s5 + $0x1e0] sm:$0xff]  ;;  %v7156_v18 = vld [vmem:[%s13002_s5 + $0x1e8] sm:$0xff] }
 0x531   :  { %v1609_v4 = vpop.xlane.xlu0 %1608 }
 0x532   :  { %9231 = vrsqrt.f32 %v1629_v19  ;;  %v1616_v10 = vmul.f32 0.0078125, %v1609_v4  ;;  %v7154_v19 = vld [vmem:[%s13002_s5 + $0x1d8] sm:$0xff]  ;;  %v7157_v4 = vld [vmem:[%s13002_s5 + $0x1f0] sm:$0xff] }
 0x534   :  { %v1624_v7 = vsub.f32 %v1616_v10, %v1620_v20  ;;  %v7158_v20 = vld [vmem:[%s13002_s5 + $0x1f8] sm:$0xff]  ;;  %v7159_v10 = vld [vmem:[%s13002_s5 + $0x200] sm:$0xff] }
 0x536   :  { %v1628_v11 = vadd.f32 1e-05, %v1624_v7  ;;  %v7160_v7 = vld [vmem:[%s13002_s5 + $0x208] sm:$0xff] }
 0x538   :  { %9233 = vrsqrt.f32 %v1628_v11  ;;  %v7163_v11 = vld [vmem:[%s13002_s5 + $0x220] sm:$0xff] }
 0x53b   :  { %v9228_v22 = vpop.eup %9227 }
 0x53c   :  { %v1638_v37 = vmul.f32 %v9329_v35, %v9228_v22  ;;  %v7164_v22 = vld [vmem:[%s13002_s5 + $0x228] sm:$0xff] }
 0x53d   :  { %v9230_v16 = vpop.eup %9229 }
 0x53e   :  { %v1666_v39 = vmul.f32 %v1638_v37, %v1602_v49  ;;  %v1639_v42 = vmul.f32 %v9330_v41, %v9230_v16  ;;  %v7140_v49 = vld [vmem:[%s13002_s5 + $0x168] sm:$0xff]  ;;  %v7165_v16 = vld [vmem:[%s13002_s5 + $0x230] sm:$0xff] }
 0x53f   :  { %v9232_v43 = vpop.eup %9231 }
 0x540   :  { %1676 = vrot.lane.b32.xlu0 %v1666_v39, %s9619_s20  ;;  %v1667_v51 = vmul.f32 %v1639_v42, %v1603_v36  ;;  %v1637_v45 = vmul.f32 %v9331_v44, %v9232_v43  ;;  %v7139_v36 = vld [vmem:[%s13002_s5 + $0x160] sm:$0xff]  ;;  %v7166_v39 = vld [vmem:[%s13002_s5 + $0x238] sm:$0xff] }
 0x542   :  { %1678 = vrot.lane.b32.xlu1 %v1667_v51, %s9619_s20  ;;  %v1665_v46 = vmul.f32 %v1637_v45, %v1601_v38  ;;  %v7134_v38 = vld [vmem:[%s13002_s5 + $0x138] sm:$0xff] }
 0x544   :  { %1652 = vperm.xlu0 %9188, %v1638_v37   ;;  %v7162_v37 = vld [vmem:[%s13002_s5 + $0x218] sm:$0xff] }
 0x545   :  { %v9234_v47 = vpop.eup %9233 }
 0x546   :  { %1674 = vrot.lane.b32.xlu1 %v1665_v46, %s9619_s20  ;;  %v1636_v52 = vmul.f32 %v9332_v48, %v9234_v47 }
 0x548   :  { %v1664_v55 = vmul.f32 %v1636_v52, %v1600_v8  ;;  %9190 = vset.pattern.permute.xlu0 %v13019_v56  ;;  %v7153_v8 = vld [vmem:[%s13002_s5 + $0x1d0] sm:$0xff] }
 0x54a   :  { %1672 = vrot.lane.b32.xlu1 %v1664_v55, %s9619_s20 }
 0x54e   :  { %1657 = vperm.xlu1 %9187, %v1639_v42  }
 0x552   :  { %1647 = vperm.xlu1 %9187, %v1637_v45  }
 0x556   :  { %1642 = vperm.xlu1 %9187, %v1636_v52  }
 0x55a   :  { %9189 = vset.pattern.permute.xlu1 %v13019_v56 }
 0x5b2   :  { %v1677_v57 = vpop.permute.xlu0 %1676 }
 0x5b3   :  { %v1686_v58 = vsub.f32 %v9329_v35, %v1677_v57  ;;  %v7161_v35 = vld [vmem:[%s13002_s5 + $0x210] sm:$0xff] }
 0x5b4   :  { %v1679_v62 = vpop.permute.xlu1 %1678 }
 0x5b5   :  { %v1687_v0 = vsub.f32 %v9330_v41, %v1679_v62  ;;  %1700 = vperm.xlu0 %9190, %v1686_v58  }
 0x5b7   :  { %1705 = vperm.xlu1 %9189, %v1687_v0  }
 0x5b8   :  { %v1675_v6 = vpop.permute.xlu1 %1674 }
 0x5b9   :  { %v1685_v21 = vsub.f32 %v9331_v44, %v1675_v6 }
 0x5bb   :  { %1695 = vperm.xlu1 %9189, %v1685_v21  }
 0x5bc   :  { %v1673_v24 = vpop.permute.xlu1 %1672 }
 0x5bd   :  { %v1684_v25 = vsub.f32 %v9332_v48, %v1673_v24  ;;  %v7124_v24 = vld [vmem:[%s13003_s4 + $0x28] sm:$0xff] }
 0x5bf   :  { %1690 = vperm.xlu0 %9190, %v1684_v25   ;;  %9191 = vset.pattern.permute.xlu1 %v13024_v14  ;;  %v1653_v43 = vpop.permute.xlu0 %1652  ;;  %v9333_v25 = vld [vmem:[%s13004_s1 + $0xf8] sm:$0xff] }
 0x5c0   :  { %1854 = vperm.xlu1 %9191, %v7135_v27   ;;  %v1662_v45 = vmul.f32 %v1653_v43, %v10526_v23  ;;  %v9334_v27 = vld [vmem:[%s13004_s1 + $0xf0] sm:$0xff] }
 0x5c1   :  { %v9352_v43 = vld [vmem:[%s13004_s1 + $0x1f0] sm:$0xff] }
 0x5c3   :  { %9192 = vset.pattern.permute.xlu0 %v13024_v14 }
 0x5c4   :  { %1864 = vperm.xlu1 %9191, %v7137_v28   ;;  %1859 = vperm.xlu0 %9192, %v7136_v32   ;;  %v9335_v28 = vld [vmem:[%s13004_s1 + $0xe8] sm:$0xff]  ;;  %v9337_v32 = vld [vmem:[%s13004_s1 + $0xd8] sm:$0xff] }
 0x5c8   :  { %1869 = vperm.xlu1 %9191, %v7138_v30   ;;  %1825 = vperm.xlu0 %9192, %v7131_v33   ;;  %v9336_v30 = vld [vmem:[%s13004_s1 + $0xe0] sm:$0xff]  ;;  %v9338_v33 = vld [vmem:[%s13004_s1 + $0xd0] sm:$0xff] }
 0x5c9   :  { %v1658_v41 = vpop.permute.xlu1 %1657 }
 0x5ca   :  { %v1663_v46 = vmul.f32 %v1658_v41, %v10524_v1 }
 0x5cc   :  { %1830 = vperm.xlu1 %9191, %v7132_v34   ;;  %2053 = vperm.xlu0 %9192, %v7139_v36   ;;  %v9339_v34 = vld [vmem:[%s13004_s1 + $0xc8] sm:$0xff]  ;;  %v9340_v36 = vld [vmem:[%s13004_s1 + $0xc0] sm:$0xff] }
 0x5cd   :  { %v1648_v42 = vpop.permute.xlu1 %1647 }
 0x5ce   :  { %v1661_v55 = vmul.f32 %v1648_v42, %v10521_v53  ;;  %v9351_v42 = vld [vmem:[%s13004_s1 + $0x170] sm:$0xff] }
 0x5d0   :  { %2058 = vperm.xlu1 %9191, %v7140_v49   ;;  %1835 = vperm.xlu0 %9192, %v7133_v54   ;;  %v9341_v49 = vld [vmem:[%s13004_s1 + $0xb8] sm:$0xff]  ;;  %v9342_v54 = vld [vmem:[%s13004_s1 + $0xb0] sm:$0xff] }
 0x5d1   :  { %v1643_v51 = vpop.permute.xlu1 %1642 }
 0x5d2   :  { %v1660_v6 = vmul.f32 %v1643_v51, %v10536_v29  ;;  %v7125_v29 = vld [vmem:[%s13003_s4 + $0x30] sm:$0xff] }
 0x5d4   :  { %1840 = vperm.xlu1 %9191, %v7134_v38   ;;  %2063 = vperm.xlu0 %9192, %v7141_v61   ;;  %v9343_v38 = vld [vmem:[%s13004_s1 + $0xa8] sm:$0xff]  ;;  %v9344_v61 = vld [vmem:[%s13004_s1 + $0xa0] sm:$0xff] }
 0x5d8   :  { %2068 = vperm.xlu1 %9191, %v7142_v40   ;;  %2171 = vperm.xlu0 %9192, %v7143_v2   ;;  %v9345_v40 = vld [vmem:[%s13004_s1 + $0x98] sm:$0xff]  ;;  %v9346_v2 = vld [vmem:[%s13004_s1 + $0x90] sm:$0xff] }
 0x5dc   :  { %2176 = vperm.xlu1 %9191, %v7144_v3   ;;  %2289 = vperm.xlu0 %9192, %v7147_v5   ;;  %v9347_v3 = vld [vmem:[%s13004_s1 + $0x88] sm:$0xff]  ;;  %v9348_v5 = vld [vmem:[%s13004_s1 + $0x80] sm:$0xff] }
 0x5e0   :  { %2294 = vperm.xlu1 %9191, %v7148_v50   ;;  %2181 = vperm.xlu0 %9192, %v7145_v9   ;;  %v9349_v50 = vld [vmem:[%s13004_s1 + $0x178] sm:$0xff] }
 0x5e4   :  { %2186 = vperm.xlu1 %9191, %v7146_v12   ;;  %2299 = vperm.xlu0 %9192, %v7149_v60  }
 0x5e8   :  { %2304 = vperm.xlu1 %9191, %v7150_v13   ;;  %2407 = vperm.xlu0 %9192, %v7151_v15  }
 0x5ec   :  { %2412 = vperm.xlu1 %9191, %v7152_v17   ;;  %2525 = vperm.xlu0 %9192, %v7155_v63  }
 0x5f0   :  { %2530 = vperm.xlu1 %9191, %v7156_v18   ;;  %2417 = vperm.xlu0 %9192, %v7153_v8  }
 0x5f4   :  { %2422 = vperm.xlu1 %9191, %v7154_v19   ;;  %2535 = vperm.xlu0 %9192, %v7157_v4  }
 0x5f8   :  { %2540 = vperm.xlu1 %9191, %v7158_v20   ;;  %2643 = vperm.xlu0 %9192, %v7159_v10  }
 0x5fc   :  { %2648 = vperm.xlu1 %9191, %v7160_v7   ;;  %2761 = vperm.xlu0 %9192, %v7163_v11  }
 0x600   :  { %2766 = vperm.xlu1 %9191, %v7164_v22   ;;  %2653 = vperm.xlu0 %9192, %v7161_v35  }
 0x604   :  { %2658 = vperm.xlu1 %9191, %v7162_v37   ;;  %2771 = vperm.xlu0 %9192, %v7165_v16   ;;  %v10777_v16 = vld [vmem:[%s13004_s1 + $0x1f8] sm:$0xff] }
 0x608   :  { %2776 = vperm.xlu1 %9191, %v7166_v39  }
 0x630   :  { %v1701_v44 = vpop.permute.xlu0 %1700 }
 0x631   :  { %v1710_v48 = vadd.f32 %v1701_v44, %v1662_v45 }
 0x632   :  { %v1706_v47 = vpop.permute.xlu1 %1705 }
 0x633   :  { %v1711_v52 = vadd.f32 %v1706_v47, %v1663_v46  ;;  %v10680_v62 = vmax.f32 %v1710_v48, 0.0  ;;  %v9353_v46 = vld [vmem:[%s13004_s1 + $0x168] sm:$0xff] }
 0x634   :  { %v9354_v47 = vld [vmem:[%s13004_s1 + $0x1e8] sm:$0xff] }
 0x635   :  { %v10678_v57 = vmax.f32 %v1711_v52, 0.0 }
 0x636   :  { %v1696_v58 = vpop.permute.xlu1 %1695 }
 0x637   :  { %v1709_v0 = vadd.f32 %v1696_v58, %v1661_v55  ;;  %8296 = vmatprep.subr.mxu1 %v10678_v57  ;;  %v9355_v58 = vld [vmem:[%s13004_s1 + $0x160] sm:$0xff] }
 0x638   :  { %8297 = vmatpush3.msra.mxu1 %v10678_v57 }
 0x639   :  { %v10685_v23 = vmax.f32 %v1709_v0, 0.0  ;;  %8298 = vmatprep.subr.mxu1 %v10680_v62  ;;  %v9356_v0 = vld [vmem:[%s13004_s1 + $0x1e0] sm:$0xff] }
 0x63a   :  { %8299 = vmatpush3.msra.mxu1 %v10680_v62  ;;  %v1691_v1 = vpop.permute.xlu0 %1690 }
 0x63b   :  { %v1708_v53 = vadd.f32 %v1691_v1, %v1660_v6  ;;  %8300 = vmatprep.subr.mxu1 %v10685_v23  ;;  %v1855_v9 = vpop.permute.xlu1 %1854  ;;  %v9357_v6 = vld [vmem:[%s13004_s1 + $0x158] sm:$0xff] }
 0x63c   :  { %8301 = vmatpush3.msra.mxu1 %v10685_v23  ;;  %v9358_v1 = vld [vmem:[%s13004_s1 + $0x1d8] sm:$0xff] }
 0x63d   :  { %v10691_v21 = vmax.f32 %v1708_v53, 0.0  ;;  %v9359_v53 = vld [vmem:[%s13004_s1 + $0x150] sm:$0xff] }
 0x63f   :  { %8302 = vmatprep.subr.mxu1 %v10691_v21  ;;  %v1860_v12 = vpop.permute.xlu0 %1859  ;;  %v1865_v60 = vpop.permute.xlu1 %1864 }
 0x640   :  { %8303 = vmatpush3.msra.mxu1 %v10691_v21 }
 0x641   :  { %8305 = vmatmul.mubr.msk.f32.vlgmr.msra.gmra.mxu1 %vm289_vm1, %v7124_v24  ;;  %8310 = vmatprep.subr.mxu1 %v9333_v25  ;;  %v9360_v24 = vld [vmem:[%s13004_s1 + $0x1d0] sm:$0xff] }
 0x642   :  { %8307 = vmatprep.mubr.msk.f32.mxu1 %vm289_vm1, %v7125_v29  ;;  %8311 = vmatpush3.msra.mxu1 %v9333_v25  ;;  %v9361_v29 = vld [vmem:[%s13004_s1 + $0x148] sm:$0xff] }
 0x643   :  { %8312 = vmatprep.subr.mxu1 %v9334_v27  ;;  %v1826_v13 = vpop.permute.xlu0 %1825  ;;  %v1870_v15 = vpop.permute.xlu1 %1869  ;;  %v9362_v25 = vld [vmem:[%s13004_s1 + $0x1c8] sm:$0xff] }
 0x644   :  { %8313 = vmatpush3.msra.mxu1 %v9334_v27  ;;  %v9364_v27 = vld [vmem:[%s13004_s1 + $0x1c0] sm:$0xff] }
 0x645   :  { %8308 = vmatmul.mubr.msk.f32.gmra.mxu1 %vm289_vm1, %v7126_v26  ;;  %8314 = vmatprep.subr.mxu1 %v9335_v28  ;;  %v9363_v26 = vld [vmem:[%s13004_s1 + $0x140] sm:$0xff] }
 0x646   :  { %8315 = vmatpush3.msra.mxu1 %v9335_v28  ;;  %v9365_v28 = vld [vmem:[%s13004_s1 + $0x138] sm:$0xff] }
 0x647   :  { %8316 = vmatprep.subr.mxu1 %v9336_v30  ;;  %v2054_v17 = vpop.permute.xlu0 %2053  ;;  %v1831_v63 = vpop.permute.xlu1 %1830 }
 0x648   :  { %8317 = vmatpush3.msra.mxu1 %v9336_v30  ;;  %v9366_v30 = vld [vmem:[%s13004_s1 + $0x1b8] sm:$0xff] }
 0x649   :  { %8318 = vmatprep.subr.mxu1 %v9337_v32 }
 0x64a   :  { %8319 = vmatpush3.msra.mxu1 %v9337_v32 }
 0x64b   :  { %8320 = vmatprep.subr.mxu1 %v9338_v33  ;;  %v1836_v18 = vpop.permute.xlu0 %1835  ;;  %v10762_v4 = vpop.permute.xlu1 %2058 }
 0x64c   :  { %8321 = vmatpush3.msra.mxu1 %v9338_v33  ;;  %v9367_v33 = vld [vmem:[%s13004_s1 + $0x130] sm:$0xff] }
 0x64d   :  { %8322 = vmatprep.subr.mxu1 %v9339_v34 }
 0x64e   :  { %8323 = vmatpush3.msra.mxu1 %v9339_v34  ;;  %v9368_v34 = vld [vmem:[%s13004_s1 + $0x1b0] sm:$0xff] }
 0x64f   :  { %8324 = vmatprep.subr.mxu1 %v9340_v36  ;;  %v10770_v35 = vpop.permute.xlu0 %2063  ;;  %v1841_v51 = vpop.permute.xlu1 %1840 }
 0x650   :  { %8325 = vmatpush3.msra.mxu1 %v9340_v36 }
 0x651   :  { %8326 = vmatprep.subr.mxu1 %v9341_v49 }
 0x652   :  { %8327 = vmatpush3.msra.mxu1 %v9341_v49  ;;  %v9369_v49 = vld [vmem:[%s13004_s1 + $0x128] sm:$0xff] }
 0x653   :  { %8328 = vmatprep.subr.mxu1 %v9342_v54  ;;  %v2172_v48 = vpop.permute.xlu0 %2171  ;;  %v10834_v32 = vpop.permute.xlu1 %2068 }
 0x654   :  { %8329 = vmatpush3.msra.mxu1 %v9342_v54  ;;  %v9370_v54 = vld [vmem:[%s13004_s1 + $0x1a8] sm:$0xff] }
 0x655   :  { %8330 = vmatprep.subr.mxu1 %v9343_v38 }
 0x656   :  { %8331 = vmatpush3.msra.mxu1 %v9343_v38  ;;  %v9371_v38 = vld [vmem:[%s13004_s1 + $0x120] sm:$0xff] }
 0x657   :  { %8332 = vmatprep.subr.mxu1 %v9344_v61  ;;  %v10842_v36 = vpop.permute.xlu0 %2289 }
 0x658   :  { %8333 = vmatpush3.msra.mxu1 %v9344_v61  ;;  %v9372_v61 = vld [vmem:[%s13004_s1 + $0x1a0] sm:$0xff] }
 0x659   :  { %8334 = vmatprep.subr.mxu1 %v9345_v40 }
 0x65a   :  { %8335 = vmatpush3.msra.mxu1 %v9345_v40  ;;  %v2177_v40 = vpop.permute.xlu1 %2176 }
 0x65b   :  { %8336 = vmatprep.subr.mxu1 %v9346_v2 }
 0x65c   :  { %8337 = vmatpush3.msra.mxu1 %v9346_v2  ;;  %v9373_v2 = vld [vmem:[%s13004_s1 + $0x118] sm:$0xff] }
 0x65d   :  { %8338 = vmatprep.subr.mxu1 %v9347_v3 }
 0x65e   :  { %8339 = vmatpush3.msra.mxu1 %v9347_v3  ;;  %v9374_v3 = vld [vmem:[%s13004_s1 + $0x198] sm:$0xff] }
 0x65f   :  { %8340 = vmatprep.subr.mxu1 %v9348_v5 }
 0x660   :  { %8341 = vmatpush3.msra.mxu1 %v9348_v5  ;;  %v2182_v5 = vpop.permute.xlu0 %2181 }
 0x661   :  { %8386 = vmatprep.subr.mxu1 %v9349_v50 }
 0x701   :  { %v10758_v8 = vpop.f32.mrf.mxu1 }
 0x702   :  { %v1873_v11 = vmul.f32 %v10758_v8, %v1860_v12  ;;  %v1844_v22 = vmul.f32 %v10758_v8, %v1831_v63  ;;  %v9377_v12 = vld [vmem:[%s13004_s1 + $0x108] sm:$0xff]  ;;  %v2072_v63 = vmul.f32 %v10758_v8, %v10762_v4  ;;  %v9382_v4 = vld [vmem:[%s13004_s1 + $0x2f8] sm:$0xff] }
 0x703   :  { %v10760_v19 = vpop.f32.mrf.mxu1 }
 0x704   :  { %v1872_v20 = vmul.f32 %v1855_v9, %v10760_v19  ;;  %v1843_v10 = vmul.f32 %v1826_v13, %v10760_v19  ;;  %v2071_v52 = vmul.f32 %v2054_v17, %v10760_v19  ;;  %v2189_v55 = vmul.f32 %v2172_v48, %v10760_v19  ;;  %v9376_v9 = vld [vmem:[%s13004_s1 + $0x190] sm:$0xff]  ;;  %v10874_v13 = vpop.permute.xlu1 %2294  ;;  %v9380_v17 = vld [vmem:[%s13004_s1 + $0x180] sm:$0xff] }
 0x705   :  { %v10766_v7 = vpop.f32.mrf.mxu1  ;;  %v9387_v48 = vld [vmem:[%s13004_s1 + $0x260] sm:$0xff] }
 0x706   :  { %8342 = vmatprep.mubr.f32.mxu1 %v1872_v20  ;;  %8380 = vmatprep.mubr.f32.mxu0 %v1843_v10  ;;  %v1875_v44 = vmul.f32 %v10766_v7, %v1870_v15  ;;  %v1846_v45 = vmul.f32 %v10766_v7, %v1841_v51  ;;  %v9379_v15 = vld [vmem:[%s13004_s1 + $0x100] sm:$0xff]  ;;  %v10885_v20 = vpop.permute.xlu0 %2299 }
 0x707   :  { %v10772_v37 = vpop.f32.mrf.mxu1  ;;  %8343 = vmatmul.mubr.f32.vlgmr.msra.gmra.mxu1 %v1873_v11  ;;  %8381 = vmatmul.mubr.f32.vlgmr.msra.gmra.mxu0 %v1844_v22  ;;  %v9381_v22 = vld [vmem:[%s13004_s1 + $0x278] sm:$0xff] }
 0x708   :  { %8387 = vmatpush3.msra.mxu1 %v9349_v50  ;;  %8425 = vmatpush3.msra.mxu0 %v10777_v16  ;;  %v1874_v39 = vmul.f32 %v1865_v60, %v10772_v37  ;;  %v1845_v41 = vmul.f32 %v1836_v18, %v10772_v37  ;;  %v9375_v50 = vld [vmem:[%s13004_s1 + $0x110] sm:$0xff]  ;;  %v9378_v60 = vld [vmem:[%s13004_s1 + $0x188] sm:$0xff]  ;;  %v2190_v18 = vmul.f32 %v10758_v8, %v2177_v40 }
 0x709   :  { %8388 = vmatprep.subr.mxu1 %v9351_v42  ;;  %8426 = vmatprep.subr.mxu0 %v9352_v43  ;;  %v2073_v10 = vmul.f32 %v10770_v35, %v10772_v37  ;;  %v2191_v11 = vmul.f32 %v2182_v5, %v10772_v37  ;;  %v9383_v35 = vld [vmem:[%s13004_s1 + $0x270] sm:$0xff]  ;;  %v9409_v5 = vld [vmem:[%s13004_s1 + $0x208] sm:$0xff] }
 0x70a   :  { %8389 = vmatpush3.msra.mxu1 %v9351_v42  ;;  %8427 = vmatpush3.msra.mxu0 %v9352_v43  ;;  %v2074_v42 = vmul.f32 %v10766_v7, %v10834_v32  ;;  %v2408_v51 = vpop.permute.xlu0 %2407 }
 0x70b   :  { %8345 = vmatprep.mubr.f32.mxu1 %v1874_v39  ;;  %8383 = vmatprep.mubr.f32.mxu0 %v1845_v41  ;;  %v2187_v39 = vpop.permute.xlu1 %2186  ;;  %v9384_v41 = vld [vmem:[%s13004_s1 + $0x2f0] sm:$0xff] }
 0x70c   :  { %8390 = vmatprep.subr.mxu1 %v9353_v46  ;;  %8428 = vmatprep.subr.mxu0 %v9354_v47  ;;  %v2192_v43 = vmul.f32 %v10766_v7, %v2187_v39 }
 0x70d   :  { %8346 = vmatmul.mubr.f32.gmra.mxu1 %v1875_v44  ;;  %8384 = vmatmul.mubr.f32.gmra.mxu0 %v1846_v45  ;;  %v2307_v44 = vmul.f32 %v10842_v36, %v10760_v19  ;;  %v9385_v45 = vld [vmem:[%s13004_s1 + $0x268] sm:$0xff]  ;;  %v9403_v36 = vld [vmem:[%s13004_s1 + $0x220] sm:$0xff] }
 0x70e   :  { %8391 = vmatpush3.msra.mxu1 %v9353_v46  ;;  %8429 = vmatpush3.msra.mxu0 %v9354_v47  ;;  %v9386_v46 = vld [vmem:[%s13004_s1 + $0x2e8] sm:$0xff]  ;;  %v2425_v47 = vmul.f32 %v2408_v51, %v10760_v19  ;;  %v10958_v32 = vpop.permute.xlu0 %2525 }
 0x70f   :  { %8392 = vmatprep.subr.mxu1 %v9355_v58  ;;  %8418 = vmatprep.mubr.f32.mxu1 %v2071_v52  ;;  %v9388_v52 = vld [vmem:[%s13004_s1 + $0x2e0] sm:$0xff]  ;;  %v9418_v51 = vld [vmem:[%s13004_s1 + $0x3e8] sm:$0xff] }
 0x710   :  { %8430 = vmatprep.subr.mxu0 %v9356_v0  ;;  %8456 = vmatprep.mubr.f32.mxu0 %v2189_v55  ;;  %v9389_v55 = vld [vmem:[%s13004_s1 + $0x258] sm:$0xff] }
 0x711   :  { %8393 = vmatpush3.msra.mxu1 %v9355_v58  ;;  %8431 = vmatpush3.msra.mxu0 %v9356_v0  ;;  %v9390_v58 = vld [vmem:[%s13004_s1 + $0x2d8] sm:$0xff]  ;;  %v9391_v0 = vld [vmem:[%s13004_s1 + $0x250] sm:$0xff] }
 0x712   :  { %8394 = vmatprep.subr.mxu1 %v9357_v6  ;;  %8432 = vmatprep.subr.mxu0 %v9358_v1  ;;  %v2418_v40 = vpop.permute.xlu0 %2417 }
 0x713   :  { %8395 = vmatpush3.msra.mxu1 %v9357_v6  ;;  %8433 = vmatpush3.msra.mxu0 %v9358_v1  ;;  %v9392_v6 = vld [vmem:[%s13004_s1 + $0x2d0] sm:$0xff]  ;;  %v9393_v1 = vld [vmem:[%s13004_s1 + $0x248] sm:$0xff] }
 0x714   :  { %8396 = vmatprep.subr.mxu1 %v9359_v53  ;;  %8434 = vmatprep.subr.mxu0 %v9360_v24 }
 0x715   :  { %8397 = vmatpush3.msra.mxu1 %v9359_v53  ;;  %8435 = vmatpush3.msra.mxu0 %v9360_v24  ;;  %v9394_v53 = vld [vmem:[%s13004_s1 + $0x2c8] sm:$0xff]  ;;  %v9395_v24 = vld [vmem:[%s13004_s1 + $0x240] sm:$0xff] }
 0x716   :  { %8398 = vmatprep.subr.mxu1 %v9361_v29  ;;  %8436 = vmatprep.subr.mxu0 %v9362_v25 }
 0x717   :  { %8399 = vmatpush3.msra.mxu1 %v9361_v29  ;;  %8437 = vmatpush3.msra.mxu0 %v9362_v25  ;;  %v9396_v29 = vld [vmem:[%s13004_s1 + $0x2c0] sm:$0xff]  ;;  %v9397_v25 = vld [vmem:[%s13004_s1 + $0x238] sm:$0xff] }
 0x718   :  { %8400 = vmatprep.subr.mxu1 %v9363_v26  ;;  %8438 = vmatprep.subr.mxu0 %v9364_v27 }
 0x719   :  { %8401 = vmatpush3.msra.mxu1 %v9363_v26  ;;  %8439 = vmatpush3.msra.mxu0 %v9364_v27  ;;  %v9398_v26 = vld [vmem:[%s13004_s1 + $0x2b8] sm:$0xff]  ;;  %v10950_v27 = vpop.permute.xlu1 %2304 }
 0x71a   :  { %8402 = vmatprep.subr.mxu1 %v9365_v28  ;;  %8440 = vmatprep.subr.mxu0 %v9366_v30  ;;  %v2310_v39 = vmul.f32 %v10766_v7, %v10950_v27  ;;  %v9433_v27 = vld [vmem:[%s13004_s1 + $0x328] sm:$0xff] }
 0x71b   :  { %8403 = vmatpush3.msra.mxu1 %v9365_v28  ;;  %8441 = vmatpush3.msra.mxu0 %v9366_v30  ;;  %v9399_v28 = vld [vmem:[%s13004_s1 + $0x230] sm:$0xff] }
 0x71c   :  { %8404 = vmatprep.subr.mxu1 %v9367_v33  ;;  %8442 = vmatprep.subr.mxu0 %v9368_v34  ;;  %v9400_v30 = vld [vmem:[%s13004_s1 + $0x2b0] sm:$0xff] }
 0x71d   :  { %8405 = vmatpush3.msra.mxu1 %v9367_v33  ;;  %8443 = vmatpush3.msra.mxu0 %v9368_v34  ;;  %v9401_v33 = vld [vmem:[%s13004_s1 + $0x228] sm:$0xff] }
 0x71e   :  { %8406 = vmatprep.subr.mxu1 %v9369_v49  ;;  %8444 = vmatprep.subr.mxu0 %v9370_v54  ;;  %v9402_v34 = vld [vmem:[%s13004_s1 + $0x2a8] sm:$0xff] }
 0x71f   :  { %8407 = vmatpush3.msra.mxu1 %v9369_v49  ;;  %8445 = vmatpush3.msra.mxu0 %v9370_v54  ;;  %v9404_v49 = vld [vmem:[%s13004_s1 + $0x2a0] sm:$0xff]  ;;  %v2413_v54 = vpop.permute.xlu1 %2412 }
 0x720   :  { %8408 = vmatprep.subr.mxu1 %v9371_v38  ;;  %8446 = vmatprep.subr.mxu0 %v9372_v61 }
 0x721   :  { %8409 = vmatpush3.msra.mxu1 %v9371_v38  ;;  %8447 = vmatpush3.msra.mxu0 %v9372_v61  ;;  %v9405_v38 = vld [vmem:[%s13004_s1 + $0x218] sm:$0xff] }
 0x722   :  { %8410 = vmatprep.subr.mxu1 %v9373_v2  ;;  %8448 = vmatprep.subr.mxu0 %v9374_v3  ;;  %v9406_v61 = vld [vmem:[%s13004_s1 + $0x298] sm:$0xff] }
 0x723   :  { %8411 = vmatpush3.msra.mxu1 %v9373_v2  ;;  %8449 = vmatpush3.msra.mxu0 %v9374_v3  ;;  %v9407_v2 = vld [vmem:[%s13004_s1 + $0x210] sm:$0xff] }
 0x724   :  { %8412 = vmatprep.subr.mxu1 %v9375_v50  ;;  %8450 = vmatprep.subr.mxu0 %v9376_v9  ;;  %v9408_v3 = vld [vmem:[%s13004_s1 + $0x290] sm:$0xff] }
 0x725   :  { %8413 = vmatpush3.msra.mxu1 %v9375_v50  ;;  %8451 = vmatpush3.msra.mxu0 %v9376_v9  ;;  %v9410_v50 = vld [vmem:[%s13004_s1 + $0x288] sm:$0xff]  ;;  %v10990_v9 = vpop.permute.xlu1 %2530 }
 0x726   :  { %8414 = vmatprep.subr.mxu1 %v9377_v12  ;;  %8452 = vmatprep.subr.mxu0 %v9378_v60 }
 0x727   :  { %8415 = vmatpush3.msra.mxu1 %v9377_v12  ;;  %8453 = vmatpush3.msra.mxu0 %v9378_v60  ;;  %v9411_v12 = vld [vmem:[%s13004_s1 + $0x200] sm:$0xff] }
 0x728   :  { %8416 = vmatprep.subr.mxu1 %v9379_v15  ;;  %8454 = vmatprep.subr.mxu0 %v9380_v17  ;;  %v9412_v60 = vld [vmem:[%s13004_s1 + $0x280] sm:$0xff] }
 0x729   :  { %8417 = vmatpush3.msra.mxu1 %v9379_v15  ;;  %8455 = vmatpush3.msra.mxu0 %v9380_v17  ;;  %v2308_v15 = vmul.f32 %v10758_v8, %v10874_v13  ;;  %v2426_v17 = vmul.f32 %v10758_v8, %v2413_v54  ;;  %v9414_v13 = vld [vmem:[%s13004_s1 + $0x3f8] sm:$0xff]  ;;  %v9439_v54 = vld [vmem:[%s13004_s1 + $0x310] sm:$0xff] }
 0x72a   :  { %8419 = vmatmul.mubr.f32.vlgmr.msra.gmra.mxu1 %v2072_v63  ;;  %8457 = vmatmul.mubr.f32.vlgmr.msra.gmra.mxu0 %v2190_v18  ;;  %v11001_v63 = vpop.permute.xlu0 %2535  ;;  %v2309_v18 = vmul.f32 %v10885_v20, %v10772_v37  ;;  %v9415_v20 = vld [vmem:[%s13004_s1 + $0x370] sm:$0xff] }
 0x72b   :  { %8462 = vmatprep.subr.mxu1 %v9381_v22  ;;  %8500 = vmatprep.subr.mxu0 %v9382_v4 }
 0x72c   :  { %8421 = vmatprep.mubr.f32.mxu1 %v2073_v10  ;;  %8459 = vmatprep.mubr.f32.mxu0 %v2191_v11  ;;  %v2427_v10 = vmul.f32 %v2418_v40, %v10772_v37  ;;  %v9413_v11 = vld [vmem:[%s13004_s1 + $0x378] sm:$0xff]  ;;  %v9441_v40 = vld [vmem:[%s13004_s1 + $0x308] sm:$0xff] }
 0x72d   :  { %8463 = vmatpush3.msra.mxu1 %v9381_v22  ;;  %8501 = vmatpush3.msra.mxu0 %v9382_v4  ;;  %v2423_v22 = vpop.permute.xlu1 %2422  ;;  %v9416_v4 = vld [vmem:[%s13004_s1 + $0x3f0] sm:$0xff] }
 0x72e   :  { %8464 = vmatprep.subr.mxu1 %v9383_v35  ;;  %8502 = vmatprep.subr.mxu0 %v9384_v41 }
 0x72f   :  { %8465 = vmatpush3.msra.mxu1 %v9383_v35  ;;  %8503 = vmatpush3.msra.mxu0 %v9384_v41  ;;  %v2428_v35 = vmul.f32 %v10766_v7, %v2423_v22  ;;  %v2644_v41 = vpop.permute.xlu0 %2643  ;;  %v9447_v22 = vld [vmem:[%s13004_s1 + $0x468] sm:$0xff] }
 0x730   :  { %8422 = vmatmul.mubr.f32.gmra.mxu1 %v2074_v42  ;;  %8460 = vmatmul.mubr.f32.gmra.mxu0 %v2192_v43  ;;  %v2543_v42 = vmul.f32 %v10958_v32, %v10760_v19  ;;  %v9417_v43 = vld [vmem:[%s13004_s1 + $0x368] sm:$0xff]  ;;  %v9435_v32 = vld [vmem:[%s13004_s1 + $0x320] sm:$0xff] }
 0x731   :  { %8466 = vmatprep.subr.mxu1 %v9385_v45  ;;  %8504 = vmatprep.subr.mxu0 %v9386_v46 }
 0x732   :  { %8467 = vmatpush3.msra.mxu1 %v9385_v45  ;;  %8494 = vmatprep.mubr.f32.mxu1 %v2307_v44  ;;  %v2661_v44 = vmul.f32 %v2644_v41, %v10760_v19  ;;  %v9419_v45 = vld [vmem:[%s13004_s1 + $0x360] sm:$0xff]  ;;  %v9453_v41 = vld [vmem:[%s13004_s1 + $0x438] sm:$0xff] }
 0x733   :  { %8505 = vmatpush3.msra.mxu0 %v9386_v46  ;;  %8532 = vmatprep.mubr.f32.mxu0 %v2425_v47  ;;  %v9420_v46 = vld [vmem:[%s13004_s1 + $0x3e0] sm:$0xff]  ;;  %v9421_v47 = vld [vmem:[%s13004_s1 + $0x358] sm:$0xff] }
 0x734   :  { %8468 = vmatprep.subr.mxu1 %v9387_v48  ;;  %8506 = vmatprep.subr.mxu0 %v9388_v52 }
 0x735   :  { %8469 = vmatpush3.msra.mxu1 %v9387_v48  ;;  %8507 = vmatpush3.msra.mxu0 %v9388_v52  ;;  %v9422_v48 = vld [vmem:[%s13004_s1 + $0x3d8] sm:$0xff]  ;;  %v9423_v52 = vld [vmem:[%s13004_s1 + $0x350] sm:$0xff] }
 0x736   :  { %8470 = vmatprep.subr.mxu1 %v9389_v55  ;;  %8508 = vmatprep.subr.mxu0 %v9390_v58 }
 0x737   :  { %8471 = vmatpush3.msra.mxu1 %v9389_v55  ;;  %8509 = vmatpush3.msra.mxu0 %v9390_v58  ;;  %v9424_v55 = vld [vmem:[%s13004_s1 + $0x3d0] sm:$0xff]  ;;  %v9425_v58 = vld [vmem:[%s13004_s1 + $0x348] sm:$0xff] }
 0x738   :  { %8472 = vmatprep.subr.mxu1 %v9391_v0  ;;  %8510 = vmatprep.subr.mxu0 %v9392_v6 }
 0x739   :  { %8473 = vmatpush3.msra.mxu1 %v9391_v0  ;;  %8511 = vmatpush3.msra.mxu0 %v9392_v6  ;;  %v9426_v0 = vld [vmem:[%s13004_s1 + $0x3c8] sm:$0xff]  ;;  %v9427_v6 = vld [vmem:[%s13004_s1 + $0x340] sm:$0xff] }
 0x73a   :  { %8474 = vmatprep.subr.mxu1 %v9393_v1  ;;  %8512 = vmatprep.subr.mxu0 %v9394_v53 }
 0x73b   :  { %8475 = vmatpush3.msra.mxu1 %v9393_v1  ;;  %8513 = vmatpush3.msra.mxu0 %v9394_v53  ;;  %v9428_v1 = vld [vmem:[%s13004_s1 + $0x3c0] sm:$0xff]  ;;  %v11060_v53 = vpop.permute.xlu1 %2540 }
 0x73c   :  { %8476 = vmatprep.subr.mxu1 %v9395_v24  ;;  %8514 = vmatprep.subr.mxu0 %v9396_v29 }
 0x73d   :  { %8477 = vmatpush3.msra.mxu1 %v9395_v24  ;;  %8515 = vmatpush3.msra.mxu0 %v9396_v29  ;;  %v9429_v24 = vld [vmem:[%s13004_s1 + $0x338] sm:$0xff] }
 0x73e   :  { %8478 = vmatprep.subr.mxu1 %v9397_v25  ;;  %8516 = vmatprep.subr.mxu0 %v9398_v26  ;;  %v9430_v29 = vld [vmem:[%s13004_s1 + $0x3b8] sm:$0xff] }
 0x73f   :  { %8479 = vmatpush3.msra.mxu1 %v9397_v25  ;;  %8517 = vmatpush3.msra.mxu0 %v9398_v26  ;;  %v9431_v25 = vld [vmem:[%s13004_s1 + $0x330] sm:$0xff] }
 0x740   :  { %8480 = vmatprep.subr.mxu1 %v9399_v28  ;;  %8518 = vmatprep.subr.mxu0 %v9400_v30  ;;  %v9432_v26 = vld [vmem:[%s13004_s1 + $0x3b0] sm:$0xff] }
 0x741   :  { %8481 = vmatpush3.msra.mxu1 %v9399_v28  ;;  %8519 = vmatpush3.msra.mxu0 %v9400_v30  ;;  %v9434_v28 = vld [vmem:[%s13004_s1 + $0x3a8] sm:$0xff]  ;;  %v2649_v30 = vpop.permute.xlu1 %2648 }
 0x742   :  { %8482 = vmatprep.subr.mxu1 %v9401_v33  ;;  %8520 = vmatprep.subr.mxu0 %v9402_v34 }
 0x743   :  { %8483 = vmatpush3.msra.mxu1 %v9401_v33  ;;  %8521 = vmatpush3.msra.mxu0 %v9402_v34  ;;  %v9436_v33 = vld [vmem:[%s13004_s1 + $0x3a0] sm:$0xff]  ;;  %v9437_v34 = vld [vmem:[%s13004_s1 + $0x318] sm:$0xff] }
 0x744   :  { %8484 = vmatprep.subr.mxu1 %v9403_v36  ;;  %8522 = vmatprep.subr.mxu0 %v9404_v49 }
 0x745   :  { %8485 = vmatpush3.msra.mxu1 %v9403_v36  ;;  %8523 = vmatpush3.msra.mxu0 %v9404_v49  ;;  %v9438_v36 = vld [vmem:[%s13004_s1 + $0x398] sm:$0xff]  ;;  %v2762_v49 = vpop.permute.xlu0 %2761 }
 0x746   :  { %8486 = vmatprep.subr.mxu1 %v9405_v38  ;;  %8524 = vmatprep.subr.mxu0 %v9406_v61 }
 0x747   :  { %8487 = vmatpush3.msra.mxu1 %v9405_v38  ;;  %8525 = vmatpush3.msra.mxu0 %v9406_v61  ;;  %v9440_v38 = vld [vmem:[%s13004_s1 + $0x390] sm:$0xff]  ;;  %v11098_v61 = vpop.permute.xlu1 %2766 }
 0x748   :  { %8488 = vmatprep.subr.mxu1 %v9407_v2  ;;  %8526 = vmatprep.subr.mxu0 %v9408_v3 }
 0x749   :  { %8489 = vmatpush3.msra.mxu1 %v9407_v2  ;;  %8527 = vmatpush3.msra.mxu0 %v9408_v3  ;;  %v9442_v2 = vld [vmem:[%s13004_s1 + $0x388] sm:$0xff]  ;;  %v9443_v3 = vld [vmem:[%s13004_s1 + $0x300] sm:$0xff] }
 0x74a   :  { %8490 = vmatprep.subr.mxu1 %v9409_v5  ;;  %8528 = vmatprep.subr.mxu0 %v9410_v50 }
 0x74b   :  { %8491 = vmatpush3.msra.mxu1 %v9409_v5  ;;  %8529 = vmatpush3.msra.mxu0 %v9410_v50  ;;  %v9444_v5 = vld [vmem:[%s13004_s1 + $0x380] sm:$0xff]  ;;  %v2544_v50 = vmul.f32 %v10758_v8, %v10990_v9 }
 0x74c   :  { %8492 = vmatprep.subr.mxu1 %v9411_v12  ;;  %8530 = vmatprep.subr.mxu0 %v9412_v60 }
 0x74d   :  { %8493 = vmatpush3.msra.mxu1 %v9411_v12  ;;  %8531 = vmatpush3.msra.mxu0 %v9412_v60  ;;  %v2662_v12 = vmul.f32 %v10758_v8, %v2649_v30  ;;  %v2654_v60 = vpop.permute.xlu0 %2653  ;;  %v9473_v30 = vld [vmem:[%s13004_s1 + $0x18] sm:$0xff] }
 0x74e   :  { %8495 = vmatmul.mubr.f32.vlgmr.msra.gmra.mxu1 %v2308_v15  ;;  %8533 = vmatmul.mubr.f32.vlgmr.msra.gmra.mxu0 %v2426_v17  ;;  %v2545_v15 = vmul.f32 %v11001_v63, %v10772_v37  ;;  %v2663_v17 = vmul.f32 %v2654_v60, %v10772_v37  ;;  %v2546_v63 = vmul.f32 %v10766_v7, %v11060_v53  ;;  %v9466_v53 = vld [vmem:[%s13004_s1 + $0x50] sm:$0xff] }
 0x74f   :  { %8538 = vmatprep.subr.mxu1 %v9413_v11  ;;  %8576 = vmatprep.subr.mxu0 %v9414_v13 }
 0x750   :  { %8497 = vmatprep.mubr.f32.mxu1 %v2309_v18  ;;  %8535 = vmatprep.mubr.f32.mxu0 %v2427_v10  ;;  %v2659_v18 = vpop.permute.xlu1 %2658  ;;  %v9445_v10 = vld [vmem:[%s13004_s1 + $0x478] sm:$0xff] }
 0x751   :  { %8539 = vmatpush3.msra.mxu1 %v9413_v11  ;;  %8577 = vmatpush3.msra.mxu0 %v9414_v13  ;;  %v2664_v9 = vmul.f32 %v10766_v7, %v2659_v18  ;;  %v9446_v11 = vld [vmem:[%s13004_s1 + $0x470] sm:$0xff]  ;;  %v2779_v13 = vmul.f32 %v2762_v49, %v10760_v19 }
 0x752   :  { %8540 = vmatprep.subr.mxu1 %v9415_v20  ;;  %8578 = vmatprep.subr.mxu0 %v9416_v4  ;;  %v9450_v19 = vld [vmem:[%s13004_s1 + $0x450] sm:$0xff] }
 0x753   :  { %8541 = vmatpush3.msra.mxu1 %v9415_v20  ;;  %8579 = vmatpush3.msra.mxu0 %v9416_v4  ;;  %v9448_v20 = vld [vmem:[%s13004_s1 + $0x460] sm:$0xff]  ;;  %v9449_v4 = vld [vmem:[%s13004_s1 + $0x458] sm:$0xff] }
 0x754   :  { %8498 = vmatmul.mubr.f32.gmra.mxu1 %v2310_v39  ;;  %8536 = vmatmul.mubr.f32.gmra.mxu0 %v2428_v35  ;;  %v9451_v39 = vld [vmem:[%s13004_s1 + $0x448] sm:$0xff]  ;;  %v9452_v35 = vld [vmem:[%s13004_s1 + $0x440] sm:$0xff] }
 0x755   :  { %8542 = vmatprep.subr.mxu1 %v9417_v43  ;;  %8580 = vmatprep.subr.mxu0 %v9418_v51 }
 0x756   :  { %8543 = vmatpush3.msra.mxu1 %v9417_v43  ;;  %8570 = vmatprep.mubr.f32.mxu1 %v2543_v42  ;;  %v9454_v42 = vld [vmem:[%s13004_s1 + $0x430] sm:$0xff]  ;;  %v9455_v43 = vld [vmem:[%s13004_s1 + $0x428] sm:$0xff] }
 0x757   :  { %8581 = vmatpush3.msra.mxu0 %v9418_v51  ;;  %8608 = vmatprep.mubr.f32.mxu0 %v2661_v44  ;;  %v9456_v51 = vld [vmem:[%s13004_s1 + $0x420] sm:$0xff]  ;;  %v9457_v44 = vld [vmem:[%s13004_s1 + $0x418] sm:$0xff] }
 0x758   :  { %8544 = vmatprep.subr.mxu1 %v9419_v45  ;;  %8582 = vmatprep.subr.mxu0 %v9420_v46 }
 0x759   :  { %8545 = vmatpush3.msra.mxu1 %v9419_v45  ;;  %8583 = vmatpush3.msra.mxu0 %v9420_v46  ;;  %v9458_v45 = vld [vmem:[%s13004_s1 + $0x410] sm:$0xff]  ;;  %v9459_v46 = vld [vmem:[%s13004_s1 + $0x408] sm:$0xff] }
 0x75a   :  { %8546 = vmatprep.subr.mxu1 %v9421_v47  ;;  %8584 = vmatprep.subr.mxu0 %v9422_v48 }
 0x75b   :  { %8547 = vmatpush3.msra.mxu1 %v9421_v47  ;;  %8585 = vmatpush3.msra.mxu0 %v9422_v48  ;;  %v2772_v47 = vpop.permute.xlu0 %2771  ;;  %v9460_v48 = vld [vmem:[%s13004_s1 + $0x400] sm:$0xff] }
 0x75c   :  { %8548 = vmatprep.subr.mxu1 %v9423_v52  ;;  %8586 = vmatprep.subr.mxu0 %v9424_v55 }
 0x75d   :  { %8549 = vmatpush3.msra.mxu1 %v9423_v52  ;;  %8587 = vmatpush3.msra.mxu0 %v9424_v55  ;;  %v2780_v52 = vmul.f32 %v10758_v8, %v11098_v61  ;;  %v2781_v55 = vmul.f32 %v2772_v47, %v10772_v37  ;;  %v9463_v8 = vld [vmem:[%s13004_s1 + $0x68] sm:$0xff]  ;;  %v9464_v37 = vld [vmem:[%s13004_s1 + $0x60] sm:$0xff] }
 0x75e   :  { %8550 = vmatprep.subr.mxu1 %v9425_v58  ;;  %8588 = vmatprep.subr.mxu0 %v9426_v0 }
 0x75f   :  { %8551 = vmatpush3.msra.mxu1 %v9425_v58  ;;  %8589 = vmatpush3.msra.mxu0 %v9426_v0  ;;  %v9461_v58 = vld [vmem:[%s13004_s1 + $0x78] sm:$0xff]  ;;  %v2777_v0 = vpop.permute.xlu1 %2776 }
 0x760   :  { %8552 = vmatprep.subr.mxu1 %v9427_v6  ;;  %8590 = vmatprep.subr.mxu0 %v9428_v1 }
 0x761   :  { %8553 = vmatpush3.msra.mxu1 %v9427_v6  ;;  %8591 = vmatpush3.msra.mxu0 %v9428_v1  ;;  %v2782_v6 = vmul.f32 %v10766_v7, %v2777_v0  ;;  %v9462_v1 = vld [vmem:[%s13004_s1 + $0x70] sm:$0xff]  ;;  %v9465_v7 = vld [vmem:[%s13004_s1 + $0x58] sm:$0xff] }
 0x762   :  { %8554 = vmatprep.subr.mxu1 %v9429_v24  ;;  %8592 = vmatprep.subr.mxu0 %v9430_v29 }
 0x763   :  { %8555 = vmatpush3.msra.mxu1 %v9429_v24  ;;  %8593 = vmatpush3.msra.mxu0 %v9430_v29  ;;  %v9467_v24 = vld [vmem:[%s13004_s1 + $0x48] sm:$0xff]  ;;  %v9468_v29 = vld [vmem:[%s13004_s1 + $0x40] sm:$0xff] }
 0x764   :  { %8556 = vmatprep.subr.mxu1 %v9431_v25  ;;  %8594 = vmatprep.subr.mxu0 %v9432_v26 }
 0x765   :  { %8557 = vmatpush3.msra.mxu1 %v9431_v25  ;;  %8595 = vmatpush3.msra.mxu0 %v9432_v26  ;;  %v9469_v25 = vld [vmem:[%s13004_s1 + $0x38] sm:$0xff]  ;;  %v9470_v26 = vld [vmem:[%s13004_s1 + $0x30] sm:$0xff] }
 0x766   :  { %8558 = vmatprep.subr.mxu1 %v9433_v27  ;;  %8596 = vmatprep.subr.mxu0 %v9434_v28 }
 0x767   :  { %8559 = vmatpush3.msra.mxu1 %v9433_v27  ;;  %8597 = vmatpush3.msra.mxu0 %v9434_v28  ;;  %v9471_v27 = vld [vmem:[%s13004_s1 + $0x28] sm:$0xff]  ;;  %v9472_v28 = vld [vmem:[%s13004_s1 + $0x20] sm:$0xff] }
 0x768   :  { %8560 = vmatprep.subr.mxu1 %v9435_v32  ;;  %8598 = vmatprep.subr.mxu0 %v9436_v33 }
 0x769   :  { %8561 = vmatpush3.msra.mxu1 %v9435_v32  ;;  %8599 = vmatpush3.msra.mxu0 %v9436_v33  ;;  %v9474_v32 = vld [vmem:[%s13004_s1 + $0x10] sm:$0xff]  ;;  %v9475_v33 = vld [vmem:[%s13004_s1 + $0x8] sm:$0xff] }
 0x76a   :  { %8562 = vmatprep.subr.mxu1 %v9437_v34  ;;  %8600 = vmatprep.subr.mxu0 %v9438_v36 }
 0x76b   :  { %8563 = vmatpush3.msra.mxu1 %v9437_v34  ;;  %8601 = vmatpush3.msra.mxu0 %v9438_v36  ;;  %v9476_v34 = vld [vmem:[%s13004_s1] sm:$0xff] }
 0x76c   :  { %8564 = vmatprep.subr.mxu1 %v9439_v54  ;;  %8602 = vmatprep.subr.mxu0 %v9440_v38 }
 0x76d   :  { %8565 = vmatpush3.msra.mxu1 %v9439_v54  ;;  %8603 = vmatpush3.msra.mxu0 %v9440_v38 }
 0x76e   :  { %8566 = vmatprep.subr.mxu1 %v9441_v40  ;;  %8604 = vmatprep.subr.mxu0 %v9442_v2 }
 0x76f   :  { %8567 = vmatpush3.msra.mxu1 %v9441_v40  ;;  %8605 = vmatpush3.msra.mxu0 %v9442_v2 }
 0x770   :  { %8568 = vmatprep.subr.mxu1 %v9443_v3  ;;  %8606 = vmatprep.subr.mxu0 %v9444_v5 }
 0x771   :  { %8569 = vmatpush3.msra.mxu1 %v9443_v3  ;;  %8607 = vmatpush3.msra.mxu0 %v9444_v5 }
 0x772   :  { %8571 = vmatmul.mubr.f32.vlgmr.msra.gmra.mxu1 %v2544_v50  ;;  %8609 = vmatmul.mubr.f32.vlgmr.msra.gmra.mxu0 %v2662_v12 }
 0x773   :  { %8614 = vmatprep.subr.mxu1 %v9445_v10  ;;  %8573 = vmatprep.mubr.f32.mxu1 %v2545_v15 }
 0x774   :  { %8611 = vmatprep.mubr.f32.mxu0 %v2663_v17  ;;  %8615 = vmatpush3.msra.mxu1 %v9445_v10 }
 0x775   :  { %8616 = vmatprep.subr.mxu1 %v9446_v11 }
 0x776   :  { %8617 = vmatpush3.msra.mxu1 %v9446_v11  ;;  %8612 = vmatmul.mubr.f32.gmra.mxu0 %v2664_v9 }
 0x777   :  { %8574 = vmatmul.mubr.f32.gmra.mxu1 %v2546_v63  ;;  %8618 = vmatprep.subr.mxu1 %v9447_v22 }
 0x778   :  { %8619 = vmatpush3.msra.mxu1 %v9447_v22  ;;  %8646 = vmatprep.mubr.f32.mxu1 %v2779_v13 }
 0x779   :  { %8620 = vmatprep.subr.mxu1 %v9448_v20 }
 0x77a   :  { %8621 = vmatpush3.msra.mxu1 %v9448_v20 }
 0x77b   :  { %8622 = vmatprep.subr.mxu1 %v9449_v4 }
 0x77c   :  { %8623 = vmatpush3.msra.mxu1 %v9449_v4 }
 0x77d   :  { %8624 = vmatprep.subr.mxu1 %v9450_v19 }
 0x77e   :  { %8625 = vmatpush3.msra.mxu1 %v9450_v19 }
 0x77f   :  { %8626 = vmatprep.subr.mxu1 %v9451_v39 }
 0x780   :  { %8627 = vmatpush3.msra.mxu1 %v9451_v39 }
 0x781   :  { %8628 = vmatprep.subr.mxu1 %v9452_v35 }
 0x782   :  { %8629 = vmatpush3.msra.mxu1 %v9452_v35 }
 0x783   :  { %8630 = vmatprep.subr.mxu1 %v9453_v41 }
 0x784   :  { %8631 = vmatpush3.msra.mxu1 %v9453_v41 }
 0x785   :  { %8632 = vmatprep.subr.mxu1 %v9454_v42 }
 0x786   :  { %8633 = vmatpush3.msra.mxu1 %v9454_v42 }
 0x787   :  { %8634 = vmatprep.subr.mxu1 %v9455_v43 }
 0x788   :  { %8635 = vmatpush3.msra.mxu1 %v9455_v43 }
 0x789   :  { %8636 = vmatprep.subr.mxu1 %v9456_v51 }
 0x78a   :  { %8637 = vmatpush3.msra.mxu1 %v9456_v51 }
 0x78b   :  { %8638 = vmatprep.subr.mxu1 %v9457_v44 }
 0x78c   :  { %8639 = vmatpush3.msra.mxu1 %v9457_v44 }
 0x78d   :  { %8640 = vmatprep.subr.mxu1 %v9458_v45 }
 0x78e   :  { %8641 = vmatpush3.msra.mxu1 %v9458_v45 }
 0x78f   :  { %8642 = vmatprep.subr.mxu1 %v9459_v46 }
 0x790   :  { %8643 = vmatpush3.msra.mxu1 %v9459_v46 }
 0x791   :  { %8644 = vmatprep.subr.mxu1 %v9460_v48 }
 0x792   :  { %8645 = vmatpush3.msra.mxu1 %v9460_v48 }
 0x793   :  { %8647 = vmatmul.mubr.f32.vlgmr.msra.gmra.mxu1 %v2780_v52  ;;  %8704 = vmatprep.subr.mxu1 %v9461_v58 }
 0x794   :  { %8649 = vmatprep.mubr.f32.mxu1 %v2781_v55  ;;  %8705 = vmatpush3.msra.mxu1 %v9461_v58 }
 0x795   :  { %8706 = vmatprep.subr.mxu1 %v9462_v1 }
 0x796   :  { %8707 = vmatpush3.msra.mxu1 %v9462_v1 }
 0x797   :  { %8650 = vmatmul.mubr.f32.gmra.mxu1 %v2782_v6  ;;  %8708 = vmatprep.subr.mxu1 %v9463_v8 }
 0x798   :  { %8709 = vmatpush3.msra.mxu1 %v9463_v8 }
 0x799   :  { %8710 = vmatprep.subr.mxu1 %v9464_v37 }
 0x79a   :  { %8711 = vmatpush3.msra.mxu1 %v9464_v37 }
 0x79b   :  { %8712 = vmatprep.subr.mxu1 %v9465_v7 }
 0x79c   :  { %8713 = vmatpush3.msra.mxu1 %v9465_v7 }
 0x79d   :  { %8714 = vmatprep.subr.mxu1 %v9466_v53 }
 0x79e   :  { %8715 = vmatpush3.msra.mxu1 %v9466_v53 }
 0x79f   :  { %8716 = vmatprep.subr.mxu1 %v9467_v24 }
 0x7a0   :  { %8717 = vmatpush3.msra.mxu1 %v9467_v24 }
 0x7a1   :  { %8718 = vmatprep.subr.mxu1 %v9468_v29 }
 0x7a2   :  { %8719 = vmatpush3.msra.mxu1 %v9468_v29 }
 0x7a3   :  { %8720 = vmatprep.subr.mxu1 %v9469_v25 }
 0x7a4   :  { %8721 = vmatpush3.msra.mxu1 %v9469_v25 }
 0x7a5   :  { %8722 = vmatprep.subr.mxu1 %v9470_v26 }
 0x7a6   :  { %8723 = vmatpush3.msra.mxu1 %v9470_v26 }
 0x7a7   :  { %8724 = vmatprep.subr.mxu1 %v9471_v27 }
 0x7a8   :  { %8725 = vmatpush3.msra.mxu1 %v9471_v27 }
 0x7a9   :  { %8726 = vmatprep.subr.mxu1 %v9472_v28 }
 0x7aa   :  { %8727 = vmatpush3.msra.mxu1 %v9472_v28 }
 0x7ab   :  { %8728 = vmatprep.subr.mxu1 %v9473_v30 }
 0x7ac   :  { %8729 = vmatpush3.msra.mxu1 %v9473_v30 }
 0x7ad   :  { %8730 = vmatprep.subr.mxu1 %v9474_v32 }
 0x7ae   :  { %8731 = vmatpush3.msra.mxu1 %v9474_v32 }
 0x7af   :  { %8732 = vmatprep.subr.mxu1 %v9475_v33 }
 0x7b0   :  { %8733 = vmatpush3.msra.mxu1 %v9475_v33 }
 0x7b1   :  { %8734 = vmatprep.subr.mxu1 %v9476_v34 }
 0x7b2   :  { %8735 = vmatpush3.msra.mxu1 %v9476_v34 }
 0x7b3   :  { %8780 = vmatprep.subr.mxu1 %v10777_v16 }
 0x7c7   :  { %v8344_v36 = vpop.f32.mrf.mxu1  ;;  %v8382_v54 = vpop.f32.mrf.mxu0 }
 0x7c8   :  { %v2033_v13 = vadd.f32 %v8382_v54, %v8344_v36 }
 0x7c9   :  { %v1942_v49 = vpop.f32.mrf.mxu1  ;;  %v2027_v61 = vpop.f32.mrf.mxu0 }
 0x7ca   :  { %v2028_v47 = vadd.f32 %v2027_v61, %v1942_v49 }
 0x7cd   :  { %v8347_v38 = vpop.f32.mrf.mxu1  ;;  %v8385_v2 = vpop.f32.mrf.mxu0 }
 0x7ce   :  { %v2043_v19 = vadd.f32 %v8385_v2, %v8347_v38 }
 0x7cf   :  { %v1952_v40 = vpop.f32.mrf.mxu1  ;;  %v2037_v5 = vpop.f32.mrf.mxu0 }
 0x7d0   :  { %v2038_v41 = vadd.f32 %v2037_v5, %v1952_v40 }
 0x7ea   :  { %v8420_v3 = vpop.f32.mrf.mxu1  ;;  %v8458_v12 = vpop.f32.mrf.mxu0 }
 0x7eb   :  { %v2161_v20 = vadd.f32 %v8420_v3, %v2033_v13 }
 0x7ec   :  { %v2141_v50 = vpop.f32.mrf.mxu1  ;;  %v2259_v15 = vpop.f32.mrf.mxu0 }
 0x7ed   :  { %v2279_v42 = vadd.f32 %v8458_v12, %v2161_v20  ;;  %v2160_v55 = vadd.f32 %v2141_v50, %v2028_v47 }
 0x7ef   :  { %v2278_v53 = vadd.f32 %v2259_v15, %v2160_v55 }
 0x7f0   :  { %v8423_v60 = vpop.f32.mrf.mxu1  ;;  %v8461_v18 = vpop.f32.mrf.mxu0 }
 0x7f1   :  { %v2163_v43 = vadd.f32 %v8423_v60, %v2043_v19 }
 0x7f2   :  { %v2151_v17 = vpop.f32.mrf.mxu1  ;;  %v2269_v9 = vpop.f32.mrf.mxu0 }
 0x7f3   :  { %v2162_v51 = vadd.f32 %v2151_v17, %v2038_v41  ;;  %v2281_v48 = vadd.f32 %v8461_v18, %v2163_v43 }
 0x7f5   :  { %v2280_v58 = vadd.f32 %v2269_v9, %v2162_v51  ;;  %v9623_v9 = vmov 4  }
 0x7f6   :  { %9193 = vset.pattern.permute.xlu0 %v9623_v9  ;;  %9194 = vset.pattern.permute.xlu1 %v9623_v9 }
 0x80e   :  { %v8496_v10 = vpop.f32.mrf.mxu1  ;;  %v8534_v63 = vpop.f32.mrf.mxu0 }
 0x80f   :  { %v2397_v44 = vadd.f32 %v8496_v10, %v2279_v42 }
 0x810   :  { %v2377_v11 = vpop.f32.mrf.mxu1  ;;  %v2495_v22 = vpop.f32.mrf.mxu0 }
 0x811   :  { %v2515_v0 = vadd.f32 %v8534_v63, %v2397_v44  ;;  %v2396_v25 = vadd.f32 %v2377_v11, %v2278_v53 }
 0x813   :  { %v2514_v49 = vadd.f32 %v2495_v22, %v2396_v25 }
 0x814   :  { %v8499_v16 = vpop.f32.mrf.mxu1  ;;  %v8537_v39 = vpop.f32.mrf.mxu0 }
 0x815   :  { %v2399_v6 = vadd.f32 %v8499_v16, %v2281_v48 }
 0x816   :  { %v2387_v4 = vpop.f32.mrf.mxu1  ;;  %v2505_v45 = vpop.f32.mrf.mxu0 }
 0x817   :  { %v2398_v8 = vadd.f32 %v2387_v4, %v2280_v58  ;;  %v2517_v24 = vadd.f32 %v8537_v39, %v2399_v6 }
 0x819   :  { %v2516_v26 = vadd.f32 %v2505_v45, %v2398_v8 }
 0x832   :  { %v8572_v35 = vpop.f32.mrf.mxu1  ;;  %v8610_v52 = vpop.f32.mrf.mxu0 }
 0x833   :  { %v2633_v37 = vadd.f32 %v8572_v35, %v2515_v0 }
 0x834   :  { %v2613_v46 = vpop.f32.mrf.mxu1  ;;  %v2731_v7 = vpop.f32.mrf.mxu0 }
 0x835   :  { %v2751_v27 = vadd.f32 %v8610_v52, %v2633_v37  ;;  %v2632_v40 = vadd.f32 %v2613_v46, %v2514_v49 }
 0x836   :  { %v8613_v30 = vpop.f32.mrf.mxu0 }
 0x837   :  { %v8575_v1 = vpop.f32.mrf.mxu1  ;;  %v2750_v12 = vadd.f32 %v2731_v7, %v2632_v40 }
 0x838   :  { %v2635_v28 = vadd.f32 %v8575_v1, %v2517_v24  ;;  %v2741_v38 = vpop.f32.mrf.mxu0  ;;  %v9477_v24 = vld [vmem:[%s13001_s13 + $0x18] sm:$0xff] }
 0x839   :  { %v2623_v29 = vpop.f32.mrf.mxu1 }
 0x83a   :  { %v2634_v33 = vadd.f32 %v2623_v29, %v2516_v26  ;;  %v2753_v54 = vadd.f32 %v8613_v30, %v2635_v28  ;;  %v9478_v28 = vld [vmem:[%s13001_s13 + $0x8] sm:$0xff] }
 0x83c   :  { %v2752_v2 = vadd.f32 %v2741_v38, %v2634_v33  ;;  %v9479_v33 = vld [vmem:[%s13001_s13 + $0x10] sm:$0xff] }
 0x853   :  { %v8648_v32 = vpop.f32.mrf.mxu1 }
 0x854   :  { %v11223_v34 = vadd.f32 %v8648_v32, %v2751_v27 }
 0x855   :  { %v2849_v36 = vpop.f32.mrf.mxu1 }
 0x856   :  { %2874 = vadd.xlane.f32.xlu0 %v11223_v34  ;;  %v11234_v15 = vadd.f32 %v2849_v36, %v2750_v12  ;;  %v2885_v10 = vmul.f32 %v11223_v34, %v11223_v34 }
 0x857   :  { %v8651_v61 = vpop.f32.mrf.mxu1 }
 0x858   :  { %v11226_v3 = vadd.f32 %v8651_v61, %v2753_v54  ;;  %v2884_v18 = vmul.f32 %v11234_v15, %v11234_v15  ;;  %v9480_v54 = vld [vmem:[%s13001_s13] sm:$0xff] }
 0x859   :  { %v2859_v5 = vpop.f32.mrf.mxu1 }
 0x85a   :  { %v11228_v50 = vadd.f32 %v2859_v5, %v2752_v2  ;;  %2878 = vadd.xlane.f32.xlu0 %v11226_v3  ;;  %v2887_v60 = vmul.f32 %v11226_v3, %v11226_v3  ;;  %v9624_v2 = vmov 5  }
 0x85c   :  { %2876 = vadd.xlane.f32.xlu1 %v11228_v50  ;;  %v2886_v17 = vmul.f32 %v11228_v50, %v11228_v50 }
 0x85e   :  { %2894 = vadd.xlane.f32.xlu0 %v2887_v60 }
 0x860   :  { %2872 = vadd.xlane.f32.xlu1 %v11234_v15 }
 0x862   :  { %2892 = vadd.xlane.f32.xlu0 %v2886_v17 }
 0x864   :  { %2888 = vadd.xlane.f32.xlu1 %v2884_v18 }
 0x866   :  { %2890 = vadd.xlane.f32.xlu0 %v2885_v10 }
 0x8df   :  { %v2875_v11 = vpop.xlane.xlu0 %2874 }
 0x8e0   :  { %v2881_v41 = vmul.f32 0.0078125, %v2875_v11 }
 0x8e2   :  { %v2901_v55 = vmul.f32 %v2881_v41, %v2881_v41 }
 0x8e3   :  { %v2879_v63 = vpop.xlane.xlu0 %2878 }
 0x8e4   :  { %v2883_v16 = vmul.f32 0.0078125, %v2879_v63  ;;  %v7179_v63 = vld [vmem:[%s13002_s5 + $0x260] sm:$0xff] }
 0x8e5   :  { %v2877_v13 = vpop.xlane.xlu1 %2876 }
 0x8e6   :  { %v2903_v20 = vmul.f32 %v2883_v16, %v2883_v16  ;;  %v2882_v4 = vmul.f32 0.0078125, %v2877_v13  ;;  %v7180_v13 = vld [vmem:[%s13002_s5 + $0x268] sm:$0xff] }
 0x8e7   :  { %v2895_v22 = vpop.xlane.xlu0 %2894 }
 0x8e8   :  { %v2899_v19 = vmul.f32 0.0078125, %v2895_v22  ;;  %v2902_v43 = vmul.f32 %v2882_v4, %v2882_v4  ;;  %v7181_v22 = vld [vmem:[%s13002_s5 + $0x270] sm:$0xff] }
 0x8e9   :  { %v2873_v39 = vpop.xlane.xlu1 %2872 }
 0x8ea   :  { %v2907_v35 = vsub.f32 %v2899_v19, %v2903_v20  ;;  %v2880_v44 = vmul.f32 0.0078125, %v2873_v39  ;;  %v7182_v20 = vld [vmem:[%s13002_s5 + $0x278] sm:$0xff]  ;;  %v7175_v19 = vld [vmem:[%s13002_s5 + $0x240] sm:$0xff]  ;;  %v7184_v39 = vld [vmem:[%s13002_s5 + $0x288] sm:$0xff] }
 0x8eb   :  { %v2893_v42 = vpop.xlane.xlu0 %2892 }
 0x8ec   :  { %v2911_v51 = vadd.f32 1e-05, %v2907_v35  ;;  %v2898_v45 = vmul.f32 0.0078125, %v2893_v42  ;;  %v2900_v58 = vmul.f32 %v2880_v44, %v2880_v44  ;;  %v7183_v35 = vld [vmem:[%s13002_s5 + $0x280] sm:$0xff]  ;;  %v7177_v42 = vld [vmem:[%s13002_s5 + $0x250] sm:$0xff] }
 0x8ed   :  { %v2889_v46 = vpop.xlane.xlu1 %2888 }
 0x8ee   :  { %9235 = vrsqrt.f32 %v2911_v51  ;;  %v2906_v47 = vsub.f32 %v2898_v45, %v2902_v43  ;;  %v2896_v48 = vmul.f32 0.0078125, %v2889_v46  ;;  %v7186_v43 = vld [vmem:[%s13002_s5 + $0x298] sm:$0xff]  ;;  %v7185_v51 = vld [vmem:[%s13002_s5 + $0x290] sm:$0xff]  ;;  %v7187_v45 = vld [vmem:[%s13002_s5 + $0x2a0] sm:$0xff] }
 0x8ef   :  { %v2891_v52 = vpop.xlane.xlu0 %2890  ;;  %v7192_v46 = vld [vmem:[%s13002_s5 + $0x2c8] sm:$0xff] }
 0x8f0   :  { %v2897_v0 = vmul.f32 0.0078125, %v2891_v52  ;;  %v2910_v6 = vadd.f32 1e-05, %v2906_v47  ;;  %v2904_v1 = vsub.f32 %v2896_v48, %v2900_v58  ;;  %v7191_v47 = vld [vmem:[%s13002_s5 + $0x2c0] sm:$0xff]  ;;  %v7190_v48 = vld [vmem:[%s13002_s5 + $0x2b8] sm:$0xff]  ;;  %v7189_v52 = vld [vmem:[%s13002_s5 + $0x2b0] sm:$0xff] }
 0x8f1   :  { %v7193_v58 = vld [vmem:[%s13002_s5 + $0x2d0] sm:$0xff] }
 0x8f2   :  { %v2905_v8 = vsub.f32 %v2897_v0, %v2901_v55  ;;  %9237 = vrsqrt.f32 %v2910_v6  ;;  %v2908_v7 = vadd.f32 1e-05, %v2904_v1  ;;  %v7194_v55 = vld [vmem:[%s13002_s5 + $0x2d8] sm:$0xff]  ;;  %v7196_v0 = vld [vmem:[%s13002_s5 + $0x2e8] sm:$0xff]  ;;  %v7195_v6 = vld [vmem:[%s13002_s5 + $0x2e0] sm:$0xff] }
 0x8f3   :  { %v7200_v1 = vld [vmem:[%s13002_s5 + $0x308] sm:$0xff] }
 0x8f4   :  { %v2909_v37 = vadd.f32 1e-05, %v2905_v8  ;;  %v7199_v8 = vld [vmem:[%s13002_s5 + $0x300] sm:$0xff] }
 0x8f6   :  { %9239 = vrsqrt.f32 %v2909_v37  ;;  %v7198_v37 = vld [vmem:[%s13002_s5 + $0x2f8] sm:$0xff] }
 0x8f7   :  { %9241 = vrsqrt.f32 %v2908_v7  ;;  %v7197_v7 = vld [vmem:[%s13002_s5 + $0x2f0] sm:$0xff] }
 0x8fb   :  { %v9236_v53 = vpop.eup %9235 }
 0x8fc   :  { %v2919_v29 = vmul.f32 %v9477_v24, %v9236_v53  ;;  %v7202_v53 = vld [vmem:[%s13002_s5 + $0x318] sm:$0xff] }
 0x8fe   :  { %v2947_v25 = vmul.f32 %v2919_v29, %v2883_v16  ;;  %v7167_v16 = vld [vmem:[%s13003_s4 + $0x40] sm:$0xff] }
 0x8ff   :  { %v9238_v26 = vpop.eup %9237  ;;  %8660 = vmatprep.mubr.msk.f32.mxu0 %vm289_vm1, %v7167_v16 }
 0x900   :  { %2958 = vrot.lane.b32.xlu0 %v2947_v25, %s9619_s20  ;;  %v2918_v36 = vmul.f32 %v9479_v33, %v9238_v26  ;;  %v7203_v25 = vld [vmem:[%s13002_s5 + $0x320] sm:$0xff]  ;;  %v7208_v26 = vld [vmem:[%s13002_s5 + $0x348] sm:$0xff] }
 0x902   :  { %v2946_v61 = vmul.f32 %v2918_v36, %v2882_v4  ;;  %v7176_v4 = vld [vmem:[%s13002_s5 + $0x248] sm:$0xff] }
 0x903   :  { %v9240_v27 = vpop.eup %9239 }
 0x904   :  { %2937 = vperm.xlu0 %9193, %v2919_v29   ;;  %v2917_v30 = vmul.f32 %v9478_v28, %v9240_v27  ;;  %v9242_v49 = vpop.eup %9241  ;;  %v7204_v29 = vld [vmem:[%s13002_s5 + $0x328] sm:$0xff]  ;;  %v7207_v27 = vld [vmem:[%s13002_s5 + $0x340] sm:$0xff] }
 0x905   :  { %v2916_v38 = vmul.f32 %v9480_v54, %v9242_v49 }
 0x906   :  { %v2945_v32 = vmul.f32 %v2917_v30, %v2881_v41  ;;  %v7178_v41 = vld [vmem:[%s13002_s5 + $0x258] sm:$0xff] }
 0x907   :  { %v2944_v40 = vmul.f32 %v2916_v38, %v2880_v44  ;;  %v7188_v44 = vld [vmem:[%s13002_s5 + $0x2a8] sm:$0xff] }
 0x908   :  { %2927 = vperm.xlu0 %9193, %v2917_v30   ;;  %2954 = vrot.lane.b32.xlu1 %v2945_v32, %s9619_s20  ;;  %v7205_v30 = vld [vmem:[%s13002_s5 + $0x330] sm:$0xff]  ;;  %v7210_v32 = vld [vmem:[%s13002_s5 + $0x358] sm:$0xff] }
 0x90c   :  { %2922 = vperm.xlu0 %9193, %v2916_v38   ;;  %2956 = vrot.lane.b32.xlu1 %v2946_v61, %s9619_s20 }
 0x910   :  { %2952 = vrot.lane.b32.xlu1 %v2944_v40, %s9619_s20  ;;  %9196 = vset.pattern.permute.xlu0 %v9624_v2 }
 0x914   :  { %2932 = vperm.xlu1 %9194, %v2918_v36  }
 0x918   :  { %9195 = vset.pattern.permute.xlu1 %v9624_v2 }
 0x972   :  { %v2959_v5 = vpop.permute.xlu0 %2958 }
 0x973   :  { %v2967_v12 = vsub.f32 %v9477_v24, %v2959_v5  ;;  %v7201_v24 = vld [vmem:[%s13002_s5 + $0x310] sm:$0xff] }
 0x975   :  { %2985 = vperm.xlu1 %9195, %v2967_v12  }
 0x97a   :  { %v2955_v60 = vpop.permute.xlu1 %2954 }
 0x97b   :  { %v2965_v9 = vsub.f32 %v9478_v28, %v2955_v60  ;;  %v7206_v28 = vld [vmem:[%s13002_s5 + $0x338] sm:$0xff] }
 0x97e   :  { %v2957_v17 = vpop.permute.xlu1 %2956 }
 0x97f   :  { %v2966_v18 = vsub.f32 %v9479_v33, %v2957_v17  ;;  %v7209_v33 = vld [vmem:[%s13002_s5 + $0x350] sm:$0xff]  ;;  %v2938_v36 = vpop.permute.xlu0 %2937 }
 0x981   :  { %2980 = vperm.xlu1 %9195, %v2966_v18  }
 0x982   :  { %v2953_v10 = vpop.permute.xlu1 %2952 }
 0x983   :  { %v2964_v11 = vsub.f32 %v9480_v54, %v2953_v10  ;;  %v2943_v54 = vmul.f32 %v2938_v36, %v11226_v3  ;;  %v2928_v2 = vpop.permute.xlu0 %2927 }
 0x984   :  { %v2941_v18 = vmul.f32 %v2928_v2, %v11223_v34  ;;  %v7168_v34 = vld [vmem:[%s13003_s4 + $0x48] sm:$0xff] }
 0x985   :  { %2970 = vperm.xlu0 %9196, %v2964_v11   ;;  %2975 = vperm.xlu1 %9195, %v2965_v9  }
 0x987   :  { %v2923_v12 = vpop.permute.xlu0 %2922 }
 0x988   :  { %v2940_v10 = vmul.f32 %v2923_v12, %v11234_v15  ;;  %v7169_v15 = vld [vmem:[%s13003_s4 + $0x50] sm:$0xff] }
 0x989   :  { %9197 = vset.pattern.permute.xlu1 %v13024_v14  ;;  %9198 = vset.pattern.permute.xlu0 %v13024_v14  ;;  %v9500_v12 = vld [vmem:[%s13004_s1 + $0x1f0] sm:$0xff] }
 0x98a   :  { %3134 = vperm.xlu1 %9197, %v7179_v63   ;;  %3144 = vperm.xlu0 %9198, %v7181_v22   ;;  %v9481_v22 = vld [vmem:[%s13004_s1 + $0xf8] sm:$0xff] }
 0x98e   :  { %3139 = vperm.xlu1 %9197, %v7180_v13   ;;  %3110 = vperm.xlu0 %9198, %v7176_v4   ;;  %v9482_v4 = vld [vmem:[%s13004_s1 + $0xf0] sm:$0xff] }
 0x98f   :  { %v2933_v49 = vpop.permute.xlu1 %2932 }
 0x990   :  { %v2942_v5 = vmul.f32 %v2933_v49, %v11228_v50 }
 0x992   :  { %3149 = vperm.xlu1 %9197, %v7182_v20   ;;  %3338 = vperm.xlu0 %9198, %v7184_v39   ;;  %v7170_v20 = vld [vmem:[%s13003_s4 + $0x58] sm:$0xff]  ;;  %v9484_v39 = vld [vmem:[%s13004_s1 + $0xe0] sm:$0xff] }
 0x996   :  { %3105 = vperm.xlu1 %9197, %v7175_v19   ;;  %3120 = vperm.xlu0 %9198, %v7178_v41   ;;  %v9483_v19 = vld [vmem:[%s13004_s1 + $0xe8] sm:$0xff]  ;;  %v9486_v41 = vld [vmem:[%s13004_s1 + $0xd0] sm:$0xff] }
 0x99a   :  { %3333 = vperm.xlu1 %9197, %v7183_v35   ;;  %3348 = vperm.xlu0 %9198, %v7186_v43   ;;  %v9485_v35 = vld [vmem:[%s13004_s1 + $0xd8] sm:$0xff]  ;;  %v9488_v43 = vld [vmem:[%s13004_s1 + $0xc0] sm:$0xff] }
 0x99e   :  { %3115 = vperm.xlu1 %9197, %v7177_v42   ;;  %3456 = vperm.xlu0 %9198, %v7188_v44   ;;  %v9487_v42 = vld [vmem:[%s13004_s1 + $0xc8] sm:$0xff]  ;;  %v9490_v44 = vld [vmem:[%s13004_s1 + $0xb0] sm:$0xff] }
 0x9a2   :  { %3343 = vperm.xlu1 %9197, %v7185_v51   ;;  %3574 = vperm.xlu0 %9198, %v7192_v46   ;;  %v9489_v51 = vld [vmem:[%s13004_s1 + $0xb8] sm:$0xff]  ;;  %v9492_v46 = vld [vmem:[%s13004_s1 + $0xa0] sm:$0xff] }
 0x9a6   :  { %3451 = vperm.xlu1 %9197, %v7187_v45   ;;  %3466 = vperm.xlu0 %9198, %v7190_v48   ;;  %v9491_v45 = vld [vmem:[%s13004_s1 + $0xa8] sm:$0xff]  ;;  %v9494_v48 = vld [vmem:[%s13004_s1 + $0x90] sm:$0xff] }
 0x9aa   :  { %3569 = vperm.xlu1 %9197, %v7191_v47   ;;  %3584 = vperm.xlu0 %9198, %v7194_v55   ;;  %v9493_v47 = vld [vmem:[%s13004_s1 + $0x98] sm:$0xff]  ;;  %v9496_v55 = vld [vmem:[%s13004_s1 + $0x80] sm:$0xff] }
 0x9ae   :  { %3461 = vperm.xlu1 %9197, %v7189_v52   ;;  %3692 = vperm.xlu0 %9198, %v7196_v0   ;;  %v9495_v52 = vld [vmem:[%s13004_s1 + $0x88] sm:$0xff] }
 0x9b2   :  { %3579 = vperm.xlu1 %9197, %v7193_v58   ;;  %3810 = vperm.xlu0 %9198, %v7200_v1   ;;  %v9497_v58 = vld [vmem:[%s13004_s1 + $0x178] sm:$0xff] }
 0x9b6   :  { %3687 = vperm.xlu1 %9197, %v7195_v6   ;;  %3702 = vperm.xlu0 %9198, %v7198_v37  }
 0x9ba   :  { %3805 = vperm.xlu1 %9197, %v7199_v8   ;;  %3820 = vperm.xlu0 %9198, %v7202_v53  }
 0x9be   :  { %3697 = vperm.xlu1 %9197, %v7197_v7   ;;  %3928 = vperm.xlu0 %9198, %v7204_v29  }
 0x9c2   :  { %3815 = vperm.xlu1 %9197, %v7201_v24   ;;  %4046 = vperm.xlu0 %9198, %v7208_v26  }
 0x9c6   :  { %3923 = vperm.xlu1 %9197, %v7203_v25   ;;  %3938 = vperm.xlu0 %9198, %v7206_v28  }
 0x9ca   :  { %4041 = vperm.xlu1 %9197, %v7207_v27   ;;  %4056 = vperm.xlu0 %9198, %v7210_v32  }
 0x9ce   :  { %3933 = vperm.xlu1 %9197, %v7205_v30  }
 0x9d2   :  { %4051 = vperm.xlu1 %9197, %v7209_v33  }
 0x9f0   :  { %v2986_v38 = vpop.permute.xlu1 %2985 }
 0x9f1   :  { %v2991_v61 = vadd.f32 %v2986_v38, %v2943_v54  ;;  %v9498_v38 = vld [vmem:[%s13004_s1 + $0x1f8] sm:$0xff] }
 0x9f3   :  { %v11374_v40 = vmax.f32 %v2991_v61, 0.0 }
 0x9f5   :  { %8652 = vmatprep.subr.mxu0 %v11374_v40 }
 0x9f6   :  { %8653 = vmatpush3.msra.mxu0 %v11374_v40 }
 0x9fc   :  { %v2981_v60 = vpop.permute.xlu1 %2980 }
 0x9fd   :  { %v2990_v17 = vadd.f32 %v2981_v60, %v2942_v5  ;;  %v9499_v5 = vld [vmem:[%s13004_s1 + $0x170] sm:$0xff] }
 0x9ff   :  { %v11381_v9 = vmax.f32 %v2990_v17, 0.0 }
 0xa00   :  { %v2976_v3 = vpop.permute.xlu1 %2975  ;;  %v2971_v11 = vpop.permute.xlu0 %2970 }
 0xa01   :  { %v2989_v63 = vadd.f32 %v2976_v3, %v2941_v18  ;;  %v2988_v16 = vadd.f32 %v2971_v11, %v2940_v10  ;;  %8654 = vmatprep.subr.mxu0 %v11381_v9  ;;  %v9501_v18 = vld [vmem:[%s13004_s1 + $0x168] sm:$0xff] }
 0xa02   :  { %8655 = vmatpush3.msra.mxu0 %v11381_v9  ;;  %v9502_v10 = vld [vmem:[%s13004_s1 + $0x1e8] sm:$0xff] }
 0xa03   :  { %v11385_v13 = vmax.f32 %v2989_v63, 0.0  ;;  %v11387_v50 = vmax.f32 %v2988_v16, 0.0  ;;  %v9503_v16 = vld [vmem:[%s13004_s1 + $0x160] sm:$0xff] }
 0xa05   :  { %8656 = vmatprep.subr.mxu0 %v11385_v13  ;;  %v3135_v0 = vpop.permute.xlu1 %3134  ;;  %v3145_v37 = vpop.permute.xlu0 %3144 }
 0xa06   :  { %8657 = vmatpush3.msra.mxu0 %v11385_v13 }
 0xa07   :  { %8658 = vmatprep.subr.mxu0 %v11387_v50 }
 0xa08   :  { %8659 = vmatpush3.msra.mxu0 %v11387_v50 }
 0xa09   :  { %8661 = vmatmul.mubr.msk.f32.vlgmr.msra.gmra.mxu0 %vm289_vm1, %v7168_v34  ;;  %8666 = vmatprep.subr.mxu0 %v9481_v22  ;;  %v3140_v6 = vpop.permute.xlu1 %3139  ;;  %v3111_v53 = vpop.permute.xlu0 %3110  ;;  %v9504_v34 = vld [vmem:[%s13004_s1 + $0x1e0] sm:$0xff] }
 0xa0a   :  { %8663 = vmatprep.mubr.msk.f32.mxu0 %vm289_vm1, %v7169_v15  ;;  %8667 = vmatpush3.msra.mxu0 %v9481_v22  ;;  %v9505_v15 = vld [vmem:[%s13004_s1 + $0x158] sm:$0xff] }
 0xa0b   :  { %8668 = vmatprep.subr.mxu0 %v9482_v4  ;;  %v9506_v22 = vld [vmem:[%s13004_s1 + $0x1d8] sm:$0xff] }
 0xa0c   :  { %8669 = vmatpush3.msra.mxu0 %v9482_v4  ;;  %v9508_v4 = vld [vmem:[%s13004_s1 + $0x1d0] sm:$0xff] }
 0xa0d   :  { %8664 = vmatmul.mubr.msk.f32.gmra.mxu0 %vm289_vm1, %v7170_v20  ;;  %8670 = vmatprep.subr.mxu0 %v9483_v19  ;;  %v3150_v1 = vpop.permute.xlu1 %3149  ;;  %v11458_v25 = vpop.permute.xlu0 %3338  ;;  %v9507_v20 = vld [vmem:[%s13004_s1 + $0x150] sm:$0xff] }
 0xa0e   :  { %8671 = vmatpush3.msra.mxu0 %v9483_v19  ;;  %v9509_v19 = vld [vmem:[%s13004_s1 + $0x148] sm:$0xff] }
 0xa0f   :  { %8672 = vmatprep.subr.mxu0 %v9484_v39 }
 0xa10   :  { %8673 = vmatpush3.msra.mxu0 %v9484_v39  ;;  %v9510_v39 = vld [vmem:[%s13004_s1 + $0x1c8] sm:$0xff] }
 0xa11   :  { %8674 = vmatprep.subr.mxu0 %v9485_v35  ;;  %v3106_v8 = vpop.permute.xlu1 %3105  ;;  %v3121_v54 = vpop.permute.xlu0 %3120 }
 0xa12   :  { %8675 = vmatpush3.msra.mxu0 %v9485_v35  ;;  %v9511_v35 = vld [vmem:[%s13004_s1 + $0x140] sm:$0xff] }
 0xa13   :  { %8676 = vmatprep.subr.mxu0 %v9486_v41 }
 0xa14   :  { %8677 = vmatpush3.msra.mxu0 %v9486_v41  ;;  %v9512_v41 = vld [vmem:[%s13004_s1 + $0x1c0] sm:$0xff] }
 0xa15   :  { %8678 = vmatprep.subr.mxu0 %v9487_v42  ;;  %v3334_v7 = vpop.permute.xlu1 %3333 }
 0xa16   :  { %8679 = vmatpush3.msra.mxu0 %v9487_v42  ;;  %v9513_v42 = vld [vmem:[%s13004_s1 + $0x138] sm:$0xff] }
 0xa17   :  { %8680 = vmatprep.subr.mxu0 %v9488_v43 }
 0xa18   :  { %8681 = vmatpush3.msra.mxu0 %v9488_v43  ;;  %v9514_v43 = vld [vmem:[%s13004_s1 + $0x1b8] sm:$0xff] }
 0xa19   :  { %8682 = vmatprep.subr.mxu0 %v9489_v51  ;;  %v3116_v24 = vpop.permute.xlu1 %3115 }
 0xa1a   :  { %8683 = vmatpush3.msra.mxu0 %v9489_v51  ;;  %v11529_v51 = vpop.permute.xlu0 %3348 }
 0xa1b   :  { %8684 = vmatprep.subr.mxu0 %v9490_v44 }
 0xa1c   :  { %8685 = vmatpush3.msra.mxu0 %v9490_v44  ;;  %v9515_v44 = vld [vmem:[%s13004_s1 + $0x130] sm:$0xff] }
 0xa1d   :  { %8686 = vmatprep.subr.mxu0 %v9491_v45  ;;  %v11468_v36 = vpop.permute.xlu1 %3343 }
 0xa1e   :  { %8687 = vmatpush3.msra.mxu0 %v9491_v45  ;;  %v9516_v45 = vld [vmem:[%s13004_s1 + $0x1b0] sm:$0xff] }
 0xa1f   :  { %8688 = vmatprep.subr.mxu0 %v9492_v46 }
 0xa20   :  { %8689 = vmatpush3.msra.mxu0 %v9492_v46 }
 0xa21   :  { %8690 = vmatprep.subr.mxu0 %v9493_v47  ;;  %v3452_v3 = vpop.permute.xlu1 %3451 }
 0xa22   :  { %8691 = vmatpush3.msra.mxu0 %v9493_v47  ;;  %v9517_v47 = vld [vmem:[%s13004_s1 + $0x128] sm:$0xff] }
 0xa23   :  { %8692 = vmatprep.subr.mxu0 %v9494_v48 }
 0xa24   :  { %8693 = vmatpush3.msra.mxu0 %v9494_v48  ;;  %v9518_v48 = vld [vmem:[%s13004_s1 + $0x1a8] sm:$0xff] }
 0xa25   :  { %8694 = vmatprep.subr.mxu0 %v9495_v52  ;;  %v11537_v46 = vpop.permute.xlu1 %3569 }
 0xa26   :  { %8695 = vmatpush3.msra.mxu0 %v9495_v52  ;;  %v9519_v52 = vld [vmem:[%s13004_s1 + $0x120] sm:$0xff] }
 0xa27   :  { %8696 = vmatprep.subr.mxu0 %v9496_v55 }
 0xa28   :  { %8697 = vmatpush3.msra.mxu0 %v9496_v55  ;;  %v9520_v55 = vld [vmem:[%s13004_s1 + $0x1a0] sm:$0xff] }
 0xa29   :  { %8742 = vmatprep.subr.mxu0 %v9497_v58 }
 0xac9   :  { %v11456_v29 = vpop.f32.mrf.mxu0 }
 0xaca   :  { %v3153_v32 = vmul.f32 %v11456_v29, %v3140_v6  ;;  %v3124_v33 = vmul.f32 %v11456_v29, %v3111_v53  ;;  %v9522_v6 = vld [vmem:[%s13004_s1 + $0x198] sm:$0xff]  ;;  %v9526_v53 = vld [vmem:[%s13004_s1 + $0x188] sm:$0xff] }
 0xacb   :  { %v11460_v26 = vpop.f32.mrf.mxu0 }
 0xacc   :  { %v3152_v27 = vmul.f32 %v3135_v0, %v11460_v26  ;;  %v3123_v28 = vmul.f32 %v3106_v8, %v11460_v26  ;;  %v3351_v11 = vmul.f32 %v3334_v7, %v11460_v26  ;;  %v3469_v63 = vmul.f32 %v3452_v3, %v11460_v26  ;;  %v9521_v0 = vld [vmem:[%s13004_s1 + $0x118] sm:$0xff]  ;;  %v9523_v8 = vld [vmem:[%s13004_s1 + $0x110] sm:$0xff]  ;;  %v9525_v7 = vld [vmem:[%s13004_s1 + $0x108] sm:$0xff] }
 0xacd   :  { %v11464_v30 = vpop.f32.mrf.mxu0  ;;  %v9533_v3 = vld [vmem:[%s13004_s1 + $0x268] sm:$0xff] }
 0xace   :  { %8698 = vmatprep.mubr.f32.mxu0 %v3152_v27  ;;  %8736 = vmatprep.mubr.f32.mxu1 %v3123_v28  ;;  %v3126_v60 = vmul.f32 %v11464_v30, %v3121_v54  ;;  %v3155_v17 = vmul.f32 %v11464_v30, %v3150_v1  ;;  %v3462_v1 = vpop.permute.xlu1 %3461  ;;  %v9527_v27 = vld [vmem:[%s13004_s1 + $0x100] sm:$0xff] }
 0xacf   :  { %v11470_v49 = vpop.f32.mrf.mxu0  ;;  %8699 = vmatmul.mubr.f32.vlgmr.msra.gmra.mxu0 %v3153_v32  ;;  %8737 = vmatmul.mubr.f32.vlgmr.msra.gmra.mxu1 %v3124_v33  ;;  %v9528_v28 = vld [vmem:[%s13004_s1 + $0x180] sm:$0xff]  ;;  %v3352_v32 = vmul.f32 %v11456_v29, %v11458_v25  ;;  %v9530_v25 = vld [vmem:[%s13004_s1 + $0x2f8] sm:$0xff] }
 0xad0   :  { %8743 = vmatpush3.msra.mxu0 %v9497_v58  ;;  %8781 = vmatpush3.msra.mxu1 %v9498_v38  ;;  %v3154_v61 = vmul.f32 %v3145_v37, %v11470_v49  ;;  %v3125_v2 = vmul.f32 %v3116_v24, %v11470_v49  ;;  %v3457_v58 = vpop.permute.xlu0 %3456  ;;  %v9524_v37 = vld [vmem:[%s13004_s1 + $0x190] sm:$0xff]  ;;  %v3353_v38 = vmul.f32 %v11468_v36, %v11470_v49 }
 0xad1   :  { %8744 = vmatprep.subr.mxu0 %v9499_v5  ;;  %8782 = vmatprep.subr.mxu1 %v9500_v12  ;;  %v3470_v33 = vmul.f32 %v11456_v29, %v3457_v58  ;;  %v9531_v36 = vld [vmem:[%s13004_s1 + $0x270] sm:$0xff] }
 0xad2   :  { %8745 = vmatpush3.msra.mxu0 %v9499_v5  ;;  %8783 = vmatpush3.msra.mxu1 %v9500_v12  ;;  %v11580_v54 = vpop.permute.xlu1 %3579  ;;  %v9532_v12 = vld [vmem:[%s13004_s1 + $0x2f0] sm:$0xff] }
 0xad3   :  { %8701 = vmatprep.mubr.f32.mxu0 %v3154_v61  ;;  %8739 = vmatprep.mubr.f32.mxu1 %v3125_v2  ;;  %v3471_v61 = vmul.f32 %v3462_v1, %v11470_v49  ;;  %v9529_v2 = vld [vmem:[%s13004_s1 + $0x278] sm:$0xff] }
 0xad4   :  { %8746 = vmatprep.subr.mxu0 %v9501_v18  ;;  %8784 = vmatprep.subr.mxu1 %v9502_v10  ;;  %v11569_v24 = vpop.permute.xlu0 %3574 }
 0xad5   :  { %8702 = vmatmul.mubr.f32.gmra.mxu0 %v3155_v17  ;;  %8740 = vmatmul.mubr.f32.gmra.mxu1 %v3126_v60  ;;  %v3354_v60 = vmul.f32 %v11464_v30, %v11529_v51 }
 0xad6   :  { %8747 = vmatpush3.msra.mxu0 %v9501_v18  ;;  %8785 = vmatpush3.msra.mxu1 %v9502_v10  ;;  %v3688_v18 = vpop.permute.xlu1 %3687  ;;  %v3587_v10 = vmul.f32 %v11537_v46, %v11460_v26 }
 0xad7   :  { %8748 = vmatprep.subr.mxu0 %v9503_v16  ;;  %8774 = vmatprep.mubr.f32.mxu0 %v3351_v11  ;;  %v9534_v11 = vld [vmem:[%s13004_s1 + $0x2e8] sm:$0xff] }
 0xad8   :  { %8786 = vmatprep.subr.mxu1 %v9504_v34  ;;  %8812 = vmatprep.mubr.f32.mxu1 %v3469_v63  ;;  %v3467_v5 = vpop.permute.xlu0 %3466  ;;  %v3705_v63 = vmul.f32 %v3688_v18, %v11460_v26 }
 0xad9   :  { %8749 = vmatpush3.msra.mxu0 %v9503_v16  ;;  %8787 = vmatpush3.msra.mxu1 %v9504_v34  ;;  %v3472_v17 = vmul.f32 %v11464_v30, %v3467_v5  ;;  %v9535_v16 = vld [vmem:[%s13004_s1 + $0x260] sm:$0xff]  ;;  %v9561_v5 = vld [vmem:[%s13004_s1 + $0x378] sm:$0xff] }
 0xada   :  { %8750 = vmatprep.subr.mxu0 %v9505_v15  ;;  %8788 = vmatprep.subr.mxu1 %v9506_v22  ;;  %v9536_v34 = vld [vmem:[%s13004_s1 + $0x2e0] sm:$0xff]  ;;  %v11653_v46 = vpop.permute.xlu1 %3805 }
 0xadb   :  { %8751 = vmatpush3.msra.mxu0 %v9505_v15  ;;  %8789 = vmatpush3.msra.mxu1 %v9506_v22  ;;  %v9537_v15 = vld [vmem:[%s13004_s1 + $0x258] sm:$0xff] }
 0xadc   :  { %8752 = vmatprep.subr.mxu0 %v9507_v20  ;;  %8790 = vmatprep.subr.mxu1 %v9508_v4  ;;  %v9538_v22 = vld [vmem:[%s13004_s1 + $0x2d8] sm:$0xff]  ;;  %v11645_v51 = vpop.permute.xlu0 %3584 }
 0xadd   :  { %8753 = vmatpush3.msra.mxu0 %v9507_v20  ;;  %8791 = vmatpush3.msra.mxu1 %v9508_v4  ;;  %v9539_v20 = vld [vmem:[%s13004_s1 + $0x250] sm:$0xff] }
 0xade   :  { %8754 = vmatprep.subr.mxu0 %v9509_v19  ;;  %8792 = vmatprep.subr.mxu1 %v9510_v39  ;;  %v9540_v4 = vld [vmem:[%s13004_s1 + $0x2d0] sm:$0xff]  ;;  %v3698_v1 = vpop.permute.xlu1 %3697 }
 0xadf   :  { %8755 = vmatpush3.msra.mxu0 %v9509_v19  ;;  %8793 = vmatpush3.msra.mxu1 %v9510_v39  ;;  %v9541_v19 = vld [vmem:[%s13004_s1 + $0x248] sm:$0xff] }
 0xae0   :  { %8756 = vmatprep.subr.mxu0 %v9511_v35  ;;  %8794 = vmatprep.subr.mxu1 %v9512_v41  ;;  %v9542_v39 = vld [vmem:[%s13004_s1 + $0x2c8] sm:$0xff]  ;;  %v3693_v58 = vpop.permute.xlu0 %3692 }
 0xae1   :  { %8757 = vmatpush3.msra.mxu0 %v9511_v35  ;;  %8795 = vmatpush3.msra.mxu1 %v9512_v41  ;;  %v9543_v35 = vld [vmem:[%s13004_s1 + $0x240] sm:$0xff] }
 0xae2   :  { %8758 = vmatprep.subr.mxu0 %v9513_v42  ;;  %8796 = vmatprep.subr.mxu1 %v9514_v43  ;;  %v9544_v41 = vld [vmem:[%s13004_s1 + $0x2c0] sm:$0xff] }
 0xae3   :  { %8759 = vmatpush3.msra.mxu0 %v9513_v42  ;;  %8797 = vmatpush3.msra.mxu1 %v9514_v43  ;;  %v9545_v42 = vld [vmem:[%s13004_s1 + $0x238] sm:$0xff] }
 0xae4   :  { %8760 = vmatprep.subr.mxu0 %v9515_v44  ;;  %8798 = vmatprep.subr.mxu1 %v9516_v45  ;;  %v9546_v43 = vld [vmem:[%s13004_s1 + $0x2b8] sm:$0xff] }
 0xae5   :  { %8761 = vmatpush3.msra.mxu0 %v9515_v44  ;;  %8799 = vmatpush3.msra.mxu1 %v9516_v45  ;;  %v9547_v44 = vld [vmem:[%s13004_s1 + $0x230] sm:$0xff] }
 0xae6   :  { %8762 = vmatprep.subr.mxu0 %v9517_v47  ;;  %8800 = vmatprep.subr.mxu1 %v9518_v48  ;;  %v9548_v45 = vld [vmem:[%s13004_s1 + $0x2b0] sm:$0xff] }
 0xae7   :  { %8763 = vmatpush3.msra.mxu0 %v9517_v47  ;;  %8801 = vmatpush3.msra.mxu1 %v9518_v48  ;;  %v9549_v47 = vld [vmem:[%s13004_s1 + $0x228] sm:$0xff] }
 0xae8   :  { %8764 = vmatprep.subr.mxu0 %v9519_v52  ;;  %8802 = vmatprep.subr.mxu1 %v9520_v55  ;;  %v9550_v48 = vld [vmem:[%s13004_s1 + $0x2a8] sm:$0xff] }
 0xae9   :  { %8765 = vmatpush3.msra.mxu0 %v9519_v52  ;;  %8803 = vmatpush3.msra.mxu1 %v9520_v55  ;;  %v9551_v52 = vld [vmem:[%s13004_s1 + $0x220] sm:$0xff] }
 0xaea   :  { %8766 = vmatprep.subr.mxu0 %v9521_v0  ;;  %8804 = vmatprep.subr.mxu1 %v9522_v6  ;;  %v9552_v55 = vld [vmem:[%s13004_s1 + $0x2a0] sm:$0xff] }
 0xaeb   :  { %8767 = vmatpush3.msra.mxu0 %v9521_v0  ;;  %8805 = vmatpush3.msra.mxu1 %v9522_v6  ;;  %v9553_v0 = vld [vmem:[%s13004_s1 + $0x218] sm:$0xff] }
 0xaec   :  { %8768 = vmatprep.subr.mxu0 %v9523_v8  ;;  %8806 = vmatprep.subr.mxu1 %v9524_v37  ;;  %v9554_v6 = vld [vmem:[%s13004_s1 + $0x298] sm:$0xff] }
 0xaed   :  { %8769 = vmatpush3.msra.mxu0 %v9523_v8  ;;  %8807 = vmatpush3.msra.mxu1 %v9524_v37  ;;  %v9555_v8 = vld [vmem:[%s13004_s1 + $0x210] sm:$0xff] }
 0xaee   :  { %8770 = vmatprep.subr.mxu0 %v9525_v7  ;;  %8808 = vmatprep.subr.mxu1 %v9526_v53  ;;  %v9556_v37 = vld [vmem:[%s13004_s1 + $0x290] sm:$0xff] }
 0xaef   :  { %8771 = vmatpush3.msra.mxu0 %v9525_v7  ;;  %8809 = vmatpush3.msra.mxu1 %v9526_v53  ;;  %v9557_v7 = vld [vmem:[%s13004_s1 + $0x208] sm:$0xff] }
 0xaf0   :  { %8772 = vmatprep.subr.mxu0 %v9527_v27  ;;  %8810 = vmatprep.subr.mxu1 %v9528_v28  ;;  %v9558_v53 = vld [vmem:[%s13004_s1 + $0x288] sm:$0xff] }
 0xaf1   :  { %8773 = vmatpush3.msra.mxu0 %v9527_v27  ;;  %8811 = vmatpush3.msra.mxu1 %v9528_v28  ;;  %v11685_v27 = vpop.permute.xlu0 %3810  ;;  %v9559_v28 = vld [vmem:[%s13004_s1 + $0x200] sm:$0xff] }
 0xaf2   :  { %8775 = vmatmul.mubr.f32.vlgmr.msra.gmra.mxu0 %v3352_v32  ;;  %8813 = vmatmul.mubr.f32.vlgmr.msra.gmra.mxu1 %v3470_v33  ;;  %v9560_v32 = vld [vmem:[%s13004_s1 + $0x280] sm:$0xff]  ;;  %v3588_v33 = vmul.f32 %v11456_v29, %v11569_v24  ;;  %v9562_v24 = vld [vmem:[%s13004_s1 + $0x3f8] sm:$0xff] }
 0xaf3   :  { %8818 = vmatprep.subr.mxu0 %v9529_v2  ;;  %8856 = vmatprep.subr.mxu1 %v9530_v25 }
 0xaf4   :  { %8777 = vmatprep.mubr.f32.mxu0 %v3353_v38  ;;  %8815 = vmatprep.mubr.f32.mxu1 %v3471_v61  ;;  %v3706_v38 = vmul.f32 %v11456_v29, %v3693_v58  ;;  %v11696_v61 = vpop.permute.xlu1 %3815  ;;  %v9586_v58 = vld [vmem:[%s13004_s1 + $0x398] sm:$0xff] }
 0xaf5   :  { %8819 = vmatpush3.msra.mxu0 %v9529_v2  ;;  %8857 = vmatpush3.msra.mxu1 %v9530_v25  ;;  %v3589_v2 = vmul.f32 %v11580_v54, %v11470_v49  ;;  %v3707_v25 = vmul.f32 %v3698_v1, %v11470_v49  ;;  %v9563_v54 = vld [vmem:[%s13004_s1 + $0x370] sm:$0xff] }
 0xaf6   :  { %8820 = vmatprep.subr.mxu0 %v9531_v36  ;;  %8858 = vmatprep.subr.mxu1 %v9532_v12  ;;  %v9587_v1 = vld [vmem:[%s13004_s1 + $0x310] sm:$0xff] }
 0xaf7   :  { %8821 = vmatpush3.msra.mxu0 %v9531_v36  ;;  %8859 = vmatpush3.msra.mxu1 %v9532_v12  ;;  %v3703_v36 = vpop.permute.xlu0 %3702  ;;  %v9564_v12 = vld [vmem:[%s13004_s1 + $0x3f0] sm:$0xff] }
 0xaf8   :  { %8778 = vmatmul.mubr.f32.gmra.mxu0 %v3354_v60  ;;  %8816 = vmatmul.mubr.f32.gmra.mxu1 %v3472_v17  ;;  %v3590_v60 = vmul.f32 %v11464_v30, %v11645_v51  ;;  %v3708_v17 = vmul.f32 %v11464_v30, %v3703_v36  ;;  %v3924_v18 = vpop.permute.xlu1 %3923  ;;  %v9579_v51 = vld [vmem:[%s13004_s1 + $0x330] sm:$0xff] }
 0xaf9   :  { %8822 = vmatprep.subr.mxu0 %v9533_v3  ;;  %8860 = vmatprep.subr.mxu1 %v9534_v11 }
 0xafa   :  { %8823 = vmatpush3.msra.mxu0 %v9533_v3  ;;  %8850 = vmatprep.mubr.f32.mxu0 %v3587_v10  ;;  %v3823_v10 = vmul.f32 %v11653_v46, %v11460_v26  ;;  %v9565_v3 = vld [vmem:[%s13004_s1 + $0x368] sm:$0xff] }
 0xafb   :  { %8861 = vmatpush3.msra.mxu1 %v9534_v11  ;;  %8888 = vmatprep.mubr.f32.mxu1 %v3705_v63  ;;  %v9566_v11 = vld [vmem:[%s13004_s1 + $0x3e8] sm:$0xff]  ;;  %v3941_v63 = vmul.f32 %v3924_v18, %v11460_v26  ;;  %v9602_v18 = vld [vmem:[%s13004_s1 + $0x430] sm:$0xff] }
 0xafc   :  { %8824 = vmatprep.subr.mxu0 %v9535_v16  ;;  %8862 = vmatprep.subr.mxu1 %v9536_v34  ;;  %v9581_v46 = vld [vmem:[%s13004_s1 + $0x328] sm:$0xff] }
 0xafd   :  { %8825 = vmatpush3.msra.mxu0 %v9535_v16  ;;  %8863 = vmatpush3.msra.mxu1 %v9536_v34  ;;  %v9567_v16 = vld [vmem:[%s13004_s1 + $0x360] sm:$0xff] }
 0xafe   :  { %8826 = vmatprep.subr.mxu0 %v9537_v15  ;;  %8864 = vmatprep.subr.mxu1 %v9538_v22  ;;  %v9568_v34 = vld [vmem:[%s13004_s1 + $0x3e0] sm:$0xff] }
 0xaff   :  { %8827 = vmatpush3.msra.mxu0 %v9537_v15  ;;  %8865 = vmatpush3.msra.mxu1 %v9538_v22  ;;  %v9569_v15 = vld [vmem:[%s13004_s1 + $0x358] sm:$0xff] }
 0xb00   :  { %8828 = vmatprep.subr.mxu0 %v9539_v20  ;;  %8866 = vmatprep.subr.mxu1 %v9540_v4  ;;  %v9570_v22 = vld [vmem:[%s13004_s1 + $0x3d8] sm:$0xff] }
 0xb01   :  { %8829 = vmatpush3.msra.mxu0 %v9539_v20  ;;  %8867 = vmatpush3.msra.mxu1 %v9540_v4  ;;  %v9571_v20 = vld [vmem:[%s13004_s1 + $0x350] sm:$0xff] }
 0xb02   :  { %8830 = vmatprep.subr.mxu0 %v9541_v19  ;;  %8868 = vmatprep.subr.mxu1 %v9542_v39  ;;  %v9572_v4 = vld [vmem:[%s13004_s1 + $0x3d0] sm:$0xff] }
 0xb03   :  { %8831 = vmatpush3.msra.mxu0 %v9541_v19  ;;  %8869 = vmatpush3.msra.mxu1 %v9542_v39  ;;  %v9573_v19 = vld [vmem:[%s13004_s1 + $0x348] sm:$0xff] }
 0xb04   :  { %8832 = vmatprep.subr.mxu0 %v9543_v35  ;;  %8870 = vmatprep.subr.mxu1 %v9544_v41  ;;  %v9574_v39 = vld [vmem:[%s13004_s1 + $0x3c8] sm:$0xff] }
 0xb05   :  { %8833 = vmatpush3.msra.mxu0 %v9543_v35  ;;  %8871 = vmatpush3.msra.mxu1 %v9544_v41  ;;  %v9575_v35 = vld [vmem:[%s13004_s1 + $0x340] sm:$0xff] }
 0xb06   :  { %8834 = vmatprep.subr.mxu0 %v9545_v42  ;;  %8872 = vmatprep.subr.mxu1 %v9546_v43  ;;  %v9576_v41 = vld [vmem:[%s13004_s1 + $0x3c0] sm:$0xff] }
 0xb07   :  { %8835 = vmatpush3.msra.mxu0 %v9545_v42  ;;  %8873 = vmatpush3.msra.mxu1 %v9546_v43  ;;  %v9577_v42 = vld [vmem:[%s13004_s1 + $0x338] sm:$0xff] }
 0xb08   :  { %8836 = vmatprep.subr.mxu0 %v9547_v44  ;;  %8874 = vmatprep.subr.mxu1 %v9548_v45  ;;  %v9578_v43 = vld [vmem:[%s13004_s1 + $0x3b8] sm:$0xff] }
 0xb09   :  { %8837 = vmatpush3.msra.mxu0 %v9547_v44  ;;  %8875 = vmatpush3.msra.mxu1 %v9548_v45  ;;  %v9580_v44 = vld [vmem:[%s13004_s1 + $0x3b0] sm:$0xff]  ;;  %v3821_v45 = vpop.permute.xlu0 %3820 }
 0xb0a   :  { %8838 = vmatprep.subr.mxu0 %v9549_v47  ;;  %8876 = vmatprep.subr.mxu1 %v9550_v48 }
 0xb0b   :  { %8839 = vmatpush3.msra.mxu0 %v9549_v47  ;;  %8877 = vmatpush3.msra.mxu1 %v9550_v48  ;;  %v9582_v47 = vld [vmem:[%s13004_s1 + $0x3a8] sm:$0xff]  ;;  %v9583_v48 = vld [vmem:[%s13004_s1 + $0x320] sm:$0xff] }
 0xb0c   :  { %8840 = vmatprep.subr.mxu0 %v9551_v52  ;;  %8878 = vmatprep.subr.mxu1 %v9552_v55 }
 0xb0d   :  { %8841 = vmatpush3.msra.mxu0 %v9551_v52  ;;  %8879 = vmatpush3.msra.mxu1 %v9552_v55  ;;  %v9584_v52 = vld [vmem:[%s13004_s1 + $0x3a0] sm:$0xff]  ;;  %v9585_v55 = vld [vmem:[%s13004_s1 + $0x318] sm:$0xff] }
 0xb0e   :  { %8842 = vmatprep.subr.mxu0 %v9553_v0  ;;  %8880 = vmatprep.subr.mxu1 %v9554_v6 }
 0xb0f   :  { %8843 = vmatpush3.msra.mxu0 %v9553_v0  ;;  %8881 = vmatpush3.msra.mxu1 %v9554_v6  ;;  %v4042_v0 = vpop.permute.xlu1 %4041  ;;  %v3929_v6 = vpop.permute.xlu0 %3928 }
 0xb10   :  { %8844 = vmatprep.subr.mxu0 %v9555_v8  ;;  %8882 = vmatprep.subr.mxu1 %v9556_v37 }
 0xb11   :  { %8845 = vmatpush3.msra.mxu0 %v9555_v8  ;;  %8883 = vmatpush3.msra.mxu1 %v9556_v37  ;;  %v9588_v8 = vld [vmem:[%s13004_s1 + $0x390] sm:$0xff]  ;;  %v9589_v37 = vld [vmem:[%s13004_s1 + $0x308] sm:$0xff] }
 0xb12   :  { %8846 = vmatprep.subr.mxu0 %v9557_v7  ;;  %8884 = vmatprep.subr.mxu1 %v9558_v53 }
 0xb13   :  { %8847 = vmatpush3.msra.mxu0 %v9557_v7  ;;  %8885 = vmatpush3.msra.mxu1 %v9558_v53  ;;  %v9590_v7 = vld [vmem:[%s13004_s1 + $0x388] sm:$0xff]  ;;  %v9591_v53 = vld [vmem:[%s13004_s1 + $0x300] sm:$0xff] }
 0xb14   :  { %8848 = vmatprep.subr.mxu0 %v9559_v28  ;;  %8886 = vmatprep.subr.mxu1 %v9560_v32 }
 0xb15   :  { %8849 = vmatpush3.msra.mxu0 %v9559_v28  ;;  %8887 = vmatpush3.msra.mxu1 %v9560_v32  ;;  %v9592_v28 = vld [vmem:[%s13004_s1 + $0x380] sm:$0xff]  ;;  %v3824_v32 = vmul.f32 %v11456_v29, %v11685_v27 }
 0xb16   :  { %8851 = vmatmul.mubr.f32.vlgmr.msra.gmra.mxu0 %v3588_v33  ;;  %8889 = vmatmul.mubr.f32.vlgmr.msra.gmra.mxu1 %v3706_v38  ;;  %v3942_v33 = vmul.f32 %v11456_v29, %v3929_v6  ;;  %v3934_v38 = vpop.permute.xlu1 %3933 }
 0xb17   :  { %8894 = vmatprep.subr.mxu0 %v9561_v5  ;;  %8932 = vmatprep.subr.mxu1 %v9562_v24 }
 0xb18   :  { %8853 = vmatprep.mubr.f32.mxu0 %v3589_v2  ;;  %8891 = vmatprep.mubr.f32.mxu1 %v3707_v25  ;;  %v11806_v2 = vpop.permute.xlu0 %4046  ;;  %v3825_v25 = vmul.f32 %v11696_v61, %v11470_v49  ;;  %v9594_v61 = vld [vmem:[%s13004_s1 + $0x470] sm:$0xff] }
 0xb19   :  { %8895 = vmatpush3.msra.mxu0 %v9561_v5  ;;  %8933 = vmatpush3.msra.mxu1 %v9562_v24  ;;  %v3943_v5 = vmul.f32 %v3934_v38, %v11470_v49  ;;  %v9593_v24 = vld [vmem:[%s13004_s1 + $0x478] sm:$0xff] }
 0xb1a   :  { %8896 = vmatprep.subr.mxu0 %v9563_v54  ;;  %8934 = vmatprep.subr.mxu1 %v9564_v12 }
 0xb1b   :  { %8897 = vmatpush3.msra.mxu0 %v9563_v54  ;;  %8935 = vmatpush3.msra.mxu1 %v9564_v12  ;;  %v3826_v54 = vmul.f32 %v11464_v30, %v3821_v45  ;;  %v4059_v12 = vmul.f32 %v4042_v0, %v11460_v26  ;;  %v9599_v26 = vld [vmem:[%s13004_s1 + $0x448] sm:$0xff] }
 0xb1c   :  { %8854 = vmatmul.mubr.f32.gmra.mxu0 %v3590_v60  ;;  %8892 = vmatmul.mubr.f32.gmra.mxu1 %v3708_v17  ;;  %v3939_v27 = vpop.permute.xlu0 %3938  ;;  %v9596_v60 = vld [vmem:[%s13004_s1 + $0x460] sm:$0xff]  ;;  %v9601_v17 = vld [vmem:[%s13004_s1 + $0x438] sm:$0xff] }
 0xb1d   :  { %8898 = vmatprep.subr.mxu0 %v9565_v3  ;;  %8936 = vmatprep.subr.mxu1 %v9566_v11  ;;  %v3944_v36 = vmul.f32 %v11464_v30, %v3939_v27 }
 0xb1e   :  { %8899 = vmatpush3.msra.mxu0 %v9565_v3  ;;  %8926 = vmatprep.mubr.f32.mxu0 %v3823_v10  ;;  %v9603_v10 = vld [vmem:[%s13004_s1 + $0x428] sm:$0xff]  ;;  %v9604_v3 = vld [vmem:[%s13004_s1 + $0x420] sm:$0xff] }
 0xb1f   :  { %8937 = vmatpush3.msra.mxu1 %v9566_v11  ;;  %8964 = vmatprep.mubr.f32.mxu1 %v3941_v63  ;;  %v9605_v11 = vld [vmem:[%s13004_s1 + $0x418] sm:$0xff]  ;;  %v9606_v63 = vld [vmem:[%s13004_s1 + $0x410] sm:$0xff] }
 0xb20   :  { %8900 = vmatprep.subr.mxu0 %v9567_v16  ;;  %8938 = vmatprep.subr.mxu1 %v9568_v34 }
 0xb21   :  { %8901 = vmatpush3.msra.mxu0 %v9567_v16  ;;  %8939 = vmatpush3.msra.mxu1 %v9568_v34  ;;  %v9607_v16 = vld [vmem:[%s13004_s1 + $0x408] sm:$0xff]  ;;  %v4052_v34 = vpop.permute.xlu1 %4051 }
 0xb22   :  { %8902 = vmatprep.subr.mxu0 %v9569_v15  ;;  %8940 = vmatprep.subr.mxu1 %v9570_v22 }
 0xb23   :  { %8903 = vmatpush3.msra.mxu0 %v9569_v15  ;;  %8941 = vmatpush3.msra.mxu1 %v9570_v22  ;;  %v4060_v15 = vmul.f32 %v11456_v29, %v11806_v2  ;;  %v9608_v22 = vld [vmem:[%s13004_s1 + $0x400] sm:$0xff] }
 0xb24   :  { %8904 = vmatprep.subr.mxu0 %v9571_v20  ;;  %8942 = vmatprep.subr.mxu1 %v9572_v4 }
 0xb25   :  { %8905 = vmatpush3.msra.mxu0 %v9571_v20  ;;  %8943 = vmatpush3.msra.mxu1 %v9572_v4  ;;  %v4057_v20 = vpop.permute.xlu0 %4056  ;;  %v4061_v4 = vmul.f32 %v4052_v34, %v11470_v49 }
 0xb26   :  { %8906 = vmatprep.subr.mxu0 %v9573_v19  ;;  %8944 = vmatprep.subr.mxu1 %v9574_v39 }
 0xb27   :  { %8907 = vmatpush3.msra.mxu0 %v9573_v19  ;;  %8945 = vmatpush3.msra.mxu1 %v9574_v39  ;;  %v4062_v19 = vmul.f32 %v11464_v30, %v4057_v20 }
 0xb28   :  { %8908 = vmatprep.subr.mxu0 %v9575_v35  ;;  %8946 = vmatprep.subr.mxu1 %v9576_v41 }
 0xb29   :  { %8909 = vmatpush3.msra.mxu0 %v9575_v35  ;;  %8947 = vmatpush3.msra.mxu1 %v9576_v41 }
 0xb2a   :  { %8910 = vmatprep.subr.mxu0 %v9577_v42  ;;  %8948 = vmatprep.subr.mxu1 %v9578_v43 }
 0xb2b   :  { %8911 = vmatpush3.msra.mxu0 %v9577_v42  ;;  %8949 = vmatpush3.msra.mxu1 %v9578_v43 }
 0xb2c   :  { %8912 = vmatprep.subr.mxu0 %v9579_v51  ;;  %8950 = vmatprep.subr.mxu1 %v9580_v44 }
 0xb2d   :  { %8913 = vmatpush3.msra.mxu0 %v9579_v51  ;;  %8951 = vmatpush3.msra.mxu1 %v9580_v44 }
 0xb2e   :  { %8914 = vmatprep.subr.mxu0 %v9581_v46  ;;  %8952 = vmatprep.subr.mxu1 %v9582_v47 }
 0xb2f   :  { %8915 = vmatpush3.msra.mxu0 %v9581_v46  ;;  %8953 = vmatpush3.msra.mxu1 %v9582_v47 }
 0xb30   :  { %8916 = vmatprep.subr.mxu0 %v9583_v48  ;;  %8954 = vmatprep.subr.mxu1 %v9584_v52 }
 0xb31   :  { %8917 = vmatpush3.msra.mxu0 %v9583_v48  ;;  %8955 = vmatpush3.msra.mxu1 %v9584_v52 }
 0xb32   :  { %8918 = vmatprep.subr.mxu0 %v9585_v55  ;;  %8956 = vmatprep.subr.mxu1 %v9586_v58 }
 0xb33   :  { %8919 = vmatpush3.msra.mxu0 %v9585_v55  ;;  %8957 = vmatpush3.msra.mxu1 %v9586_v58 }
 0xb34   :  { %8920 = vmatprep.subr.mxu0 %v9587_v1  ;;  %8958 = vmatprep.subr.mxu1 %v9588_v8 }
 0xb35   :  { %8921 = vmatpush3.msra.mxu0 %v9587_v1  ;;  %8959 = vmatpush3.msra.mxu1 %v9588_v8 }
 0xb36   :  { %8922 = vmatprep.subr.mxu0 %v9589_v37  ;;  %8960 = vmatprep.subr.mxu1 %v9590_v7 }
 0xb37   :  { %8923 = vmatpush3.msra.mxu0 %v9589_v37  ;;  %8961 = vmatpush3.msra.mxu1 %v9590_v7 }
 0xb38   :  { %8924 = vmatprep.subr.mxu0 %v9591_v53  ;;  %8962 = vmatprep.subr.mxu1 %v9592_v28 }
 0xb39   :  { %8925 = vmatpush3.msra.mxu0 %v9591_v53  ;;  %8963 = vmatpush3.msra.mxu1 %v9592_v28 }
 0xb3a   :  { %8927 = vmatmul.mubr.f32.vlgmr.msra.gmra.mxu0 %v3824_v32  ;;  %8965 = vmatmul.mubr.f32.vlgmr.msra.gmra.mxu1 %v3942_v33 }
 0xb3b   :  { %8970 = vmatprep.subr.mxu0 %v9593_v24  ;;  %9008 = vmatprep.subr.mxu1 %v11374_v40 }
 0xb3c   :  { %8929 = vmatprep.mubr.f32.mxu0 %v3825_v25  ;;  %8967 = vmatprep.mubr.f32.mxu1 %v3943_v5 }
 0xb3d   :  { %8971 = vmatpush3.msra.mxu0 %v9593_v24  ;;  %9009 = vmatpush3.msra.mxu1 %v11374_v40  ;;  %v9595_v40 = vld [vmem:[%s13004_s1 + $0x468] sm:$0xff] }
 0xb3e   :  { %8972 = vmatprep.subr.mxu0 %v9594_v61  ;;  %9010 = vmatprep.subr.mxu1 %v11381_v9 }
 0xb3f   :  { %8973 = vmatpush3.msra.mxu0 %v9594_v61  ;;  %9011 = vmatpush3.msra.mxu1 %v11381_v9  ;;  %v9597_v9 = vld [vmem:[%s13004_s1 + $0x458] sm:$0xff] }
 0xb40   :  { %8930 = vmatmul.mubr.f32.gmra.mxu0 %v3826_v54  ;;  %8968 = vmatmul.mubr.f32.gmra.mxu1 %v3944_v36 }
 0xb41   :  { %8974 = vmatprep.subr.mxu0 %v9595_v40  ;;  %9012 = vmatprep.subr.mxu1 %v11385_v13 }
 0xb42   :  { %8975 = vmatpush3.msra.mxu0 %v9595_v40  ;;  %9002 = vmatprep.mubr.f32.mxu0 %v4059_v12 }
 0xb43   :  { %9013 = vmatpush3.msra.mxu1 %v11385_v13  ;;  %8976 = vmatprep.subr.mxu0 %v9596_v60  ;;  %v9598_v13 = vld [vmem:[%s13004_s1 + $0x450] sm:$0xff] }
 0xb44   :  { %9014 = vmatprep.subr.mxu1 %v11387_v50  ;;  %8977 = vmatpush3.msra.mxu0 %v9596_v60 }
 0xb45   :  { %9015 = vmatpush3.msra.mxu1 %v11387_v50  ;;  %8978 = vmatprep.subr.mxu0 %v9597_v9  ;;  %v9600_v50 = vld [vmem:[%s13004_s1 + $0x440] sm:$0xff] }
 0xb46   :  { %8979 = vmatpush3.msra.mxu0 %v9597_v9 }
 0xb47   :  { %8980 = vmatprep.subr.mxu0 %v9598_v13 }
 0xb48   :  { %8981 = vmatpush3.msra.mxu0 %v9598_v13 }
 0xb49   :  { %8982 = vmatprep.subr.mxu0 %v9599_v26 }
 0xb4a   :  { %8983 = vmatpush3.msra.mxu0 %v9599_v26 }
 0xb4b   :  { %8984 = vmatprep.subr.mxu0 %v9600_v50 }
 0xb4c   :  { %8985 = vmatpush3.msra.mxu0 %v9600_v50 }
 0xb4d   :  { %8986 = vmatprep.subr.mxu0 %v9601_v17 }
 0xb4e   :  { %8987 = vmatpush3.msra.mxu0 %v9601_v17 }
 0xb4f   :  { %8988 = vmatprep.subr.mxu0 %v9602_v18 }
 0xb50   :  { %8989 = vmatpush3.msra.mxu0 %v9602_v18 }
 0xb51   :  { %8990 = vmatprep.subr.mxu0 %v9603_v10 }
 0xb52   :  { %8991 = vmatpush3.msra.mxu0 %v9603_v10 }
 0xb53   :  { %8992 = vmatprep.subr.mxu0 %v9604_v3 }
 0xb54   :  { %8993 = vmatpush3.msra.mxu0 %v9604_v3 }
 0xb55   :  { %8994 = vmatprep.subr.mxu0 %v9605_v11 }
 0xb56   :  { %8995 = vmatpush3.msra.mxu0 %v9605_v11 }
 0xb57   :  { %8996 = vmatprep.subr.mxu0 %v9606_v63 }
 0xb58   :  { %8997 = vmatpush3.msra.mxu0 %v9606_v63 }
 0xb59   :  { %8998 = vmatprep.subr.mxu0 %v9607_v16 }
 0xb5a   :  { %8999 = vmatpush3.msra.mxu0 %v9607_v16 }
 0xb5b   :  { %9000 = vmatprep.subr.mxu0 %v9608_v22 }
 0xb5c   :  { %9001 = vmatpush3.msra.mxu0 %v9608_v22 }
 0xb5d   :  { %9003 = vmatmul.mubr.f32.vlgmr.msra.gmra.mxu0 %v4060_v15 }
 0xb5e   :  { %9005 = vmatprep.mubr.f32.mxu0 %v4061_v4 }
 0xb61   :  { %9006 = vmatmul.mubr.f32.gmra.mxu0 %v4062_v19 }
 0xb8f   :  { %v8700_v39 = vpop.f32.mrf.mxu0  ;;  %v8738_v41 = vpop.f32.mrf.mxu1 }
 0xb90   :  { %v3313_v8 = vadd.f32 %v8738_v41, %v8700_v39 }
 0xb91   :  { %v3222_v35 = vpop.f32.mrf.mxu0  ;;  %v3307_v43 = vpop.f32.mrf.mxu1 }
 0xb92   :  { %v3308_v13 = vadd.f32 %v3307_v43, %v3222_v35 }
 0xb95   :  { %v8703_v42 = vpop.f32.mrf.mxu0  ;;  %v8741_v51 = vpop.f32.mrf.mxu1 }
 0xb96   :  { %v3323_v28 = vadd.f32 %v8741_v51, %v8703_v42 }
 0xb97   :  { %v3232_v29 = vpop.f32.mrf.mxu0  ;;  %v3317_v45 = vpop.f32.mrf.mxu1 }
 0xb98   :  { %v3318_v38 = vadd.f32 %v3317_v45, %v3232_v29 }
 0xbb2   :  { %v8776_v44 = vpop.f32.mrf.mxu0  ;;  %v8814_v47 = vpop.f32.mrf.mxu1 }
 0xbb3   :  { %v3441_v7 = vadd.f32 %v8776_v44, %v3313_v8 }
 0xbb4   :  { %v3421_v46 = vpop.f32.mrf.mxu0  ;;  %v3539_v52 = vpop.f32.mrf.mxu1 }
 0xbb5   :  { %v3559_v2 = vadd.f32 %v8814_v47, %v3441_v7  ;;  %v3440_v18 = vadd.f32 %v3421_v46, %v3308_v13 }
 0xbb7   :  { %v3558_v22 = vadd.f32 %v3539_v52, %v3440_v18 }
 0xbb8   :  { %v8779_v48 = vpop.f32.mrf.mxu0  ;;  %v8817_v49 = vpop.f32.mrf.mxu1 }
 0xbb9   :  { %v3443_v25 = vadd.f32 %v8779_v48, %v3323_v28 }
 0xbba   :  { %v3431_v55 = vpop.f32.mrf.mxu0  ;;  %v3549_v0 = vpop.f32.mrf.mxu1 }
 0xbbb   :  { %v3442_v5 = vadd.f32 %v3431_v55, %v3318_v38  ;;  %v3561_v61 = vadd.f32 %v8817_v49, %v3443_v25 }
 0xbbd   :  { %v3560_v12 = vadd.f32 %v3549_v0, %v3442_v5  ;;  %v9625_v0 = vmov 6  }
 0xbbe   :  { %9200 = vset.pattern.permute.xlu0 %v9625_v0  ;;  %9199 = vset.pattern.permute.xlu1 %v9625_v0 }
 0xbd6   :  { %v8852_v58 = vpop.f32.mrf.mxu0  ;;  %v8890_v30 = vpop.f32.mrf.mxu1 }
 0xbd7   :  { %v3677_v24 = vadd.f32 %v8852_v58, %v3559_v2 }
 0xbd8   :  { %v3657_v6 = vpop.f32.mrf.mxu0  ;;  %v3775_v37 = vpop.f32.mrf.mxu1 }
 0xbd9   :  { %v3795_v40 = vadd.f32 %v8890_v30, %v3677_v24  ;;  %v3676_v39 = vadd.f32 %v3657_v6, %v3558_v22 }
 0xbdb   :  { %v3794_v44 = vadd.f32 %v3775_v37, %v3676_v39 }
 0xbdc   :  { %v8855_v1 = vpop.f32.mrf.mxu0  ;;  %v8893_v32 = vpop.f32.mrf.mxu1 }
 0xbdd   :  { %v3679_v60 = vadd.f32 %v8855_v1, %v3561_v61 }
 0xbde   :  { %v3667_v53 = vpop.f32.mrf.mxu0  ;;  %v3785_v27 = vpop.f32.mrf.mxu1 }
 0xbdf   :  { %v3678_v26 = vadd.f32 %v3667_v53, %v3560_v12  ;;  %v3797_v10 = vadd.f32 %v8893_v32, %v3679_v60 }
 0xbe1   :  { %v3796_v11 = vadd.f32 %v3785_v27, %v3678_v26 }
 0xbfa   :  { %v8928_v33 = vpop.f32.mrf.mxu0  ;;  %v8966_v54 = vpop.f32.mrf.mxu1 }
 0xbfb   :  { %v3913_v50 = vadd.f32 %v8928_v33, %v3795_v40 }
 0xbfc   :  { %v3893_v36 = vpop.f32.mrf.mxu0  ;;  %v4011_v17 = vpop.f32.mrf.mxu1 }
 0xbfd   :  { %v4031_v63 = vadd.f32 %v8966_v54, %v3913_v50  ;;  %v3912_v46 = vadd.f32 %v3893_v36, %v3794_v44  ;;  %v9626_v44 = vmov 7  }
 0xbff   :  { %v4030_v52 = vadd.f32 %v4011_v17, %v3912_v46 }
 0xc00   :  { %v8931_v9 = vpop.f32.mrf.mxu0  ;;  %v8969_v34 = vpop.f32.mrf.mxu1 }
 0xc01   :  { %v3915_v16 = vadd.f32 %v8931_v9, %v3797_v10 }
 0xc02   :  { %v3903_v3 = vpop.f32.mrf.mxu0  ;;  %v4021_v35 = vpop.f32.mrf.mxu1 }
 0xc03   :  { %v3914_v20 = vadd.f32 %v3903_v3, %v3796_v11  ;;  %v4033_v41 = vadd.f32 %v8969_v34, %v3915_v16  ;;  %v11897_v3 = vld [vmem:[%s13001_s13 + $0x10] sm:$0xff]  ;;  %v11903_v34 = vld [vmem:[%s13001_s13 + $0x18] sm:$0xff] }
 0xc05   :  { %v4032_v43 = vadd.f32 %v4021_v35, %v3914_v20 }
 0xc1d   :  { %v9004_v15 = vpop.f32.mrf.mxu0 }
 0xc1e   :  { %v11874_v4 = vadd.f32 %v9004_v15, %v4031_v63 }
 0xc1f   :  { %v4129_v19 = vpop.f32.mrf.mxu0 }
 0xc20   :  { %4154 = vadd.xlane.f32.xlu0 %v11874_v4  ;;  %v4165_v55 = vmul.f32 %v11874_v4, %v11874_v4  ;;  %v11889_v49 = vadd.f32 %v4129_v19, %v4030_v52  ;;  %v11910_v19 = vld [vmem:[%s13001_s13 + $0x8] sm:$0xff] }
 0xc21   :  { %v9007_v42 = vpop.f32.mrf.mxu0 }
 0xc22   :  { %v11877_v29 = vadd.f32 %v9007_v42, %v4033_v41  ;;  %v4164_v58 = vmul.f32 %v11889_v49, %v11889_v49  ;;  %v11918_v42 = vld [vmem:[%s13001_s13] sm:$0xff] }
 0xc23   :  { %v4139_v51 = vpop.f32.mrf.mxu0 }
 0xc24   :  { %v11879_v45 = vadd.f32 %v4139_v51, %v4032_v43  ;;  %4158 = vadd.xlane.f32.xlu1 %v11877_v29  ;;  %v4167_v48 = vmul.f32 %v11877_v29, %v11877_v29 }
 0xc26   :  { %4156 = vadd.xlane.f32.xlu0 %v11879_v45  ;;  %v4166_v47 = vmul.f32 %v11879_v45, %v11879_v45 }
 0xc28   :  { %4172 = vadd.xlane.f32.xlu1 %v4166_v47 }
 0xc2a   :  { %4174 = vadd.xlane.f32.xlu0 %v4167_v48 }
 0xc2c   :  { %4170 = vadd.xlane.f32.xlu1 %v4165_v55 }
 0xc2e   :  { %4152 = vadd.xlane.f32.xlu0 %v11889_v49 }
 0xc32   :  { %4168 = vadd.xlane.f32.xlu0 %v4164_v58 }
 0xca9   :  { %v4155_v6 = vpop.xlane.xlu0 %4154 }
 0xcaa   :  { %v4161_v53 = vmul.f32 0.0078125, %v4155_v6 }
 0xcac   :  { %v4181_v24 = vmul.f32 %v4161_v53, %v4161_v53 }
 0xcad   :  { %v4159_v30 = vpop.xlane.xlu1 %4158 }
 0xcae   :  { %v4163_v8 = vmul.f32 0.0078125, %v4159_v30  ;;  %v4276_v30 = vld [vmem:[%s13005_s6] sm:$0xff] }
 0xcaf   :  { %v4157_v1 = vpop.xlane.xlu0 %4156  ;;  %9024 = vmatprep.mubr.msk.f32.mxu1 %vm4280_vm2, %v4276_v30 }
 0xcb0   :  { %v4162_v37 = vmul.f32 0.0078125, %v4157_v1  ;;  %v4183_v38 = vmul.f32 %v4163_v8, %v4163_v8 }
 0xcb1   :  { %v4173_v7 = vpop.xlane.xlu1 %4172 }
 0xcb2   :  { %v4182_v28 = vmul.f32 %v4162_v37, %v4162_v37  ;;  %v4178_v32 = vmul.f32 0.0078125, %v4173_v7 }
 0xcb3   :  { %v4175_v33 = vpop.xlane.xlu0 %4174 }
 0xcb4   :  { %v4186_v2 = vsub.f32 %v4178_v32, %v4182_v28  ;;  %v4179_v25 = vmul.f32 0.0078125, %v4175_v33 }
 0xcb5   :  { %v4171_v5 = vpop.xlane.xlu1 %4170 }
 0xcb6   :  { %v4190_v27 = vadd.f32 1e-05, %v4186_v2  ;;  %v4187_v36 = vsub.f32 %v4179_v25, %v4183_v38  ;;  %v4177_v61 = vmul.f32 0.0078125, %v4171_v5 }
 0xcb7   :  { %v4153_v54 = vpop.xlane.xlu0 %4152 }
 0xcb8   :  { %9243 = vrsqrt.f32 %v4190_v27  ;;  %v4191_v12 = vadd.f32 1e-05, %v4187_v36  ;;  %v4185_v40 = vsub.f32 %v4177_v61, %v4181_v24  ;;  %v4160_v60 = vmul.f32 0.0078125, %v4153_v54 }
 0xcba   :  { %9245 = vrsqrt.f32 %v4191_v12  ;;  %v4189_v9 = vadd.f32 1e-05, %v4185_v40  ;;  %v4180_v26 = vmul.f32 %v4160_v60, %v4160_v60  ;;  %v4277_v12 = vld [vmem:[%s13005_s6 + $0x8] sm:$0xff]  ;;  %v4279_v40 = vld [vmem:[%s13005_s6 + $0x18] sm:$0xff] }
 0xcbb   :  { %v4169_v13 = vpop.xlane.xlu0 %4168 }
 0xcbc   :  { %9247 = vrsqrt.f32 %v4189_v9  ;;  %v4176_v50 = vmul.f32 0.0078125, %v4169_v13 }
 0xcbe   :  { %v4184_v17 = vsub.f32 %v4176_v50, %v4180_v26  ;;  %v4380_v26 = vld [vmem:[%s13006_s7 + $0x10] sm:$0xff]  ;;  %v4381_v50 = vld [vmem:[%s13006_s7 + $0x18] sm:$0xff] }
 0xcc0   :  { %v4188_v18 = vadd.f32 1e-05, %v4184_v17  ;;  %v4483_v17 = vld [vmem:[%s13007_s8] sm:$0x1] }
 0xcc2   :  { %9249 = vrsqrt.f32 %v4188_v18 }
 0xcc5   :  { %v9244_v10 = vpop.eup %9243 }
 0xcc6   :  { %v4198_v11 = vmul.f32 %v11897_v3, %v9244_v10 }
 0xcc7   :  { %v9246_v63 = vpop.eup %9245 }
 0xcc8   :  { %v4226_v16 = vmul.f32 %v4198_v11, %v4162_v37  ;;  %v4199_v15 = vmul.f32 %v11903_v34, %v9246_v63 }
 0xcc9   :  { %v9248_v22 = vpop.eup %9247 }
 0xcca   :  { %4236 = vrot.lane.b32.xlu0 %v4226_v16, %s9619_s20  ;;  %v4227_v20 = vmul.f32 %v4199_v15, %v4163_v8  ;;  %v4197_v39 = vmul.f32 %v11910_v19, %v9248_v22 }
 0xccc   :  { %4238 = vrot.lane.b32.xlu1 %v4227_v20, %s9619_s20  ;;  %v4225_v41 = vmul.f32 %v4197_v39, %v4161_v53 }
 0xcce   :  { %4212 = vperm.xlu0 %9200, %v4198_v11  }
 0xccf   :  { %v9250_v35 = vpop.eup %9249 }
 0xcd0   :  { %4234 = vrot.lane.b32.xlu1 %v4225_v41, %s9619_s20  ;;  %v4196_v43 = vmul.f32 %v11918_v42, %v9250_v35 }
 0xcd2   :  { %v4224_v51 = vmul.f32 %v4196_v43, %v4160_v60  ;;  %9202 = vset.pattern.permute.xlu0 %v9626_v44  ;;  %v9627_v60 = vmov 0.0  }
 0xcd3   :  { %4551 = vmatprep.mubr.f32.mxu0 %v9627_v60 }
 0xcd4   :  { %4232 = vrot.lane.b32.xlu1 %v4224_v51, %s9619_s20 }
 0xcd8   :  { %4217 = vperm.xlu1 %9199, %v4199_v15  }
 0xcdc   :  { %4207 = vperm.xlu1 %9199, %v4197_v39  }
 0xce0   :  { %4202 = vperm.xlu1 %9199, %v4196_v43  }
 0xce4   :  { %9201 = vset.pattern.permute.xlu1 %v9626_v44  ;;  %v12039_v44 = vld [vmem:[%s13008_s2 + $0x8] sm:$0x3f] }
 0xd3c   :  { %v4237_v46 = vpop.permute.xlu0 %4236 }
 0xd3d   :  { %v4246_v47 = vsub.f32 %v11897_v3, %v4237_v46  ;;  %v12044_v46 = vld [vmem:[%s13008_s2] sm:$0x3f] }
 0xd3e   :  { %v4239_v48 = vpop.permute.xlu1 %4238 }
 0xd3f   :  { %v4247_v52 = vsub.f32 %v11903_v34, %v4239_v48  ;;  %4260 = vperm.xlu0 %9202, %v4246_v47  }
 0xd41   :  { %4265 = vperm.xlu1 %9201, %v4247_v52  }
 0xd42   :  { %v4235_v55 = vpop.permute.xlu1 %4234 }
 0xd43   :  { %v4245_v58 = vsub.f32 %v11910_v19, %v4235_v55 }
 0xd45   :  { %4255 = vperm.xlu1 %9201, %v4245_v58  }
 0xd46   :  { %v4233_v0 = vpop.permute.xlu1 %4232 }
 0xd47   :  { %v4244_v6 = vsub.f32 %v11918_v42, %v4233_v0 }
 0xd49   :  { %4250 = vperm.xlu0 %9202, %v4244_v6   ;;  %9206 = vset.pattern.permute.xlu1 %v9621_v31  ;;  %v4213_v37 = vpop.permute.xlu0 %4212 }
 0xd4a   :  { %v4222_v28 = vmul.f32 %v4213_v37, %v11879_v45 }
 0xd53   :  { %v4218_v1 = vpop.permute.xlu1 %4217 }
 0xd54   :  { %v4223_v32 = vmul.f32 %v4218_v1, %v11877_v29 }
 0xd57   :  { %v4208_v8 = vpop.permute.xlu1 %4207 }
 0xd58   :  { %v4221_v25 = vmul.f32 %v4208_v8, %v11874_v4  ;;  %v4481_v8 = vld [vmem:[%s13008_s2 + $0x10] sm:$0x3f] }
 0xd5b   :  { %v4203_v7 = vpop.permute.xlu1 %4202 }
 0xd5c   :  { %v4220_v61 = vmul.f32 %v4203_v7, %v11889_v49  ;;  %v4278_v49 = vld [vmem:[%s13005_s6 + $0x10] sm:$0xff] }
 0xdba   :  { %v4261_v53 = vpop.permute.xlu0 %4260 }
 0xdbb   :  { %v4270_v38 = vadd.f32 %v4261_v53, %v4222_v28 }
 0xdbc   :  { %v4266_v33 = vpop.permute.xlu1 %4265 }
 0xdbd   :  { %v4271_v2 = vadd.f32 %v4266_v33, %v4223_v32  ;;  %v11936_v27 = vmax.f32 %v4270_v38, 0.0  ;;  %v9629_v38 = vmov 8  }
 0xdbe   :  { %9203 = vset.pattern.permute.xlu0 %v9629_v38 }
 0xdbf   :  { %v11934_v5 = vmax.f32 %v4271_v2, 0.0  ;;  %5152 = vperm.xlu0 %9203, %v11903_v34  }
 0xdc0   :  { %v4256_v24 = vpop.permute.xlu1 %4255 }
 0xdc1   :  { %v4269_v36 = vadd.f32 %v4256_v24, %v4221_v25  ;;  %9016 = vmatprep.subr.mxu1 %v11934_v5 }
 0xdc2   :  { %9017 = vmatpush3.msra.mxu1 %v11934_v5 }
 0xdc3   :  { %v11941_v45 = vmax.f32 %v4269_v36, 0.0  ;;  %9018 = vmatprep.subr.mxu1 %v11936_v27  ;;  %5147 = vperm.xlu0 %9203, %v11897_v3  }
 0xdc4   :  { %9019 = vmatpush3.msra.mxu1 %v11936_v27  ;;  %v4251_v29 = vpop.permute.xlu0 %4250 }
 0xdc5   :  { %v4268_v4 = vadd.f32 %v4251_v29, %v4220_v61  ;;  %9020 = vmatprep.subr.mxu1 %v11941_v45  ;;  %v4946_v61 = vlaneseq }
 0xdc6   :  { %9021 = vmatpush3.msra.mxu1 %v11941_v45 }
 0xdc7   :  { %v11947_v54 = vmax.f32 %v4268_v4, 0.0  ;;  %5142 = vperm.xlu0 %9203, %v11910_v19   ;;  %v4947_v29 = vshrl.u32 %v4946_v61, 7 }
 0xdc9   :  { %9022 = vmatprep.subr.mxu1 %v11947_v54 }
 0xdca   :  { %9023 = vmatpush3.msra.mxu1 %v11947_v54 }
 0xdcb   :  { %9025 = vmatmul.mubr.msk.f32.vlgmr.msra.gmra.mxu1 %vm4280_vm2, %v4277_v12  ;;  %9030 = vmatprep.subr.mxu1 %v10678_v57  ;;  %v4948_v12 = vsub.s32 0, %v4947_v29  ;;  %v5159_v29 = vld [vmem:[%s13010_s9] sm:$0x3] }
 0xdcc   :  { %9031 = vmatpush3.msra.mxu1 %v10678_v57  ;;  %9027 = vmatprep.mubr.msk.f32.mxu1 %vm4280_vm2, %v4278_v49  ;;  %v4378_v57 = vld [vmem:[%s13006_s7] sm:$0xff] }
 0xdcd   :  { %9032 = vmatprep.subr.mxu1 %v10680_v62  ;;  %5137 = vperm.xlu0 %9203, %v11918_v42  }
 0xdce   :  { %9033 = vmatpush3.msra.mxu1 %v10680_v62 }
 0xdcf   :  { %9028 = vmatmul.mubr.msk.f32.gmra.mxu1 %vm4280_vm2, %v4279_v40  ;;  %9034 = vmatprep.subr.mxu1 %v10685_v23 }
 0xdd0   :  { %9035 = vmatpush3.msra.mxu1 %v10685_v23  ;;  %9046 = vmatprep.mubr.msk.f32.mxu1 %vm4280_vm2, %v4378_v57 }
 0xdd1   :  { %9036 = vmatprep.subr.mxu1 %v10691_v21  ;;  %9204 = vset.pattern.permute.xlu0 %v13024_v14 }
 0xdd2   :  { %9037 = vmatpush3.msra.mxu1 %v10691_v21  ;;  %v4379_v21 = vld [vmem:[%s13006_s7 + $0x8] sm:$0xff] }
 0xe8b   :  { %v11976_v62 = vpop.f32.mrf.mxu1 }
 0xe8d   :  { %v11978_v9 = vpop.f32.mrf.mxu1 }
 0xe8f   :  { %v11980_v13 = vpop.f32.mrf.mxu1 }
 0xe90   :  { %9038 = vmatprep.subr.mxu1 %v11980_v13  ;;  %4511 = vmatprep.subr.mxu0 %v11980_v13 }
 0xe91   :  { %v11984_v23 = vpop.f32.mrf.mxu1  ;;  %9039 = vmatpush3.msra.mxu1 %v11980_v13 }
 0xe92   :  { %9040 = vmatprep.subr.mxu1 %v11984_v23 }
 0xe93   :  { %9041 = vmatpush3.msra.mxu1 %v11984_v23 }
 0xe94   :  { %9042 = vmatprep.subr.mxu1 %v11976_v62 }
 0xe95   :  { %9043 = vmatpush3.msra.mxu1 %v11976_v62 }
 0xe96   :  { %9044 = vmatprep.subr.mxu1 %v11978_v9 }
 0xe97   :  { %9045 = vmatpush3.msra.mxu1 %v11978_v9 }
 0xe98   :  { %9047 = vmatmul.mubr.msk.f32.vlgmr.msra.gmra.mxu1 %vm4280_vm2, %v4379_v21  ;;  %9052 = vmatprep.subr.mxu1 %v9627_v60 }
 0xe99   :  { %9053 = vmatpush3.msra.mxu1 %v11934_v5  ;;  %9049 = vmatprep.mubr.msk.f32.mxu1 %vm4280_vm2, %v4380_v26 }
 0xe9a   :  { %9054 = vmatprep.subr.mxu1 %v9627_v60 }
 0xe9b   :  { %9055 = vmatpush3.msra.mxu1 %v11936_v27 }
 0xe9c   :  { %9050 = vmatmul.mubr.msk.f32.gmra.mxu1 %vm4280_vm2, %v4381_v50  ;;  %9056 = vmatprep.subr.mxu1 %v9627_v60 }
 0xe9d   :  { %9057 = vmatpush3.msra.mxu1 %v11941_v45  ;;  %9060 = vmatprep.mubr.msk.f32.mxu1 %vm9628_vm3, %v9627_v60 }
 0xe9e   :  { %9058 = vmatprep.subr.mxu1 %v9627_v60 }
 0xe9f   :  { %9059 = vmatpush3.msra.mxu1 %v11947_v54 }
 0xea0   :  { %9061 = vmatmul.mubr.msk.f32.vlgmr.msra.gmra.mxu1 %vm289_vm1, %v4483_v17  ;;  %7221 = vmatprep.subr.msk.mxu1 %vm4789_vm5, %v12039_v44 }
 0xea1   :  { %4863 = vmatprep.mubr.f32.mxu1 %v9627_v60  ;;  %7222 = vmatpush1.msk.msra.mxu1 %vm4789_vm5, %v12044_v46 }
 0xf58   :  { %v12020_v18 = vpop.f32.mrf.mxu1 }
 0xf5a   :  { %v12022_v10 = vpop.f32.mrf.mxu1 }
 0xf5c   :  { %v12024_v11 = vpop.f32.mrf.mxu1 }
 0xf5d   :  { %4512 = vmatpush1.msra.mxu0 %v12024_v11 }
 0xf5e   :  { %v12027_v63 = vpop.f32.mrf.mxu1  ;;  %4513 = vmatprep.subr.mxu0 %v11984_v23 }
 0xf5f   :  { %4514 = vmatpush1.msra.mxu0 %v12027_v63 }
 0xf60   :  { %4515 = vmatprep.subr.mxu0 %v11976_v62  ;;  %v4624_v16 = vpop.f32.mrf.mxu1 }
 0xf61   :  { %4516 = vmatpush1.msra.mxu0 %v12020_v18  ;;  %v4631_v35 = vsel %vm4628_vm4, %v4624_v16, -inf }
 0xf62   :  { %4517 = vmatprep.subr.mxu0 %v11978_v9  ;;  %v9062_v15 = vpop.f32.mrf.mxu1 }
 0xf63   :  { %4518 = vmatpush1.msra.mxu0 %v12022_v10 }
 0xf64   :  { %7219 = vmatmul.mubr.msk.f32.vlgmr.msra.gmra.mxu0 %vm289_vm1, %v4483_v17  ;;  %4675 = vmatprep.subr.mxu0 %v12039_v44 }
 0xf65   :  { %4676 = vmatpush1.xpose.msra.mxu0 %v12044_v46 }
 0xf66   :  { %9063 = vmatprep.subr.mxu0 %v9627_v60 }
0x1024   :  { %v4553_v22 = vpop.f32.mrf.mxu0 }
0x1025   :  { %v4629_v39 = vsel %vm4628_vm4, %v4553_v22, -inf }
0x1026   :  { %v4555_v20 = vpop.f32.mrf.mxu0 }
0x1027   :  { %v4630_v41 = vsel %vm4628_vm4, %v4555_v20, -inf }
0x1028   :  { %v4632_v43 = vmax.f32 %v4629_v39, %v4630_v41  ;;  %v5160_v39 = vld [vmem:[%s13009_s14] sm:$0x3] }
0x1029   :  { %5163 = vperm.xlu0 %9204, %v5160_v39  }
0x102a   :  { %v4633_v51 = vmax.f32 %v4632_v43, %v4631_v35  ;;  %v5153_v43 = vpop.permute.xlu0 %5152 }
0x102c   :  { %4634 = vmax.xlane.f32.xlu1 %v4633_v51 }
0x102d   :  { %9205 = vset.pattern.permute.xlu0 %v13017_v59 }
0x102e   :  { %5265 = vperm.xlu0 %9205, %v5160_v39  }
0x103d   :  { %5270 = vperm.xlu1 %9206, %v5160_v39  }
0x10b5   :  { %v4635_v47 = vpop.xlane.xlu1 %4634 }
0x10b6   :  { %v4636_v48 = vsub.f32 %v4553_v22, %v4635_v47  ;;  %v4637_v52 = vsub.f32 %v4555_v20, %v4635_v47  ;;  %v4638_v55 = vsub.f32 %v4624_v16, %v4635_v47 }
0x10b8   :  { %v4639_v58 = vmul.f32 1.442695, %v4636_v48  ;;  %v4641_v0 = vmul.f32 1.442695, %v4637_v52  ;;  %v4643_v6 = vmul.f32 1.442695, %v4638_v55  ;;  %v5148_v52 = vpop.permute.xlu0 %5147 }
0x10ba   :  { %9251 = vpow2.f32 %v4639_v58 }
0x10bb   :  { %9253 = vpow2.f32 %v4641_v0 }
0x10bc   :  { %9255 = vpow2.f32 %v4643_v6 }
0x10c7   :  { %v9252_v30 = vpop.eup %9251 }
0x10c8   :  { %v9254_v1 = vpop.eup %9253 }
0x10c9   :  { %4709 = vmatprep.mubr.f32.mxu0 %v9254_v1  ;;  %v9256_v37 = vpop.eup %9255 }
0x10ca   :  { %4710 = vmatmul.mubr.f32.vlgmr.msra.gmra.mxu0 %v9252_v30 }
0x10cb   :  { %9064 = vmatpush3.xpose.msra.mxu0 %v4481_v8  ;;  %9065 = vmatprep.mubr.msk.f32.mxu0 %vm9628_vm3, %v9627_v60 }
0x10cc   :  { %9068 = vmatprep.subr.mxu0 %v9627_v60 }
0x10ce   :  { %9066 = vmatmul.mubr.f32.vlgmr.msra.gmra.mxu0 %v9256_v37 }
0x10cf   :  { %9070 = vmatprep.mubr.msk.f32.mxu0 %vm9628_vm3, %v9627_v60  ;;  %9069 = vmatpush3.msk.msra.mxu0 %vm4789_vm5, %v4481_v8 }
0x118a   :  { %v4711_v7 = vpop.f32.mrf.mxu0 }
0x118c   :  { %v4713_v53 = vpop.f32.mrf.mxu0 }
0x118e   :  { %v4781_v28 = vpop.f32.mrf.mxu0 }
0x118f   :  { %v4782_v32 = vadd.f32 %v4781_v28, %v4711_v7 }
0x1190   :  { %v9067_v33 = vpop.f32.mrf.mxu0 }
0x1191   :  { %7223 = vmatmul.mubr.msk.f32.vlgmr.msra.gmra.mxu1 %vm4785_vm6, %v4782_v32  ;;  %9071 = vmatmul.mubr.msk.f32.vlgmr.msra.gmra.mxu0 %vm4785_vm6, %v4782_v32 }
0x1192   :  { %5025 = vmatprep.mubr.f32.mxu1 %v11978_v9  ;;  %9075 = vmatprep.mubr.f32.mxu0 %v11947_v54 }
0x1251   :  { %v4865_v2 = vpop.f32.mrf.mxu1  ;;  %v4936_v25 = vpop.f32.mrf.mxu0 }
0x1252   :  { %9257 = vrcp.f32 %v4865_v2 }
0x1253   :  { %9259 = vrcp.f32 %v4936_v25  ;;  %v4867_v24 = vpop.f32.mrf.mxu1  ;;  %v9072_v36 = vpop.f32.mrf.mxu0 }
0x1254   :  { %9261 = vrcp.f32 %v4867_v24 }
0x125f   :  { %v9258_v4 = vpop.eup %9257 }
0x1260   :  { %v9260_v49 = vpop.eup %9259  ;;  %v4943_v40 = vmul.f32 %v9258_v4, %v9252_v30  ;;  %v5275_v4 = vld [vmem:[%s13011_s10] sm:$0xff] }
0x1261   :  { %v9262_v57 = vpop.eup %9261  ;;  %v4945_v21 = vmul.f32 %v9260_v49, %v9256_v37  ;;  %v5143_v37 = vpop.permute.xlu0 %5142  ;;  %v4482_v49 = vld [vmem:[%s13008_s2 + $0x18] sm:$0x3f] }
0x1262   :  { %v4944_v26 = vmul.f32 %v9262_v57, %v9254_v1  ;;  %v4949_v17 = vrot.slane %v4943_v40, %v4948_v12 }
0x1263   :  { %v4957_v50 = vrot.slane %v4945_v21, %v4948_v12 }
0x1264   :  { %v4953_v16 = vrot.slane %v4944_v26, %v4948_v12  ;;  %v4958_v20 = vmul.f32 %v4949_v17, %v12044_v46  ;;  %v9630_v12 = vmov 9  }
0x1265   :  { %v4960_v15 = vmul.f32 %v4957_v50, %v4481_v8  ;;  %v5138_v24 = vpop.permute.xlu0 %5137  ;;  %9207 = vset.pattern.permute.xlu0 %v9630_v12 }
0x1266   :  { %v4959_v22 = vmul.f32 %v4953_v16, %v12039_v44  ;;  %5280 = vperm.xlu0 %9207, %v11918_v42  }
0x1267   :  { %9073 = vmatprep.subr.mxu0 %v4960_v15 }
0x1268   :  { %9074 = vmatpush3.xpose.msra.mxu0 %v4960_v15  ;;  %4991 = vmatprep.subr.mxu1 %v4959_v22 }
0x1269   :  { %4992 = vmatpush1.xpose.msra.mxu1 %v4958_v20  ;;  %9081 = vmatprep.subr.mxu0 %v9627_v60  ;;  %v5164_v42 = vpop.permute.xlu0 %5163 }
0x126a   :  { %9100 = vmatprep.subr.msk.mxu1 %vm4789_vm5, %v4482_v49  ;;  %5284 = vperm.xlu0 %9207, %v11910_v19  }
0x126b   :  { %9076 = vmatmul.mubr.f32.vlgmr.msra.gmra.mxu0 %v11941_v45 }
0x126c   :  { %9078 = vmatprep.mubr.f32.mxu0 %v11936_v27  ;;  %5026 = vmatmul.mubr.f32.vlgmr.msra.gmra.mxu1 %v12022_v10 }
0x126d   :  { %5030 = vmatprep.mubr.f32.mxu1 %v11976_v62  ;;  %9101 = vmatpush3.msk.msra.mxu1 %vm4789_vm5, %v4482_v49  ;;  %v9614_v49 = vld [vmem:[%s13048_s23] sm:$0xff] }
0x126e   :  { %5288 = vperm.xlu0 %9207, %v11897_v3  }
0x126f   :  { %9079 = vmatmul.mubr.f32.gmra.mxu0 %v11934_v5 }
0x1270   :  { %5031 = vmatmul.mubr.f32.gmra.mxu1 %v12020_v18  ;;  %9089 = vmatprep.mubr.msk.f32.mxu0 %vm9628_vm3, %v9627_v60 }
0x1271   :  { %5035 = vmatprep.mubr.f32.mxu1 %v11984_v23 }
0x1272   :  { %5292 = vperm.xlu0 %9207, %v11903_v34  }
0x1274   :  { %5036 = vmatmul.mubr.f32.gmra.mxu1 %v12027_v63 }
0x1275   :  { %5040 = vmatprep.mubr.f32.mxu1 %v11980_v13 }
0x1276   :  { %9208 = vset.pattern.permute.xlu0 %v9621_v31 }
0x1278   :  { %5041 = vmatmul.mubr.f32.gmra.mxu1 %v12024_v11 }
0x132b   :  { %v9077_v41 = vpop.f32.mrf.mxu0 }
0x132c   :  { %v5027_v35 = vpop.f32.mrf.mxu1 }
0x132d   :  { %v5112_v51 = vpop.f32.mrf.mxu0 }
0x132e   :  { %v5029_v44 = vpop.f32.mrf.mxu1  ;;  %v5113_v53 = vadd.f32 %v5112_v51, %v5027_v35 }
0x132f   :  { %v9080_v47 = vpop.f32.mrf.mxu0 }
0x1330   :  { %v5032_v46 = vpop.f32.mrf.mxu1  ;;  %v5131_v2 = vmul.f32 0.33333334, %v5113_v53  ;;  %v5278_v53 = vld [vmem:[%s13011_s10 + $0x18] sm:$0xff] }
0x1331   :  { %v5122_v58 = vpop.f32.mrf.mxu0  ;;  %v5118_v1 = vadd.f32 %v9077_v41, %v5032_v46 }
0x1332   :  { %v5034_v48 = vpop.f32.mrf.mxu1  ;;  %v5155_v61 = vadd.f32 %v5138_v24, %v5131_v2 }
0x1333   :  { %v5132_v33 = vmul.f32 0.33333334, %v5118_v1 }
0x1334   :  { %v5037_v55 = vpop.f32.mrf.mxu1 }
0x1335   :  { %v5123_v6 = vadd.f32 %v5122_v58, %v5037_v55  ;;  %v5156_v36 = vadd.f32 %v5143_v37, %v5132_v33  ;;  %v5266_v58 = vpop.permute.xlu0 %5265  ;;  %v5276_v37 = vld [vmem:[%s13011_s10 + $0x8] sm:$0xff] }
0x1336   :  { %v5039_v0 = vpop.f32.mrf.mxu1 }
0x1337   :  { %v5133_v28 = vmul.f32 0.33333334, %v5123_v6  ;;  %v5271_v6 = vpop.permute.xlu1 %5270 }
0x1338   :  { %v5042_v30 = vpop.f32.mrf.mxu1 }
0x1339   :  { %v5128_v8 = vadd.f32 %v9080_v47, %v5042_v30  ;;  %v5157_v25 = vadd.f32 %v5148_v52, %v5133_v28  ;;  %v5281_v28 = vpop.permute.xlu0 %5280 }
0x133a   :  { %v5044_v7 = vpop.f32.mrf.mxu1 }
0x133b   :  { %v5134_v32 = vmul.f32 0.33333334, %v5128_v8  ;;  %v5277_v7 = vld [vmem:[%s13011_s10 + $0x10] sm:$0xff] }
0x133d   :  { %v5158_v38 = vadd.f32 %v5153_v43, %v5134_v32  ;;  %v5285_v32 = vpop.permute.xlu0 %5284 }
0x133f   :  { %9082 = vmatpush3.msra.mxu0 %v5158_v38 }
0x1340   :  { %9083 = vmatprep.subr.mxu0 %v9627_v60 }
0x1341   :  { %9084 = vmatpush3.msra.mxu0 %v5157_v25  ;;  %v5289_v38 = vpop.permute.xlu0 %5288 }
0x1342   :  { %9085 = vmatprep.subr.mxu0 %v9627_v60 }
0x1343   :  { %9086 = vmatpush3.msra.mxu0 %v5156_v36 }
0x1344   :  { %9087 = vmatprep.subr.mxu0 %v9627_v60  ;;  %v12110_v60 = vld [vmem:[%s13048_s23 + $0x8] sm:$0xff] }
0x1345   :  { %9088 = vmatpush3.msra.mxu0 %v5155_v61  ;;  %9140 = vmatprep.subr.mxu1 %v12110_v60 }
0x1346   :  { %9090 = vmatmul.mubr.msk.f32.vlgmr.msra.gmra.mxu0 %vm289_vm1, %v5159_v29  ;;  %v5293_v29 = vpop.permute.xlu0 %5292 }
0x1347   :  { %9094 = vmatprep.mubr.msk.f32.mxu0 %vm5295_vm7, %v5275_v4 }
0x1406   :  { %v5235_v40 = vpop.f32.mrf.mxu0 }
0x1407   :  { %v5236_v57 = vadd.f32 %v5235_v40, %v5164_v42  ;;  %v6214_v42 = vld [vmem:[%s13012_s12] sm:$0xff]  ;;  %v6216_v40 = vld [vmem:[%s13012_s12 + $0x10] sm:$0xff] }
0x1408   :  { %v9091_v21 = vpop.f32.mrf.mxu0 }
0x1409   :  { %v5240_v26 = vsel %vm5239_vm8, %v5236_v57, 0.0  ;;  %v5249_v50 = vmul.f32 %v5236_v57, %v5236_v57  ;;  %v6218_v21 = vld [vmem:[%s13012_s12 + $0x20] sm:$0xff] }
0x140a   :  { %v5241_v17 = vrot.slane %v5240_v26, 4 }
0x140b   :  { %v5250_v16 = vsel %vm5239_vm8, %v5249_v50, 0.0  ;;  %v6220_v50 = vld [vmem:[%s13012_s12 + $0x30] sm:$0xff] }
0x140c   :  { %v5242_v15 = vadd.f32 %v5241_v17, %v5240_v26  ;;  %v5251_v22 = vrot.slane %v5250_v16, 4  ;;  %v6219_v26 = vld [vmem:[%s13012_s12 + $0x28] sm:$0xff]  ;;  %v6221_v17 = vld [vmem:[%s13012_s12 + $0x38] sm:$0xff] }
0x140e   :  { %v5243_v20 = vrot.slane %v5242_v15, 2  ;;  %v5252_v39 = vadd.f32 %v5251_v22, %v5250_v16  ;;  %v6222_v16 = vld [vmem:[%s13012_s12 + $0x40] sm:$0xff]  ;;  %v6224_v22 = vld [vmem:[%s13012_s12 + $0x50] sm:$0xff] }
0x1410   :  { %v5244_v19 = vadd.f32 %v5243_v20, %v5242_v15  ;;  %v5253_v41 = vrot.slane %v5252_v39, 2  ;;  %v6223_v15 = vld [vmem:[%s13012_s12 + $0x48] sm:$0xff]  ;;  %v6225_v20 = vld [vmem:[%s13012_s12 + $0x58] sm:$0xff] }
0x1412   :  { %v5254_v3 = vadd.f32 %v5253_v41, %v5252_v39  ;;  %v5245_v35 = vrot.slane %v5244_v19, 1  ;;  %v6226_v39 = vld [vmem:[%s13012_s12 + $0x60] sm:$0xff]  ;;  %v6228_v41 = vld [vmem:[%s13012_s12 + $0x70] sm:$0xff] }
0x1414   :  { %v5255_v34 = vrot.slane %v5254_v3, 1  ;;  %v5246_v43 = vadd.f32 %v5245_v35, %v5244_v19  ;;  %v6227_v19 = vld [vmem:[%s13012_s12 + $0x68] sm:$0xff]  ;;  %v5509_v35 = vld [vmem:[%s13013_s11] sm:$0xff] }
0x1416   :  { %v5256_v31 = vadd.f32 %v5255_v34, %v5254_v3  ;;  %v5248_v51 = vmul.f32 0.5, %v5246_v43  ;;  %v6229_v3 = vld [vmem:[%s13012_s12 + $0x78] sm:$0xff]  ;;  %v5400_v34 = vadd.f32 %v12024_v11, %v11980_v13 }
0x1418   :  { %v5257_v44 = vmul.f32 0.5, %v5256_v31  ;;  %v5258_v46 = vmul.f32 %v5248_v51, %v5248_v51  ;;  %v5260_v52 = vsub.f32 %v5236_v57, %v5248_v51  ;;  %v6217_v57 = vld [vmem:[%s13012_s12 + $0x18] sm:$0xff]  ;;  %v5399_v31 = vadd.f32 %v12027_v63, %v11984_v23 }
0x141a   :  { %v5259_v47 = vsub.f32 %v5257_v44, %v5258_v46  ;;  %v5398_v44 = vadd.f32 %v12020_v18, %v11976_v62  ;;  %v5404_v46 = vadd.f32 %v5400_v34, %v11934_v5 }
0x141c   :  { %v5261_v48 = vadd.f32 1e-05, %v5259_v47  ;;  %v5402_v13 = vadd.f32 %v5398_v44, %v11941_v45 }
0x141e   :  { %9263 = vrsqrt.f32 %v5261_v48  ;;  %v5397_v48 = vadd.f32 %v12022_v10, %v11978_v9  ;;  %v5511_v10 = vld [vmem:[%s13013_s11 + $0x10] sm:$0xff] }
0x1420   :  { %v5401_v62 = vadd.f32 %v5397_v48, %v11947_v54  ;;  %v5510_v54 = vld [vmem:[%s13013_s11 + $0x8] sm:$0xff] }
0x142b   :  { %v9264_v55 = vpop.eup %9263 }
0x142c   :  { %v5263_v0 = vmul.f32 %v9264_v55, %v5260_v52  ;;  %v5403_v55 = vadd.f32 %v5399_v31, %v11936_v27 }
0x142e   :  { %v5268_v30 = vmul.f32 %v5266_v58, %v5263_v0 }
0x1430   :  { %v5273_v1 = vadd.f32 %v5271_v6, %v5268_v30 }
0x1432   :  { %v5274_v8 = vmax.f32 %v5273_v1, 0.0  ;;  %v5512_v1 = vld [vmem:[%s13013_s11 + $0x18] sm:$0xff] }
0x1434   :  { %9092 = vmatprep.subr.msk.mxu0 %vm5308_vm9, %v5274_v8 }
0x1435   :  { %9093 = vmatpush3.msk.msra.mxu0 %vm5308_vm9, %v5274_v8  ;;  %v5513_v8 = vld [vmem:[%s13013_s11 + $0x20] sm:$0xff] }
0x1436   :  { %9095 = vmatmul.mubr.msk.f32.vlgmr.msra.gmra.mxu0 %vm5295_vm7, %v5276_v37 }
0x1437   :  { %9097 = vmatprep.mubr.msk.f32.mxu0 %vm5295_vm7, %v5277_v7  ;;  %v5514_v7 = vld [vmem:[%s13013_s11 + $0x28] sm:$0xff] }
0x143a   :  { %9098 = vmatmul.mubr.msk.f32.gmra.mxu0 %vm5295_vm7, %v5278_v53 }
0x143b   :  { %9116 = vmatprep.mubr.msk.f32.mxu0 %vm289_vm1, %v5509_v35 }
0x14f6   :  { %v9096_v33 = vpop.f32.mrf.mxu0 }
0x14f7   :  { %v5384_v24 = vadd.f32 %v9096_v33, %v5285_v32  ;;  %v5516_v33 = vld [vmem:[%s13013_s11 + $0x38] sm:$0xff] }
0x14f8   :  { %v5378_v2 = vpop.f32.mrf.mxu0 }
0x14f9   :  { %v5379_v25 = vadd.f32 %v5378_v2, %v5281_v28  ;;  %v5515_v28 = vld [vmem:[%s13013_s11 + $0x30] sm:$0xff]  ;;  %v5517_v2 = vld [vmem:[%s13013_s11 + $0x40] sm:$0xff] }
0x14fa   :  { %v9099_v36 = vpop.f32.mrf.mxu0 }
0x14fb   :  { %9102 = vmatprep.mubr.msk.f32.mxu1 %vm4785_vm6, %v5379_v25  ;;  %v5394_v12 = vadd.f32 %v9099_v36, %v5293_v29 }
0x14fc   :  { %v5388_v61 = vpop.f32.mrf.mxu0  ;;  %9103 = vmatmul.mubr.msk.f32.vlgmr.msra.gmra.mxu1 %vm4785_vm6, %v5384_v24  ;;  %v5518_v24 = vld [vmem:[%s13013_s11 + $0x48] sm:$0xff] }
0x14fd   :  { %v5389_v4 = vadd.f32 %v5388_v61, %v5289_v38  ;;  %9141 = vmatpush3.msra.mxu1 %v12110_v60  ;;  %v6215_v60 = vld [vmem:[%s13012_s12 + $0x8] sm:$0xff]  ;;  %v5519_v61 = vld [vmem:[%s13013_s11 + $0x50] sm:$0xff] }
0x14fe   :  { %9142 = vmatprep.subr.mxu1 %v9614_v49 }
0x14ff   :  { %9105 = vmatprep.mubr.msk.f32.mxu1 %vm4785_vm6, %v5389_v4  ;;  %9143 = vmatpush3.msra.mxu1 %v9614_v49  ;;  %v5521_v49 = vld [vmem:[%s13013_s11 + $0x60] sm:$0xff] }
0x1500   :  { %9106 = vmatmul.mubr.msk.f32.gmra.mxu1 %vm4785_vm6, %v5394_v12  ;;  %v5520_v12 = vld [vmem:[%s13013_s11 + $0x58] sm:$0xff] }
0x1501   :  { %9144 = vmatprep.mubr.msk.f32.mxu1 %vm59_vm0, %v6214_v42 }
0x1504   :  { %9145 = vmatmul.mubr.msk.f32.vlgmr.msra.gmra.mxu1 %vm59_vm0, %v6215_v60  ;;  %v5522_v60 = vld [vmem:[%s13013_s11 + $0x68] sm:$0xff] }
0x1505   :  { %9147 = vmatprep.mubr.msk.f32.mxu1 %vm59_vm0, %v6216_v40 }
0x1508   :  { %9148 = vmatmul.mubr.msk.f32.gmra.mxu1 %vm59_vm0, %v6217_v57  ;;  %v5523_v57 = vld [vmem:[%s13013_s11 + $0x70] sm:$0xff] }
0x1509   :  { %9150 = vmatprep.mubr.msk.f32.mxu1 %vm59_vm0, %v6218_v21 }
0x150c   :  { %9151 = vmatmul.mubr.msk.f32.gmra.mxu1 %vm59_vm0, %v6219_v26 }
0x150d   :  { %9153 = vmatprep.mubr.msk.f32.mxu1 %vm59_vm0, %v6220_v50  ;;  %v5524_v50 = vld [vmem:[%s13013_s11 + $0x78] sm:$0xff] }
0x1510   :  { %9154 = vmatmul.mubr.msk.f32.gmra.mxu1 %vm59_vm0, %v6221_v17 }
0x1511   :  { %9156 = vmatprep.mubr.msk.f32.mxu1 %vm59_vm0, %v6222_v16 }
0x1514   :  { %9157 = vmatmul.mubr.msk.f32.gmra.mxu1 %vm59_vm0, %v6223_v15 }
0x1515   :  { %9159 = vmatprep.mubr.msk.f32.mxu1 %vm59_vm0, %v6224_v22 }
0x1518   :  { %9160 = vmatmul.mubr.msk.f32.gmra.mxu1 %vm59_vm0, %v6225_v20 }
0x1519   :  { %9162 = vmatprep.mubr.msk.f32.mxu1 %vm59_vm0, %v6226_v39 }
0x151c   :  { %9163 = vmatmul.mubr.msk.f32.gmra.mxu1 %vm59_vm0, %v6227_v19 }
0x151d   :  { %9165 = vmatprep.mubr.msk.f32.mxu1 %vm59_vm0, %v6228_v41 }
0x1520   :  { %9166 = vmatmul.mubr.msk.f32.gmra.mxu1 %vm59_vm0, %v6229_v3 }
0x15bc   :  { %v9104_v43 = vpop.f32.mrf.mxu1 }
0x15bd   :  { %v5506_v63 = vadd.f32 %v9104_v43, %v5402_v13 }
0x15be   :  { %v5486_v51 = vpop.f32.mrf.mxu1 }
0x15bf   :  { %v5505_v9 = vadd.f32 %v5486_v51, %v5401_v62 }
0x15c0   :  { %v9107_v47 = vpop.f32.mrf.mxu1 }
0x15c1   :  { %v5508_v52 = vadd.f32 %v9107_v47, %v5404_v46 }
0x15c2   :  { %v5496_v58 = vpop.f32.mrf.mxu1 }
0x15c3   :  { %v5507_v11 = vadd.f32 %v5496_v58, %v5403_v55  ;;  %9108 = vmatprep.subr.mxu0 %v5508_v52 }
0x15c4   :  { %9109 = vmatpush3.msra.mxu0 %v5508_v52  ;;  %v12216_v23 = vpop.f32.mrf.mxu1 }
0x15c5   :  { %6425 = vadd.xlane.f32.xlu1 %v12216_v23  ;;  %9110 = vmatprep.subr.mxu0 %v5507_v11  ;;  %v6472_v18 = vmul.f32 %v12216_v23, %v12216_v23 }
0x15c6   :  { %9111 = vmatpush3.msra.mxu0 %v5507_v11  ;;  %v12220_v5 = vpop.f32.mrf.mxu1 }
0x15c7   :  { %v6471_v27 = vmul.f32 %v12220_v5, %v12220_v5  ;;  %6423 = vadd.xlane.f32.xlu0 %v12220_v5  ;;  %9112 = vmatprep.subr.mxu0 %v5506_v63 }
0x15c8   :  { %9113 = vmatpush3.msra.mxu0 %v5506_v63  ;;  %v12225_v45 = vpop.f32.mrf.mxu1 }
0x15c9   :  { %6487 = vadd.xlane.f32.xlu1 %v6471_v27  ;;  %9114 = vmatprep.subr.mxu0 %v5505_v9  ;;  %v6474_v38 = vmul.f32 %v12225_v45, %v12225_v45 }
0x15ca   :  { %9115 = vmatpush3.msra.mxu0 %v5505_v9  ;;  %v12235_v0 = vpop.f32.mrf.mxu1 }
0x15cb   :  { %v6473_v6 = vmul.f32 %v12235_v0, %v12235_v0  ;;  %6489 = vadd.xlane.f32.xlu0 %v6472_v18  ;;  %9117 = vmatmul.mubr.msk.f32.vlgmr.msra.gmra.mxu0 %vm289_vm1, %v5510_v54 }
0x15cc   :  { %v12240_v30 = vpop.f32.mrf.mxu1  ;;  %9119 = vmatprep.mubr.msk.f32.mxu0 %vm289_vm1, %v5511_v10 }
0x15cd   :  { %13049 = vst [vmem:[#allocation2_spill] sm:$0xff] %v12240_v30  ;;  %6491 = vadd.xlane.f32.xlu1 %v6473_v6  ;;  %v6476_v4 = vmul.f32 %v12240_v30, %v12240_v30 }
0x15ce   :  { %v12249_v37 = vpop.f32.mrf.mxu1 }
0x15cf   :  { %13050 = vst [vmem:[#allocation3_spill] sm:$0xff] %v12249_v37  ;;  %6429 = vadd.xlane.f32.xlu0 %v12225_v45  ;;  %9120 = vmatmul.mubr.msk.f32.gmra.mxu0 %vm289_vm1, %v5512_v1  ;;  %v6475_v53 = vmul.f32 %v12249_v37, %v12249_v37 }
0x15d0   :  { %9122 = vmatprep.mubr.msk.f32.mxu0 %vm289_vm1, %v5513_v8  ;;  %v12263_v32 = vpop.f32.mrf.mxu1 }
0x15d1   :  { %6431 = vadd.xlane.f32.xlu1 %v12249_v37  ;;  %13051 = vst [vmem:[#allocation4_spill] sm:$0xff] %v12263_v32  ;;  %v6478_v26 = vmul.f32 %v12263_v32, %v12263_v32 }
0x15d2   :  { %v12276_v25 = vpop.f32.mrf.mxu1 }
0x15d3   :  { %6427 = vadd.xlane.f32.xlu0 %v12235_v0  ;;  %9123 = vmatmul.mubr.msk.f32.gmra.mxu0 %vm289_vm1, %v5514_v7  ;;  %13052 = vst [vmem:[#allocation5_spill] sm:$0xff] %v12276_v25  ;;  %v6477_v36 = vmul.f32 %v12276_v25, %v12276_v25 }
0x15d4   :  { %9125 = vmatprep.mubr.msk.f32.mxu0 %vm289_vm1, %v5515_v28  ;;  %v12289_v29 = vpop.f32.mrf.mxu1 }
0x15d5   :  { %6495 = vadd.xlane.f32.xlu1 %v6475_v53  ;;  %13053 = vst [vmem:[#allocation6_spill] sm:$0xff] %v12289_v29  ;;  %v6480_v22 = vmul.f32 %v12289_v29, %v12289_v29 }
0x15d6   :  { %v12302_v42 = vpop.f32.mrf.mxu1 }
0x15d7   :  { %6493 = vadd.xlane.f32.xlu0 %v6474_v38  ;;  %9126 = vmatmul.mubr.msk.f32.gmra.mxu0 %vm289_vm1, %v5516_v33  ;;  %13054 = vst [vmem:[#allocation7_spill] sm:$0xff] %v12302_v42  ;;  %v6479_v40 = vmul.f32 %v12302_v42, %v12302_v42 }
0x15d8   :  { %9128 = vmatprep.mubr.msk.f32.mxu0 %vm289_vm1, %v5517_v2  ;;  %v12315_v21 = vpop.f32.mrf.mxu1 }
0x15d9   :  { %6435 = vadd.xlane.f32.xlu1 %v12276_v25  ;;  %13055 = vst [vmem:[#allocation8_spill] sm:$0xff] %v12315_v21  ;;  %v6482_v41 = vmul.f32 %v12315_v21, %v12315_v21 }
0x15da   :  { %v12325_v17 = vpop.f32.mrf.mxu1 }
0x15db   :  { %6433 = vadd.xlane.f32.xlu0 %v12240_v30  ;;  %9129 = vmatmul.mubr.msk.f32.gmra.mxu0 %vm289_vm1, %v5518_v24  ;;  %13056 = vst [vmem:[#allocation9_spill] sm:$0xff] %v12325_v17  ;;  %v6481_v16 = vmul.f32 %v12325_v17, %v12325_v17 }
0x15dc   :  { %9131 = vmatprep.mubr.msk.f32.mxu0 %vm289_vm1, %v5519_v61  ;;  %v12331_v15 = vpop.f32.mrf.mxu1  ;;  %v12368_v61 = vld [vmem:[%s13014_s15] sm:$0xff] }
0x15dd   :  { %6499 = vadd.xlane.f32.xlu1 %v6477_v36  ;;  %13057 = vst [vmem:[#allocation10_spill] sm:$0xff] %v12331_v15  ;;  %v6484_v34 = vmul.f32 %v12331_v15, %v12331_v15 }
0x15de   :  { %v12336_v20 = vpop.f32.mrf.mxu1 }
0x15df   :  { %6497 = vadd.xlane.f32.xlu0 %v6476_v4  ;;  %9132 = vmatmul.mubr.msk.f32.gmra.mxu0 %vm289_vm1, %v5520_v12  ;;  %13058 = vst [vmem:[#allocation11_spill] sm:$0xff] %v12336_v20  ;;  %v6483_v39 = vmul.f32 %v12336_v20, %v12336_v20 }
0x15e0   :  { %9134 = vmatprep.mubr.msk.f32.mxu0 %vm289_vm1, %v5521_v49  ;;  %v12341_v19 = vpop.f32.mrf.mxu1 }
0x15e1   :  { %6439 = vadd.xlane.f32.xlu1 %v12302_v42  ;;  %13059 = vst [vmem:[#allocation12_spill] sm:$0xff] %v12341_v19  ;;  %v6486_v43 = vmul.f32 %v12341_v19, %v12341_v19 }
0x15e2   :  { %v12346_v3 = vpop.f32.mrf.mxu1 }
0x15e3   :  { %6437 = vadd.xlane.f32.xlu0 %v12263_v32  ;;  %9135 = vmatmul.mubr.msk.f32.gmra.mxu0 %vm289_vm1, %v5522_v60  ;;  %13060 = vst [vmem:[#allocation13_spill] sm:$0xff] %v12346_v3  ;;  %v6485_v35 = vmul.f32 %v12346_v3, %v12346_v3 }
0x15e4   :  { %9137 = vmatprep.mubr.msk.f32.mxu0 %vm289_vm1, %v5523_v57 }
0x15e5   :  { %6503 = vadd.xlane.f32.xlu1 %v6479_v40  ;;  %v12375_v40 = vld [vmem:[%s13014_s15 + $0x8] sm:$0xff] }
0x15e7   :  { %6501 = vadd.xlane.f32.xlu0 %v6478_v26  ;;  %9138 = vmatmul.mubr.msk.f32.gmra.mxu0 %vm289_vm1, %v5524_v50 }
0x15e9   :  { %6443 = vadd.xlane.f32.xlu1 %v12325_v17 }
0x15eb   :  { %6441 = vadd.xlane.f32.xlu0 %v12289_v29 }
0x15ed   :  { %6507 = vadd.xlane.f32.xlu1 %v6481_v16 }
0x15ef   :  { %6505 = vadd.xlane.f32.xlu0 %v6480_v22 }
0x15f1   :  { %6447 = vadd.xlane.f32.xlu1 %v12336_v20 }
0x15f3   :  { %6445 = vadd.xlane.f32.xlu0 %v12315_v21 }
0x15f5   :  { %6511 = vadd.xlane.f32.xlu1 %v6483_v39 }
0x15f7   :  { %6509 = vadd.xlane.f32.xlu0 %v6482_v41 }
0x15f9   :  { %6451 = vadd.xlane.f32.xlu1 %v12346_v3 }
0x15fb   :  { %6449 = vadd.xlane.f32.xlu0 %v12331_v15 }
0x15fd   :  { %6515 = vadd.xlane.f32.xlu1 %v6485_v35 }
0x15ff   :  { %6513 = vadd.xlane.f32.xlu0 %v6484_v34 }
0x1603   :  { %6453 = vadd.xlane.f32.xlu0 %v12341_v19  ;;  %v13080_v19 = vmov 0  }
0x1607   :  { %6517 = vadd.xlane.f32.xlu0 %v6486_v43 }
0x164e   :  { %v6426_v31 = vpop.xlane.xlu1 %6425 }
0x164f   :  { %v6456_v44 = vmul.f32 0.0078125, %v6426_v31 }
0x1650   :  { %v6424_v51 = vpop.xlane.xlu0 %6423 }
0x1651   :  { %v12357_v46 = vmul.f32 0.0078125, %v6424_v51  ;;  %v6536_v58 = vmul.f32 %v6456_v44, %v6456_v44 }
0x1652   :  { %v6488_v47 = vpop.xlane.xlu1 %6487 }
0x1653   :  { %v6535_v48 = vmul.f32 %v12357_v46, %v12357_v46  ;;  %v6519_v52 = vmul.f32 0.0078125, %v6488_v47 }
0x1654   :  { %v6490_v55 = vpop.xlane.xlu0 %6489 }
0x1655   :  { %v6551_v13 = vsub.f32 %v6519_v52, %v6535_v48  ;;  %v6520_v11 = vmul.f32 0.0078125, %v6490_v55 }
0x1656   :  { %v6492_v63 = vpop.xlane.xlu1 %6491 }
0x1657   :  { %v6567_v62 = vadd.f32 1e-05, %v6551_v13  ;;  %v6552_v9 = vsub.f32 %v6520_v11, %v6536_v58  ;;  %v6521_v24 = vmul.f32 0.0078125, %v6492_v63 }
0x1658   :  { %v6430_v27 = vpop.xlane.xlu0 %6429 }
0x1659   :  { %9265 = vrsqrt.f32 %v6567_v62  ;;  %v6568_v54 = vadd.f32 1e-05, %v6552_v9  ;;  %v6458_v6 = vmul.f32 0.0078125, %v6430_v27 }
0x165a   :  { %v6432_v18 = vpop.xlane.xlu1 %6431 }
0x165b   :  { %9267 = vrsqrt.f32 %v6568_v54  ;;  %v6538_v53 = vmul.f32 %v6458_v6, %v6458_v6  ;;  %v12381_v35 = vmul.f32 0.0078125, %v6432_v18 }
0x165c   :  { %v6428_v10 = vpop.xlane.xlu0 %6427 }
0x165d   :  { %v12361_v1 = vmul.f32 0.0078125, %v6428_v10  ;;  %v6539_v55 = vmul.f32 %v12381_v35, %v12381_v35 }
0x165e   :  { %v6496_v8 = vpop.xlane.xlu1 %6495 }
0x165f   :  { %v6537_v33 = vmul.f32 %v12361_v1, %v12361_v1  ;;  %v6523_v58 = vmul.f32 0.0078125, %v6496_v8 }
0x1660   :  { %v6494_v7 = vpop.xlane.xlu0 %6493 }
0x1661   :  { %v6522_v28 = vmul.f32 0.0078125, %v6494_v7  ;;  %v6553_v60 = vsub.f32 %v6521_v24, %v6537_v33  ;;  %v6555_v62 = vsub.f32 %v6523_v58, %v6539_v55 }
0x1662   :  { %v6436_v38 = vpop.xlane.xlu1 %6435 }
0x1663   :  { %v6554_v2 = vsub.f32 %v6522_v28, %v6538_v53  ;;  %v6569_v34 = vadd.f32 1e-05, %v6553_v60  ;;  %v12395_v10 = vmul.f32 0.0078125, %v6436_v38  ;;  %v6571_v53 = vadd.f32 1e-05, %v6555_v62 }
0x1664   :  { %v6434_v36 = vpop.xlane.xlu0 %6433 }
0x1665   :  { %v6570_v4 = vadd.f32 1e-05, %v6554_v2  ;;  %v12370_v12 = vmul.f32 0.0078125, %v6434_v36  ;;  %v6541_v36 = vmul.f32 %v12395_v10, %v12395_v10 }
0x1666   :  { %v9266_v49 = vpop.eup %9265  ;;  %v6500_v26 = vpop.xlane.xlu1 %6499 }
0x1667   :  { %9269 = vrsqrt.f32 %v6570_v4  ;;  %v6540_v57 = vmul.f32 %v12370_v12, %v12370_v12  ;;  %v6599_v50 = vmul.f32 %v9266_v49, %v12368_v61  ;;  %v6525_v4 = vmul.f32 0.0078125, %v6500_v26 }
0x1668   :  { %v9268_v16 = vpop.eup %9267  ;;  %v6498_v22 = vpop.xlane.xlu0 %6497  ;;  %9271 = vrsqrt.f32 %v6569_v34 }
0x1669   :  { %v6524_v39 = vmul.f32 0.0078125, %v6498_v22  ;;  %6617 = vperm.xlu1 %9206, %v6599_v50   ;;  %v6600_v41 = vmul.f32 %v9268_v16, %v12375_v40  ;;  %v6711_v60 = vmul.f32 %v6599_v50, %v12357_v46  ;;  %v12409_v16 = vld [vmem:[%s13014_s15 + $0x10] sm:$0xff] }
0x166a   :  { %v6440_v48 = vpop.xlane.xlu1 %6439 }
0x166b   :  { %v6556_v43 = vsub.f32 %v6524_v39, %v6540_v57  ;;  %6622 = vperm.xlu0 %9208, %v6600_v41   ;;  %v6712_v52 = vmul.f32 %v6600_v41, %v6456_v44  ;;  %v12393_v44 = vld [vmem:[%s13014_s15 + $0x18] sm:$0xff]  ;;  %v6557_v41 = vsub.f32 %v6525_v4, %v6541_v36  ;;  %v12420_v50 = vmul.f32 0.0078125, %v6440_v48  ;;  %v12445_v4 = vld [vmem:[%s13014_s15 + $0x20] sm:$0xff] }
0x166c   :  { %v6438_v31 = vpop.xlane.xlu0 %6437 }
0x166d   :  { %v6572_v51 = vadd.f32 1e-05, %v6556_v43  ;;  %v12383_v47 = vmul.f32 0.0078125, %v6438_v31 }
0x166e   :  { %v6504_v27 = vpop.xlane.xlu1 %6503 }
0x166f   :  { %9273 = vrsqrt.f32 %v6572_v51  ;;  %v6542_v13 = vmul.f32 %v12383_v47, %v12383_v47  ;;  %6745 = vrot.lane.b32.xlu0 %v6712_v52, %s9619_s20  ;;  %v6527_v62 = vmul.f32 0.0078125, %v6504_v27 }
0x1670   :  { %v6502_v11 = vpop.xlane.xlu0 %6501 }
0x1671   :  { %v6526_v63 = vmul.f32 0.0078125, %v6502_v11 }
0x1672   :  { %v6444_v49 = vpop.xlane.xlu1 %6443 }
0x1673   :  { %v6558_v9 = vsub.f32 %v6526_v63, %v6542_v13  ;;  %v6573_v13 = vadd.f32 1e-05, %v6557_v41  ;;  %v6543_v63 = vmul.f32 %v12420_v50, %v12420_v50  ;;  %v12437_v27 = vmul.f32 0.0078125, %v6444_v49 }
0x1674   :  { %v9270_v54 = vpop.eup %9269  ;;  %v6442_v18 = vpop.xlane.xlu0 %6441 }
0x1675   :  { %v6574_v8 = vadd.f32 1e-05, %v6558_v9  ;;  %v12397_v7 = vmul.f32 0.0078125, %v6442_v18  ;;  %v6602_v28 = vmul.f32 %v9270_v54, %v12393_v44  ;;  %v9272_v57 = vpop.eup %9271  ;;  %v12432_v9 = vld [vmem:[%s13014_s15 + $0x38] sm:$0xff] }
0x1676   :  { %v6601_v46 = vmul.f32 %v9272_v57, %v12409_v16  ;;  %v6508_v51 = vpop.xlane.xlu1 %6507  ;;  %v6545_v57 = vmul.f32 %v12437_v27, %v12437_v27 }
0x1677   :  { %9275 = vrsqrt.f32 %v6574_v8  ;;  %v6544_v33 = vmul.f32 %v12397_v7, %v12397_v7  ;;  %6632 = vperm.xlu1 %9206, %v6602_v28   ;;  %v6714_v24 = vmul.f32 %v6602_v28, %v6458_v6  ;;  %v12414_v6 = vld [vmem:[%s13014_s15 + $0x28] sm:$0xff] }
0x1678   :  { %v6506_v2 = vpop.xlane.xlu0 %6505  ;;  %9277 = vrsqrt.f32 %v6571_v53  ;;  %v6713_v28 = vmul.f32 %v6601_v46, %v12361_v1 }
0x1679   :  { %v6528_v38 = vmul.f32 0.0078125, %v6506_v2  ;;  %6749 = vrot.lane.b32.xlu0 %v6714_v24, %s9619_s20 }
0x167a   :  { %v6448_v8 = vpop.xlane.xlu1 %6447 }
0x167b   :  { %v6560_v22 = vsub.f32 %v6528_v38, %v6544_v33  ;;  %6743 = vrot.lane.b32.xlu1 %v6711_v60, %s9619_s20  ;;  %v6559_v33 = vsub.f32 %v6527_v62, %v6543_v63 }
0x167c   :  { %v9274_v26 = vpop.eup %9273  ;;  %v6446_v39 = vpop.xlane.xlu0 %6445 }
0x167d   :  { %v6576_v34 = vadd.f32 1e-05, %v6560_v22  ;;  %v12417_v43 = vmul.f32 0.0078125, %v6446_v39  ;;  %v6604_v31 = vmul.f32 %v9274_v26, %v12414_v6  ;;  %v6575_v49 = vadd.f32 1e-05, %v6559_v33  ;;  %v12456_v39 = vld [vmem:[%s13014_s15 + $0x48] sm:$0xff] }
0x167e   :  { %v6529_v22 = vmul.f32 0.0078125, %v6508_v51  ;;  %v6512_v41 = vpop.xlane.xlu1 %6511  ;;  %v12472_v33 = vld [vmem:[%s13014_s15 + $0x58] sm:$0xff] }
0x167f   :  { %9279 = vrsqrt.f32 %v6576_v34  ;;  %v6546_v52 = vmul.f32 %v12417_v43, %v12417_v43  ;;  %6627 = vperm.xlu1 %9206, %v6601_v46   ;;  %v6716_v58 = vmul.f32 %v6604_v31, %v12370_v12 }
0x1680   :  { %v6510_v55 = vpop.xlane.xlu0 %6509  ;;  %9281 = vrsqrt.f32 %v6573_v13  ;;  %v6561_v51 = vsub.f32 %v6529_v22, %v6545_v57 }
0x1681   :  { %v6530_v11 = vmul.f32 0.0078125, %v6510_v55  ;;  %6753 = vrot.lane.b32.xlu0 %v6716_v58, %s9619_s20  ;;  %v12461_v58 = vmul.f32 0.0078125, %v6448_v8 }
0x1682   :  { %v6452_v63 = vpop.xlane.xlu1 %6451 }
0x1683   :  { %v6562_v48 = vsub.f32 %v6530_v11, %v6546_v52  ;;  %6642 = vperm.xlu1 %9206, %v6604_v31  }
0x1684   :  { %v9276_v54 = vpop.eup %9275  ;;  %v6450_v18 = vpop.xlane.xlu0 %6449 }
0x1685   :  { %v6578_v12 = vadd.f32 1e-05, %v6562_v48  ;;  %v12434_v53 = vmul.f32 0.0078125, %v6450_v18  ;;  %v6606_v2 = vmul.f32 %v9276_v54, %v12432_v9  ;;  %v9278_v24 = vpop.eup %9277  ;;  %v6577_v18 = vadd.f32 1e-05, %v6561_v51 }
0x1686   :  { %v6603_v26 = vmul.f32 %v9278_v24, %v12445_v4 }
0x1687   :  { %9283 = vrsqrt.f32 %v6578_v12  ;;  %v6548_v36 = vmul.f32 %v12434_v53, %v12434_v53  ;;  %6747 = vrot.lane.b32.xlu1 %v6713_v28, %s9619_s20  ;;  %v6718_v1 = vmul.f32 %v6606_v2, %v12383_v47  ;;  %v6547_v12 = vmul.f32 %v12461_v58, %v12461_v58 }
0x1688   :  { %v6514_v38 = vpop.xlane.xlu0 %6513  ;;  %9285 = vrsqrt.f32 %v6575_v49  ;;  %v6531_v28 = vmul.f32 0.0078125, %v6512_v41  ;;  %v6715_v8 = vmul.f32 %v6603_v26, %v12381_v35  ;;  %v6516_v49 = vpop.xlane.xlu1 %6515 }
0x1689   :  { %v6532_v60 = vmul.f32 0.0078125, %v6514_v38  ;;  %6757 = vrot.lane.b32.xlu0 %v6718_v1, %s9619_s20  ;;  %v6469_v1 = vmul.f32 0.0078125, %v6452_v63  ;;  %v6533_v41 = vmul.f32 0.0078125, %v6516_v49 }
0x168a   :  { %v6563_v35 = vsub.f32 %v6531_v28, %v6547_v12 }
0x168b   :  { %v6564_v34 = vsub.f32 %v6532_v60, %v6548_v36  ;;  %6637 = vperm.xlu1 %9206, %v6603_v26   ;;  %v6549_v26 = vmul.f32 %v6469_v1, %v6469_v1 }
0x168c   :  { %v9280_v46 = vpop.eup %9279  ;;  %v6454_v47 = vpop.xlane.xlu0 %6453  ;;  %v6579_v22 = vadd.f32 1e-05, %v6563_v35 }
0x168d   :  { %v6580_v31 = vadd.f32 1e-05, %v6564_v34  ;;  %v12458_v52 = vmul.f32 0.0078125, %v6454_v47  ;;  %v6608_v55 = vmul.f32 %v9280_v46, %v12456_v39  ;;  %v9282_v54 = vpop.eup %9281  ;;  %v12488_v46 = vld [vmem:[%s13014_s15 + $0x68] sm:$0xff] }
0x168f   :  { %9287 = vrsqrt.f32 %v6580_v31  ;;  %v6550_v13 = vmul.f32 %v12458_v52, %v12458_v52  ;;  %6662 = vperm.xlu0 %9208, %v6608_v55   ;;  %6652 = vperm.xlu1 %9206, %v6606_v2   ;;  %v6720_v48 = vmul.f32 %v6608_v55, %v12397_v7  ;;  %v12478_v7 = vld [vmem:[%s13014_s15 + $0x30] sm:$0xff]  ;;  %v12494_v31 = vld [vmem:[%s13014_s15 + $0x40] sm:$0xff] }
0x1690   :  { %v6518_v11 = vpop.xlane.xlu0 %6517  ;;  %9289 = vrsqrt.f32 %v6577_v18  ;;  %v6605_v60 = vmul.f32 %v9282_v54, %v12478_v7  ;;  %v12510_v54 = vld [vmem:[%s13014_s15 + $0x50] sm:$0xff] }
0x1691   :  { %v6534_v62 = vmul.f32 0.0078125, %v6518_v11 }
0x1692   :  { %v6717_v34 = vmul.f32 %v6605_v60, %v12395_v10  ;;  %v6565_v10 = vsub.f32 %v6533_v41, %v6549_v26 }
0x1693   :  { %v6566_v24 = vsub.f32 %v6534_v62, %v6550_v13  ;;  %6761 = vrot.lane.b32.xlu0 %v6720_v48, %s9619_s20  ;;  %6751 = vrot.lane.b32.xlu1 %v6715_v8, %s9619_s20  ;;  %v12504_v62 = vld [vmem:[%s13014_s15 + $0x78] sm:$0xff] }
0x1694   :  { %v9284_v2 = vpop.eup %9283  ;;  %v6581_v11 = vadd.f32 1e-05, %v6565_v10 }
0x1695   :  { %v6582_v36 = vadd.f32 1e-05, %v6566_v24  ;;  %v6610_v38 = vmul.f32 %v9284_v2, %v12472_v33  ;;  %v9286_v47 = vpop.eup %9285  ;;  %v12522_v24 = vld [vmem:[%s13014_s15 + $0x60] sm:$0xff] }
0x1696   :  { %v6607_v51 = vmul.f32 %v9286_v47, %v12494_v31 }
0x1697   :  { %9291 = vrsqrt.f32 %v6582_v36  ;;  %6672 = vperm.xlu0 %9208, %v6610_v38   ;;  %6647 = vperm.xlu1 %9206, %v6605_v60   ;;  %v6722_v57 = vmul.f32 %v6610_v38, %v12417_v43  ;;  %v12537_v60 = vpop.f32.mrf.mxu0 }
0x1698   :  { %9293 = vrsqrt.f32 %v6579_v22  ;;  %v6719_v63 = vmul.f32 %v6607_v51, %v12420_v50 }
0x1699   :  { %9295 = vrsqrt.f32 %v6581_v11  ;;  %v12539_v49 = vpop.f32.mrf.mxu0 }
0x169b   :  { %6765 = vrot.lane.b32.xlu0 %v6722_v57, %s9619_s20  ;;  %6755 = vrot.lane.b32.xlu1 %v6717_v34, %s9619_s20  ;;  %v12544_v57 = vpop.f32.mrf.mxu0 }
0x169c   :  { %v9288_v55 = vpop.eup %9287 }
0x169d   :  { %v6612_v43 = vmul.f32 %v9288_v55, %v12488_v46  ;;  %v9290_v48 = vpop.eup %9289  ;;  %v12546_v22 = vpop.f32.mrf.mxu0 }
0x169e   :  { %v6609_v50 = vmul.f32 %v9290_v48, %v12510_v54  ;;  %13061 = vst [vmem:[#allocation14_spill] sm:$0xff] %v12546_v22  ;;  %v5785_v48 = vmul.f32 %v12544_v57, %v12544_v57 }
0x169f   :  { %6682 = vperm.xlu0 %9208, %v6612_v43   ;;  %6657 = vperm.xlu1 %9206, %v6607_v51   ;;  %v6724_v13 = vmul.f32 %v6612_v43, %v12434_v53  ;;  %v12551_v26 = vpop.f32.mrf.mxu0  ;;  %v5783_v51 = vmul.f32 %v12537_v60, %v12537_v60 }
0x16a0   :  { %v6721_v28 = vmul.f32 %v6609_v50, %v12437_v27  ;;  %v12531_v27 = vld [vmem:[%s13014_s15 + $0x70] sm:$0xff]  ;;  %13062 = vst [vmem:[#allocation15_spill] sm:$0xff] %v12551_v26 }
0x16a1   :  { %v12553_v41 = vpop.f32.mrf.mxu0 }
0x16a2   :  { %13063 = vst [vmem:[#allocation16_spill] sm:$0xff] %v12553_v41  ;;  %v5786_v34 = vmul.f32 %v12553_v41, %v12553_v41 }
0x16a3   :  { %6769 = vrot.lane.b32.xlu0 %v6724_v13, %s9619_s20  ;;  %6759 = vrot.lane.b32.xlu1 %v6719_v63, %s9619_s20  ;;  %v12558_v47 = vpop.f32.mrf.mxu0 }
0x16a4   :  { %v9292_v18 = vpop.eup %9291  ;;  %13064 = vst [vmem:[#allocation17_spill] sm:$0xff] %v12558_v47 }
0x16a5   :  { %v6614_v53 = vmul.f32 %v9292_v18, %v12504_v62  ;;  %v9294_v8 = vpop.eup %9293  ;;  %v12560_v55 = vpop.f32.mrf.mxu0 }
0x16a6   :  { %v6611_v2 = vmul.f32 %v9294_v8, %v12522_v24  ;;  %13065 = vst [vmem:[#allocation18_spill] sm:$0xff] %v12560_v55  ;;  %v5788_v43 = vmul.f32 %v12560_v55, %v12560_v55 }
0x16a7   :  { %6692 = vperm.xlu0 %9208, %v6614_v53   ;;  %v12516_v12 = vmul.f32 %v6614_v53, %v12458_v52  ;;  %6667 = vperm.xlu1 %9206, %v6609_v50   ;;  %v9296_v52 = vpop.eup %9295  ;;  %v12565_v10 = vpop.f32.mrf.mxu0 }
0x16a8   :  { %v6723_v36 = vmul.f32 %v6611_v2, %v12461_v58  ;;  %v6613_v38 = vmul.f32 %v9296_v52, %v12531_v27  ;;  %v5782_v58 = vmul.f32 %v12539_v49, %v12539_v49  ;;  %13066 = vst [vmem:[#allocation19_spill] sm:$0xff] %v12565_v10  ;;  %v5789_v52 = vmul.f32 %v12558_v47, %v12558_v47 }
0x16a9   :  { %v12570_v13 = vpop.f32.mrf.mxu0 }
0x16aa   :  { %v6725_v35 = vmul.f32 %v6613_v38, %v6469_v1  ;;  %v5784_v1 = vmul.f32 %v12546_v22, %v12546_v22  ;;  %13067 = vst [vmem:[#allocation20_spill] sm:$0xff] %v12570_v13  ;;  %v5790_v11 = vmul.f32 %v12570_v13, %v12570_v13 }
0x16ab   :  { %9209 = vset.pattern.permute.xlu0 %v13019_v56  ;;  %6763 = vrot.lane.b32.xlu1 %v6721_v28, %s9619_s20  ;;  %v12575_v63 = vpop.f32.mrf.mxu0  ;;  %v5787_v28 = vmul.f32 %v12551_v26, %v12551_v26 }
0x16ac   :  { %13068 = vst [vmem:[#allocation21_spill] sm:$0xff] %v12575_v63 }
0x16ad   :  { %v12580_v18 = vpop.f32.mrf.mxu0 }
0x16ae   :  { %13069 = vst [vmem:[#allocation22_spill] sm:$0xff] %v12580_v18  ;;  %v5792_v53 = vmul.f32 %v12580_v18, %v12580_v18 }
0x16af   :  { %6677 = vperm.xlu1 %9206, %v6611_v2   ;;  %v12585_v50 = vpop.f32.mrf.mxu0 }
0x16b0   :  { %13070 = vst [vmem:[#allocation23_spill] sm:$0xff] %v12585_v50 }
0x16b1   :  { %v12590_v8 = vpop.f32.mrf.mxu0 }
0x16b2   :  { %13071 = vst [vmem:[#allocation24_spill] sm:$0xff] %v12590_v8  ;;  %v5794_v2 = vmul.f32 %v12590_v8, %v12590_v8 }
0x16b3   :  { %6767 = vrot.lane.b32.xlu1 %v6723_v36, %s9619_s20  ;;  %v12595_v36 = vpop.f32.mrf.mxu0 }
0x16b4   :  { %13072 = vst [vmem:[#allocation25_spill] sm:$0xff] %v12595_v36 }
0x16b7   :  { %6687 = vperm.xlu1 %9206, %v6613_v38  }
0x16bb   :  { %6771 = vrot.lane.b32.xlu1 %v6725_v35, %s9619_s20  ;;  %v12602_v35 = vpop.f32.mrf.mxu0 }
0x16bc   :  { %9210 = vset.pattern.permute.xlu1 %v13019_v56  ;;  %13073 = vst [vmem:[#allocation26_spill] sm:$0xff] %v12602_v35 }
0x16c6   :  { %5736 = vadd.xlane.f32.xlu0 %v12537_v60 }
0x16ca   :  { %5798 = vadd.xlane.f32.xlu0 %v5782_v58  ;;  %v5796_v58 = vmul.f32 %v12602_v35, %v12602_v35 }
0x16ce   :  { %5738 = vadd.xlane.f32.xlu0 %v12546_v22 }
0x16d2   :  { %5802 = vadd.xlane.f32.xlu0 %v5784_v1 }
0x16d6   :  { %5742 = vadd.xlane.f32.xlu0 %v12553_v41 }
0x16da   :  { %5806 = vadd.xlane.f32.xlu0 %v5786_v34  ;;  %v5791_v34 = vmul.f32 %v12565_v10, %v12565_v10 }
0x16de   :  { %5746 = vadd.xlane.f32.xlu0 %v12560_v55 }
0x16df   :  { %5734 = vadd.xlane.f32.xlu1 %v12539_v49 }
0x16e2   :  { %5810 = vadd.xlane.f32.xlu0 %v5788_v43 }
0x16e3   :  { %5800 = vadd.xlane.f32.xlu1 %v5783_v51  ;;  %v5793_v51 = vmul.f32 %v12575_v63, %v12575_v63 }
0x16e4   :  { %v12600_v38 = vpop.permute.xlu1 %6617 }
0x16e6   :  { %5750 = vadd.xlane.f32.xlu0 %v12570_v13 }
0x16e7   :  { %5740 = vadd.xlane.f32.xlu1 %v12544_v57 }
0x16ea   :  { %5814 = vadd.xlane.f32.xlu0 %v5790_v11 }
0x16eb   :  { %5804 = vadd.xlane.f32.xlu1 %v5785_v48  ;;  %v5795_v48 = vmul.f32 %v12585_v50, %v12585_v50 }
0x16ee   :  { %5754 = vadd.xlane.f32.xlu0 %v12580_v18 }
0x16ef   :  { %5744 = vadd.xlane.f32.xlu1 %v12551_v26 }
0x16f2   :  { %5818 = vadd.xlane.f32.xlu0 %v5792_v53  ;;  %v12607_v1 = vpop.permute.xlu1 %6632  ;;  %v12620_v53 = vpop.permute.xlu0 %6622 }
0x16f3   :  { %5808 = vadd.xlane.f32.xlu1 %v5787_v28 }
0x16f6   :  { %5758 = vadd.xlane.f32.xlu0 %v12590_v8  ;;  %v6744_v43 = vpop.permute.xlu1 %6743 }
0x16f7   :  { %5748 = vadd.xlane.f32.xlu1 %v12558_v47  ;;  %v6791_v8 = vsub.f32 %v12368_v61, %v6744_v43 }
0x16fa   :  { %5822 = vadd.xlane.f32.xlu0 %v5794_v2  ;;  %v12615_v11 = vpop.permute.xlu1 %6627  ;;  %v6746_v2 = vpop.permute.xlu0 %6745 }
0x16fb   :  { %5812 = vadd.xlane.f32.xlu1 %v5789_v52 }
0x16fe   :  { %5762 = vadd.xlane.f32.xlu0 %v12602_v35  ;;  %v12622_v28 = vpop.permute.xlu1 %6642  ;;  %v6750_v59 = vpop.permute.xlu0 %6749 }
0x16ff   :  { %5752 = vadd.xlane.f32.xlu1 %v12565_v10  ;;  %13074 = vst [vmem:[#allocation27_spill] sm:$0xff] %v12622_v28 }
0x1702   :  { %5826 = vadd.xlane.f32.xlu0 %v5796_v58  ;;  %v6748_v52 = vpop.permute.xlu1 %6747  ;;  %v5797_v58 = vmul.f32 %v12595_v36, %v12595_v36  ;;  %v12635_v56 = vpop.permute.xlu0 %6753 }
0x1703   :  { %5816 = vadd.xlane.f32.xlu1 %v5791_v34  ;;  %v6792_v34 = vsub.f32 %v12375_v40, %v6746_v2  ;;  %v6794_v2 = vsub.f32 %v12393_v44, %v6750_v59 }
0x1706   :  { %v12637_v35 = vpop.permute.xlu0 %6757 }
0x1707   :  { %5756 = vadd.xlane.f32.xlu1 %v12575_v63 }
0x170b   :  { %5820 = vadd.xlane.f32.xlu1 %v5793_v51  ;;  %v12630_v51 = vpop.permute.xlu1 %6637 }
0x170c   :  { %13075 = vst [vmem:[#allocation28_spill] sm:$0xff] %v12630_v51 }
0x170f   :  { %5760 = vadd.xlane.f32.xlu1 %v12585_v50 }
0x1713   :  { %5824 = vadd.xlane.f32.xlu1 %v5795_v48  ;;  %v12633_v48 = vpop.permute.xlu1 %6652 }
0x1714   :  { %13076 = vst [vmem:[#allocation29_spill] sm:$0xff] %v12633_v48 }
0x1717   :  { %5764 = vadd.xlane.f32.xlu1 %v12595_v36  ;;  %v12639_v3 = vpop.permute.xlu1 %6751 }
0x1718   :  { %6773 = vrot.lane.b32.xlu0 %v12516_v12, %s9619_s20  ;;  %v12642_v12 = vpop.permute.xlu0 %6662 }
0x1719   :  { %13077 = vst [vmem:[#allocation30_spill] sm:$0xff] %v12642_v12 }
0x171b   :  { %5828 = vadd.xlane.f32.xlu1 %v5797_v58  ;;  %v12645_v58 = vpop.permute.xlu1 %6647 }
0x171c   :  { %6814 = vperm.xlu0 %9209, %v6792_v34   ;;  %13078 = vst [vmem:[#allocation31_spill] sm:$0xff] %v12645_v58  ;;  %v12647_v34 = vpop.permute.xlu0 %6761 }
0x171f   :  { %v12650_v20 = vpop.permute.xlu1 %6755 }
0x1720   :  { %9212 = vset.pattern.permute.xlu0 %v13024_v14  ;;  %v6793_v14 = vsub.f32 %v12409_v16, %v6748_v52  ;;  %v12652_v36 = vpop.permute.xlu0 %6672 }
0x1721   :  { %13079 = vst [vmem:[#allocation32_spill] sm:$0xff] %v12652_v36 }
0x1723   :  { %v12655_v43 = vpop.permute.xlu1 %6657 }
0x1724   :  { %13081 = vst [vmem:[#allocation33_spill] sm:$0xff] %v12655_v43  ;;  %v12657_v18 = vpop.permute.xlu0 %6765 }
0x1728   :  { %v12661_v59 = vpop.permute.xlu0 %6682 }
0x1729   :  { %13082 = vst [vmem:[#allocation34_spill] sm:$0xff] %v12661_v59 }
0x172c   :  { %6809 = vperm.xlu1 %9210, %v6791_v8   ;;  %v12659_v8 = vpop.permute.xlu1 %6759  ;;  %v12665_v17 = vpop.permute.xlu0 %6769 }
0x1730   :  { %6824 = vperm.xlu1 %9210, %v6794_v2   ;;  %v12663_v2 = vpop.permute.xlu1 %6667  ;;  %v12669_v13 = vpop.permute.xlu0 %6692 }
0x1731   :  { %13083 = vst [vmem:[#allocation35_spill] sm:$0xff] %v12663_v2  ;;  %13084 = vst [vmem:[#allocation36_spill] sm:$0xff] %v12669_v13 }
0x1734   :  { %6819 = vperm.xlu1 %9210, %v6793_v14   ;;  %v12667_v52 = vpop.permute.xlu1 %6763 }
0x1738   :  { %9211 = vset.pattern.permute.xlu1 %v13080_v19  ;;  %v12671_v14 = vpop.permute.xlu1 %6677 }
0x1739   :  { %13085 = vst [vmem:[#allocation37_spill] sm:$0xff] %v12671_v14 }
0x173c   :  { %v12673_v19 = vpop.permute.xlu1 %6767 }
0x1740   :  { %v12675_v50 = vpop.permute.xlu1 %6687 }
0x1741   :  { %13086 = vst [vmem:[#allocation38_spill] sm:$0xff] %v12675_v50 }
0x1744   :  { %v12677_v55 = vpop.permute.xlu1 %6771 }
0x174f   :  { %v5737_v42 = vpop.xlane.xlu0 %5736 }
0x1750   :  { %v5767_v2 = vmul.f32 0.0078125, %v5737_v42 }
0x1752   :  { %v5847_v36 = vmul.f32 %v5767_v2, %v5767_v2 }
0x1753   :  { %v5799_v43 = vpop.xlane.xlu0 %5798 }
0x1754   :  { %v5830_v63 = vmul.f32 0.0078125, %v5799_v43 }
0x1757   :  { %v5739_v15 = vpop.xlane.xlu0 %5738 }
0x1758   :  { %v12683_v51 = vmul.f32 0.0078125, %v5739_v15 }
0x175a   :  { %v5848_v43 = vmul.f32 %v12683_v51, %v12683_v51 }
0x175b   :  { %v5803_v59 = vpop.xlane.xlu0 %5802 }
0x175c   :  { %v5832_v32 = vmul.f32 0.0078125, %v5803_v59 }
0x175f   :  { %v5743_v21 = vpop.xlane.xlu0 %5742 }
0x1760   :  { %v12691_v28 = vmul.f32 0.0078125, %v5743_v21 }
0x1763   :  { %v5807_v37 = vpop.xlane.xlu0 %5806 }
0x1767   :  { %v5747_v30 = vpop.xlane.xlu0 %5746 }
0x1768   :  { %v5735_v58 = vpop.xlane.xlu1 %5734 }
0x1769   :  { %v12679_v25 = vmul.f32 0.0078125, %v5735_v58 }
0x176b   :  { %v5846_v13 = vmul.f32 %v12679_v25, %v12679_v25 }
0x176c   :  { %v5801_v14 = vpop.xlane.xlu1 %5800 }
0x176d   :  { %v5862_v10 = vsub.f32 %v5830_v63, %v5846_v13  ;;  %v5831_v41 = vmul.f32 0.0078125, %v5801_v14 }
0x176f   :  { %v5878_v29 = vadd.f32 1e-05, %v5862_v10  ;;  %v5863_v12 = vsub.f32 %v5831_v41, %v5847_v36  ;;  %v5864_v10 = vsub.f32 %v5832_v32, %v5848_v43  ;;  %v5850_v43 = vmul.f32 %v12691_v28, %v12691_v28 }
0x1770   :  { %v5741_v50 = vpop.xlane.xlu1 %5740 }
0x1771   :  { %9297 = vrsqrt.f32 %v5878_v29  ;;  %v5879_v47 = vadd.f32 1e-05, %v5863_v12  ;;  %v5769_v42 = vmul.f32 0.0078125, %v5741_v50  ;;  %v5811_v50 = vpop.xlane.xlu0 %5810 }
0x1773   :  { %9299 = vrsqrt.f32 %v5879_v47  ;;  %v5849_v48 = vmul.f32 %v5769_v42, %v5769_v42  ;;  %v5880_v47 = vadd.f32 1e-05, %v5864_v10 }
0x1774   :  { %v5805_v58 = vpop.xlane.xlu1 %5804 }
0x1775   :  { %v5833_v26 = vmul.f32 0.0078125, %v5805_v58 }
0x1777   :  { %v5865_v13 = vsub.f32 %v5833_v26, %v5849_v48 }
0x1778   :  { %v5745_v63 = vpop.xlane.xlu1 %5744 }
0x1779   :  { %v5881_v41 = vadd.f32 1e-05, %v5865_v13  ;;  %v12687_v36 = vmul.f32 0.0078125, %v5745_v63  ;;  %v5834_v13 = vmul.f32 0.0078125, %v5807_v37 }
0x177b   :  { %9301 = vrsqrt.f32 %v5881_v41  ;;  %v5851_v29 = vmul.f32 %v12687_v36, %v12687_v36  ;;  %v5751_v41 = vpop.xlane.xlu0 %5750 }
0x177c   :  { %v5809_v15 = vpop.xlane.xlu1 %5808  ;;  %9303 = vrsqrt.f32 %v5880_v47  ;;  %v5866_v47 = vsub.f32 %v5834_v13, %v5850_v43 }
0x177d   :  { %v5835_v12 = vmul.f32 0.0078125, %v5809_v15 }
0x177e   :  { %v9298_v14 = vpop.eup %9297 }
0x177f   :  { %v5910_v59 = vmul.f32 %v9298_v14, %v12368_v61  ;;  %v5867_v58 = vsub.f32 %v5835_v12, %v5851_v29  ;;  %v5815_v37 = vpop.xlane.xlu0 %5814 }
0x1780   :  { %v9300_v26 = vpop.eup %9299  ;;  %v5749_v48 = vpop.xlane.xlu1 %5748 }
0x1781   :  { %v5883_v32 = vadd.f32 1e-05, %v5867_v58  ;;  %5928 = vperm.xlu0 %9212, %v5910_v59   ;;  %v12696_v63 = vmul.f32 0.0078125, %v5749_v48  ;;  %v5911_v10 = vmul.f32 %v9300_v26, %v12375_v40  ;;  %v5882_v40 = vadd.f32 1e-05, %v5866_v47 }
0x1782   :  { %v12704_v26 = vmul.f32 0.0078125, %v5747_v30 }
0x1783   :  { %9305 = vrsqrt.f32 %v5883_v32  ;;  %v5853_v21 = vmul.f32 %v12696_v63, %v12696_v63  ;;  %5933 = vperm.xlu1 %9211, %v5911_v10   ;;  %v6023_v29 = vmul.f32 %v5911_v10, %v5767_v2  ;;  %v5755_v30 = vpop.xlane.xlu0 %5754 }
0x1784   :  { %v5813_v61 = vpop.xlane.xlu1 %5812 }
0x1785   :  { %v5837_v15 = vmul.f32 0.0078125, %v5813_v61  ;;  %6056 = vrot.lane.b32.xlu0 %v6023_v29, %s9619_s20  ;;  %v5852_v61 = vmul.f32 %v12704_v26, %v12704_v26  ;;  %v6022_v29 = vmul.f32 %v5910_v59, %v12679_v25 }
0x1787   :  { %v5869_v12 = vsub.f32 %v5837_v15, %v5853_v21  ;;  %v5836_v15 = vmul.f32 0.0078125, %v5811_v50 }
0x1788   :  { %v9302_v14 = vpop.eup %9301  ;;  %v5753_v58 = vpop.xlane.xlu1 %5752 }
0x1789   :  { %v5885_v48 = vadd.f32 1e-05, %v5869_v12  ;;  %v12702_v22 = vmul.f32 0.0078125, %v5753_v58  ;;  %v5913_v32 = vmul.f32 %v9302_v14, %v12393_v44  ;;  %v9304_v21 = vpop.eup %9303 }
0x178b   :  { %9307 = vrsqrt.f32 %v5885_v48  ;;  %v5855_v2 = vmul.f32 %v12702_v22, %v12702_v22  ;;  %5943 = vperm.xlu1 %9211, %v5913_v32   ;;  %v6025_v13 = vmul.f32 %v5913_v32, %v5769_v42  ;;  %v5868_v48 = vsub.f32 %v5836_v15, %v5852_v61 }
0x178c   :  { %v5817_v43 = vpop.xlane.xlu1 %5816  ;;  %9309 = vrsqrt.f32 %v5882_v40  ;;  %v12717_v40 = vmul.f32 0.0078125, %v5751_v41  ;;  %v5912_v32 = vmul.f32 %v9304_v21, %v12409_v16  ;;  %v5838_v41 = vmul.f32 0.0078125, %v5815_v37 }
0x178d   :  { %v5839_v10 = vmul.f32 0.0078125, %v5817_v43  ;;  %6060 = vrot.lane.b32.xlu0 %v6025_v13, %s9619_s20  ;;  %v5884_v13 = vadd.f32 1e-05, %v5868_v48 }
0x178f   :  { %v5871_v44 = vsub.f32 %v5839_v10, %v5855_v2  ;;  %6054 = vrot.lane.b32.xlu1 %v6022_v29, %s9619_s20  ;;  %v5819_v2 = vpop.xlane.xlu0 %5818  ;;  %v5854_v10 = vmul.f32 %v12717_v40, %v12717_v40 }
0x1790   :  { %v9306_v47 = vpop.eup %9305  ;;  %v5757_v12 = vpop.xlane.xlu1 %5756 }
0x1791   :  { %v5887_v14 = vadd.f32 1e-05, %v5871_v44  ;;  %v12714_v58 = vmul.f32 0.0078125, %v5757_v12  ;;  %v5915_v42 = vmul.f32 %v9306_v47, %v12414_v6  ;;  %v5870_v47 = vsub.f32 %v5838_v41, %v5854_v10 }
0x1792   :  { %v12729_v12 = vmul.f32 0.0078125, %v5755_v30 }
0x1793   :  { %9311 = vrsqrt.f32 %v5887_v14  ;;  %v5857_v25 = vmul.f32 %v12714_v58, %v12714_v58  ;;  %v6027_v50 = vmul.f32 %v5915_v42, %v12687_v36  ;;  %5938 = vperm.xlu1 %9211, %v5912_v32   ;;  %v6024_v14 = vmul.f32 %v5912_v32, %v12683_v51 }
0x1794   :  { %v5821_v59 = vpop.xlane.xlu1 %5820  ;;  %9313 = vrsqrt.f32 %v5884_v13  ;;  %v5856_v30 = vmul.f32 %v12729_v12, %v12729_v12  ;;  %v5840_v13 = vmul.f32 0.0078125, %v5819_v2 }
0x1795   :  { %v5841_v43 = vmul.f32 0.0078125, %v5821_v59  ;;  %6064 = vrot.lane.b32.xlu0 %v6027_v50, %s9619_s20  ;;  %v5759_v50 = vpop.xlane.xlu0 %5758 }
0x1797   :  { %v5873_v61 = vsub.f32 %v5841_v43, %v5857_v25  ;;  %5953 = vperm.xlu1 %9211, %v5915_v42   ;;  %v5886_v43 = vadd.f32 1e-05, %v5870_v47 }
0x1798   :  { %v9308_v29 = vpop.eup %9307  ;;  %v5761_v21 = vpop.xlane.xlu1 %5760 }
0x1799   :  { %v5889_v15 = vadd.f32 1e-05, %v5873_v61  ;;  %v12726_v44 = vmul.f32 0.0078125, %v5761_v21  ;;  %v5917_v36 = vmul.f32 %v9308_v29, %v12432_v9  ;;  %v9310_v48 = vpop.eup %9309  ;;  %v5823_v61 = vpop.xlane.xlu0 %5822 }
0x179a   :  { %v5914_v51 = vmul.f32 %v9310_v48, %v12445_v4 }
0x179b   :  { %9315 = vrsqrt.f32 %v5889_v15  ;;  %v5859_v37 = vmul.f32 %v12726_v44, %v12726_v44  ;;  %v6029_v42 = vmul.f32 %v5917_v36, %v12696_v63  ;;  %6058 = vrot.lane.b32.xlu1 %v6024_v14, %s9619_s20  ;;  %v5872_v15 = vsub.f32 %v5840_v13, %v5856_v30 }
0x179c   :  { %v5825_v25 = vpop.xlane.xlu1 %5824  ;;  %9317 = vrsqrt.f32 %v5886_v43  ;;  %v12741_v14 = vmul.f32 0.0078125, %v5759_v50 }
0x179d   :  { %v5843_v59 = vmul.f32 0.0078125, %v5825_v25  ;;  %6068 = vrot.lane.b32.xlu0 %v6029_v42, %s9619_s20  ;;  %v5763_v43 = vpop.xlane.xlu0 %5762 }
0x179e   :  { %v5858_v25 = vmul.f32 %v12741_v14, %v12741_v14 }
0x179f   :  { %v5875_v32 = vsub.f32 %v5843_v59, %v5859_v37  ;;  %5948 = vperm.xlu1 %9211, %v5914_v51   ;;  %v5888_v37 = vadd.f32 1e-05, %v5872_v15  ;;  %v5842_v59 = vmul.f32 0.0078125, %v5823_v61 }
0x17a0   :  { %v9312_v10 = vpop.eup %9311  ;;  %v5765_v41 = vpop.xlane.xlu1 %5764 }
0x17a1   :  { %v5891_v29 = vadd.f32 1e-05, %v5875_v32  ;;  %v5781_v63 = vmul.f32 0.0078125, %v5765_v41  ;;  %v5919_v21 = vmul.f32 %v9312_v10, %v12456_v39  ;;  %v6026_v32 = vmul.f32 %v5914_v51, %v12691_v28  ;;  %v9314_v10 = vpop.eup %9313  ;;  %v5827_v28 = vpop.xlane.xlu0 %5826 }
0x17a2   :  { %v5780_v41 = vmul.f32 0.0078125, %v5763_v43  ;;  %v5844_v15 = vmul.f32 0.0078125, %v5827_v28  ;;  %v6799_v28 = vsub.f32 %v12494_v31, %v12659_v8  ;;  %v6798_v8 = vsub.f32 %v12432_v9, %v12637_v35 }
0x17a3   :  { %9319 = vrsqrt.f32 %v5891_v29  ;;  %v5861_v47 = vmul.f32 %v5781_v63, %v5781_v63  ;;  %5973 = vperm.xlu0 %9212, %v5919_v21   ;;  %5963 = vperm.xlu1 %9211, %v5917_v36   ;;  %v6031_v48 = vmul.f32 %v5919_v21, %v12702_v22  ;;  %v5874_v22 = vsub.f32 %v5842_v59, %v5858_v25 }
0x17a4   :  { %v5829_v2 = vpop.xlane.xlu1 %5828  ;;  %9321 = vrsqrt.f32 %v5888_v37  ;;  %v5916_v29 = vmul.f32 %v9314_v10, %v12478_v7  ;;  %v5860_v21 = vmul.f32 %v5780_v41, %v5780_v41 }
0x17a5   :  { %v5845_v42 = vmul.f32 0.0078125, %v5829_v2  ;;  %v5890_v61 = vadd.f32 1e-05, %v5874_v22  ;;  %v12797_v35 = vpop.permute.xlu0 %6773 }
0x17a6   :  { %v5876_v37 = vsub.f32 %v5844_v15, %v5860_v21  ;;  %v13088_v21 = vmov 1  }
0x17a7   :  { %v5877_v30 = vsub.f32 %v5845_v42, %v5861_v47  ;;  %6072 = vrot.lane.b32.xlu0 %v6031_v48, %s9619_s20  ;;  %6062 = vrot.lane.b32.xlu1 %v6026_v32, %s9619_s20  ;;  %v6028_v47 = vmul.f32 %v5916_v29, %v12704_v26 }
0x17a8   :  { %v9316_v50 = vpop.eup %9315  ;;  %v5892_v59 = vadd.f32 1e-05, %v5876_v37 }
0x17a9   :  { %v5893_v36 = vadd.f32 1e-05, %v5877_v30  ;;  %v5921_v13 = vmul.f32 %v9316_v50, %v12472_v33  ;;  %v9318_v2 = vpop.eup %9317  ;;  %v12799_v15 = vpop.permute.xlu0 %6814 }
0x17aa   :  { %v5918_v25 = vmul.f32 %v9318_v2, %v12494_v31 }
0x17ab   :  { %9323 = vrsqrt.f32 %v5893_v36  ;;  %5983 = vperm.xlu0 %9212, %v5921_v13   ;;  %5958 = vperm.xlu1 %9211, %v5916_v29   ;;  %v6033_v51 = vmul.f32 %v5921_v13, %v12714_v58  ;;  %v6795_v13 = vsub.f32 %v12445_v4, %v12639_v3  ;;  %v6797_v29 = vsub.f32 %v12478_v7, %v12650_v20 }
0x17ac   :  { %9325 = vrsqrt.f32 %v5890_v61  ;;  %v6030_v32 = vmul.f32 %v5918_v25, %v12717_v40  ;;  %v13087_v40 = vmov 3   ;;  %v6801_v3 = vsub.f32 %v12510_v54, %v12667_v52 }
0x17ad   :  { %9327 = vrsqrt.f32 %v5892_v59  ;;  %v6803_v20 = vsub.f32 %v12522_v24, %v12673_v19  ;;  %v6800_v52 = vsub.f32 %v12456_v39, %v12647_v34  ;;  %v6802_v19 = vsub.f32 %v12472_v33, %v12657_v18 }
0x17af   :  { %6076 = vrot.lane.b32.xlu0 %v6033_v51, %s9619_s20  ;;  %6066 = vrot.lane.b32.xlu1 %v6028_v47, %s9619_s20 }
0x17b0   :  { %v9320_v42 = vpop.eup %9319 }
0x17b1   :  { %v5923_v48 = vmul.f32 %v9320_v42, %v12488_v46  ;;  %v9322_v26 = vpop.eup %9321 }
0x17b2   :  { %v5920_v30 = vmul.f32 %v9322_v26, %v12510_v54 }
0x17b3   :  { %5993 = vperm.xlu0 %9212, %v5923_v48   ;;  %5968 = vperm.xlu1 %9211, %v5918_v25   ;;  %v6035_v58 = vmul.f32 %v5923_v48, %v12726_v44 }
0x17b4   :  { %v6032_v36 = vmul.f32 %v5920_v30, %v12729_v12 }
0x17b7   :  { %6080 = vrot.lane.b32.xlu0 %v6035_v58, %s9619_s20  ;;  %6070 = vrot.lane.b32.xlu1 %v6030_v32, %s9619_s20  ;;  %v9616_v58 = vld [vmem:[%s13014_s15] sm:$0xff] }
0x17b8   :  { %v9324_v10 = vpop.eup %9323 }
0x17b9   :  { %v5925_v43 = vmul.f32 %v9324_v10, %v12504_v62  ;;  %v9326_v44 = vpop.eup %9325  ;;  %v9617_v10 = vld [vmem:[%s13014_s15 + $0x18] sm:$0xff] }
0x17ba   :  { %v5922_v22 = vmul.f32 %v9326_v44, %v12522_v24  ;;  %v9328_v12 = vpop.eup %9327 }
0x17bb   :  { %6003 = vperm.xlu0 %9212, %v5925_v43   ;;  %5978 = vperm.xlu1 %9211, %v5920_v30   ;;  %v6037_v50 = vmul.f32 %v5925_v43, %v5781_v63  ;;  %v5924_v51 = vmul.f32 %v9328_v12, %v12531_v27 }
0x17bc   :  { %v6034_v63 = vmul.f32 %v5922_v22, %v12741_v14  ;;  %v6796_v14 = vsub.f32 %v12414_v6, %v12635_v56  ;;  %v12795_v56 = vpop.permute.xlu1 %6809 }
0x17bd   :  { %v6036_v61 = vmul.f32 %v5924_v51, %v5780_v41  ;;  %v6804_v41 = vsub.f32 %v12488_v46, %v12665_v17  ;;  %v9615_v17 = vld [vmem:[%s13014_s15 + $0x8] sm:$0xff] }
0x17bf   :  { %6084 = vrot.lane.b32.xlu0 %v6037_v50, %s9619_s20  ;;  %6074 = vrot.lane.b32.xlu1 %v6032_v36, %s9619_s20 }
0x17c0   :  { %9213 = vset.pattern.permute.xlu0 %v13087_v40  ;;  %v12801_v47 = vpop.permute.xlu1 %6824 }
0x17c3   :  { %6829 = vperm.xlu0 %9213, %v6795_v13   ;;  %5988 = vperm.xlu1 %9211, %v5922_v22  }
0x17c4   :  { %v12805_v2 = vpop.permute.xlu1 %6819 }
0x17c7   :  { %6839 = vperm.xlu0 %9213, %v6797_v29   ;;  %6078 = vrot.lane.b32.xlu1 %v6034_v63, %s9619_s20 }
0x17cb   :  { %6849 = vperm.xlu0 %9213, %v6799_v28   ;;  %5998 = vperm.xlu1 %9211, %v5924_v51  }
0x17cf   :  { %6859 = vperm.xlu0 %9213, %v6801_v3   ;;  %6082 = vrot.lane.b32.xlu1 %v6036_v61, %s9619_s20 }
0x17d0   :  { %9214 = vset.pattern.permute.xlu1 %v13087_v40 }
0x17d3   :  { %6869 = vperm.xlu0 %9213, %v6803_v20   ;;  %6834 = vperm.xlu1 %9214, %v6796_v14  }
0x17d7   :  { %9215 = vset.pattern.permute.xlu0 %v13088_v21  ;;  %6844 = vperm.xlu1 %9214, %v6798_v8  }
0x17db   :  { %6854 = vperm.xlu1 %9214, %v6800_v52  }
0x17df   :  { %6864 = vperm.xlu1 %9214, %v6802_v19  }
0x17e3   :  { %6874 = vperm.xlu1 %9214, %v6804_v41  }
0x17e7   :  { %9216 = vset.pattern.permute.xlu1 %v13088_v21 }
0x17fc   :  { %v12803_v34 = vpop.permute.xlu0 %5928 }
0x17fe   :  { %v12810_v48 = vpop.permute.xlu1 %5933 }
0x1800   :  { %v6057_v18 = vpop.permute.xlu0 %6056 }
0x1801   :  { %v6103_v42 = vsub.f32 %v9615_v17, %v6057_v18 }
0x1803   :  { %6125 = vperm.xlu0 %9215, %v6103_v42  }
0x1804   :  { %v6061_v32 = vpop.permute.xlu0 %6060 }
0x1805   :  { %v6105_v43 = vsub.f32 %v9617_v10, %v6061_v32 }
0x1806   :  { %v12812_v37 = vpop.permute.xlu1 %5943 }
0x1808   :  { %v6065_v50 = vpop.permute.xlu0 %6064 }
0x1809   :  { %v6107_v29 = vsub.f32 %v12414_v6, %v6065_v50 }
0x180a   :  { %v6055_v25 = vpop.permute.xlu1 %6054 }
0x180b   :  { %v6102_v59 = vsub.f32 %v9616_v58, %v6055_v25 }
0x180d   :  { %6120 = vperm.xlu1 %9216, %v6102_v59  }
0x180e   :  { %v12817_v26 = vpop.permute.xlu1 %5938 }
0x180f   :  { %v6069_v13 = vpop.permute.xlu0 %6068 }
0x1810   :  { %v6109_v28 = vsub.f32 %v12432_v9, %v6069_v13 }
0x1811   :  { %6135 = vperm.xlu1 %9216, %v6105_v43  }
0x1812   :  { %v12822_v30 = vpop.permute.xlu1 %5953 }
0x1816   :  { %v6059_v36 = vpop.permute.xlu1 %6058 }
0x1817   :  { %v6104_v44 = vsub.f32 %v12409_v16, %v6059_v36 }
0x1819   :  { %6130 = vperm.xlu1 %9216, %v6104_v44  }
0x181a   :  { %v12825_v22 = vpop.permute.xlu1 %5948 }
0x181d   :  { %6145 = vperm.xlu1 %9216, %v6107_v29  }
0x181e   :  { %v12828_v63 = vpop.permute.xlu0 %5973  ;;  %v12830_v12 = vpop.permute.xlu1 %5963 }
0x1821   :  { %6155 = vperm.xlu1 %9216, %v6109_v28  }
0x1822   :  { %v6073_v51 = vpop.permute.xlu0 %6072  ;;  %v6063_v3 = vpop.permute.xlu1 %6062 }
0x1823   :  { %v6111_v61 = vsub.f32 %v12456_v39, %v6073_v51  ;;  %v6106_v16 = vsub.f32 %v12445_v4, %v6063_v3  ;;  %v6696_v51 = vmul.f32 %v12216_v23, %v12620_v53  ;;  %v6695_v23 = vmul.f32 %v12600_v38, %v12220_v5 }
0x1824   :  { %v6697_v38 = vmul.f32 %v12615_v11, %v12235_v0 }
0x1825   :  { %6140 = vperm.xlu0 %9215, %v6106_v16   ;;  %6165 = vperm.xlu1 %9216, %v6111_v61  }
0x1826   :  { %v12835_v20 = vpop.permute.xlu0 %5983  ;;  %v12837_v14 = vpop.permute.xlu1 %5958 }
0x182a   :  { %v6077_v6 = vpop.permute.xlu0 %6076  ;;  %v6067_v8 = vpop.permute.xlu1 %6066 }
0x182b   :  { %v6113_v21 = vsub.f32 %v12472_v33, %v6077_v6  ;;  %v6108_v52 = vsub.f32 %v12478_v7, %v6067_v8 }
0x182d   :  { %6175 = vperm.xlu1 %9216, %v6113_v21   ;;  %6150 = vperm.xlu0 %9215, %v6108_v52   ;;  %v6698_v21 = vmul.f32 %v12225_v45, %v12607_v1  ;;  %v6009_v52 = vmul.f32 %v12544_v57, %v12812_v37  ;;  %v6889_v1 = vadd.f32 %v12805_v2, %v6697_v38  ;;  %v13091_v37 = vld [vmem:[#allocation2_spill] sm:$0xff]  ;;  %v13102_v38 = vld [vmem:[#allocation32_spill] sm:$0xff] }
0x182e   :  { %v12841_v9 = vpop.permute.xlu0 %5993  ;;  %v12843_v19 = vpop.permute.xlu1 %5968 }
0x1832   :  { %v6081_v39 = vpop.permute.xlu0 %6080  ;;  %v6071_v4 = vpop.permute.xlu1 %6070 }
0x1833   :  { %v6115_v41 = vsub.f32 %v12488_v46, %v6081_v39  ;;  %v6110_v18 = vsub.f32 %v12494_v31, %v6071_v4  ;;  %v6806_v46 = vsub.f32 %v12504_v62, %v12797_v35 }
0x1835   :  { %6185 = vperm.xlu1 %9216, %v6115_v41   ;;  %6160 = vperm.xlu0 %9215, %v6110_v18   ;;  %v6890_v41 = vadd.f32 %v12801_v47, %v6698_v21 }
0x1836   :  { %v12847_v17 = vpop.permute.xlu0 %6003  ;;  %v12849_v42 = vpop.permute.xlu1 %5978 }
0x183a   :  { %v6085_v33 = vpop.permute.xlu0 %6084  ;;  %v6075_v7 = vpop.permute.xlu1 %6074 }
0x183b   :  { %v6117_v25 = vsub.f32 %v12504_v62, %v6085_v33  ;;  %v6112_v58 = vsub.f32 %v12510_v54, %v6075_v7  ;;  %v6805_v54 = vsub.f32 %v12531_v27, %v12677_v55 }
0x183d   :  { %6195 = vperm.xlu1 %9216, %v6117_v25   ;;  %6170 = vperm.xlu0 %9215, %v6112_v58   ;;  %v13092_v25 = vld [vmem:[#allocation15_spill] sm:$0xff] }
0x183e   :  { %v12853_v59 = vpop.permute.xlu1 %5988  ;;  %v6830_v62 = vpop.permute.xlu0 %6829  ;;  %v6011_v58 = vmul.f32 %v13092_v25, %v12822_v30 }
0x1841   :  { %9218 = vset.pattern.permute.xlu1 %v13087_v40 }
0x1842   :  { %6884 = vperm.xlu1 %9218, %v6806_v46   ;;  %v6079_v31 = vpop.permute.xlu1 %6078  ;;  %v12865_v35 = vpop.permute.xlu0 %6839 }
0x1843   :  { %v6114_v32 = vsub.f32 %v12522_v24, %v6079_v31 }
0x1845   :  { %6180 = vperm.xlu0 %9215, %v6114_v32  }
0x1846   :  { %v12859_v10 = vpop.permute.xlu1 %5998  ;;  %v12867_v44 = vpop.permute.xlu0 %6849 }
0x184a   :  { %v6083_v43 = vpop.permute.xlu1 %6082  ;;  %v12869_v13 = vpop.permute.xlu0 %6859 }
0x184b   :  { %v6116_v50 = vsub.f32 %v12531_v27, %v6083_v43  ;;  %v6007_v27 = vmul.f32 %v12537_v60, %v12810_v48  ;;  %v6006_v60 = vmul.f32 %v12803_v34, %v12539_v49  ;;  %v13090_v34 = vld [vmem:[#allocation27_spill] sm:$0xff]  ;;  %v13094_v43 = vld [vmem:[#allocation4_spill] sm:$0xff] }
0x184c   :  { %v6700_v7 = vmul.f32 %v13091_v37, %v13090_v34  ;;  %v13107_v34 = vld [vmem:[#allocation18_spill] sm:$0xff] }
0x184d   :  { %6190 = vperm.xlu0 %9215, %v6116_v50   ;;  %v6012_v37 = vmul.f32 %v12837_v14, %v13107_v34 }
0x184e   :  { %v6835_v36 = vpop.permute.xlu1 %6834  ;;  %v12871_v28 = vpop.permute.xlu0 %6869 }
0x184f   :  { %v6892_v0 = vadd.f32 %v6835_v36, %v6700_v7 }
0x1851   :  { %9217 = vset.pattern.permute.xlu0 %v13087_v40  ;;  %v6888_v40 = vadd.f32 %v12799_v15, %v6696_v51  ;;  %v6887_v15 = vadd.f32 %v12795_v56, %v6695_v23  ;;  %v13089_v56 = vld [vmem:[#allocation14_spill] sm:$0xff] }
0x1852   :  { %6879 = vperm.xlu0 %9217, %v6805_v54   ;;  %v6845_v24 = vpop.permute.xlu1 %6844  ;;  %v6008_v45 = vmul.f32 %v12817_v26, %v13089_v56  ;;  %v13093_v26 = vld [vmem:[#allocation29_spill] sm:$0xff]  ;;  %v13099_v23 = vld [vmem:[#allocation6_spill] sm:$0xff]  ;;  %v13103_v56 = vld [vmem:[#allocation8_spill] sm:$0xff] }
0x1853   :  { %v6702_v50 = vmul.f32 %v13094_v43, %v13093_v26  ;;  %v13095_v54 = vld [vmem:[#allocation17_spill] sm:$0xff]  ;;  %v13108_v26 = vld [vmem:[#allocation34_spill] sm:$0xff] }
0x1854   :  { %v6013_v51 = vmul.f32 %v13095_v54, %v12830_v12  ;;  %v13101_v12 = vld [vmem:[#allocation19_spill] sm:$0xff]  ;;  %v13109_v43 = vld [vmem:[#allocation10_spill] sm:$0xff] }
0x1855   :  { %v13110_v54 = vld [vmem:[#allocation23_spill] sm:$0xff] }
0x1856   :  { %v6855_v29 = vpop.permute.xlu1 %6854 }
0x185a   :  { %v12878_v3 = vpop.permute.xlu1 %6864 }
0x185e   :  { %v12880_v8 = vpop.permute.xlu1 %6874 }
0x187e   :  { %v6126_v55 = vpop.permute.xlu0 %6125 }
0x187f   :  { %v6199_v61 = vadd.f32 %v6126_v55, %v6007_v27  ;;  %v6894_v55 = vadd.f32 %v6845_v24, %v6702_v50  ;;  %v6708_v50 = vmul.f32 %v13109_v43, %v13108_v26 }
0x1881   :  { %v6904_v16 = vadd.f32 %v6888_v40, %v6199_v61  ;;  %v13096_v61 = vld [vmem:[#allocation3_spill] sm:$0xff] }
0x1883   :  { %v6920_v6 = vmax.f32 %v6904_v16, 0.0  ;;  %v13097_v16 = vld [vmem:[#allocation28_spill] sm:$0xff] }
0x1884   :  { %v6699_v36 = vmul.f32 %v13097_v16, %v13096_v61 }
0x1885   :  { %6936 = vst [vmem:[%s13015_s16 + $0x8] sm:$0xff] %v6920_v6  ;;  %v13098_v6 = vld [vmem:[#allocation30_spill] sm:$0xff] }
0x1886   :  { %v6891_v24 = vadd.f32 %v6830_v62, %v6699_v36 }
0x1888   :  { %v6121_v53 = vpop.permute.xlu1 %6120 }
0x1889   :  { %v6198_v48 = vadd.f32 %v6121_v53, %v6006_v60  ;;  %v6704_v60 = vmul.f32 %v13099_v23, %v13098_v6  ;;  %v13100_v53 = vld [vmem:[#allocation16_spill] sm:$0xff] }
0x188b   :  { %v6903_v39 = vadd.f32 %v6887_v15, %v6198_v48  ;;  %v6010_v15 = vmul.f32 %v12825_v22, %v13100_v53  ;;  %v6015_v48 = vmul.f32 %v13101_v12, %v12828_v63 }
0x188c   :  { %v6136_v4 = vpop.permute.xlu1 %6135 }
0x188d   :  { %v6919_v18 = vmax.f32 %v6903_v39, 0.0  ;;  %v6201_v33 = vadd.f32 %v6136_v4, %v6009_v52  ;;  %v6896_v4 = vadd.f32 %v6855_v29, %v6704_v60 }
0x188f   :  { %6935 = vst [vmem:[%s13015_s16] sm:$0xff] %v6919_v18  ;;  %v6906_v5 = vadd.f32 %v6890_v41, %v6201_v33 }
0x1891   :  { %v6922_v49 = vmax.f32 %v6906_v5, 0.0 }
0x1893   :  { %6938 = vst [vmem:[%s13015_s16 + $0x18] sm:$0xff] %v6922_v49 }
0x1894   :  { %v6131_v57 = vpop.permute.xlu1 %6130 }
0x1895   :  { %v6200_v47 = vadd.f32 %v6131_v57, %v6008_v45  ;;  %v6706_v45 = vmul.f32 %v13103_v56, %v13102_v38  ;;  %v13104_v57 = vld [vmem:[#allocation21_spill] sm:$0xff]  ;;  %v13120_v38 = vld [vmem:[#allocation11_spill] sm:$0xff] }
0x1896   :  { %v6017_v62 = vmul.f32 %v13104_v57, %v12835_v20  ;;  %v13121_v56 = vld [vmem:[#allocation37_spill] sm:$0xff]  ;;  %v13122_v57 = vld [vmem:[#allocation24_spill] sm:$0xff] }
0x1897   :  { %v6905_v46 = vadd.f32 %v6889_v1, %v6200_v47  ;;  %v13105_v1 = vld [vmem:[#allocation5_spill] sm:$0xff]  ;;  %v13106_v47 = vld [vmem:[#allocation31_spill] sm:$0xff]  ;;  %v6898_v25 = vadd.f32 %v12878_v3, %v6706_v45  ;;  %v6707_v45 = vmul.f32 %v13121_v56, %v13120_v38 }
0x1898   :  { %v6146_v31 = vpop.permute.xlu1 %6145  ;;  %v6701_v29 = vmul.f32 %v13106_v47, %v13105_v1  ;;  %v13111_v3 = vld [vmem:[#allocation7_spill] sm:$0xff] }
0x1899   :  { %v6921_v11 = vmax.f32 %v6905_v46, 0.0  ;;  %v6203_v32 = vadd.f32 %v6146_v31, %v6011_v58  ;;  %v6899_v47 = vadd.f32 %v12871_v28, %v6707_v45 }
0x189a   :  { %v6893_v20 = vadd.f32 %v12865_v35, %v6701_v29 }
0x189b   :  { %6937 = vst [vmem:[%s13015_s16 + $0x10] sm:$0xff] %v6921_v11  ;;  %v6908_v2 = vadd.f32 %v6892_v0, %v6203_v32 }
0x189c   :  { %v6156_v27 = vpop.permute.xlu1 %6155 }
0x189d   :  { %v6924_v40 = vmax.f32 %v6908_v2, 0.0  ;;  %v6205_v30 = vadd.f32 %v6156_v27, %v6013_v51  ;;  %v6019_v51 = vmul.f32 %v13110_v54, %v12841_v9  ;;  %v13112_v2 = vld [vmem:[#allocation33_spill] sm:$0xff] }
0x189e   :  { %v6703_v27 = vmul.f32 %v13112_v2, %v13111_v3 }
0x189f   :  { %6940 = vst [vmem:[%s13015_s16 + $0x28] sm:$0xff] %v6924_v40  ;;  %v6910_v21 = vadd.f32 %v6894_v55, %v6205_v30  ;;  %v13113_v55 = vld [vmem:[#allocation20_spill] sm:$0xff]  ;;  %v6900_v30 = vadd.f32 %v12880_v8, %v6708_v50 }
0x18a0   :  { %v6166_v52 = vpop.permute.xlu1 %6165  ;;  %v6141_v39 = vpop.permute.xlu0 %6140  ;;  %v6014_v35 = vmul.f32 %v12843_v19, %v13113_v55  ;;  %v6895_v9 = vadd.f32 %v12867_v44, %v6703_v27  ;;  %v13114_v19 = vld [vmem:[#allocation9_spill] sm:$0xff] }
0x18a1   :  { %v6926_v41 = vmax.f32 %v6910_v21, 0.0  ;;  %v6207_v18 = vadd.f32 %v6166_v52, %v6015_v48  ;;  %v6202_v33 = vadd.f32 %v6141_v39, %v6010_v15  ;;  %v13115_v15 = vld [vmem:[#allocation35_spill] sm:$0xff]  ;;  %v13116_v48 = vld [vmem:[#allocation22_spill] sm:$0xff]  ;;  %v13117_v39 = vld [vmem:[#allocation36_spill] sm:$0xff] }
0x18a2   :  { %v6705_v12 = vmul.f32 %v13115_v15, %v13114_v19  ;;  %v6016_v21 = vmul.f32 %v12849_v42, %v13116_v48 }
0x18a3   :  { %6942 = vst [vmem:[%s13015_s16 + $0x38] sm:$0xff] %v6926_v41  ;;  %v6912_v22 = vadd.f32 %v6896_v4, %v6207_v18  ;;  %v6907_v5 = vadd.f32 %v6891_v24, %v6202_v33  ;;  %v13118_v4 = vld [vmem:[#allocation12_spill] sm:$0xff]  ;;  %v13119_v18 = vld [vmem:[#allocation25_spill] sm:$0xff] }
0x18a4   :  { %v6897_v24 = vadd.f32 %v12869_v13, %v6705_v12  ;;  %v6710_v41 = vmul.f32 %v13118_v4, %v13117_v39  ;;  %v6021_v33 = vmul.f32 %v13119_v18, %v12847_v17 }
0x18a5   :  { %v6928_v49 = vmax.f32 %v6912_v22, 0.0  ;;  %v6923_v63 = vmax.f32 %v6907_v5, 0.0 }
0x18a7   :  { %6944 = vst [vmem:[%s13015_s16 + $0x48] sm:$0xff] %v6928_v49  ;;  %6939 = vst [vmem:[%s13015_s16 + $0x20] sm:$0xff] %v6923_v63 }
0x18a8   :  { %v6176_v7 = vpop.permute.xlu1 %6175  ;;  %v6151_v46 = vpop.permute.xlu0 %6150 }
0x18a9   :  { %v6209_v58 = vadd.f32 %v6176_v7, %v6017_v62  ;;  %v6204_v31 = vadd.f32 %v6151_v46, %v6012_v37  ;;  %v6018_v62 = vmul.f32 %v12853_v59, %v13122_v57  ;;  %v13123_v7 = vld [vmem:[#allocation13_spill] sm:$0xff]  ;;  %v13125_v46 = vld [vmem:[#allocation26_spill] sm:$0xff] }
0x18ab   :  { %v6914_v0 = vadd.f32 %v6898_v25, %v6209_v58  ;;  %v6909_v11 = vadd.f32 %v6893_v20, %v6204_v31  ;;  %v13124_v25 = vld [vmem:[#allocation38_spill] sm:$0xff]  ;;  %v6020_v20 = vmul.f32 %v12859_v10, %v13125_v46 }
0x18ac   :  { %v6709_v58 = vmul.f32 %v13124_v25, %v13123_v7 }
0x18ad   :  { %v6930_v32 = vmax.f32 %v6914_v0, 0.0  ;;  %v6925_v14 = vmax.f32 %v6909_v11, 0.0 }
0x18af   :  { %6946 = vst [vmem:[%s13015_s16 + $0x58] sm:$0xff] %v6930_v32  ;;  %6941 = vst [vmem:[%s13015_s16 + $0x30] sm:$0xff] %v6925_v14 }
0x18b0   :  { %v6186_v40 = vpop.permute.xlu1 %6185  ;;  %v6161_v16 = vpop.permute.xlu0 %6160 }
0x18b1   :  { %v6211_v61 = vadd.f32 %v6186_v40, %v6019_v51  ;;  %v6206_v36 = vadd.f32 %v6161_v16, %v6014_v35 }
0x18b3   :  { %v6916_v6 = vadd.f32 %v6900_v30, %v6211_v61  ;;  %v6911_v23 = vadd.f32 %v6895_v9, %v6206_v36 }
0x18b5   :  { %v6932_v60 = vmax.f32 %v6916_v6, 0.0  ;;  %v6927_v53 = vmax.f32 %v6911_v23, 0.0 }
0x18b7   :  { %6948 = vst [vmem:[%s13015_s16 + $0x68] sm:$0xff] %v6932_v60  ;;  %6943 = vst [vmem:[%s13015_s16 + $0x40] sm:$0xff] %v6927_v53 }
0x18b8   :  { %v6196_v44 = vpop.permute.xlu1 %6195  ;;  %v6171_v8 = vpop.permute.xlu0 %6170 }
0x18b9   :  { %v6208_v52 = vadd.f32 %v6171_v8, %v6016_v21  ;;  %v6213_v49 = vadd.f32 %v6196_v44, %v6021_v33 }
0x18bb   :  { %v6913_v22 = vadd.f32 %v6897_v24, %v6208_v52 }
0x18bd   :  { %v6885_v5 = vpop.permute.xlu1 %6884  ;;  %v6929_v63 = vmax.f32 %v6913_v22, 0.0 }
0x18be   :  { %v6902_v42 = vadd.f32 %v6885_v5, %v6710_v41 }
0x18bf   :  { %6945 = vst [vmem:[%s13015_s16 + $0x50] sm:$0xff] %v6929_v63 }
0x18c0   :  { %v6918_v13 = vadd.f32 %v6902_v42, %v6213_v49  ;;  %v6181_v1 = vpop.permute.xlu0 %6180 }
0x18c1   :  { %v6210_v29 = vadd.f32 %v6181_v1, %v6018_v62 }
0x18c2   :  { %v6934_v17 = vmax.f32 %v6918_v13, 0.0 }
0x18c3   :  { %v6915_v34 = vadd.f32 %v6899_v47, %v6210_v29 }
0x18c4   :  { %6950 = vst [vmem:[%s13015_s16 + $0x78] sm:$0xff] %v6934_v17 }
0x18c5   :  { %v6931_v37 = vmax.f32 %v6915_v34, 0.0 }
0x18c7   :  { %6947 = vst [vmem:[%s13015_s16 + $0x60] sm:$0xff] %v6931_v37 }
0x18c8   :  { %v6191_v59 = vpop.permute.xlu0 %6190 }
0x18c9   :  { %v6212_v31 = vadd.f32 %v6191_v59, %v6020_v20 }
0x18cd   :  { %v6880_v28 = vpop.permute.xlu0 %6879 }
0x18ce   :  { %v6901_v0 = vadd.f32 %v6880_v28, %v6709_v58 }
0x18d0   :  { %v6917_v11 = vadd.f32 %v6901_v0, %v6212_v31 }
0x18d2   :  { %v6933_v32 = vmax.f32 %v6917_v11, 0.0 }
0x18d4   :  { %6949 = vst [vmem:[%s13015_s16 + $0x70] sm:$0xff] %v6933_v32 }

</bundles_post_ra>
